<compile_context>
chip_gen: v6e
topology: v6e:2x2x1
jax: 0.10.0
libtpu: 0.0.40
codegen_flags: <defaults>
</compile_context>

<pallas_src>
import functools

import jax
import jax.numpy as jnp
from jax import lax
from jax.experimental import pallas as pl
from jax.experimental.pallas import tpu as pltpu


# =============================================================================
# Kernel 1: one fused bidirectional LSTM layer over the whole sequence.
#   x        : (T*B, D)    time-major, flattened
#   w_ih     : (D, 8H)     columns = [fwd: i f o g | bwd: i f o g]
#   w_hh_f   : (H, 4H)     per-direction recurrent weights, gate order [i f o g]
#   w_hh_b   : (H, 4H)
#   b        : (1, 8H)
#   out      : (T*B, 2H)   [:, :H] = forward outputs, [:, H:] = backward outputs
# =============================================================================
def _bilstm_layer_kernel(x_ref, wih_ref, whhf_ref, whhb_ref, b_ref, out_ref,
                         pre_scr, *, T, B):
    H = whhf_ref.shape[0]
    H2, H3, H4 = 2 * H, 3 * H, 4 * H
    G = 2 * H4                      # 8H

    # Hoisted input projection: one matmul for all timesteps + both directions.
    pre_scr[...] = (jnp.dot(x_ref[...], wih_ref[...],
                            preferred_element_type=jnp.float32) + b_ref[...])

    whh_f = whhf_ref[...]           # (H, 4H), read once
    whh_b = whhb_ref[...]

    def step(s, carry):
        h_f, c_f, h_b, c_b = carry                           # (B, H) each
        row_f = pl.multiple_of(s * B, B)                      # fwd consumes time s
        row_b = pl.multiple_of((T - 1 - s) * B, B)            # bwd consumes time T-1-s

        # Per-direction gates: no structural zeros, no direction select.
        g_f = (pre_scr[pl.ds(row_f, B), 0:H4]
               + jnp.dot(h_f, whh_f, preferred_element_type=jnp.float32))   # (B, 4H)
        g_b = (pre_scr[pl.ds(row_b, B), H4:G]
               + jnp.dot(h_b, whh_b, preferred_element_type=jnp.float32))   # (B, 4H)

        # Gate order [i f o | g]: sigmoid only over the i/f/o columns.
        s_f = jax.nn.sigmoid(g_f[:, 0:H3])
        s_b = jax.nn.sigmoid(g_b[:, 0:H3])
        c_f = s_f[:, H:H2] * c_f + s_f[:, 0:H] * jnp.tanh(g_f[:, H3:H4])
        c_b = s_b[:, H:H2] * c_b + s_b[:, 0:H] * jnp.tanh(g_b[:, H3:H4])
        h_f = s_f[:, H2:H3] * jnp.tanh(c_f)
        h_b = s_b[:, H2:H3] * jnp.tanh(c_b)

        # fwd output belongs to time s, bwd output to time T-1-s (final rows directly;
        # unmasked full-lane stores once H is a multiple of 128).
        out_ref[pl.ds(row_f, B), 0:H] = h_f
        out_ref[pl.ds(row_b, B), H:H2] = h_b
        return h_f, c_f, h_b, c_b

    z = jnp.zeros((B, H), jnp.float32)
    lax.fori_loop(0, T, step, (z, z, z, z), unroll=min(T, 8))


def bilstm_layer(x2d, w_ih, w_hh_f, w_hh_b, b, T, B):
    TB, D = x2d.shape
    G = w_ih.shape[1]              # 8H
    H = G // 8
    H2 = 2 * H
    return pl.pallas_call(
        functools.partial(_bilstm_layer_kernel, T=T, B=B),
        out_shape=jax.ShapeDtypeStruct((TB, H2), jnp.float32),
        grid=(1,),
        in_specs=[pl.BlockSpec((TB, D), lambda i: (0, 0)),
                  pl.BlockSpec((D, G), lambda i: (0, 0)),
                  pl.BlockSpec((H, 4 * H), lambda i: (0, 0)),
                  pl.BlockSpec((H, 4 * H), lambda i: (0, 0)),
                  pl.BlockSpec((1, G), lambda i: (0, 0))],
        out_specs=pl.BlockSpec((TB, H2), lambda i: (0, 0)),
        # NOTE: at production (T, B, H) this scratch must be T-chunked or bf16 to fit
        # v7x's 64 MiB VMEM / 32 MiB default scoped limits (see header).
        scratch_shapes=[pltpu.VMEM((TB, G), jnp.float32)],
        compiler_params=pltpu.CompilerParams(dimension_semantics=("arbitrary",)),
    )(x2d, w_ih, w_hh_f, w_hh_b, b)


# =============================================================================
# Kernel 2: fused fc (no bias) + CRF Viterbi forward + backtracking.
#   h      : (T*B, 2H) time-major BiLSTM features
#   fc_w   : (2H, C)
#   trans  : (C, C)  trans[i, j] = score of transitioning FROM i TO j (torchcrf layout)
#   start/end : (1, C)
#   tags   : (T*B, 1) int32 time-major tag column (reshaped/transposed in the wrapper)
# =============================================================================
def _decode_kernel(h_ref, fcw_ref, trans_ref, start_ref, end_ref, tags_ref,
                   em_scr, bp_scr, *, T, B):
    C = trans_ref.shape[0]

    # Emissions for all timesteps in one matmul. The reference module applies a
    # LogSoftmax before crf.decode; that is a per-(b,t) constant shift, so the Viterbi
    # argmax path is unchanged and we skip it (saves exp/log EUP passes + two XLU row
    # reductions over (T*B, C)). Do NOT skip it if log-probs are ever exposed.
    em_scr[...] = jnp.dot(h_ref[...], fcw_ref[...], preferred_element_type=jnp.float32)

    trans = trans_ref[...]                                    # (C, C)
    ids_i = lax.broadcasted_iota(jnp.int32, (B, C, C), 1)
    cid = lax.broadcasted_iota(jnp.int32, (B, C), 1)

    # ---- Viterbi forward recursion (backpointers stay in VMEM scratch) ----
    score0 = start_ref[...] + em_scr[pl.ds(0, B), :]          # (B, C)

    def fwd_step(t, score):
        row = pl.multiple_of(t * B, B)
        em_t = em_scr[pl.ds(row, B), :]                       # (B, C)
        nxt = score[:, :, None] + trans[None, :, :] + em_t[:, None, :]   # (B, C, C)
        best = jnp.max(nxt, axis=1)                           # (B, C)
        arg = jnp.min(jnp.where(nxt == best[:, None, :], ids_i, C), axis=1)
        bp_scr[pl.ds(row, B), :] = arg.astype(jnp.int32)
        return best

    score = lax.fori_loop(1, T, fwd_step, score0, unroll=min(max(T - 1, 1), 8))
    score = score + end_ref[...]                              # (B, C)

    # ---- backtracking: O(B) store per step into the time-major tag column ----
    best_s = jnp.max(score, axis=-1, keepdims=True)
    last_tag = jnp.min(jnp.where(score == best_s, cid, C),
                       axis=-1, keepdims=True)                # (B, 1) int32
    tags_ref[pl.ds(pl.multiple_of((T - 1) * B, B), B), :] = last_tag

    def back_step(i, tag):
        t = T - 1 - i                                         # use backpointers at time t
        row = pl.multiple_of(t * B, B)
        bp_t = bp_scr[pl.ds(row, B), :]                       # (B, C)
        prev = jnp.sum(jnp.where(cid == tag, bp_t, 0),
                       axis=-1, keepdims=True)                # (B, 1)
        tags_ref[pl.ds(pl.multiple_of((t - 1) * B, B), B), :] = prev
        return prev

    lax.fori_loop(0, T - 1, back_step, last_tag, unroll=min(max(T - 1, 1), 8))


def crf_decode(h2d, fc_w, trans, start, end, T, B):
    TB, H2 = h2d.shape
    C = fc_w.shape[1]
    tags_tm = pl.pallas_call(
        functools.partial(_decode_kernel, T=T, B=B),
        out_shape=jax.ShapeDtypeStruct((TB, 1), jnp.int32),
        grid=(1,),
        in_specs=[pl.BlockSpec((TB, H2), lambda i: (0, 0)),
                  pl.BlockSpec((H2, C), lambda i: (0, 0)),
                  pl.BlockSpec((C, C), lambda i: (0, 0)),
                  pl.BlockSpec((1, C), lambda i: (0, 0)),
                  pl.BlockSpec((1, C), lambda i: (0, 0))],
        out_specs=pl.BlockSpec((TB, 1), lambda i: (0, 0)),
        # NOTE: em_scr/bp_scr are lane-padded (C=8 -> 128); pack/widen at large T*B.
        scratch_shapes=[pltpu.VMEM((TB, C), jnp.float32),
                        pltpu.VMEM((TB, C), jnp.int32)],
        compiler_params=pltpu.CompilerParams(dimension_semantics=("arbitrary",)),
    )(h2d, fc_w, trans, start, end)
    return tags_tm.reshape(T, B).T                            # (B, T), tiny XLA transpose


# =============================================================================
# Weight fusion (pure JAX on parameters; constant-folded under jit).
# =============================================================================
def _reorder_gates_ifog(w, H):
    """Per-direction gate columns [i f g o] (PyTorch) -> [i f o g] (g last)."""
    return jnp.concatenate([w[..., 0:2 * H], w[..., 3 * H:4 * H], w[..., 2 * H:3 * H]],
                           axis=-1)


def _fuse_bidir_params(layer):
    f, b = layer["fwd"], layer["bwd"]
    H = f["w_hh"].shape[0]
    w_ih = jnp.concatenate([_reorder_gates_ifog(f["w_ih"], H),
                            _reorder_gates_ifog(b["w_ih"], H)], axis=-1)   # (D, 8H)
    bias = jnp.concatenate([_reorder_gates_ifog(f["b"], H),
                            _reorder_gates_ifog(b["b"], H)], axis=-1)      # (1, 8H)
    w_hh_f = _reorder_gates_ifog(f["w_hh"], H)                             # (H, 4H)
    w_hh_b = _reorder_gates_ifog(b["w_hh"], H)                             # (H, 4H)
    return w_ih, w_hh_f, w_hh_b, bias


# =============================================================================
# Forward glue.
# =============================================================================
def bilstm_crf_forward(params, x_ids, seq_len, mask):
    del seq_len, mask  # TODO(synk): ragged sequences (pack_padded / masked decode).
    B, T = x_ids.shape
    assert B % 8 == 0, "pad batch to a multiple of 8 so per-step row slices stay aligned"

    # Embedding gather stays in XLA; produce time-major flattened (T*B, E) directly.
    h2d = params["embedding"][x_ids.T].reshape(T * B, -1)

    for layer in params["lstm"]:
        w_ih, w_hh_f, w_hh_b, b = _fuse_bidir_params(layer)
        h2d = bilstm_layer(h2d, w_ih, w_hh_f, w_hh_b, b, T, B)    # (T*B, 2H)

    tags = crf_decode(h2d, params["fc_w"], params["crf"]["trans"],
                      params["crf"]["start"], params["crf"]["end"], T, B)
    return tags                                                   # (B, T) int32


def init_params(key, vocab_size, embedding_size, hidden_size, num_layers, num_classes):
    keys = iter(jax.random.split(key, 10 * num_layers + 8))
    params = {
        "embedding": jax.random.normal(next(keys), (vocab_size, embedding_size),
                                       jnp.float32),
        "lstm": [],
    }
    s = 1.0 / (hidden_size ** 0.5)
    d_in = embedding_size
    for _ in range(num_layers):
        layer = {}
        for d in ("fwd", "bwd"):
            b_ih = jax.random.uniform(next(keys), (1, 4 * hidden_size),
                                      jnp.float32, -s, s)
            b_hh = jax.random.uniform(next(keys), (1, 4 * hidden_size),
                                      jnp.float32, -s, s)
            layer[d] = dict(
                w_ih=jax.random.uniform(next(keys), (d_in, 4 * hidden_size),
                                        jnp.float32, -s, s),
                w_hh=jax.random.uniform(next(keys), (hidden_size, 4 * hidden_size),
                                        jnp.float32, -s, s),
                b=b_ih + b_hh,      # PyTorch b_ih + b_hh combined (forward-equivalent)
            )
        params["lstm"].append(layer)
        d_in = 2 * hidden_size
    params["fc_w"] = jax.random.uniform(next(keys), (2 * hidden_size, num_classes),
                                        jnp.float32, -0.1, 0.1)
    params["crf"] = dict(
        start=jax.random.uniform(next(keys), (1, num_classes), jnp.float32, -0.1, 0.1),
        end=jax.random.uniform(next(keys), (1, num_classes), jnp.float32, -0.1, 0.1),
        trans=jax.random.uniform(next(keys), (num_classes, num_classes),
                                 jnp.float32, -0.1, 0.1),
    )
    return params


if __name__ == "__main__":
    B, T = 8, 8
    vocab_size, embedding_size, hidden_size = 64, 32, 32
    num_layers, num_classes, dropout = 2, 8, 0.1  # dropout unused (inference path)

    key = jax.random.PRNGKey(0)
    pkey, xkey = jax.random.split(key)
    params = init_params(pkey, vocab_size, embedding_size, hidden_size,
                         num_layers, num_classes)

    x = jax.random.randint(xkey, (B, T), 0, vocab_size, dtype=jnp.int32)
    seq_len = jnp.full((B,), T, jnp.int32)
    mask = jnp.ones((B, T), jnp.bool_)

    fwd = jax.jit(functools.partial(bilstm_crf_forward, params))
    pred = fwd(x, seq_len, mask)
    jax.block_until_ready(pred)
    assert pred.shape == (B, T) and pred.dtype == jnp.int32
    assert bool(jnp.all((pred >= 0) & (pred < num_classes)))
    print("KERNEL_OK")
</pallas_src>

<mosaic_0001>
module attributes {stable_mosaic.version = 11 : i64} {
  func.func @_decode_kernel(%arg0: i32, %arg1: memref<64x64xf32, #tpu.memory_space<vmem>>, %arg2: memref<64x8xf32, #tpu.memory_space<vmem>>, %arg3: memref<8x8xf32, #tpu.memory_space<vmem>>, %arg4: memref<1x8xf32, #tpu.memory_space<vmem>>, %arg5: memref<1x8xf32, #tpu.memory_space<vmem>>, %arg6: memref<64x1xi32, #tpu.memory_space<vmem>>, %arg7: memref<64x8xf32, #tpu.memory_space<vmem>>, %arg8: memref<64x8xi32, #tpu.memory_space<vmem>>) attributes {dimension_semantics = [#tpu.dimension_semantics<arbitrary>], iteration_bounds = array<i64: 1>, scalar_prefetch = 0 : i64, scratch_operands = 2 : i64, tpu.core_type = #tpu.core_type<tc>, window_params = [{pipeline_mode = #tpu.pipeline_mode<synchronous>, transform_indices = @transform_0, window_bounds = array<i64: 64, 64>}, {pipeline_mode = #tpu.pipeline_mode<synchronous>, transform_indices = @transform_1, window_bounds = array<i64: 64, 8>}, {pipeline_mode = #tpu.pipeline_mode<synchronous>, transform_indices = @transform_2, window_bounds = array<i64: 8, 8>}, {pipeline_mode = #tpu.pipeline_mode<synchronous>, transform_indices = @transform_3, window_bounds = array<i64: 1, 8>}, {pipeline_mode = #tpu.pipeline_mode<synchronous>, transform_indices = @transform_4, window_bounds = array<i64: 1, 8>}, {pipeline_mode = #tpu.pipeline_mode<synchronous>, transform_indices = @transform_5, window_bounds = array<i64: 64, 1>}]} {
    %c0 = arith.constant 0 : index
    %c0_0 = arith.constant 0 : index
    %0 = vector.load %arg1[%c0, %c0_0] : memref<64x64xf32, #tpu.memory_space<vmem>>, vector<64x64xf32>
    %c0_1 = arith.constant 0 : index
    %c0_2 = arith.constant 0 : index
    %1 = vector.load %arg2[%c0_1, %c0_2] : memref<64x8xf32, #tpu.memory_space<vmem>>, vector<64x8xf32>
    %cst = arith.constant dense<0.000000e+00> : vector<64x8xf32>
    %2 = tpu.matmul %0, %1, %cst {dimension_numbers = #tpu.dot_dimension_numbers<[1], [0], [0], [1], [0, 0, 1, 1], [], []>} : vector<64x64xf32>, vector<64x8xf32>, vector<64x8xf32> -> vector<64x8xf32>
    %c0_3 = arith.constant 0 : index
    %c0_4 = arith.constant 0 : index
    %3 = vector.load %arg7[%c0_3, %c0_4] : memref<64x8xf32, #tpu.memory_space<vmem>>, vector<64x8xf32>
    tpu.vector_store %arg7[%c0_3, %c0_4], %2 {strides = array<i32>} : memref<64x8xf32, #tpu.memory_space<vmem>>, vector<64x8xf32>,
    %c0_5 = arith.constant 0 : index
    %c0_6 = arith.constant 0 : index
    %4 = vector.load %arg3[%c0_5, %c0_6] : memref<8x8xf32, #tpu.memory_space<vmem>>, vector<8x8xf32>
    %5 = tpu.iota {dimensions = array<i32: 1>} : vector<8x8x8xi32>
    %6 = tpu.iota {dimensions = array<i32: 1>} : vector<8x8xi32>
    %c0_7 = arith.constant 0 : index
    %c0_8 = arith.constant 0 : index
    %7 = vector.load %arg4[%c0_7, %c0_8] : memref<1x8xf32, #tpu.memory_space<vmem>>, vector<1x8xf32>
    %c0_9 = arith.constant 0 : index
    %c0_10 = arith.constant 0 : index
    %8 = vector.load %arg7[%c0_9, %c0_10] : memref<64x8xf32, #tpu.memory_space<vmem>>, vector<8x8xf32>
    %9 = vector.broadcast %7 : vector<1x8xf32> to vector<8x8xf32>
    %10 = arith.addf %9, %8 : vector<8x8xf32>
    %c1_i32 = arith.constant 1 : i32
    %c8_i32 = arith.constant 8 : i32
    %11 = arith.muli %c1_i32, %c8_i32 : i32
    %12 = tpu.assume_multiple %11, 8 : i32
    %13 = arith.index_cast %12 : i32 to index
    %c0_11 = arith.constant 0 : index
    %14 = vector.load %arg7[%13, %c0_11] : memref<64x8xf32, #tpu.memory_space<vmem>>, vector<8x8xf32>
    %15 = vector.shape_cast %10 : vector<8x8xf32> to vector<8x8x1xf32>
    %16 = vector.shape_cast %4 : vector<8x8xf32> to vector<1x8x8xf32>
    %17 = vector.broadcast %15 : vector<8x8x1xf32> to vector<8x8x8xf32>
    %18 = vector.broadcast %16 : vector<1x8x8xf32> to vector<8x8x8xf32>
    %19 = arith.addf %17, %18 : vector<8x8x8xf32>
    %20 = vector.shape_cast %14 : vector<8x8xf32> to vector<8x1x8xf32>
    %21 = vector.broadcast %20 : vector<8x1x8xf32> to vector<8x8x8xf32>
    %22 = arith.addf %19, %21 : vector<8x8x8xf32>
    %cst_12 = arith.constant dense<0xFF800000> : vector<8x8xf32>
    %23 = vector.multi_reduction <maximumf>, %22, %cst_12 [1] : vector<8x8x8xf32> to vector<8x8xf32>
    %24 = vector.shape_cast %23 : vector<8x8xf32> to vector<8x1x8xf32>
    %25 = vector.broadcast %24 : vector<8x1x8xf32> to vector<8x8x8xf32>
    %26 = arith.cmpf oeq, %22, %25 : vector<8x8x8xf32>
    %c8_i32_13 = arith.constant 8 : i32
    %27 = vector.broadcast %c8_i32_13 : i32 to vector<8x8x8xi32>
    %28 = arith.select %26, %5, %27 : vector<8x8x8xi1>, vector<8x8x8xi32>
    %cst_14 = arith.constant dense<2147483647> : vector<8x8xi32>
    %29 = vector.multi_reduction <minsi>, %28, %cst_14 [1] : vector<8x8x8xi32> to vector<8x8xi32>
    %30 = arith.index_cast %12 : i32 to index
    %c0_15 = arith.constant 0 : index
    %31 = vector.load %arg8[%30, %c0_15] : memref<64x8xi32, #tpu.memory_space<vmem>>, vector<8x8xi32>
    tpu.vector_store %arg8[%30, %c0_15], %29 {strides = array<i32>} : memref<64x8xi32, #tpu.memory_space<vmem>>, vector<8x8xi32>,
    %c2_i32 = arith.constant 2 : i32
    %c8_i32_16 = arith.constant 8 : i32
    %32 = arith.muli %c2_i32, %c8_i32_16 : i32
    %33 = tpu.assume_multiple %32, 8 : i32
    %34 = arith.index_cast %33 : i32 to index
    %c0_17 = arith.constant 0 : index
    %35 = vector.load %arg7[%34, %c0_17] : memref<64x8xf32, #tpu.memory_space<vmem>>, vector<8x8xf32>
    %36 = vector.shape_cast %23 : vector<8x8xf32> to vector<8x8x1xf32>
    %37 = vector.shape_cast %4 : vector<8x8xf32> to vector<1x8x8xf32>
    %38 = vector.broadcast %36 : vector<8x8x1xf32> to vector<8x8x8xf32>
    %39 = vector.broadcast %37 : vector<1x8x8xf32> to vector<8x8x8xf32>
    %40 = arith.addf %38, %39 : vector<8x8x8xf32>
    %41 = vector.shape_cast %35 : vector<8x8xf32> to vector<8x1x8xf32>
    %42 = vector.broadcast %41 : vector<8x1x8xf32> to vector<8x8x8xf32>
    %43 = arith.addf %40, %42 : vector<8x8x8xf32>
    %cst_18 = arith.constant dense<0xFF800000> : vector<8x8xf32>
    %44 = vector.multi_reduction <maximumf>, %43, %cst_18 [1] : vector<8x8x8xf32> to vector<8x8xf32>
    %45 = vector.shape_cast %44 : vector<8x8xf32> to vector<8x1x8xf32>
    %46 = vector.broadcast %45 : vector<8x1x8xf32> to vector<8x8x8xf32>
    %47 = arith.cmpf oeq, %43, %46 : vector<8x8x8xf32>
    %c8_i32_19 = arith.constant 8 : i32
    %48 = vector.broadcast %c8_i32_19 : i32 to vector<8x8x8xi32>
    %49 = arith.select %47, %5, %48 : vector<8x8x8xi1>, vector<8x8x8xi32>
    %cst_20 = arith.constant dense<2147483647> : vector<8x8xi32>
    %50 = vector.multi_reduction <minsi>, %49, %cst_20 [1] : vector<8x8x8xi32> to vector<8x8xi32>
    %51 = arith.index_cast %33 : i32 to index
    %c0_21 = arith.constant 0 : index
    %52 = vector.load %arg8[%51, %c0_21] : memref<64x8xi32, #tpu.memory_space<vmem>>, vector<8x8xi32>
    tpu.vector_store %arg8[%51, %c0_21], %50 {strides = array<i32>} : memref<64x8xi32, #tpu.memory_space<vmem>>, vector<8x8xi32>,
    %c3_i32 = arith.constant 3 : i32
    %c8_i32_22 = arith.constant 8 : i32
    %53 = arith.muli %c3_i32, %c8_i32_22 : i32
    %54 = tpu.assume_multiple %53, 8 : i32
    %55 = arith.index_cast %54 : i32 to index
    %c0_23 = arith.constant 0 : index
    %56 = vector.load %arg7[%55, %c0_23] : memref<64x8xf32, #tpu.memory_space<vmem>>, vector<8x8xf32>
    %57 = vector.shape_cast %44 : vector<8x8xf32> to vector<8x8x1xf32>
    %58 = vector.shape_cast %4 : vector<8x8xf32> to vector<1x8x8xf32>
    %59 = vector.broadcast %57 : vector<8x8x1xf32> to vector<8x8x8xf32>
    %60 = vector.broadcast %58 : vector<1x8x8xf32> to vector<8x8x8xf32>
    %61 = arith.addf %59, %60 : vector<8x8x8xf32>
    %62 = vector.shape_cast %56 : vector<8x8xf32> to vector<8x1x8xf32>
    %63 = vector.broadcast %62 : vector<8x1x8xf32> to vector<8x8x8xf32>
    %64 = arith.addf %61, %63 : vector<8x8x8xf32>
    %cst_24 = arith.constant dense<0xFF800000> : vector<8x8xf32>
    %65 = vector.multi_reduction <maximumf>, %64, %cst_24 [1] : vector<8x8x8xf32> to vector<8x8xf32>
    %66 = vector.shape_cast %65 : vector<8x8xf32> to vector<8x1x8xf32>
    %67 = vector.broadcast %66 : vector<8x1x8xf32> to vector<8x8x8xf32>
    %68 = arith.cmpf oeq, %64, %67 : vector<8x8x8xf32>
    %c8_i32_25 = arith.constant 8 : i32
    %69 = vector.broadcast %c8_i32_25 : i32 to vector<8x8x8xi32>
    %70 = arith.select %68, %5, %69 : vector<8x8x8xi1>, vector<8x8x8xi32>
    %cst_26 = arith.constant dense<2147483647> : vector<8x8xi32>
    %71 = vector.multi_reduction <minsi>, %70, %cst_26 [1] : vector<8x8x8xi32> to vector<8x8xi32>
    %72 = arith.index_cast %54 : i32 to index
    %c0_27 = arith.constant 0 : index
    %73 = vector.load %arg8[%72, %c0_27] : memref<64x8xi32, #tpu.memory_space<vmem>>, vector<8x8xi32>
    tpu.vector_store %arg8[%72, %c0_27], %71 {strides = array<i32>} : memref<64x8xi32, #tpu.memory_space<vmem>>, vector<8x8xi32>,
    %c4_i32 = arith.constant 4 : i32
    %c8_i32_28 = arith.constant 8 : i32
    %74 = arith.muli %c4_i32, %c8_i32_28 : i32
    %75 = tpu.assume_multiple %74, 8 : i32
    %76 = arith.index_cast %75 : i32 to index
    %c0_29 = arith.constant 0 : index
    %77 = vector.load %arg7[%76, %c0_29] : memref<64x8xf32, #tpu.memory_space<vmem>>, vector<8x8xf32>
    %78 = vector.shape_cast %65 : vector<8x8xf32> to vector<8x8x1xf32>
    %79 = vector.shape_cast %4 : vector<8x8xf32> to vector<1x8x8xf32>
    %80 = vector.broadcast %78 : vector<8x8x1xf32> to vector<8x8x8xf32>
    %81 = vector.broadcast %79 : vector<1x8x8xf32> to vector<8x8x8xf32>
    %82 = arith.addf %80, %81 : vector<8x8x8xf32>
    %83 = vector.shape_cast %77 : vector<8x8xf32> to vector<8x1x8xf32>
    %84 = vector.broadcast %83 : vector<8x1x8xf32> to vector<8x8x8xf32>
    %85 = arith.addf %82, %84 : vector<8x8x8xf32>
    %cst_30 = arith.constant dense<0xFF800000> : vector<8x8xf32>
    %86 = vector.multi_reduction <maximumf>, %85, %cst_30 [1] : vector<8x8x8xf32> to vector<8x8xf32>
    %87 = vector.shape_cast %86 : vector<8x8xf32> to vector<8x1x8xf32>
    %88 = vector.broadcast %87 : vector<8x1x8xf32> to vector<8x8x8xf32>
    %89 = arith.cmpf oeq, %85, %88 : vector<8x8x8xf32>
    %c8_i32_31 = arith.constant 8 : i32
    %90 = vector.broadcast %c8_i32_31 : i32 to vector<8x8x8xi32>
    %91 = arith.select %89, %5, %90 : vector<8x8x8xi1>, vector<8x8x8xi32>
    %cst_32 = arith.constant dense<2147483647> : vector<8x8xi32>
    %92 = vector.multi_reduction <minsi>, %91, %cst_32 [1] : vector<8x8x8xi32> to vector<8x8xi32>
    %93 = arith.index_cast %75 : i32 to index
    %c0_33 = arith.constant 0 : index
    %94 = vector.load %arg8[%93, %c0_33] : memref<64x8xi32, #tpu.memory_space<vmem>>, vector<8x8xi32>
    tpu.vector_store %arg8[%93, %c0_33], %92 {strides = array<i32>} : memref<64x8xi32, #tpu.memory_space<vmem>>, vector<8x8xi32>,
    %c5_i32 = arith.constant 5 : i32
    %c8_i32_34 = arith.constant 8 : i32
    %95 = arith.muli %c5_i32, %c8_i32_34 : i32
    %96 = tpu.assume_multiple %95, 8 : i32
    %97 = arith.index_cast %96 : i32 to index
    %c0_35 = arith.constant 0 : index
    %98 = vector.load %arg7[%97, %c0_35] : memref<64x8xf32, #tpu.memory_space<vmem>>, vector<8x8xf32>
    %99 = vector.shape_cast %86 : vector<8x8xf32> to vector<8x8x1xf32>
    %100 = vector.shape_cast %4 : vector<8x8xf32> to vector<1x8x8xf32>
    %101 = vector.broadcast %99 : vector<8x8x1xf32> to vector<8x8x8xf32>
    %102 = vector.broadcast %100 : vector<1x8x8xf32> to vector<8x8x8xf32>
    %103 = arith.addf %101, %102 : vector<8x8x8xf32>
    %104 = vector.shape_cast %98 : vector<8x8xf32> to vector<8x1x8xf32>
    %105 = vector.broadcast %104 : vector<8x1x8xf32> to vector<8x8x8xf32>
    %106 = arith.addf %103, %105 : vector<8x8x8xf32>
    %cst_36 = arith.constant dense<0xFF800000> : vector<8x8xf32>
    %107 = vector.multi_reduction <maximumf>, %106, %cst_36 [1] : vector<8x8x8xf32> to vector<8x8xf32>
    %108 = vector.shape_cast %107 : vector<8x8xf32> to vector<8x1x8xf32>
    %109 = vector.broadcast %108 : vector<8x1x8xf32> to vector<8x8x8xf32>
    %110 = arith.cmpf oeq, %106, %109 : vector<8x8x8xf32>
    %c8_i32_37 = arith.constant 8 : i32
    %111 = vector.broadcast %c8_i32_37 : i32 to vector<8x8x8xi32>
    %112 = arith.select %110, %5, %111 : vector<8x8x8xi1>, vector<8x8x8xi32>
    %cst_38 = arith.constant dense<2147483647> : vector<8x8xi32>
    %113 = vector.multi_reduction <minsi>, %112, %cst_38 [1] : vector<8x8x8xi32> to vector<8x8xi32>
    %114 = arith.index_cast %96 : i32 to index
    %c0_39 = arith.constant 0 : index
    %115 = vector.load %arg8[%114, %c0_39] : memref<64x8xi32, #tpu.memory_space<vmem>>, vector<8x8xi32>
    tpu.vector_store %arg8[%114, %c0_39], %113 {strides = array<i32>} : memref<64x8xi32, #tpu.memory_space<vmem>>, vector<8x8xi32>,
    %c6_i32 = arith.constant 6 : i32
    %c8_i32_40 = arith.constant 8 : i32
    %116 = arith.muli %c6_i32, %c8_i32_40 : i32
    %117 = tpu.assume_multiple %116, 8 : i32
    %118 = arith.index_cast %117 : i32 to index
    %c0_41 = arith.constant 0 : index
    %119 = vector.load %arg7[%118, %c0_41] : memref<64x8xf32, #tpu.memory_space<vmem>>, vector<8x8xf32>
    %120 = vector.shape_cast %107 : vector<8x8xf32> to vector<8x8x1xf32>
    %121 = vector.shape_cast %4 : vector<8x8xf32> to vector<1x8x8xf32>
    %122 = vector.broadcast %120 : vector<8x8x1xf32> to vector<8x8x8xf32>
    %123 = vector.broadcast %121 : vector<1x8x8xf32> to vector<8x8x8xf32>
    %124 = arith.addf %122, %123 : vector<8x8x8xf32>
    %125 = vector.shape_cast %119 : vector<8x8xf32> to vector<8x1x8xf32>
    %126 = vector.broadcast %125 : vector<8x1x8xf32> to vector<8x8x8xf32>
    %127 = arith.addf %124, %126 : vector<8x8x8xf32>
    %cst_42 = arith.constant dense<0xFF800000> : vector<8x8xf32>
    %128 = vector.multi_reduction <maximumf>, %127, %cst_42 [1] : vector<8x8x8xf32> to vector<8x8xf32>
    %129 = vector.shape_cast %128 : vector<8x8xf32> to vector<8x1x8xf32>
    %130 = vector.broadcast %129 : vector<8x1x8xf32> to vector<8x8x8xf32>
    %131 = arith.cmpf oeq, %127, %130 : vector<8x8x8xf32>
    %c8_i32_43 = arith.constant 8 : i32
    %132 = vector.broadcast %c8_i32_43 : i32 to vector<8x8x8xi32>
    %133 = arith.select %131, %5, %132 : vector<8x8x8xi1>, vector<8x8x8xi32>
    %cst_44 = arith.constant dense<2147483647> : vector<8x8xi32>
    %134 = vector.multi_reduction <minsi>, %133, %cst_44 [1] : vector<8x8x8xi32> to vector<8x8xi32>
    %135 = arith.index_cast %117 : i32 to index
    %c0_45 = arith.constant 0 : index
    %136 = vector.load %arg8[%135, %c0_45] : memref<64x8xi32, #tpu.memory_space<vmem>>, vector<8x8xi32>
    tpu.vector_store %arg8[%135, %c0_45], %134 {strides = array<i32>} : memref<64x8xi32, #tpu.memory_space<vmem>>, vector<8x8xi32>,
    %c7_i32 = arith.constant 7 : i32
    %c8_i32_46 = arith.constant 8 : i32
    %137 = arith.muli %c7_i32, %c8_i32_46 : i32
    %138 = tpu.assume_multiple %137, 8 : i32
    %139 = arith.index_cast %138 : i32 to index
    %c0_47 = arith.constant 0 : index
    %140 = vector.load %arg7[%139, %c0_47] : memref<64x8xf32, #tpu.memory_space<vmem>>, vector<8x8xf32>
    %141 = vector.shape_cast %128 : vector<8x8xf32> to vector<8x8x1xf32>
    %142 = vector.shape_cast %4 : vector<8x8xf32> to vector<1x8x8xf32>
    %143 = vector.broadcast %141 : vector<8x8x1xf32> to vector<8x8x8xf32>
    %144 = vector.broadcast %142 : vector<1x8x8xf32> to vector<8x8x8xf32>
    %145 = arith.addf %143, %144 : vector<8x8x8xf32>
    %146 = vector.shape_cast %140 : vector<8x8xf32> to vector<8x1x8xf32>
    %147 = vector.broadcast %146 : vector<8x1x8xf32> to vector<8x8x8xf32>
    %148 = arith.addf %145, %147 : vector<8x8x8xf32>
    %cst_48 = arith.constant dense<0xFF800000> : vector<8x8xf32>
    %149 = vector.multi_reduction <maximumf>, %148, %cst_48 [1] : vector<8x8x8xf32> to vector<8x8xf32>
    %150 = vector.shape_cast %149 : vector<8x8xf32> to vector<8x1x8xf32>
    %151 = vector.broadcast %150 : vector<8x1x8xf32> to vector<8x8x8xf32>
    %152 = arith.cmpf oeq, %148, %151 : vector<8x8x8xf32>
    %c8_i32_49 = arith.constant 8 : i32
    %153 = vector.broadcast %c8_i32_49 : i32 to vector<8x8x8xi32>
    %154 = arith.select %152, %5, %153 : vector<8x8x8xi1>, vector<8x8x8xi32>
    %cst_50 = arith.constant dense<2147483647> : vector<8x8xi32>
    %155 = vector.multi_reduction <minsi>, %154, %cst_50 [1] : vector<8x8x8xi32> to vector<8x8xi32>
    %156 = arith.index_cast %138 : i32 to index
    %c0_51 = arith.constant 0 : index
    %157 = vector.load %arg8[%156, %c0_51] : memref<64x8xi32, #tpu.memory_space<vmem>>, vector<8x8xi32>
    tpu.vector_store %arg8[%156, %c0_51], %155 {strides = array<i32>} : memref<64x8xi32, #tpu.memory_space<vmem>>, vector<8x8xi32>,
    %c7_i32_52 = arith.constant 7 : i32
    %c0_53 = arith.constant 0 : index
    %c0_54 = arith.constant 0 : index
    %158 = vector.load %arg5[%c0_53, %c0_54] : memref<1x8xf32, #tpu.memory_space<vmem>>, vector<1x8xf32>
    %159 = vector.broadcast %158 : vector<1x8xf32> to vector<8x8xf32>
    %160 = arith.addf %149, %159 : vector<8x8xf32>
    %cst_55 = arith.constant dense<0xFF800000> : vector<8xf32>
    %161 = vector.multi_reduction <maximumf>, %160, %cst_55 [1] : vector<8x8xf32> to vector<8xf32>
    %162 = vector.shape_cast %161 : vector<8xf32> to vector<8x1xf32>
    %163 = vector.broadcast %162 : vector<8x1xf32> to vector<8x8xf32>
    %164 = arith.cmpf oeq, %160, %163 : vector<8x8xf32>
    %c8_i32_56 = arith.constant 8 : i32
    %165 = vector.broadcast %c8_i32_56 : i32 to vector<8x8xi32>
    %166 = arith.select %164, %6, %165 : vector<8x8xi1>, vector<8x8xi32>
    %cst_57 = arith.constant dense<2147483647> : vector<8xi32>
    %167 = vector.multi_reduction <minsi>, %166, %cst_57 [1] : vector<8x8xi32> to vector<8xi32>
    %168 = vector.shape_cast %167 : vector<8xi32> to vector<8x1xi32>
    %c56_i32 = arith.constant 56 : i32
    %169 = tpu.assume_multiple %c56_i32, 8 : i32
    %170 = arith.index_cast %169 : i32 to index
    %c0_58 = arith.constant 0 : index
    %171 = vector.load %arg6[%170, %c0_58] : memref<64x1xi32, #tpu.memory_space<vmem>>, vector<8x1xi32>
    tpu.vector_store %arg6[%170, %c0_58], %168 {strides = array<i32>} : memref<64x1xi32, #tpu.memory_space<vmem>>, vector<8x1xi32>,
    %c0_i32 = arith.constant 0 : i32
    %c7_i32_59 = arith.constant 7 : i32
    %172 = arith.subi %c7_i32_59, %c0_i32 : i32
    %c8_i32_60 = arith.constant 8 : i32
    %173 = arith.muli %172, %c8_i32_60 : i32
    %174 = tpu.assume_multiple %173, 8 : i32
    %175 = arith.index_cast %174 : i32 to index
    %c0_61 = arith.constant 0 : index
    %176 = vector.load %arg8[%175, %c0_61] : memref<64x8xi32, #tpu.memory_space<vmem>>, vector<8x8xi32>
    %177 = vector.broadcast %168 : vector<8x1xi32> to vector<8x8xi32>
    %178 = arith.cmpi eq, %6, %177 : vector<8x8xi32>
    %c0_i32_62 = arith.constant 0 : i32
    %179 = vector.broadcast %c0_i32_62 : i32 to vector<8x8xi32>
    %180 = arith.select %178, %176, %179 : vector<8x8xi1>, vector<8x8xi32>
    %cst_63 = arith.constant dense<0> : vector<8xi32>
    %181 = vector.multi_reduction <add>, %180, %cst_63 [1] : vector<8x8xi32> to vector<8xi32>
    %182 = vector.shape_cast %181 : vector<8xi32> to vector<8x1xi32>
    %c1_i32_64 = arith.constant 1 : i32
    %183 = arith.subi %172, %c1_i32_64 : i32
    %c8_i32_65 = arith.constant 8 : i32
    %184 = arith.muli %183, %c8_i32_65 : i32
    %185 = tpu.assume_multiple %184, 8 : i32
    %186 = arith.index_cast %185 : i32 to index
    %c0_66 = arith.constant 0 : index
    %187 = vector.load %arg6[%186, %c0_66] : memref<64x1xi32, #tpu.memory_space<vmem>>, vector<8x1xi32>
    tpu.vector_store %arg6[%186, %c0_66], %182 {strides = array<i32>} : memref<64x1xi32, #tpu.memory_space<vmem>>, vector<8x1xi32>,
    %c1_i32_67 = arith.constant 1 : i32
    %c7_i32_68 = arith.constant 7 : i32
    %188 = arith.subi %c7_i32_68, %c1_i32_67 : i32
    %c8_i32_69 = arith.constant 8 : i32
    %189 = arith.muli %188, %c8_i32_69 : i32
    %190 = tpu.assume_multiple %189, 8 : i32
    %191 = arith.index_cast %190 : i32 to index
    %c0_70 = arith.constant 0 : index
    %192 = vector.load %arg8[%191, %c0_70] : memref<64x8xi32, #tpu.memory_space<vmem>>, vector<8x8xi32>
    %193 = vector.broadcast %182 : vector<8x1xi32> to vector<8x8xi32>
    %194 = arith.cmpi eq, %6, %193 : vector<8x8xi32>
    %c0_i32_71 = arith.constant 0 : i32
    %195 = vector.broadcast %c0_i32_71 : i32 to vector<8x8xi32>
    %196 = arith.select %194, %192, %195 : vector<8x8xi1>, vector<8x8xi32>
    %cst_72 = arith.constant dense<0> : vector<8xi32>
    %197 = vector.multi_reduction <add>, %196, %cst_72 [1] : vector<8x8xi32> to vector<8xi32>
    %198 = vector.shape_cast %197 : vector<8xi32> to vector<8x1xi32>
    %c1_i32_73 = arith.constant 1 : i32
    %199 = arith.subi %188, %c1_i32_73 : i32
    %c8_i32_74 = arith.constant 8 : i32
    %200 = arith.muli %199, %c8_i32_74 : i32
    %201 = tpu.assume_multiple %200, 8 : i32
    %202 = arith.index_cast %201 : i32 to index
    %c0_75 = arith.constant 0 : index
    %203 = vector.load %arg6[%202, %c0_75] : memref<64x1xi32, #tpu.memory_space<vmem>>, vector<8x1xi32>
    tpu.vector_store %arg6[%202, %c0_75], %198 {strides = array<i32>} : memref<64x1xi32, #tpu.memory_space<vmem>>, vector<8x1xi32>,
    %c2_i32_76 = arith.constant 2 : i32
    %c7_i32_77 = arith.constant 7 : i32
    %204 = arith.subi %c7_i32_77, %c2_i32_76 : i32
    %c8_i32_78 = arith.constant 8 : i32
    %205 = arith.muli %204, %c8_i32_78 : i32
    %206 = tpu.assume_multiple %205, 8 : i32
    %207 = arith.index_cast %206 : i32 to index
    %c0_79 = arith.constant 0 : index
    %208 = vector.load %arg8[%207, %c0_79] : memref<64x8xi32, #tpu.memory_space<vmem>>, vector<8x8xi32>
    %209 = vector.broadcast %198 : vector<8x1xi32> to vector<8x8xi32>
    %210 = arith.cmpi eq, %6, %209 : vector<8x8xi32>
    %c0_i32_80 = arith.constant 0 : i32
    %211 = vector.broadcast %c0_i32_80 : i32 to vector<8x8xi32>
    %212 = arith.select %210, %208, %211 : vector<8x8xi1>, vector<8x8xi32>
    %cst_81 = arith.constant dense<0> : vector<8xi32>
    %213 = vector.multi_reduction <add>, %212, %cst_81 [1] : vector<8x8xi32> to vector<8xi32>
    %214 = vector.shape_cast %213 : vector<8xi32> to vector<8x1xi32>
    %c1_i32_82 = arith.constant 1 : i32
    %215 = arith.subi %204, %c1_i32_82 : i32
    %c8_i32_83 = arith.constant 8 : i32
    %216 = arith.muli %215, %c8_i32_83 : i32
    %217 = tpu.assume_multiple %216, 8 : i32
    %218 = arith.index_cast %217 : i32 to index
    %c0_84 = arith.constant 0 : index
    %219 = vector.load %arg6[%218, %c0_84] : memref<64x1xi32, #tpu.memory_space<vmem>>, vector<8x1xi32>
    tpu.vector_store %arg6[%218, %c0_84], %214 {strides = array<i32>} : memref<64x1xi32, #tpu.memory_space<vmem>>, vector<8x1xi32>,
    %c3_i32_85 = arith.constant 3 : i32
    %c7_i32_86 = arith.constant 7 : i32
    %220 = arith.subi %c7_i32_86, %c3_i32_85 : i32
    %c8_i32_87 = arith.constant 8 : i32
    %221 = arith.muli %220, %c8_i32_87 : i32
    %222 = tpu.assume_multiple %221, 8 : i32
    %223 = arith.index_cast %222 : i32 to index
    %c0_88 = arith.constant 0 : index
    %224 = vector.load %arg8[%223, %c0_88] : memref<64x8xi32, #tpu.memory_space<vmem>>, vector<8x8xi32>
    %225 = vector.broadcast %214 : vector<8x1xi32> to vector<8x8xi32>
    %226 = arith.cmpi eq, %6, %225 : vector<8x8xi32>
    %c0_i32_89 = arith.constant 0 : i32
    %227 = vector.broadcast %c0_i32_89 : i32 to vector<8x8xi32>
    %228 = arith.select %226, %224, %227 : vector<8x8xi1>, vector<8x8xi32>
    %cst_90 = arith.constant dense<0> : vector<8xi32>
    %229 = vector.multi_reduction <add>, %228, %cst_90 [1] : vector<8x8xi32> to vector<8xi32>
    %230 = vector.shape_cast %229 : vector<8xi32> to vector<8x1xi32>
    %c1_i32_91 = arith.constant 1 : i32
    %231 = arith.subi %220, %c1_i32_91 : i32
    %c8_i32_92 = arith.constant 8 : i32
    %232 = arith.muli %231, %c8_i32_92 : i32
    %233 = tpu.assume_multiple %232, 8 : i32
    %234 = arith.index_cast %233 : i32 to index
    %c0_93 = arith.constant 0 : index
    %235 = vector.load %arg6[%234, %c0_93] : memref<64x1xi32, #tpu.memory_space<vmem>>, vector<8x1xi32>
    tpu.vector_store %arg6[%234, %c0_93], %230 {strides = array<i32>} : memref<64x1xi32, #tpu.memory_space<vmem>>, vector<8x1xi32>,
    %c4_i32_94 = arith.constant 4 : i32
    %c7_i32_95 = arith.constant 7 : i32
    %236 = arith.subi %c7_i32_95, %c4_i32_94 : i32
    %c8_i32_96 = arith.constant 8 : i32
    %237 = arith.muli %236, %c8_i32_96 : i32
    %238 = tpu.assume_multiple %237, 8 : i32
    %239 = arith.index_cast %238 : i32 to index
    %c0_97 = arith.constant 0 : index
    %240 = vector.load %arg8[%239, %c0_97] : memref<64x8xi32, #tpu.memory_space<vmem>>, vector<8x8xi32>
    %241 = vector.broadcast %230 : vector<8x1xi32> to vector<8x8xi32>
    %242 = arith.cmpi eq, %6, %241 : vector<8x8xi32>
    %c0_i32_98 = arith.constant 0 : i32
    %243 = vector.broadcast %c0_i32_98 : i32 to vector<8x8xi32>
    %244 = arith.select %242, %240, %243 : vector<8x8xi1>, vector<8x8xi32>
    %cst_99 = arith.constant dense<0> : vector<8xi32>
    %245 = vector.multi_reduction <add>, %244, %cst_99 [1] : vector<8x8xi32> to vector<8xi32>
    %246 = vector.shape_cast %245 : vector<8xi32> to vector<8x1xi32>
    %c1_i32_100 = arith.constant 1 : i32
    %247 = arith.subi %236, %c1_i32_100 : i32
    %c8_i32_101 = arith.constant 8 : i32
    %248 = arith.muli %247, %c8_i32_101 : i32
    %249 = tpu.assume_multiple %248, 8 : i32
    %250 = arith.index_cast %249 : i32 to index
    %c0_102 = arith.constant 0 : index
    %251 = vector.load %arg6[%250, %c0_102] : memref<64x1xi32, #tpu.memory_space<vmem>>, vector<8x1xi32>
    tpu.vector_store %arg6[%250, %c0_102], %246 {strides = array<i32>} : memref<64x1xi32, #tpu.memory_space<vmem>>, vector<8x1xi32>,
    %c5_i32_103 = arith.constant 5 : i32
    %c7_i32_104 = arith.constant 7 : i32
    %252 = arith.subi %c7_i32_104, %c5_i32_103 : i32
    %c8_i32_105 = arith.constant 8 : i32
    %253 = arith.muli %252, %c8_i32_105 : i32
    %254 = tpu.assume_multiple %253, 8 : i32
    %255 = arith.index_cast %254 : i32 to index
    %c0_106 = arith.constant 0 : index
    %256 = vector.load %arg8[%255, %c0_106] : memref<64x8xi32, #tpu.memory_space<vmem>>, vector<8x8xi32>
    %257 = vector.broadcast %246 : vector<8x1xi32> to vector<8x8xi32>
    %258 = arith.cmpi eq, %6, %257 : vector<8x8xi32>
    %c0_i32_107 = arith.constant 0 : i32
    %259 = vector.broadcast %c0_i32_107 : i32 to vector<8x8xi32>
    %260 = arith.select %258, %256, %259 : vector<8x8xi1>, vector<8x8xi32>
    %cst_108 = arith.constant dense<0> : vector<8xi32>
    %261 = vector.multi_reduction <add>, %260, %cst_108 [1] : vector<8x8xi32> to vector<8xi32>
    %262 = vector.shape_cast %261 : vector<8xi32> to vector<8x1xi32>
    %c1_i32_109 = arith.constant 1 : i32
    %263 = arith.subi %252, %c1_i32_109 : i32
    %c8_i32_110 = arith.constant 8 : i32
    %264 = arith.muli %263, %c8_i32_110 : i32
    %265 = tpu.assume_multiple %264, 8 : i32
    %266 = arith.index_cast %265 : i32 to index
    %c0_111 = arith.constant 0 : index
    %267 = vector.load %arg6[%266, %c0_111] : memref<64x1xi32, #tpu.memory_space<vmem>>, vector<8x1xi32>
    tpu.vector_store %arg6[%266, %c0_111], %262 {strides = array<i32>} : memref<64x1xi32, #tpu.memory_space<vmem>>, vector<8x1xi32>,
    %c6_i32_112 = arith.constant 6 : i32
    %c7_i32_113 = arith.constant 7 : i32
    %268 = arith.subi %c7_i32_113, %c6_i32_112 : i32
    %c8_i32_114 = arith.constant 8 : i32
    %269 = arith.muli %268, %c8_i32_114 : i32
    %270 = tpu.assume_multiple %269, 8 : i32
    %271 = arith.index_cast %270 : i32 to index
    %c0_115 = arith.constant 0 : index
    %272 = vector.load %arg8[%271, %c0_115] : memref<64x8xi32, #tpu.memory_space<vmem>>, vector<8x8xi32>
    %273 = vector.broadcast %262 : vector<8x1xi32> to vector<8x8xi32>
    %274 = arith.cmpi eq, %6, %273 : vector<8x8xi32>
    %c0_i32_116 = arith.constant 0 : i32
    %275 = vector.broadcast %c0_i32_116 : i32 to vector<8x8xi32>
    %276 = arith.select %274, %272, %275 : vector<8x8xi1>, vector<8x8xi32>
    %cst_117 = arith.constant dense<0> : vector<8xi32>
    %277 = vector.multi_reduction <add>, %276, %cst_117 [1] : vector<8x8xi32> to vector<8xi32>
    %278 = vector.shape_cast %277 : vector<8xi32> to vector<8x1xi32>
    %c1_i32_118 = arith.constant 1 : i32
    %279 = arith.subi %268, %c1_i32_118 : i32
    %c8_i32_119 = arith.constant 8 : i32
    %280 = arith.muli %279, %c8_i32_119 : i32
    %281 = tpu.assume_multiple %280, 8 : i32
    %282 = arith.index_cast %281 : i32 to index
    %c0_120 = arith.constant 0 : index
    %283 = vector.load %arg6[%282, %c0_120] : memref<64x1xi32, #tpu.memory_space<vmem>>, vector<8x1xi32>
    tpu.vector_store %arg6[%282, %c0_120], %278 {strides = array<i32>} : memref<64x1xi32, #tpu.memory_space<vmem>>, vector<8x1xi32>,
    %c7_i32_121 = arith.constant 7 : i32
    return
  }
  func.func @transform_0(%arg0: i32) -> (i32, i32) {
    %c0_i32 = arith.constant 0 : i32
    %c0_i32_0 = arith.constant 0 : i32
    %c0_i32_1 = arith.constant 0 : i32
    return %c0_i32, %c0_i32_0 : i32, i32
  }
  func.func @transform_1(%arg0: i32) -> (i32, i32) {
    %c0_i32 = arith.constant 0 : i32
    %c0_i32_0 = arith.constant 0 : i32
    %c0_i32_1 = arith.constant 0 : i32
    return %c0_i32, %c0_i32_0 : i32, i32
  }
  func.func @transform_2(%arg0: i32) -> (i32, i32) {
    %c0_i32 = arith.constant 0 : i32
    %c0_i32_0 = arith.constant 0 : i32
    %c0_i32_1 = arith.constant 0 : i32
    return %c0_i32, %c0_i32_0 : i32, i32
  }
  func.func @transform_3(%arg0: i32) -> (i32, i32) {
    %c0_i32 = arith.constant 0 : i32
    %c0_i32_0 = arith.constant 0 : i32
    %c0_i32_1 = arith.constant 0 : i32
    return %c0_i32, %c0_i32_0 : i32, i32
  }
  func.func @transform_4(%arg0: i32) -> (i32, i32) {
    %c0_i32 = arith.constant 0 : i32
    %c0_i32_0 = arith.constant 0 : i32
    %c0_i32_1 = arith.constant 0 : i32
    return %c0_i32, %c0_i32_0 : i32, i32
  }
  func.func @transform_5(%arg0: i32) -> (i32, i32) {
    %c0_i32 = arith.constant 0 : i32
    %c0_i32_0 = arith.constant 0 : i32
    %c0_i32_1 = arith.constant 0 : i32
    return %c0_i32, %c0_i32_0 : i32, i32
  }
}

module attributes {stable_mosaic.version = 11 : i64} {
  func.func @_bilstm_layer_kernel(%arg0: i32, %arg1: memref<64x64xf32, #tpu.memory_space<vmem>>, %arg2: memref<64x256xf32, #tpu.memory_space<vmem>>, %arg3: memref<32x128xf32, #tpu.memory_space<vmem>>, %arg4: memref<32x128xf32, #tpu.memory_space<vmem>>, %arg5: memref<1x256xf32, #tpu.memory_space<vmem>>, %arg6: memref<64x64xf32, #tpu.memory_space<vmem>>, %arg7: memref<64x256xf32, #tpu.memory_space<vmem>>) attributes {dimension_semantics = [#tpu.dimension_semantics<arbitrary>], iteration_bounds = array<i64: 1>, scalar_prefetch = 0 : i64, scratch_operands = 1 : i64, tpu.core_type = #tpu.core_type<tc>, window_params = [{pipeline_mode = #tpu.pipeline_mode<synchronous>, transform_indices = @transform_0, window_bounds = array<i64: 64, 64>}, {pipeline_mode = #tpu.pipeline_mode<synchronous>, transform_indices = @transform_1, window_bounds = array<i64: 64, 256>}, {pipeline_mode = #tpu.pipeline_mode<synchronous>, transform_indices = @transform_2, window_bounds = array<i64: 32, 128>}, {pipeline_mode = #tpu.pipeline_mode<synchronous>, transform_indices = @transform_3, window_bounds = array<i64: 32, 128>}, {pipeline_mode = #tpu.pipeline_mode<synchronous>, transform_indices = @transform_4, window_bounds = array<i64: 1, 256>}, {pipeline_mode = #tpu.pipeline_mode<synchronous>, transform_indices = @transform_5, window_bounds = array<i64: 64, 64>}]} {
    %c0 = arith.constant 0 : index
    %c0_0 = arith.constant 0 : index
    %0 = vector.load %arg1[%c0, %c0_0] : memref<64x64xf32, #tpu.memory_space<vmem>>, vector<64x64xf32>
    %c0_1 = arith.constant 0 : index
    %c0_2 = arith.constant 0 : index
    %1 = vector.load %arg2[%c0_1, %c0_2] : memref<64x256xf32, #tpu.memory_space<vmem>>, vector<64x256xf32>
    %cst = arith.constant dense<0.000000e+00> : vector<64x256xf32>
    %2 = tpu.matmul %0, %1, %cst {dimension_numbers = #tpu.dot_dimension_numbers<[1], [0], [0], [1], [0, 0, 1, 1], [], []>} : vector<64x64xf32>, vector<64x256xf32>, vector<64x256xf32> -> vector<64x256xf32>
    %c0_3 = arith.constant 0 : index
    %c0_4 = arith.constant 0 : index
    %3 = vector.load %arg5[%c0_3, %c0_4] : memref<1x256xf32, #tpu.memory_space<vmem>>, vector<1x256xf32>
    %4 = vector.broadcast %3 : vector<1x256xf32> to vector<64x256xf32>
    %5 = arith.addf %2, %4 : vector<64x256xf32>
    %c0_5 = arith.constant 0 : index
    %c0_6 = arith.constant 0 : index
    %6 = vector.load %arg7[%c0_5, %c0_6] : memref<64x256xf32, #tpu.memory_space<vmem>>, vector<64x256xf32>
    tpu.vector_store %arg7[%c0_5, %c0_6], %5 {strides = array<i32>} : memref<64x256xf32, #tpu.memory_space<vmem>>, vector<64x256xf32>,
    %c0_7 = arith.constant 0 : index
    %c0_8 = arith.constant 0 : index
    %7 = vector.load %arg3[%c0_7, %c0_8] : memref<32x128xf32, #tpu.memory_space<vmem>>, vector<32x128xf32>
    %c0_9 = arith.constant 0 : index
    %c0_10 = arith.constant 0 : index
    %8 = vector.load %arg4[%c0_9, %c0_10] : memref<32x128xf32, #tpu.memory_space<vmem>>, vector<32x128xf32>
    %cst_11 = arith.constant 0.000000e+00 : f32
    %9 = vector.broadcast %cst_11 : f32 to vector<8x32xf32>
    %c0_i32 = arith.constant 0 : i32
    %c8_i32 = arith.constant 8 : i32
    %10 = arith.muli %c0_i32, %c8_i32 : i32
    %11 = tpu.assume_multiple %10, 8 : i32
    %c7_i32 = arith.constant 7 : i32
    %12 = arith.subi %c7_i32, %c0_i32 : i32
    %c8_i32_12 = arith.constant 8 : i32
    %13 = arith.muli %12, %c8_i32_12 : i32
    %14 = tpu.assume_multiple %13, 8 : i32
    %15 = arith.index_cast %11 : i32 to index
    %c0_13 = arith.constant 0 : index
    %16 = vector.load %arg7[%15, %c0_13] : memref<64x256xf32, #tpu.memory_space<vmem>>, vector<8x128xf32>
    %cst_14 = arith.constant dense<0.000000e+00> : vector<8x128xf32>
    %17 = tpu.matmul %9, %7, %cst_14 {dimension_numbers = #tpu.dot_dimension_numbers<[1], [0], [0], [1], [0, 0, 1, 1], [], []>} : vector<8x32xf32>, vector<32x128xf32>, vector<8x128xf32> -> vector<8x128xf32>
    %18 = arith.addf %16, %17 : vector<8x128xf32>
    %19 = arith.index_cast %14 : i32 to index
    %c128 = arith.constant 128 : index
    %20 = vector.load %arg7[%19, %c128] : memref<64x256xf32, #tpu.memory_space<vmem>>, vector<8x128xf32>
    %cst_15 = arith.constant dense<0.000000e+00> : vector<8x128xf32>
    %21 = tpu.matmul %9, %8, %cst_15 {dimension_numbers = #tpu.dot_dimension_numbers<[1], [0], [0], [1], [0, 0, 1, 1], [], []>} : vector<8x32xf32>, vector<32x128xf32>, vector<8x128xf32> -> vector<8x128xf32>
    %22 = arith.addf %20, %21 : vector<8x128xf32>
    %23 = vector.extract_strided_slice %18 {offsets = [0, 0], sizes = [8, 96], strides = [1, 1]} : vector<8x128xf32> to vector<8x96xf32>
    %24 = arith.negf %23 : vector<8x96xf32>
    %25 = math.exp %24 : vector<8x96xf32>
    %cst_16 = arith.constant 1.000000e+00 : f32
    %26 = vector.broadcast %cst_16 : f32 to vector<8x96xf32>
    %27 = arith.addf %26, %25 : vector<8x96xf32>
    %28 = arith.divf %26, %27 : vector<8x96xf32>
    %29 = vector.extract_strided_slice %22 {offsets = [0, 0], sizes = [8, 96], strides = [1, 1]} : vector<8x128xf32> to vector<8x96xf32>
    %30 = arith.negf %29 : vector<8x96xf32>
    %31 = math.exp %30 : vector<8x96xf32>
    %cst_17 = arith.constant 1.000000e+00 : f32
    %32 = vector.broadcast %cst_17 : f32 to vector<8x96xf32>
    %33 = arith.addf %32, %31 : vector<8x96xf32>
    %34 = arith.divf %32, %33 : vector<8x96xf32>
    %35 = vector.extract_strided_slice %28 {offsets = [0, 32], sizes = [8, 32], strides = [1, 1]} : vector<8x96xf32> to vector<8x32xf32>
    %36 = arith.mulf %35, %9 : vector<8x32xf32>
    %37 = vector.extract_strided_slice %28 {offsets = [0, 0], sizes = [8, 32], strides = [1, 1]} : vector<8x96xf32> to vector<8x32xf32>
    %38 = vector.extract_strided_slice %18 {offsets = [0, 96], sizes = [8, 32], strides = [1, 1]} : vector<8x128xf32> to vector<8x32xf32>
    %39 = math.tanh %38 : vector<8x32xf32>
    %40 = arith.mulf %37, %39 : vector<8x32xf32>
    %41 = arith.addf %36, %40 : vector<8x32xf32>
    %42 = vector.extract_strided_slice %34 {offsets = [0, 32], sizes = [8, 32], strides = [1, 1]} : vector<8x96xf32> to vector<8x32xf32>
    %43 = arith.mulf %42, %9 : vector<8x32xf32>
    %44 = vector.extract_strided_slice %34 {offsets = [0, 0], sizes = [8, 32], strides = [1, 1]} : vector<8x96xf32> to vector<8x32xf32>
    %45 = vector.extract_strided_slice %22 {offsets = [0, 96], sizes = [8, 32], strides = [1, 1]} : vector<8x128xf32> to vector<8x32xf32>
    %46 = math.tanh %45 : vector<8x32xf32>
    %47 = arith.mulf %44, %46 : vector<8x32xf32>
    %48 = arith.addf %43, %47 : vector<8x32xf32>
    %49 = vector.extract_strided_slice %28 {offsets = [0, 64], sizes = [8, 32], strides = [1, 1]} : vector<8x96xf32> to vector<8x32xf32>
    %50 = math.tanh %41 : vector<8x32xf32>
    %51 = arith.mulf %49, %50 : vector<8x32xf32>
    %52 = vector.extract_strided_slice %34 {offsets = [0, 64], sizes = [8, 32], strides = [1, 1]} : vector<8x96xf32> to vector<8x32xf32>
    %53 = math.tanh %48 : vector<8x32xf32>
    %54 = arith.mulf %52, %53 : vector<8x32xf32>
    %55 = arith.index_cast %11 : i32 to index
    %c0_18 = arith.constant 0 : index
    %56 = vector.load %arg6[%55, %c0_18] : memref<64x64xf32, #tpu.memory_space<vmem>>, vector<8x32xf32>
    tpu.vector_store %arg6[%55, %c0_18], %51 {strides = array<i32>} : memref<64x64xf32, #tpu.memory_space<vmem>>, vector<8x32xf32>,
    %57 = arith.index_cast %14 : i32 to index
    %c32 = arith.constant 32 : index
    %58 = vector.load %arg6[%57, %c32] : memref<64x64xf32, #tpu.memory_space<vmem>>, vector<8x32xf32>
    tpu.vector_store %arg6[%57, %c32], %54 {strides = array<i32>} : memref<64x64xf32, #tpu.memory_space<vmem>>, vector<8x32xf32>,
    %c1_i32 = arith.constant 1 : i32
    %c8_i32_19 = arith.constant 8 : i32
    %59 = arith.muli %c1_i32, %c8_i32_19 : i32
    %60 = tpu.assume_multiple %59, 8 : i32
    %c7_i32_20 = arith.constant 7 : i32
    %61 = arith.subi %c7_i32_20, %c1_i32 : i32
    %c8_i32_21 = arith.constant 8 : i32
    %62 = arith.muli %61, %c8_i32_21 : i32
    %63 = tpu.assume_multiple %62, 8 : i32
    %64 = arith.index_cast %60 : i32 to index
    %c0_22 = arith.constant 0 : index
    %65 = vector.load %arg7[%64, %c0_22] : memref<64x256xf32, #tpu.memory_space<vmem>>, vector<8x128xf32>
    %cst_23 = arith.constant dense<0.000000e+00> : vector<8x128xf32>
    %66 = tpu.matmul %51, %7, %cst_23 {dimension_numbers = #tpu.dot_dimension_numbers<[1], [0], [0], [1], [0, 0, 1, 1], [], []>} : vector<8x32xf32>, vector<32x128xf32>, vector<8x128xf32> -> vector<8x128xf32>
    %67 = arith.addf %65, %66 : vector<8x128xf32>
    %68 = arith.index_cast %63 : i32 to index
    %c128_24 = arith.constant 128 : index
    %69 = vector.load %arg7[%68, %c128_24] : memref<64x256xf32, #tpu.memory_space<vmem>>, vector<8x128xf32>
    %cst_25 = arith.constant dense<0.000000e+00> : vector<8x128xf32>
    %70 = tpu.matmul %54, %8, %cst_25 {dimension_numbers = #tpu.dot_dimension_numbers<[1], [0], [0], [1], [0, 0, 1, 1], [], []>} : vector<8x32xf32>, vector<32x128xf32>, vector<8x128xf32> -> vector<8x128xf32>
    %71 = arith.addf %69, %70 : vector<8x128xf32>
    %72 = vector.extract_strided_slice %67 {offsets = [0, 0], sizes = [8, 96], strides = [1, 1]} : vector<8x128xf32> to vector<8x96xf32>
    %73 = arith.negf %72 : vector<8x96xf32>
    %74 = math.exp %73 : vector<8x96xf32>
    %cst_26 = arith.constant 1.000000e+00 : f32
    %75 = vector.broadcast %cst_26 : f32 to vector<8x96xf32>
    %76 = arith.addf %75, %74 : vector<8x96xf32>
    %77 = arith.divf %75, %76 : vector<8x96xf32>
    %78 = vector.extract_strided_slice %71 {offsets = [0, 0], sizes = [8, 96], strides = [1, 1]} : vector<8x128xf32> to vector<8x96xf32>
    %79 = arith.negf %78 : vector<8x96xf32>
    %80 = math.exp %79 : vector<8x96xf32>
    %cst_27 = arith.constant 1.000000e+00 : f32
    %81 = vector.broadcast %cst_27 : f32 to vector<8x96xf32>
    %82 = arith.addf %81, %80 : vector<8x96xf32>
    %83 = arith.divf %81, %82 : vector<8x96xf32>
    %84 = vector.extract_strided_slice %77 {offsets = [0, 32], sizes = [8, 32], strides = [1, 1]} : vector<8x96xf32> to vector<8x32xf32>
    %85 = arith.mulf %84, %41 : vector<8x32xf32>
    %86 = vector.extract_strided_slice %77 {offsets = [0, 0], sizes = [8, 32], strides = [1, 1]} : vector<8x96xf32> to vector<8x32xf32>
    %87 = vector.extract_strided_slice %67 {offsets = [0, 96], sizes = [8, 32], strides = [1, 1]} : vector<8x128xf32> to vector<8x32xf32>
    %88 = math.tanh %87 : vector<8x32xf32>
    %89 = arith.mulf %86, %88 : vector<8x32xf32>
    %90 = arith.addf %85, %89 : vector<8x32xf32>
    %91 = vector.extract_strided_slice %83 {offsets = [0, 32], sizes = [8, 32], strides = [1, 1]} : vector<8x96xf32> to vector<8x32xf32>
    %92 = arith.mulf %91, %48 : vector<8x32xf32>
    %93 = vector.extract_strided_slice %83 {offsets = [0, 0], sizes = [8, 32], strides = [1, 1]} : vector<8x96xf32> to vector<8x32xf32>
    %94 = vector.extract_strided_slice %71 {offsets = [0, 96], sizes = [8, 32], strides = [1, 1]} : vector<8x128xf32> to vector<8x32xf32>
    %95 = math.tanh %94 : vector<8x32xf32>
    %96 = arith.mulf %93, %95 : vector<8x32xf32>
    %97 = arith.addf %92, %96 : vector<8x32xf32>
    %98 = vector.extract_strided_slice %77 {offsets = [0, 64], sizes = [8, 32], strides = [1, 1]} : vector<8x96xf32> to vector<8x32xf32>
    %99 = math.tanh %90 : vector<8x32xf32>
    %100 = arith.mulf %98, %99 : vector<8x32xf32>
    %101 = vector.extract_strided_slice %83 {offsets = [0, 64], sizes = [8, 32], strides = [1, 1]} : vector<8x96xf32> to vector<8x32xf32>
    %102 = math.tanh %97 : vector<8x32xf32>
    %103 = arith.mulf %101, %102 : vector<8x32xf32>
    %104 = arith.index_cast %60 : i32 to index
    %c0_28 = arith.constant 0 : index
    %105 = vector.load %arg6[%104, %c0_28] : memref<64x64xf32, #tpu.memory_space<vmem>>, vector<8x32xf32>
    tpu.vector_store %arg6[%104, %c0_28], %100 {strides = array<i32>} : memref<64x64xf32, #tpu.memory_space<vmem>>, vector<8x32xf32>,
    %106 = arith.index_cast %63 : i32 to index
    %c32_29 = arith.constant 32 : index
    %107 = vector.load %arg6[%106, %c32_29] : memref<64x64xf32, #tpu.memory_space<vmem>>, vector<8x32xf32>
    tpu.vector_store %arg6[%106, %c32_29], %103 {strides = array<i32>} : memref<64x64xf32, #tpu.memory_space<vmem>>, vector<8x32xf32>,
    %c2_i32 = arith.constant 2 : i32
    %c8_i32_30 = arith.constant 8 : i32
    %108 = arith.muli %c2_i32, %c8_i32_30 : i32
    %109 = tpu.assume_multiple %108, 8 : i32
    %c7_i32_31 = arith.constant 7 : i32
    %110 = arith.subi %c7_i32_31, %c2_i32 : i32
    %c8_i32_32 = arith.constant 8 : i32
    %111 = arith.muli %110, %c8_i32_32 : i32
    %112 = tpu.assume_multiple %111, 8 : i32
    %113 = arith.index_cast %109 : i32 to index
    %c0_33 = arith.constant 0 : index
    %114 = vector.load %arg7[%113, %c0_33] : memref<64x256xf32, #tpu.memory_space<vmem>>, vector<8x128xf32>
    %cst_34 = arith.constant dense<0.000000e+00> : vector<8x128xf32>
    %115 = tpu.matmul %100, %7, %cst_34 {dimension_numbers = #tpu.dot_dimension_numbers<[1], [0], [0], [1], [0, 0, 1, 1], [], []>} : vector<8x32xf32>, vector<32x128xf32>, vector<8x128xf32> -> vector<8x128xf32>
    %116 = arith.addf %114, %115 : vector<8x128xf32>
    %117 = arith.index_cast %112 : i32 to index
    %c128_35 = arith.constant 128 : index
    %118 = vector.load %arg7[%117, %c128_35] : memref<64x256xf32, #tpu.memory_space<vmem>>, vector<8x128xf32>
    %cst_36 = arith.constant dense<0.000000e+00> : vector<8x128xf32>
    %119 = tpu.matmul %103, %8, %cst_36 {dimension_numbers = #tpu.dot_dimension_numbers<[1], [0], [0], [1], [0, 0, 1, 1], [], []>} : vector<8x32xf32>, vector<32x128xf32>, vector<8x128xf32> -> vector<8x128xf32>
    %120 = arith.addf %118, %119 : vector<8x128xf32>
    %121 = vector.extract_strided_slice %116 {offsets = [0, 0], sizes = [8, 96], strides = [1, 1]} : vector<8x128xf32> to vector<8x96xf32>
    %122 = arith.negf %121 : vector<8x96xf32>
    %123 = math.exp %122 : vector<8x96xf32>
    %cst_37 = arith.constant 1.000000e+00 : f32
    %124 = vector.broadcast %cst_37 : f32 to vector<8x96xf32>
    %125 = arith.addf %124, %123 : vector<8x96xf32>
    %126 = arith.divf %124, %125 : vector<8x96xf32>
    %127 = vector.extract_strided_slice %120 {offsets = [0, 0], sizes = [8, 96], strides = [1, 1]} : vector<8x128xf32> to vector<8x96xf32>
    %128 = arith.negf %127 : vector<8x96xf32>
    %129 = math.exp %128 : vector<8x96xf32>
    %cst_38 = arith.constant 1.000000e+00 : f32
    %130 = vector.broadcast %cst_38 : f32 to vector<8x96xf32>
    %131 = arith.addf %130, %129 : vector<8x96xf32>
    %132 = arith.divf %130, %131 : vector<8x96xf32>
    %133 = vector.extract_strided_slice %126 {offsets = [0, 32], sizes = [8, 32], strides = [1, 1]} : vector<8x96xf32> to vector<8x32xf32>
    %134 = arith.mulf %133, %90 : vector<8x32xf32>
    %135 = vector.extract_strided_slice %126 {offsets = [0, 0], sizes = [8, 32], strides = [1, 1]} : vector<8x96xf32> to vector<8x32xf32>
    %136 = vector.extract_strided_slice %116 {offsets = [0, 96], sizes = [8, 32], strides = [1, 1]} : vector<8x128xf32> to vector<8x32xf32>
    %137 = math.tanh %136 : vector<8x32xf32>
    %138 = arith.mulf %135, %137 : vector<8x32xf32>
    %139 = arith.addf %134, %138 : vector<8x32xf32>
    %140 = vector.extract_strided_slice %132 {offsets = [0, 32], sizes = [8, 32], strides = [1, 1]} : vector<8x96xf32> to vector<8x32xf32>
    %141 = arith.mulf %140, %97 : vector<8x32xf32>
    %142 = vector.extract_strided_slice %132 {offsets = [0, 0], sizes = [8, 32], strides = [1, 1]} : vector<8x96xf32> to vector<8x32xf32>
    %143 = vector.extract_strided_slice %120 {offsets = [0, 96], sizes = [8, 32], strides = [1, 1]} : vector<8x128xf32> to vector<8x32xf32>
    %144 = math.tanh %143 : vector<8x32xf32>
    %145 = arith.mulf %142, %144 : vector<8x32xf32>
    %146 = arith.addf %141, %145 : vector<8x32xf32>
    %147 = vector.extract_strided_slice %126 {offsets = [0, 64], sizes = [8, 32], strides = [1, 1]} : vector<8x96xf32> to vector<8x32xf32>
    %148 = math.tanh %139 : vector<8x32xf32>
    %149 = arith.mulf %147, %148 : vector<8x32xf32>
    %150 = vector.extract_strided_slice %132 {offsets = [0, 64], sizes = [8, 32], strides = [1, 1]} : vector<8x96xf32> to vector<8x32xf32>
    %151 = math.tanh %146 : vector<8x32xf32>
    %152 = arith.mulf %150, %151 : vector<8x32xf32>
    %153 = arith.index_cast %109 : i32 to index
    %c0_39 = arith.constant 0 : index
    %154 = vector.load %arg6[%153, %c0_39] : memref<64x64xf32, #tpu.memory_space<vmem>>, vector<8x32xf32>
    tpu.vector_store %arg6[%153, %c0_39], %149 {strides = array<i32>} : memref<64x64xf32, #tpu.memory_space<vmem>>, vector<8x32xf32>,
    %155 = arith.index_cast %112 : i32 to index
    %c32_40 = arith.constant 32 : index
    %156 = vector.load %arg6[%155, %c32_40] : memref<64x64xf32, #tpu.memory_space<vmem>>, vector<8x32xf32>
    tpu.vector_store %arg6[%155, %c32_40], %152 {strides = array<i32>} : memref<64x64xf32, #tpu.memory_space<vmem>>, vector<8x32xf32>,
    %c3_i32 = arith.constant 3 : i32
    %c8_i32_41 = arith.constant 8 : i32
    %157 = arith.muli %c3_i32, %c8_i32_41 : i32
    %158 = tpu.assume_multiple %157, 8 : i32
    %c7_i32_42 = arith.constant 7 : i32
    %159 = arith.subi %c7_i32_42, %c3_i32 : i32
    %c8_i32_43 = arith.constant 8 : i32
    %160 = arith.muli %159, %c8_i32_43 : i32
    %161 = tpu.assume_multiple %160, 8 : i32
    %162 = arith.index_cast %158 : i32 to index
    %c0_44 = arith.constant 0 : index
    %163 = vector.load %arg7[%162, %c0_44] : memref<64x256xf32, #tpu.memory_space<vmem>>, vector<8x128xf32>
    %cst_45 = arith.constant dense<0.000000e+00> : vector<8x128xf32>
    %164 = tpu.matmul %149, %7, %cst_45 {dimension_numbers = #tpu.dot_dimension_numbers<[1], [0], [0], [1], [0, 0, 1, 1], [], []>} : vector<8x32xf32>, vector<32x128xf32>, vector<8x128xf32> -> vector<8x128xf32>
    %165 = arith.addf %163, %164 : vector<8x128xf32>
    %166 = arith.index_cast %161 : i32 to index
    %c128_46 = arith.constant 128 : index
    %167 = vector.load %arg7[%166, %c128_46] : memref<64x256xf32, #tpu.memory_space<vmem>>, vector<8x128xf32>
    %cst_47 = arith.constant dense<0.000000e+00> : vector<8x128xf32>
    %168 = tpu.matmul %152, %8, %cst_47 {dimension_numbers = #tpu.dot_dimension_numbers<[1], [0], [0], [1], [0, 0, 1, 1], [], []>} : vector<8x32xf32>, vector<32x128xf32>, vector<8x128xf32> -> vector<8x128xf32>
    %169 = arith.addf %167, %168 : vector<8x128xf32>
    %170 = vector.extract_strided_slice %165 {offsets = [0, 0], sizes = [8, 96], strides = [1, 1]} : vector<8x128xf32> to vector<8x96xf32>
    %171 = arith.negf %170 : vector<8x96xf32>
    %172 = math.exp %171 : vector<8x96xf32>
    %cst_48 = arith.constant 1.000000e+00 : f32
    %173 = vector.broadcast %cst_48 : f32 to vector<8x96xf32>
    %174 = arith.addf %173, %172 : vector<8x96xf32>
    %175 = arith.divf %173, %174 : vector<8x96xf32>
    %176 = vector.extract_strided_slice %169 {offsets = [0, 0], sizes = [8, 96], strides = [1, 1]} : vector<8x128xf32> to vector<8x96xf32>
    %177 = arith.negf %176 : vector<8x96xf32>
    %178 = math.exp %177 : vector<8x96xf32>
    %cst_49 = arith.constant 1.000000e+00 : f32
    %179 = vector.broadcast %cst_49 : f32 to vector<8x96xf32>
    %180 = arith.addf %179, %178 : vector<8x96xf32>
    %181 = arith.divf %179, %180 : vector<8x96xf32>
    %182 = vector.extract_strided_slice %175 {offsets = [0, 32], sizes = [8, 32], strides = [1, 1]} : vector<8x96xf32> to vector<8x32xf32>
    %183 = arith.mulf %182, %139 : vector<8x32xf32>
    %184 = vector.extract_strided_slice %175 {offsets = [0, 0], sizes = [8, 32], strides = [1, 1]} : vector<8x96xf32> to vector<8x32xf32>
    %185 = vector.extract_strided_slice %165 {offsets = [0, 96], sizes = [8, 32], strides = [1, 1]} : vector<8x128xf32> to vector<8x32xf32>
    %186 = math.tanh %185 : vector<8x32xf32>
    %187 = arith.mulf %184, %186 : vector<8x32xf32>
    %188 = arith.addf %183, %187 : vector<8x32xf32>
    %189 = vector.extract_strided_slice %181 {offsets = [0, 32], sizes = [8, 32], strides = [1, 1]} : vector<8x96xf32> to vector<8x32xf32>
    %190 = arith.mulf %189, %146 : vector<8x32xf32>
    %191 = vector.extract_strided_slice %181 {offsets = [0, 0], sizes = [8, 32], strides = [1, 1]} : vector<8x96xf32> to vector<8x32xf32>
    %192 = vector.extract_strided_slice %169 {offsets = [0, 96], sizes = [8, 32], strides = [1, 1]} : vector<8x128xf32> to vector<8x32xf32>
    %193 = math.tanh %192 : vector<8x32xf32>
    %194 = arith.mulf %191, %193 : vector<8x32xf32>
    %195 = arith.addf %190, %194 : vector<8x32xf32>
    %196 = vector.extract_strided_slice %175 {offsets = [0, 64], sizes = [8, 32], strides = [1, 1]} : vector<8x96xf32> to vector<8x32xf32>
    %197 = math.tanh %188 : vector<8x32xf32>
    %198 = arith.mulf %196, %197 : vector<8x32xf32>
    %199 = vector.extract_strided_slice %181 {offsets = [0, 64], sizes = [8, 32], strides = [1, 1]} : vector<8x96xf32> to vector<8x32xf32>
    %200 = math.tanh %195 : vector<8x32xf32>
    %201 = arith.mulf %199, %200 : vector<8x32xf32>
    %202 = arith.index_cast %158 : i32 to index
    %c0_50 = arith.constant 0 : index
    %203 = vector.load %arg6[%202, %c0_50] : memref<64x64xf32, #tpu.memory_space<vmem>>, vector<8x32xf32>
    tpu.vector_store %arg6[%202, %c0_50], %198 {strides = array<i32>} : memref<64x64xf32, #tpu.memory_space<vmem>>, vector<8x32xf32>,
    %204 = arith.index_cast %161 : i32 to index
    %c32_51 = arith.constant 32 : index
    %205 = vector.load %arg6[%204, %c32_51] : memref<64x64xf32, #tpu.memory_space<vmem>>, vector<8x32xf32>
    tpu.vector_store %arg6[%204, %c32_51], %201 {strides = array<i32>} : memref<64x64xf32, #tpu.memory_space<vmem>>, vector<8x32xf32>,
    %c4_i32 = arith.constant 4 : i32
    %c8_i32_52 = arith.constant 8 : i32
    %206 = arith.muli %c4_i32, %c8_i32_52 : i32
    %207 = tpu.assume_multiple %206, 8 : i32
    %c7_i32_53 = arith.constant 7 : i32
    %208 = arith.subi %c7_i32_53, %c4_i32 : i32
    %c8_i32_54 = arith.constant 8 : i32
    %209 = arith.muli %208, %c8_i32_54 : i32
    %210 = tpu.assume_multiple %209, 8 : i32
    %211 = arith.index_cast %207 : i32 to index
    %c0_55 = arith.constant 0 : index
    %212 = vector.load %arg7[%211, %c0_55] : memref<64x256xf32, #tpu.memory_space<vmem>>, vector<8x128xf32>
    %cst_56 = arith.constant dense<0.000000e+00> : vector<8x128xf32>
    %213 = tpu.matmul %198, %7, %cst_56 {dimension_numbers = #tpu.dot_dimension_numbers<[1], [0], [0], [1], [0, 0, 1, 1], [], []>} : vector<8x32xf32>, vector<32x128xf32>, vector<8x128xf32> -> vector<8x128xf32>
    %214 = arith.addf %212, %213 : vector<8x128xf32>
    %215 = arith.index_cast %210 : i32 to index
    %c128_57 = arith.constant 128 : index
    %216 = vector.load %arg7[%215, %c128_57] : memref<64x256xf32, #tpu.memory_space<vmem>>, vector<8x128xf32>
    %cst_58 = arith.constant dense<0.000000e+00> : vector<8x128xf32>
    %217 = tpu.matmul %201, %8, %cst_58 {dimension_numbers = #tpu.dot_dimension_numbers<[1], [0], [0], [1], [0, 0, 1, 1], [], []>} : vector<8x32xf32>, vector<32x128xf32>, vector<8x128xf32> -> vector<8x128xf32>
    %218 = arith.addf %216, %217 : vector<8x128xf32>
    %219 = vector.extract_strided_slice %214 {offsets = [0, 0], sizes = [8, 96], strides = [1, 1]} : vector<8x128xf32> to vector<8x96xf32>
    %220 = arith.negf %219 : vector<8x96xf32>
    %221 = math.exp %220 : vector<8x96xf32>
    %cst_59 = arith.constant 1.000000e+00 : f32
    %222 = vector.broadcast %cst_59 : f32 to vector<8x96xf32>
    %223 = arith.addf %222, %221 : vector<8x96xf32>
    %224 = arith.divf %222, %223 : vector<8x96xf32>
    %225 = vector.extract_strided_slice %218 {offsets = [0, 0], sizes = [8, 96], strides = [1, 1]} : vector<8x128xf32> to vector<8x96xf32>
    %226 = arith.negf %225 : vector<8x96xf32>
    %227 = math.exp %226 : vector<8x96xf32>
    %cst_60 = arith.constant 1.000000e+00 : f32
    %228 = vector.broadcast %cst_60 : f32 to vector<8x96xf32>
    %229 = arith.addf %228, %227 : vector<8x96xf32>
    %230 = arith.divf %228, %229 : vector<8x96xf32>
    %231 = vector.extract_strided_slice %224 {offsets = [0, 32], sizes = [8, 32], strides = [1, 1]} : vector<8x96xf32> to vector<8x32xf32>
    %232 = arith.mulf %231, %188 : vector<8x32xf32>
    %233 = vector.extract_strided_slice %224 {offsets = [0, 0], sizes = [8, 32], strides = [1, 1]} : vector<8x96xf32> to vector<8x32xf32>
    %234 = vector.extract_strided_slice %214 {offsets = [0, 96], sizes = [8, 32], strides = [1, 1]} : vector<8x128xf32> to vector<8x32xf32>
    %235 = math.tanh %234 : vector<8x32xf32>
    %236 = arith.mulf %233, %235 : vector<8x32xf32>
    %237 = arith.addf %232, %236 : vector<8x32xf32>
    %238 = vector.extract_strided_slice %230 {offsets = [0, 32], sizes = [8, 32], strides = [1, 1]} : vector<8x96xf32> to vector<8x32xf32>
    %239 = arith.mulf %238, %195 : vector<8x32xf32>
    %240 = vector.extract_strided_slice %230 {offsets = [0, 0], sizes = [8, 32], strides = [1, 1]} : vector<8x96xf32> to vector<8x32xf32>
    %241 = vector.extract_strided_slice %218 {offsets = [0, 96], sizes = [8, 32], strides = [1, 1]} : vector<8x128xf32> to vector<8x32xf32>
    %242 = math.tanh %241 : vector<8x32xf32>
    %243 = arith.mulf %240, %242 : vector<8x32xf32>
    %244 = arith.addf %239, %243 : vector<8x32xf32>
    %245 = vector.extract_strided_slice %224 {offsets = [0, 64], sizes = [8, 32], strides = [1, 1]} : vector<8x96xf32> to vector<8x32xf32>
    %246 = math.tanh %237 : vector<8x32xf32>
    %247 = arith.mulf %245, %246 : vector<8x32xf32>
    %248 = vector.extract_strided_slice %230 {offsets = [0, 64], sizes = [8, 32], strides = [1, 1]} : vector<8x96xf32> to vector<8x32xf32>
    %249 = math.tanh %244 : vector<8x32xf32>
    %250 = arith.mulf %248, %249 : vector<8x32xf32>
    %251 = arith.index_cast %207 : i32 to index
    %c0_61 = arith.constant 0 : index
    %252 = vector.load %arg6[%251, %c0_61] : memref<64x64xf32, #tpu.memory_space<vmem>>, vector<8x32xf32>
    tpu.vector_store %arg6[%251, %c0_61], %247 {strides = array<i32>} : memref<64x64xf32, #tpu.memory_space<vmem>>, vector<8x32xf32>,
    %253 = arith.index_cast %210 : i32 to index
    %c32_62 = arith.constant 32 : index
    %254 = vector.load %arg6[%253, %c32_62] : memref<64x64xf32, #tpu.memory_space<vmem>>, vector<8x32xf32>
    tpu.vector_store %arg6[%253, %c32_62], %250 {strides = array<i32>} : memref<64x64xf32, #tpu.memory_space<vmem>>, vector<8x32xf32>,
    %c5_i32 = arith.constant 5 : i32
    %c8_i32_63 = arith.constant 8 : i32
    %255 = arith.muli %c5_i32, %c8_i32_63 : i32
    %256 = tpu.assume_multiple %255, 8 : i32
    %c7_i32_64 = arith.constant 7 : i32
    %257 = arith.subi %c7_i32_64, %c5_i32 : i32
    %c8_i32_65 = arith.constant 8 : i32
    %258 = arith.muli %257, %c8_i32_65 : i32
    %259 = tpu.assume_multiple %258, 8 : i32
    %260 = arith.index_cast %256 : i32 to index
    %c0_66 = arith.constant 0 : index
    %261 = vector.load %arg7[%260, %c0_66] : memref<64x256xf32, #tpu.memory_space<vmem>>, vector<8x128xf32>
    %cst_67 = arith.constant dense<0.000000e+00> : vector<8x128xf32>
    %262 = tpu.matmul %247, %7, %cst_67 {dimension_numbers = #tpu.dot_dimension_numbers<[1], [0], [0], [1], [0, 0, 1, 1], [], []>} : vector<8x32xf32>, vector<32x128xf32>, vector<8x128xf32> -> vector<8x128xf32>
    %263 = arith.addf %261, %262 : vector<8x128xf32>
    %264 = arith.index_cast %259 : i32 to index
    %c128_68 = arith.constant 128 : index
    %265 = vector.load %arg7[%264, %c128_68] : memref<64x256xf32, #tpu.memory_space<vmem>>, vector<8x128xf32>
    %cst_69 = arith.constant dense<0.000000e+00> : vector<8x128xf32>
    %266 = tpu.matmul %250, %8, %cst_69 {dimension_numbers = #tpu.dot_dimension_numbers<[1], [0], [0], [1], [0, 0, 1, 1], [], []>} : vector<8x32xf32>, vector<32x128xf32>, vector<8x128xf32> -> vector<8x128xf32>
    %267 = arith.addf %265, %266 : vector<8x128xf32>
    %268 = vector.extract_strided_slice %263 {offsets = [0, 0], sizes = [8, 96], strides = [1, 1]} : vector<8x128xf32> to vector<8x96xf32>
    %269 = arith.negf %268 : vector<8x96xf32>
    %270 = math.exp %269 : vector<8x96xf32>
    %cst_70 = arith.constant 1.000000e+00 : f32
    %271 = vector.broadcast %cst_70 : f32 to vector<8x96xf32>
    %272 = arith.addf %271, %270 : vector<8x96xf32>
    %273 = arith.divf %271, %272 : vector<8x96xf32>
    %274 = vector.extract_strided_slice %267 {offsets = [0, 0], sizes = [8, 96], strides = [1, 1]} : vector<8x128xf32> to vector<8x96xf32>
    %275 = arith.negf %274 : vector<8x96xf32>
    %276 = math.exp %275 : vector<8x96xf32>
    %cst_71 = arith.constant 1.000000e+00 : f32
    %277 = vector.broadcast %cst_71 : f32 to vector<8x96xf32>
    %278 = arith.addf %277, %276 : vector<8x96xf32>
    %279 = arith.divf %277, %278 : vector<8x96xf32>
    %280 = vector.extract_strided_slice %273 {offsets = [0, 32], sizes = [8, 32], strides = [1, 1]} : vector<8x96xf32> to vector<8x32xf32>
    %281 = arith.mulf %280, %237 : vector<8x32xf32>
    %282 = vector.extract_strided_slice %273 {offsets = [0, 0], sizes = [8, 32], strides = [1, 1]} : vector<8x96xf32> to vector<8x32xf32>
    %283 = vector.extract_strided_slice %263 {offsets = [0, 96], sizes = [8, 32], strides = [1, 1]} : vector<8x128xf32> to vector<8x32xf32>
    %284 = math.tanh %283 : vector<8x32xf32>
    %285 = arith.mulf %282, %284 : vector<8x32xf32>
    %286 = arith.addf %281, %285 : vector<8x32xf32>
    %287 = vector.extract_strided_slice %279 {offsets = [0, 32], sizes = [8, 32], strides = [1, 1]} : vector<8x96xf32> to vector<8x32xf32>
    %288 = arith.mulf %287, %244 : vector<8x32xf32>
    %289 = vector.extract_strided_slice %279 {offsets = [0, 0], sizes = [8, 32], strides = [1, 1]} : vector<8x96xf32> to vector<8x32xf32>
    %290 = vector.extract_strided_slice %267 {offsets = [0, 96], sizes = [8, 32], strides = [1, 1]} : vector<8x128xf32> to vector<8x32xf32>
    %291 = math.tanh %290 : vector<8x32xf32>
    %292 = arith.mulf %289, %291 : vector<8x32xf32>
    %293 = arith.addf %288, %292 : vector<8x32xf32>
    %294 = vector.extract_strided_slice %273 {offsets = [0, 64], sizes = [8, 32], strides = [1, 1]} : vector<8x96xf32> to vector<8x32xf32>
    %295 = math.tanh %286 : vector<8x32xf32>
    %296 = arith.mulf %294, %295 : vector<8x32xf32>
    %297 = vector.extract_strided_slice %279 {offsets = [0, 64], sizes = [8, 32], strides = [1, 1]} : vector<8x96xf32> to vector<8x32xf32>
    %298 = math.tanh %293 : vector<8x32xf32>
    %299 = arith.mulf %297, %298 : vector<8x32xf32>
    %300 = arith.index_cast %256 : i32 to index
    %c0_72 = arith.constant 0 : index
    %301 = vector.load %arg6[%300, %c0_72] : memref<64x64xf32, #tpu.memory_space<vmem>>, vector<8x32xf32>
    tpu.vector_store %arg6[%300, %c0_72], %296 {strides = array<i32>} : memref<64x64xf32, #tpu.memory_space<vmem>>, vector<8x32xf32>,
    %302 = arith.index_cast %259 : i32 to index
    %c32_73 = arith.constant 32 : index
    %303 = vector.load %arg6[%302, %c32_73] : memref<64x64xf32, #tpu.memory_space<vmem>>, vector<8x32xf32>
    tpu.vector_store %arg6[%302, %c32_73], %299 {strides = array<i32>} : memref<64x64xf32, #tpu.memory_space<vmem>>, vector<8x32xf32>,
    %c6_i32 = arith.constant 6 : i32
    %c8_i32_74 = arith.constant 8 : i32
    %304 = arith.muli %c6_i32, %c8_i32_74 : i32
    %305 = tpu.assume_multiple %304, 8 : i32
    %c7_i32_75 = arith.constant 7 : i32
    %306 = arith.subi %c7_i32_75, %c6_i32 : i32
    %c8_i32_76 = arith.constant 8 : i32
    %307 = arith.muli %306, %c8_i32_76 : i32
    %308 = tpu.assume_multiple %307, 8 : i32
    %309 = arith.index_cast %305 : i32 to index
    %c0_77 = arith.constant 0 : index
    %310 = vector.load %arg7[%309, %c0_77] : memref<64x256xf32, #tpu.memory_space<vmem>>, vector<8x128xf32>
    %cst_78 = arith.constant dense<0.000000e+00> : vector<8x128xf32>
    %311 = tpu.matmul %296, %7, %cst_78 {dimension_numbers = #tpu.dot_dimension_numbers<[1], [0], [0], [1], [0, 0, 1, 1], [], []>} : vector<8x32xf32>, vector<32x128xf32>, vector<8x128xf32> -> vector<8x128xf32>
    %312 = arith.addf %310, %311 : vector<8x128xf32>
    %313 = arith.index_cast %308 : i32 to index
    %c128_79 = arith.constant 128 : index
    %314 = vector.load %arg7[%313, %c128_79] : memref<64x256xf32, #tpu.memory_space<vmem>>, vector<8x128xf32>
    %cst_80 = arith.constant dense<0.000000e+00> : vector<8x128xf32>
    %315 = tpu.matmul %299, %8, %cst_80 {dimension_numbers = #tpu.dot_dimension_numbers<[1], [0], [0], [1], [0, 0, 1, 1], [], []>} : vector<8x32xf32>, vector<32x128xf32>, vector<8x128xf32> -> vector<8x128xf32>
    %316 = arith.addf %314, %315 : vector<8x128xf32>
    %317 = vector.extract_strided_slice %312 {offsets = [0, 0], sizes = [8, 96], strides = [1, 1]} : vector<8x128xf32> to vector<8x96xf32>
    %318 = arith.negf %317 : vector<8x96xf32>
    %319 = math.exp %318 : vector<8x96xf32>
    %cst_81 = arith.constant 1.000000e+00 : f32
    %320 = vector.broadcast %cst_81 : f32 to vector<8x96xf32>
    %321 = arith.addf %320, %319 : vector<8x96xf32>
    %322 = arith.divf %320, %321 : vector<8x96xf32>
    %323 = vector.extract_strided_slice %316 {offsets = [0, 0], sizes = [8, 96], strides = [1, 1]} : vector<8x128xf32> to vector<8x96xf32>
    %324 = arith.negf %323 : vector<8x96xf32>
    %325 = math.exp %324 : vector<8x96xf32>
    %cst_82 = arith.constant 1.000000e+00 : f32
    %326 = vector.broadcast %cst_82 : f32 to vector<8x96xf32>
    %327 = arith.addf %326, %325 : vector<8x96xf32>
    %328 = arith.divf %326, %327 : vector<8x96xf32>
    %329 = vector.extract_strided_slice %322 {offsets = [0, 32], sizes = [8, 32], strides = [1, 1]} : vector<8x96xf32> to vector<8x32xf32>
    %330 = arith.mulf %329, %286 : vector<8x32xf32>
    %331 = vector.extract_strided_slice %322 {offsets = [0, 0], sizes = [8, 32], strides = [1, 1]} : vector<8x96xf32> to vector<8x32xf32>
    %332 = vector.extract_strided_slice %312 {offsets = [0, 96], sizes = [8, 32], strides = [1, 1]} : vector<8x128xf32> to vector<8x32xf32>
    %333 = math.tanh %332 : vector<8x32xf32>
    %334 = arith.mulf %331, %333 : vector<8x32xf32>
    %335 = arith.addf %330, %334 : vector<8x32xf32>
    %336 = vector.extract_strided_slice %328 {offsets = [0, 32], sizes = [8, 32], strides = [1, 1]} : vector<8x96xf32> to vector<8x32xf32>
    %337 = arith.mulf %336, %293 : vector<8x32xf32>
    %338 = vector.extract_strided_slice %328 {offsets = [0, 0], sizes = [8, 32], strides = [1, 1]} : vector<8x96xf32> to vector<8x32xf32>
    %339 = vector.extract_strided_slice %316 {offsets = [0, 96], sizes = [8, 32], strides = [1, 1]} : vector<8x128xf32> to vector<8x32xf32>
    %340 = math.tanh %339 : vector<8x32xf32>
    %341 = arith.mulf %338, %340 : vector<8x32xf32>
    %342 = arith.addf %337, %341 : vector<8x32xf32>
    %343 = vector.extract_strided_slice %322 {offsets = [0, 64], sizes = [8, 32], strides = [1, 1]} : vector<8x96xf32> to vector<8x32xf32>
    %344 = math.tanh %335 : vector<8x32xf32>
    %345 = arith.mulf %343, %344 : vector<8x32xf32>
    %346 = vector.extract_strided_slice %328 {offsets = [0, 64], sizes = [8, 32], strides = [1, 1]} : vector<8x96xf32> to vector<8x32xf32>
    %347 = math.tanh %342 : vector<8x32xf32>
    %348 = arith.mulf %346, %347 : vector<8x32xf32>
    %349 = arith.index_cast %305 : i32 to index
    %c0_83 = arith.constant 0 : index
    %350 = vector.load %arg6[%349, %c0_83] : memref<64x64xf32, #tpu.memory_space<vmem>>, vector<8x32xf32>
    tpu.vector_store %arg6[%349, %c0_83], %345 {strides = array<i32>} : memref<64x64xf32, #tpu.memory_space<vmem>>, vector<8x32xf32>,
    %351 = arith.index_cast %308 : i32 to index
    %c32_84 = arith.constant 32 : index
    %352 = vector.load %arg6[%351, %c32_84] : memref<64x64xf32, #tpu.memory_space<vmem>>, vector<8x32xf32>
    tpu.vector_store %arg6[%351, %c32_84], %348 {strides = array<i32>} : memref<64x64xf32, #tpu.memory_space<vmem>>, vector<8x32xf32>,
    %c7_i32_85 = arith.constant 7 : i32
    %c8_i32_86 = arith.constant 8 : i32
    %353 = arith.muli %c7_i32_85, %c8_i32_86 : i32
    %354 = tpu.assume_multiple %353, 8 : i32
    %c7_i32_87 = arith.constant 7 : i32
    %355 = arith.subi %c7_i32_87, %c7_i32_85 : i32
    %c8_i32_88 = arith.constant 8 : i32
    %356 = arith.muli %355, %c8_i32_88 : i32
    %357 = tpu.assume_multiple %356, 8 : i32
    %358 = arith.index_cast %354 : i32 to index
    %c0_89 = arith.constant 0 : index
    %359 = vector.load %arg7[%358, %c0_89] : memref<64x256xf32, #tpu.memory_space<vmem>>, vector<8x128xf32>
    %cst_90 = arith.constant dense<0.000000e+00> : vector<8x128xf32>
    %360 = tpu.matmul %345, %7, %cst_90 {dimension_numbers = #tpu.dot_dimension_numbers<[1], [0], [0], [1], [0, 0, 1, 1], [], []>} : vector<8x32xf32>, vector<32x128xf32>, vector<8x128xf32> -> vector<8x128xf32>
    %361 = arith.addf %359, %360 : vector<8x128xf32>
    %362 = arith.index_cast %357 : i32 to index
    %c128_91 = arith.constant 128 : index
    %363 = vector.load %arg7[%362, %c128_91] : memref<64x256xf32, #tpu.memory_space<vmem>>, vector<8x128xf32>
    %cst_92 = arith.constant dense<0.000000e+00> : vector<8x128xf32>
    %364 = tpu.matmul %348, %8, %cst_92 {dimension_numbers = #tpu.dot_dimension_numbers<[1], [0], [0], [1], [0, 0, 1, 1], [], []>} : vector<8x32xf32>, vector<32x128xf32>, vector<8x128xf32> -> vector<8x128xf32>
    %365 = arith.addf %363, %364 : vector<8x128xf32>
    %366 = vector.extract_strided_slice %361 {offsets = [0, 0], sizes = [8, 96], strides = [1, 1]} : vector<8x128xf32> to vector<8x96xf32>
    %367 = arith.negf %366 : vector<8x96xf32>
    %368 = math.exp %367 : vector<8x96xf32>
    %cst_93 = arith.constant 1.000000e+00 : f32
    %369 = vector.broadcast %cst_93 : f32 to vector<8x96xf32>
    %370 = arith.addf %369, %368 : vector<8x96xf32>
    %371 = arith.divf %369, %370 : vector<8x96xf32>
    %372 = vector.extract_strided_slice %365 {offsets = [0, 0], sizes = [8, 96], strides = [1, 1]} : vector<8x128xf32> to vector<8x96xf32>
    %373 = arith.negf %372 : vector<8x96xf32>
    %374 = math.exp %373 : vector<8x96xf32>
    %cst_94 = arith.constant 1.000000e+00 : f32
    %375 = vector.broadcast %cst_94 : f32 to vector<8x96xf32>
    %376 = arith.addf %375, %374 : vector<8x96xf32>
    %377 = arith.divf %375, %376 : vector<8x96xf32>
    %378 = vector.extract_strided_slice %371 {offsets = [0, 32], sizes = [8, 32], strides = [1, 1]} : vector<8x96xf32> to vector<8x32xf32>
    %379 = arith.mulf %378, %335 : vector<8x32xf32>
    %380 = vector.extract_strided_slice %371 {offsets = [0, 0], sizes = [8, 32], strides = [1, 1]} : vector<8x96xf32> to vector<8x32xf32>
    %381 = vector.extract_strided_slice %361 {offsets = [0, 96], sizes = [8, 32], strides = [1, 1]} : vector<8x128xf32> to vector<8x32xf32>
    %382 = math.tanh %381 : vector<8x32xf32>
    %383 = arith.mulf %380, %382 : vector<8x32xf32>
    %384 = arith.addf %379, %383 : vector<8x32xf32>
    %385 = vector.extract_strided_slice %377 {offsets = [0, 32], sizes = [8, 32], strides = [1, 1]} : vector<8x96xf32> to vector<8x32xf32>
    %386 = arith.mulf %385, %342 : vector<8x32xf32>
    %387 = vector.extract_strided_slice %377 {offsets = [0, 0], sizes = [8, 32], strides = [1, 1]} : vector<8x96xf32> to vector<8x32xf32>
    %388 = vector.extract_strided_slice %365 {offsets = [0, 96], sizes = [8, 32], strides = [1, 1]} : vector<8x128xf32> to vector<8x32xf32>
    %389 = math.tanh %388 : vector<8x32xf32>
    %390 = arith.mulf %387, %389 : vector<8x32xf32>
    %391 = arith.addf %386, %390 : vector<8x32xf32>
    %392 = vector.extract_strided_slice %371 {offsets = [0, 64], sizes = [8, 32], strides = [1, 1]} : vector<8x96xf32> to vector<8x32xf32>
    %393 = math.tanh %384 : vector<8x32xf32>
    %394 = arith.mulf %392, %393 : vector<8x32xf32>
    %395 = vector.extract_strided_slice %377 {offsets = [0, 64], sizes = [8, 32], strides = [1, 1]} : vector<8x96xf32> to vector<8x32xf32>
    %396 = math.tanh %391 : vector<8x32xf32>
    %397 = arith.mulf %395, %396 : vector<8x32xf32>
    %398 = arith.index_cast %354 : i32 to index
    %c0_95 = arith.constant 0 : index
    %399 = vector.load %arg6[%398, %c0_95] : memref<64x64xf32, #tpu.memory_space<vmem>>, vector<8x32xf32>
    tpu.vector_store %arg6[%398, %c0_95], %394 {strides = array<i32>} : memref<64x64xf32, #tpu.memory_space<vmem>>, vector<8x32xf32>,
    %400 = arith.index_cast %357 : i32 to index
    %c32_96 = arith.constant 32 : index
    %401 = vector.load %arg6[%400, %c32_96] : memref<64x64xf32, #tpu.memory_space<vmem>>, vector<8x32xf32>
    tpu.vector_store %arg6[%400, %c32_96], %397 {strides = array<i32>} : memref<64x64xf32, #tpu.memory_space<vmem>>, vector<8x32xf32>,
    %c8_i32_97 = arith.constant 8 : i32
    return
  }
  func.func @transform_0(%arg0: i32) -> (i32, i32) {
    %c0_i32 = arith.constant 0 : i32
    %c0_i32_0 = arith.constant 0 : i32
    %c0_i32_1 = arith.constant 0 : i32
    return %c0_i32, %c0_i32_0 : i32, i32
  }
  func.func @transform_1(%arg0: i32) -> (i32, i32) {
    %c0_i32 = arith.constant 0 : i32
    %c0_i32_0 = arith.constant 0 : i32
    %c0_i32_1 = arith.constant 0 : i32
    return %c0_i32, %c0_i32_0 : i32, i32
  }
  func.func @transform_2(%arg0: i32) -> (i32, i32) {
    %c0_i32 = arith.constant 0 : i32
    %c0_i32_0 = arith.constant 0 : i32
    %c0_i32_1 = arith.constant 0 : i32
    return %c0_i32, %c0_i32_0 : i32, i32
  }
  func.func @transform_3(%arg0: i32) -> (i32, i32) {
    %c0_i32 = arith.constant 0 : i32
    %c0_i32_0 = arith.constant 0 : i32
    %c0_i32_1 = arith.constant 0 : i32
    return %c0_i32, %c0_i32_0 : i32, i32
  }
  func.func @transform_4(%arg0: i32) -> (i32, i32) {
    %c0_i32 = arith.constant 0 : i32
    %c0_i32_0 = arith.constant 0 : i32
    %c0_i32_1 = arith.constant 0 : i32
    return %c0_i32, %c0_i32_0 : i32, i32
  }
  func.func @transform_5(%arg0: i32) -> (i32, i32) {
    %c0_i32 = arith.constant 0 : i32
    %c0_i32_0 = arith.constant 0 : i32
    %c0_i32_1 = arith.constant 0 : i32
    return %c0_i32, %c0_i32_0 : i32, i32
  }
}

module attributes {stable_mosaic.version = 11 : i64} {
  func.func @_bilstm_layer_kernel(%arg0: i32, %arg1: memref<64x32xf32, #tpu.memory_space<vmem>>, %arg2: memref<32x256xf32, #tpu.memory_space<vmem>>, %arg3: memref<32x128xf32, #tpu.memory_space<vmem>>, %arg4: memref<32x128xf32, #tpu.memory_space<vmem>>, %arg5: memref<1x256xf32, #tpu.memory_space<vmem>>, %arg6: memref<64x64xf32, #tpu.memory_space<vmem>>, %arg7: memref<64x256xf32, #tpu.memory_space<vmem>>) attributes {dimension_semantics = [#tpu.dimension_semantics<arbitrary>], iteration_bounds = array<i64: 1>, scalar_prefetch = 0 : i64, scratch_operands = 1 : i64, tpu.core_type = #tpu.core_type<tc>, window_params = [{pipeline_mode = #tpu.pipeline_mode<synchronous>, transform_indices = @transform_0, window_bounds = array<i64: 64, 32>}, {pipeline_mode = #tpu.pipeline_mode<synchronous>, transform_indices = @transform_1, window_bounds = array<i64: 32, 256>}, {pipeline_mode = #tpu.pipeline_mode<synchronous>, transform_indices = @transform_2, window_bounds = array<i64: 32, 128>}, {pipeline_mode = #tpu.pipeline_mode<synchronous>, transform_indices = @transform_3, window_bounds = array<i64: 32, 128>}, {pipeline_mode = #tpu.pipeline_mode<synchronous>, transform_indices = @transform_4, window_bounds = array<i64: 1, 256>}, {pipeline_mode = #tpu.pipeline_mode<synchronous>, transform_indices = @transform_5, window_bounds = array<i64: 64, 64>}]} {
    %c0 = arith.constant 0 : index
    %c0_0 = arith.constant 0 : index
    %0 = vector.load %arg1[%c0, %c0_0] : memref<64x32xf32, #tpu.memory_space<vmem>>, vector<64x32xf32>
    %c0_1 = arith.constant 0 : index
    %c0_2 = arith.constant 0 : index
    %1 = vector.load %arg2[%c0_1, %c0_2] : memref<32x256xf32, #tpu.memory_space<vmem>>, vector<32x256xf32>
    %cst = arith.constant dense<0.000000e+00> : vector<64x256xf32>
    %2 = tpu.matmul %0, %1, %cst {dimension_numbers = #tpu.dot_dimension_numbers<[1], [0], [0], [1], [0, 0, 1, 1], [], []>} : vector<64x32xf32>, vector<32x256xf32>, vector<64x256xf32> -> vector<64x256xf32>
    %c0_3 = arith.constant 0 : index
    %c0_4 = arith.constant 0 : index
    %3 = vector.load %arg5[%c0_3, %c0_4] : memref<1x256xf32, #tpu.memory_space<vmem>>, vector<1x256xf32>
    %4 = vector.broadcast %3 : vector<1x256xf32> to vector<64x256xf32>
    %5 = arith.addf %2, %4 : vector<64x256xf32>
    %c0_5 = arith.constant 0 : index
    %c0_6 = arith.constant 0 : index
    %6 = vector.load %arg7[%c0_5, %c0_6] : memref<64x256xf32, #tpu.memory_space<vmem>>, vector<64x256xf32>
    tpu.vector_store %arg7[%c0_5, %c0_6], %5 {strides = array<i32>} : memref<64x256xf32, #tpu.memory_space<vmem>>, vector<64x256xf32>,
    %c0_7 = arith.constant 0 : index
    %c0_8 = arith.constant 0 : index
    %7 = vector.load %arg3[%c0_7, %c0_8] : memref<32x128xf32, #tpu.memory_space<vmem>>, vector<32x128xf32>
    %c0_9 = arith.constant 0 : index
    %c0_10 = arith.constant 0 : index
    %8 = vector.load %arg4[%c0_9, %c0_10] : memref<32x128xf32, #tpu.memory_space<vmem>>, vector<32x128xf32>
    %cst_11 = arith.constant 0.000000e+00 : f32
    %9 = vector.broadcast %cst_11 : f32 to vector<8x32xf32>
    %c0_i32 = arith.constant 0 : i32
    %c8_i32 = arith.constant 8 : i32
    %10 = arith.muli %c0_i32, %c8_i32 : i32
    %11 = tpu.assume_multiple %10, 8 : i32
    %c7_i32 = arith.constant 7 : i32
    %12 = arith.subi %c7_i32, %c0_i32 : i32
    %c8_i32_12 = arith.constant 8 : i32
    %13 = arith.muli %12, %c8_i32_12 : i32
    %14 = tpu.assume_multiple %13, 8 : i32
    %15 = arith.index_cast %11 : i32 to index
    %c0_13 = arith.constant 0 : index
    %16 = vector.load %arg7[%15, %c0_13] : memref<64x256xf32, #tpu.memory_space<vmem>>, vector<8x128xf32>
    %cst_14 = arith.constant dense<0.000000e+00> : vector<8x128xf32>
    %17 = tpu.matmul %9, %7, %cst_14 {dimension_numbers = #tpu.dot_dimension_numbers<[1], [0], [0], [1], [0, 0, 1, 1], [], []>} : vector<8x32xf32>, vector<32x128xf32>, vector<8x128xf32> -> vector<8x128xf32>
    %18 = arith.addf %16, %17 : vector<8x128xf32>
    %19 = arith.index_cast %14 : i32 to index
    %c128 = arith.constant 128 : index
    %20 = vector.load %arg7[%19, %c128] : memref<64x256xf32, #tpu.memory_space<vmem>>, vector<8x128xf32>
    %cst_15 = arith.constant dense<0.000000e+00> : vector<8x128xf32>
    %21 = tpu.matmul %9, %8, %cst_15 {dimension_numbers = #tpu.dot_dimension_numbers<[1], [0], [0], [1], [0, 0, 1, 1], [], []>} : vector<8x32xf32>, vector<32x128xf32>, vector<8x128xf32> -> vector<8x128xf32>
    %22 = arith.addf %20, %21 : vector<8x128xf32>
    %23 = vector.extract_strided_slice %18 {offsets = [0, 0], sizes = [8, 96], strides = [1, 1]} : vector<8x128xf32> to vector<8x96xf32>
    %24 = arith.negf %23 : vector<8x96xf32>
    %25 = math.exp %24 : vector<8x96xf32>
    %cst_16 = arith.constant 1.000000e+00 : f32
    %26 = vector.broadcast %cst_16 : f32 to vector<8x96xf32>
    %27 = arith.addf %26, %25 : vector<8x96xf32>
    %28 = arith.divf %26, %27 : vector<8x96xf32>
    %29 = vector.extract_strided_slice %22 {offsets = [0, 0], sizes = [8, 96], strides = [1, 1]} : vector<8x128xf32> to vector<8x96xf32>
    %30 = arith.negf %29 : vector<8x96xf32>
    %31 = math.exp %30 : vector<8x96xf32>
    %cst_17 = arith.constant 1.000000e+00 : f32
    %32 = vector.broadcast %cst_17 : f32 to vector<8x96xf32>
    %33 = arith.addf %32, %31 : vector<8x96xf32>
    %34 = arith.divf %32, %33 : vector<8x96xf32>
    %35 = vector.extract_strided_slice %28 {offsets = [0, 32], sizes = [8, 32], strides = [1, 1]} : vector<8x96xf32> to vector<8x32xf32>
    %36 = arith.mulf %35, %9 : vector<8x32xf32>
    %37 = vector.extract_strided_slice %28 {offsets = [0, 0], sizes = [8, 32], strides = [1, 1]} : vector<8x96xf32> to vector<8x32xf32>
    %38 = vector.extract_strided_slice %18 {offsets = [0, 96], sizes = [8, 32], strides = [1, 1]} : vector<8x128xf32> to vector<8x32xf32>
    %39 = math.tanh %38 : vector<8x32xf32>
    %40 = arith.mulf %37, %39 : vector<8x32xf32>
    %41 = arith.addf %36, %40 : vector<8x32xf32>
    %42 = vector.extract_strided_slice %34 {offsets = [0, 32], sizes = [8, 32], strides = [1, 1]} : vector<8x96xf32> to vector<8x32xf32>
    %43 = arith.mulf %42, %9 : vector<8x32xf32>
    %44 = vector.extract_strided_slice %34 {offsets = [0, 0], sizes = [8, 32], strides = [1, 1]} : vector<8x96xf32> to vector<8x32xf32>
    %45 = vector.extract_strided_slice %22 {offsets = [0, 96], sizes = [8, 32], strides = [1, 1]} : vector<8x128xf32> to vector<8x32xf32>
    %46 = math.tanh %45 : vector<8x32xf32>
    %47 = arith.mulf %44, %46 : vector<8x32xf32>
    %48 = arith.addf %43, %47 : vector<8x32xf32>
    %49 = vector.extract_strided_slice %28 {offsets = [0, 64], sizes = [8, 32], strides = [1, 1]} : vector<8x96xf32> to vector<8x32xf32>
    %50 = math.tanh %41 : vector<8x32xf32>
    %51 = arith.mulf %49, %50 : vector<8x32xf32>
    %52 = vector.extract_strided_slice %34 {offsets = [0, 64], sizes = [8, 32], strides = [1, 1]} : vector<8x96xf32> to vector<8x32xf32>
    %53 = math.tanh %48 : vector<8x32xf32>
    %54 = arith.mulf %52, %53 : vector<8x32xf32>
    %55 = arith.index_cast %11 : i32 to index
    %c0_18 = arith.constant 0 : index
    %56 = vector.load %arg6[%55, %c0_18] : memref<64x64xf32, #tpu.memory_space<vmem>>, vector<8x32xf32>
    tpu.vector_store %arg6[%55, %c0_18], %51 {strides = array<i32>} : memref<64x64xf32, #tpu.memory_space<vmem>>, vector<8x32xf32>,
    %57 = arith.index_cast %14 : i32 to index
    %c32 = arith.constant 32 : index
    %58 = vector.load %arg6[%57, %c32] : memref<64x64xf32, #tpu.memory_space<vmem>>, vector<8x32xf32>
    tpu.vector_store %arg6[%57, %c32], %54 {strides = array<i32>} : memref<64x64xf32, #tpu.memory_space<vmem>>, vector<8x32xf32>,
    %c1_i32 = arith.constant 1 : i32
    %c8_i32_19 = arith.constant 8 : i32
    %59 = arith.muli %c1_i32, %c8_i32_19 : i32
    %60 = tpu.assume_multiple %59, 8 : i32
    %c7_i32_20 = arith.constant 7 : i32
    %61 = arith.subi %c7_i32_20, %c1_i32 : i32
    %c8_i32_21 = arith.constant 8 : i32
    %62 = arith.muli %61, %c8_i32_21 : i32
    %63 = tpu.assume_multiple %62, 8 : i32
    %64 = arith.index_cast %60 : i32 to index
    %c0_22 = arith.constant 0 : index
    %65 = vector.load %arg7[%64, %c0_22] : memref<64x256xf32, #tpu.memory_space<vmem>>, vector<8x128xf32>
    %cst_23 = arith.constant dense<0.000000e+00> : vector<8x128xf32>
    %66 = tpu.matmul %51, %7, %cst_23 {dimension_numbers = #tpu.dot_dimension_numbers<[1], [0], [0], [1], [0, 0, 1, 1], [], []>} : vector<8x32xf32>, vector<32x128xf32>, vector<8x128xf32> -> vector<8x128xf32>
    %67 = arith.addf %65, %66 : vector<8x128xf32>
    %68 = arith.index_cast %63 : i32 to index
    %c128_24 = arith.constant 128 : index
    %69 = vector.load %arg7[%68, %c128_24] : memref<64x256xf32, #tpu.memory_space<vmem>>, vector<8x128xf32>
    %cst_25 = arith.constant dense<0.000000e+00> : vector<8x128xf32>
    %70 = tpu.matmul %54, %8, %cst_25 {dimension_numbers = #tpu.dot_dimension_numbers<[1], [0], [0], [1], [0, 0, 1, 1], [], []>} : vector<8x32xf32>, vector<32x128xf32>, vector<8x128xf32> -> vector<8x128xf32>
    %71 = arith.addf %69, %70 : vector<8x128xf32>
    %72 = vector.extract_strided_slice %67 {offsets = [0, 0], sizes = [8, 96], strides = [1, 1]} : vector<8x128xf32> to vector<8x96xf32>
    %73 = arith.negf %72 : vector<8x96xf32>
    %74 = math.exp %73 : vector<8x96xf32>
    %cst_26 = arith.constant 1.000000e+00 : f32
    %75 = vector.broadcast %cst_26 : f32 to vector<8x96xf32>
    %76 = arith.addf %75, %74 : vector<8x96xf32>
    %77 = arith.divf %75, %76 : vector<8x96xf32>
    %78 = vector.extract_strided_slice %71 {offsets = [0, 0], sizes = [8, 96], strides = [1, 1]} : vector<8x128xf32> to vector<8x96xf32>
    %79 = arith.negf %78 : vector<8x96xf32>
    %80 = math.exp %79 : vector<8x96xf32>
    %cst_27 = arith.constant 1.000000e+00 : f32
    %81 = vector.broadcast %cst_27 : f32 to vector<8x96xf32>
    %82 = arith.addf %81, %80 : vector<8x96xf32>
    %83 = arith.divf %81, %82 : vector<8x96xf32>
    %84 = vector.extract_strided_slice %77 {offsets = [0, 32], sizes = [8, 32], strides = [1, 1]} : vector<8x96xf32> to vector<8x32xf32>
    %85 = arith.mulf %84, %41 : vector<8x32xf32>
    %86 = vector.extract_strided_slice %77 {offsets = [0, 0], sizes = [8, 32], strides = [1, 1]} : vector<8x96xf32> to vector<8x32xf32>
    %87 = vector.extract_strided_slice %67 {offsets = [0, 96], sizes = [8, 32], strides = [1, 1]} : vector<8x128xf32> to vector<8x32xf32>
    %88 = math.tanh %87 : vector<8x32xf32>
    %89 = arith.mulf %86, %88 : vector<8x32xf32>
    %90 = arith.addf %85, %89 : vector<8x32xf32>
    %91 = vector.extract_strided_slice %83 {offsets = [0, 32], sizes = [8, 32], strides = [1, 1]} : vector<8x96xf32> to vector<8x32xf32>
    %92 = arith.mulf %91, %48 : vector<8x32xf32>
    %93 = vector.extract_strided_slice %83 {offsets = [0, 0], sizes = [8, 32], strides = [1, 1]} : vector<8x96xf32> to vector<8x32xf32>
    %94 = vector.extract_strided_slice %71 {offsets = [0, 96], sizes = [8, 32], strides = [1, 1]} : vector<8x128xf32> to vector<8x32xf32>
    %95 = math.tanh %94 : vector<8x32xf32>
    %96 = arith.mulf %93, %95 : vector<8x32xf32>
    %97 = arith.addf %92, %96 : vector<8x32xf32>
    %98 = vector.extract_strided_slice %77 {offsets = [0, 64], sizes = [8, 32], strides = [1, 1]} : vector<8x96xf32> to vector<8x32xf32>
    %99 = math.tanh %90 : vector<8x32xf32>
    %100 = arith.mulf %98, %99 : vector<8x32xf32>
    %101 = vector.extract_strided_slice %83 {offsets = [0, 64], sizes = [8, 32], strides = [1, 1]} : vector<8x96xf32> to vector<8x32xf32>
    %102 = math.tanh %97 : vector<8x32xf32>
    %103 = arith.mulf %101, %102 : vector<8x32xf32>
    %104 = arith.index_cast %60 : i32 to index
    %c0_28 = arith.constant 0 : index
    %105 = vector.load %arg6[%104, %c0_28] : memref<64x64xf32, #tpu.memory_space<vmem>>, vector<8x32xf32>
    tpu.vector_store %arg6[%104, %c0_28], %100 {strides = array<i32>} : memref<64x64xf32, #tpu.memory_space<vmem>>, vector<8x32xf32>,
    %106 = arith.index_cast %63 : i32 to index
    %c32_29 = arith.constant 32 : index
    %107 = vector.load %arg6[%106, %c32_29] : memref<64x64xf32, #tpu.memory_space<vmem>>, vector<8x32xf32>
    tpu.vector_store %arg6[%106, %c32_29], %103 {strides = array<i32>} : memref<64x64xf32, #tpu.memory_space<vmem>>, vector<8x32xf32>,
    %c2_i32 = arith.constant 2 : i32
    %c8_i32_30 = arith.constant 8 : i32
    %108 = arith.muli %c2_i32, %c8_i32_30 : i32
    %109 = tpu.assume_multiple %108, 8 : i32
    %c7_i32_31 = arith.constant 7 : i32
    %110 = arith.subi %c7_i32_31, %c2_i32 : i32
    %c8_i32_32 = arith.constant 8 : i32
    %111 = arith.muli %110, %c8_i32_32 : i32
    %112 = tpu.assume_multiple %111, 8 : i32
    %113 = arith.index_cast %109 : i32 to index
    %c0_33 = arith.constant 0 : index
    %114 = vector.load %arg7[%113, %c0_33] : memref<64x256xf32, #tpu.memory_space<vmem>>, vector<8x128xf32>
    %cst_34 = arith.constant dense<0.000000e+00> : vector<8x128xf32>
    %115 = tpu.matmul %100, %7, %cst_34 {dimension_numbers = #tpu.dot_dimension_numbers<[1], [0], [0], [1], [0, 0, 1, 1], [], []>} : vector<8x32xf32>, vector<32x128xf32>, vector<8x128xf32> -> vector<8x128xf32>
    %116 = arith.addf %114, %115 : vector<8x128xf32>
    %117 = arith.index_cast %112 : i32 to index
    %c128_35 = arith.constant 128 : index
    %118 = vector.load %arg7[%117, %c128_35] : memref<64x256xf32, #tpu.memory_space<vmem>>, vector<8x128xf32>
    %cst_36 = arith.constant dense<0.000000e+00> : vector<8x128xf32>
    %119 = tpu.matmul %103, %8, %cst_36 {dimension_numbers = #tpu.dot_dimension_numbers<[1], [0], [0], [1], [0, 0, 1, 1], [], []>} : vector<8x32xf32>, vector<32x128xf32>, vector<8x128xf32> -> vector<8x128xf32>
    %120 = arith.addf %118, %119 : vector<8x128xf32>
    %121 = vector.extract_strided_slice %116 {offsets = [0, 0], sizes = [8, 96], strides = [1, 1]} : vector<8x128xf32> to vector<8x96xf32>
    %122 = arith.negf %121 : vector<8x96xf32>
    %123 = math.exp %122 : vector<8x96xf32>
    %cst_37 = arith.constant 1.000000e+00 : f32
    %124 = vector.broadcast %cst_37 : f32 to vector<8x96xf32>
    %125 = arith.addf %124, %123 : vector<8x96xf32>
    %126 = arith.divf %124, %125 : vector<8x96xf32>
    %127 = vector.extract_strided_slice %120 {offsets = [0, 0], sizes = [8, 96], strides = [1, 1]} : vector<8x128xf32> to vector<8x96xf32>
    %128 = arith.negf %127 : vector<8x96xf32>
    %129 = math.exp %128 : vector<8x96xf32>
    %cst_38 = arith.constant 1.000000e+00 : f32
    %130 = vector.broadcast %cst_38 : f32 to vector<8x96xf32>
    %131 = arith.addf %130, %129 : vector<8x96xf32>
    %132 = arith.divf %130, %131 : vector<8x96xf32>
    %133 = vector.extract_strided_slice %126 {offsets = [0, 32], sizes = [8, 32], strides = [1, 1]} : vector<8x96xf32> to vector<8x32xf32>
    %134 = arith.mulf %133, %90 : vector<8x32xf32>
    %135 = vector.extract_strided_slice %126 {offsets = [0, 0], sizes = [8, 32], strides = [1, 1]} : vector<8x96xf32> to vector<8x32xf32>
    %136 = vector.extract_strided_slice %116 {offsets = [0, 96], sizes = [8, 32], strides = [1, 1]} : vector<8x128xf32> to vector<8x32xf32>
    %137 = math.tanh %136 : vector<8x32xf32>
    %138 = arith.mulf %135, %137 : vector<8x32xf32>
    %139 = arith.addf %134, %138 : vector<8x32xf32>
    %140 = vector.extract_strided_slice %132 {offsets = [0, 32], sizes = [8, 32], strides = [1, 1]} : vector<8x96xf32> to vector<8x32xf32>
    %141 = arith.mulf %140, %97 : vector<8x32xf32>
    %142 = vector.extract_strided_slice %132 {offsets = [0, 0], sizes = [8, 32], strides = [1, 1]} : vector<8x96xf32> to vector<8x32xf32>
    %143 = vector.extract_strided_slice %120 {offsets = [0, 96], sizes = [8, 32], strides = [1, 1]} : vector<8x128xf32> to vector<8x32xf32>
    %144 = math.tanh %143 : vector<8x32xf32>
    %145 = arith.mulf %142, %144 : vector<8x32xf32>
    %146 = arith.addf %141, %145 : vector<8x32xf32>
    %147 = vector.extract_strided_slice %126 {offsets = [0, 64], sizes = [8, 32], strides = [1, 1]} : vector<8x96xf32> to vector<8x32xf32>
    %148 = math.tanh %139 : vector<8x32xf32>
    %149 = arith.mulf %147, %148 : vector<8x32xf32>
    %150 = vector.extract_strided_slice %132 {offsets = [0, 64], sizes = [8, 32], strides = [1, 1]} : vector<8x96xf32> to vector<8x32xf32>
    %151 = math.tanh %146 : vector<8x32xf32>
    %152 = arith.mulf %150, %151 : vector<8x32xf32>
    %153 = arith.index_cast %109 : i32 to index
    %c0_39 = arith.constant 0 : index
    %154 = vector.load %arg6[%153, %c0_39] : memref<64x64xf32, #tpu.memory_space<vmem>>, vector<8x32xf32>
    tpu.vector_store %arg6[%153, %c0_39], %149 {strides = array<i32>} : memref<64x64xf32, #tpu.memory_space<vmem>>, vector<8x32xf32>,
    %155 = arith.index_cast %112 : i32 to index
    %c32_40 = arith.constant 32 : index
    %156 = vector.load %arg6[%155, %c32_40] : memref<64x64xf32, #tpu.memory_space<vmem>>, vector<8x32xf32>
    tpu.vector_store %arg6[%155, %c32_40], %152 {strides = array<i32>} : memref<64x64xf32, #tpu.memory_space<vmem>>, vector<8x32xf32>,
    %c3_i32 = arith.constant 3 : i32
    %c8_i32_41 = arith.constant 8 : i32
    %157 = arith.muli %c3_i32, %c8_i32_41 : i32
    %158 = tpu.assume_multiple %157, 8 : i32
    %c7_i32_42 = arith.constant 7 : i32
    %159 = arith.subi %c7_i32_42, %c3_i32 : i32
    %c8_i32_43 = arith.constant 8 : i32
    %160 = arith.muli %159, %c8_i32_43 : i32
    %161 = tpu.assume_multiple %160, 8 : i32
    %162 = arith.index_cast %158 : i32 to index
    %c0_44 = arith.constant 0 : index
    %163 = vector.load %arg7[%162, %c0_44] : memref<64x256xf32, #tpu.memory_space<vmem>>, vector<8x128xf32>
    %cst_45 = arith.constant dense<0.000000e+00> : vector<8x128xf32>
    %164 = tpu.matmul %149, %7, %cst_45 {dimension_numbers = #tpu.dot_dimension_numbers<[1], [0], [0], [1], [0, 0, 1, 1], [], []>} : vector<8x32xf32>, vector<32x128xf32>, vector<8x128xf32> -> vector<8x128xf32>
    %165 = arith.addf %163, %164 : vector<8x128xf32>
    %166 = arith.index_cast %161 : i32 to index
    %c128_46 = arith.constant 128 : index
    %167 = vector.load %arg7[%166, %c128_46] : memref<64x256xf32, #tpu.memory_space<vmem>>, vector<8x128xf32>
    %cst_47 = arith.constant dense<0.000000e+00> : vector<8x128xf32>
    %168 = tpu.matmul %152, %8, %cst_47 {dimension_numbers = #tpu.dot_dimension_numbers<[1], [0], [0], [1], [0, 0, 1, 1], [], []>} : vector<8x32xf32>, vector<32x128xf32>, vector<8x128xf32> -> vector<8x128xf32>
    %169 = arith.addf %167, %168 : vector<8x128xf32>
    %170 = vector.extract_strided_slice %165 {offsets = [0, 0], sizes = [8, 96], strides = [1, 1]} : vector<8x128xf32> to vector<8x96xf32>
    %171 = arith.negf %170 : vector<8x96xf32>
    %172 = math.exp %171 : vector<8x96xf32>
    %cst_48 = arith.constant 1.000000e+00 : f32
    %173 = vector.broadcast %cst_48 : f32 to vector<8x96xf32>
    %174 = arith.addf %173, %172 : vector<8x96xf32>
    %175 = arith.divf %173, %174 : vector<8x96xf32>
    %176 = vector.extract_strided_slice %169 {offsets = [0, 0], sizes = [8, 96], strides = [1, 1]} : vector<8x128xf32> to vector<8x96xf32>
    %177 = arith.negf %176 : vector<8x96xf32>
    %178 = math.exp %177 : vector<8x96xf32>
    %cst_49 = arith.constant 1.000000e+00 : f32
    %179 = vector.broadcast %cst_49 : f32 to vector<8x96xf32>
    %180 = arith.addf %179, %178 : vector<8x96xf32>
    %181 = arith.divf %179, %180 : vector<8x96xf32>
    %182 = vector.extract_strided_slice %175 {offsets = [0, 32], sizes = [8, 32], strides = [1, 1]} : vector<8x96xf32> to vector<8x32xf32>
    %183 = arith.mulf %182, %139 : vector<8x32xf32>
    %184 = vector.extract_strided_slice %175 {offsets = [0, 0], sizes = [8, 32], strides = [1, 1]} : vector<8x96xf32> to vector<8x32xf32>
    %185 = vector.extract_strided_slice %165 {offsets = [0, 96], sizes = [8, 32], strides = [1, 1]} : vector<8x128xf32> to vector<8x32xf32>
    %186 = math.tanh %185 : vector<8x32xf32>
    %187 = arith.mulf %184, %186 : vector<8x32xf32>
    %188 = arith.addf %183, %187 : vector<8x32xf32>
    %189 = vector.extract_strided_slice %181 {offsets = [0, 32], sizes = [8, 32], strides = [1, 1]} : vector<8x96xf32> to vector<8x32xf32>
    %190 = arith.mulf %189, %146 : vector<8x32xf32>
    %191 = vector.extract_strided_slice %181 {offsets = [0, 0], sizes = [8, 32], strides = [1, 1]} : vector<8x96xf32> to vector<8x32xf32>
    %192 = vector.extract_strided_slice %169 {offsets = [0, 96], sizes = [8, 32], strides = [1, 1]} : vector<8x128xf32> to vector<8x32xf32>
    %193 = math.tanh %192 : vector<8x32xf32>
    %194 = arith.mulf %191, %193 : vector<8x32xf32>
    %195 = arith.addf %190, %194 : vector<8x32xf32>
    %196 = vector.extract_strided_slice %175 {offsets = [0, 64], sizes = [8, 32], strides = [1, 1]} : vector<8x96xf32> to vector<8x32xf32>
    %197 = math.tanh %188 : vector<8x32xf32>
    %198 = arith.mulf %196, %197 : vector<8x32xf32>
    %199 = vector.extract_strided_slice %181 {offsets = [0, 64], sizes = [8, 32], strides = [1, 1]} : vector<8x96xf32> to vector<8x32xf32>
    %200 = math.tanh %195 : vector<8x32xf32>
    %201 = arith.mulf %199, %200 : vector<8x32xf32>
    %202 = arith.index_cast %158 : i32 to index
    %c0_50 = arith.constant 0 : index
    %203 = vector.load %arg6[%202, %c0_50] : memref<64x64xf32, #tpu.memory_space<vmem>>, vector<8x32xf32>
    tpu.vector_store %arg6[%202, %c0_50], %198 {strides = array<i32>} : memref<64x64xf32, #tpu.memory_space<vmem>>, vector<8x32xf32>,
    %204 = arith.index_cast %161 : i32 to index
    %c32_51 = arith.constant 32 : index
    %205 = vector.load %arg6[%204, %c32_51] : memref<64x64xf32, #tpu.memory_space<vmem>>, vector<8x32xf32>
    tpu.vector_store %arg6[%204, %c32_51], %201 {strides = array<i32>} : memref<64x64xf32, #tpu.memory_space<vmem>>, vector<8x32xf32>,
    %c4_i32 = arith.constant 4 : i32
    %c8_i32_52 = arith.constant 8 : i32
    %206 = arith.muli %c4_i32, %c8_i32_52 : i32
    %207 = tpu.assume_multiple %206, 8 : i32
    %c7_i32_53 = arith.constant 7 : i32
    %208 = arith.subi %c7_i32_53, %c4_i32 : i32
    %c8_i32_54 = arith.constant 8 : i32
    %209 = arith.muli %208, %c8_i32_54 : i32
    %210 = tpu.assume_multiple %209, 8 : i32
    %211 = arith.index_cast %207 : i32 to index
    %c0_55 = arith.constant 0 : index
    %212 = vector.load %arg7[%211, %c0_55] : memref<64x256xf32, #tpu.memory_space<vmem>>, vector<8x128xf32>
    %cst_56 = arith.constant dense<0.000000e+00> : vector<8x128xf32>
    %213 = tpu.matmul %198, %7, %cst_56 {dimension_numbers = #tpu.dot_dimension_numbers<[1], [0], [0], [1], [0, 0, 1, 1], [], []>} : vector<8x32xf32>, vector<32x128xf32>, vector<8x128xf32> -> vector<8x128xf32>
    %214 = arith.addf %212, %213 : vector<8x128xf32>
    %215 = arith.index_cast %210 : i32 to index
    %c128_57 = arith.constant 128 : index
    %216 = vector.load %arg7[%215, %c128_57] : memref<64x256xf32, #tpu.memory_space<vmem>>, vector<8x128xf32>
    %cst_58 = arith.constant dense<0.000000e+00> : vector<8x128xf32>
    %217 = tpu.matmul %201, %8, %cst_58 {dimension_numbers = #tpu.dot_dimension_numbers<[1], [0], [0], [1], [0, 0, 1, 1], [], []>} : vector<8x32xf32>, vector<32x128xf32>, vector<8x128xf32> -> vector<8x128xf32>
    %218 = arith.addf %216, %217 : vector<8x128xf32>
    %219 = vector.extract_strided_slice %214 {offsets = [0, 0], sizes = [8, 96], strides = [1, 1]} : vector<8x128xf32> to vector<8x96xf32>
    %220 = arith.negf %219 : vector<8x96xf32>
    %221 = math.exp %220 : vector<8x96xf32>
    %cst_59 = arith.constant 1.000000e+00 : f32
    %222 = vector.broadcast %cst_59 : f32 to vector<8x96xf32>
    %223 = arith.addf %222, %221 : vector<8x96xf32>
    %224 = arith.divf %222, %223 : vector<8x96xf32>
    %225 = vector.extract_strided_slice %218 {offsets = [0, 0], sizes = [8, 96], strides = [1, 1]} : vector<8x128xf32> to vector<8x96xf32>
    %226 = arith.negf %225 : vector<8x96xf32>
    %227 = math.exp %226 : vector<8x96xf32>
    %cst_60 = arith.constant 1.000000e+00 : f32
    %228 = vector.broadcast %cst_60 : f32 to vector<8x96xf32>
    %229 = arith.addf %228, %227 : vector<8x96xf32>
    %230 = arith.divf %228, %229 : vector<8x96xf32>
    %231 = vector.extract_strided_slice %224 {offsets = [0, 32], sizes = [8, 32], strides = [1, 1]} : vector<8x96xf32> to vector<8x32xf32>
    %232 = arith.mulf %231, %188 : vector<8x32xf32>
    %233 = vector.extract_strided_slice %224 {offsets = [0, 0], sizes = [8, 32], strides = [1, 1]} : vector<8x96xf32> to vector<8x32xf32>
    %234 = vector.extract_strided_slice %214 {offsets = [0, 96], sizes = [8, 32], strides = [1, 1]} : vector<8x128xf32> to vector<8x32xf32>
    %235 = math.tanh %234 : vector<8x32xf32>
    %236 = arith.mulf %233, %235 : vector<8x32xf32>
    %237 = arith.addf %232, %236 : vector<8x32xf32>
    %238 = vector.extract_strided_slice %230 {offsets = [0, 32], sizes = [8, 32], strides = [1, 1]} : vector<8x96xf32> to vector<8x32xf32>
    %239 = arith.mulf %238, %195 : vector<8x32xf32>
    %240 = vector.extract_strided_slice %230 {offsets = [0, 0], sizes = [8, 32], strides = [1, 1]} : vector<8x96xf32> to vector<8x32xf32>
    %241 = vector.extract_strided_slice %218 {offsets = [0, 96], sizes = [8, 32], strides = [1, 1]} : vector<8x128xf32> to vector<8x32xf32>
    %242 = math.tanh %241 : vector<8x32xf32>
    %243 = arith.mulf %240, %242 : vector<8x32xf32>
    %244 = arith.addf %239, %243 : vector<8x32xf32>
    %245 = vector.extract_strided_slice %224 {offsets = [0, 64], sizes = [8, 32], strides = [1, 1]} : vector<8x96xf32> to vector<8x32xf32>
    %246 = math.tanh %237 : vector<8x32xf32>
    %247 = arith.mulf %245, %246 : vector<8x32xf32>
    %248 = vector.extract_strided_slice %230 {offsets = [0, 64], sizes = [8, 32], strides = [1, 1]} : vector<8x96xf32> to vector<8x32xf32>
    %249 = math.tanh %244 : vector<8x32xf32>
    %250 = arith.mulf %248, %249 : vector<8x32xf32>
    %251 = arith.index_cast %207 : i32 to index
    %c0_61 = arith.constant 0 : index
    %252 = vector.load %arg6[%251, %c0_61] : memref<64x64xf32, #tpu.memory_space<vmem>>, vector<8x32xf32>
    tpu.vector_store %arg6[%251, %c0_61], %247 {strides = array<i32>} : memref<64x64xf32, #tpu.memory_space<vmem>>, vector<8x32xf32>,
    %253 = arith.index_cast %210 : i32 to index
    %c32_62 = arith.constant 32 : index
    %254 = vector.load %arg6[%253, %c32_62] : memref<64x64xf32, #tpu.memory_space<vmem>>, vector<8x32xf32>
    tpu.vector_store %arg6[%253, %c32_62], %250 {strides = array<i32>} : memref<64x64xf32, #tpu.memory_space<vmem>>, vector<8x32xf32>,
    %c5_i32 = arith.constant 5 : i32
    %c8_i32_63 = arith.constant 8 : i32
    %255 = arith.muli %c5_i32, %c8_i32_63 : i32
    %256 = tpu.assume_multiple %255, 8 : i32
    %c7_i32_64 = arith.constant 7 : i32
    %257 = arith.subi %c7_i32_64, %c5_i32 : i32
    %c8_i32_65 = arith.constant 8 : i32
    %258 = arith.muli %257, %c8_i32_65 : i32
    %259 = tpu.assume_multiple %258, 8 : i32
    %260 = arith.index_cast %256 : i32 to index
    %c0_66 = arith.constant 0 : index
    %261 = vector.load %arg7[%260, %c0_66] : memref<64x256xf32, #tpu.memory_space<vmem>>, vector<8x128xf32>
    %cst_67 = arith.constant dense<0.000000e+00> : vector<8x128xf32>
    %262 = tpu.matmul %247, %7, %cst_67 {dimension_numbers = #tpu.dot_dimension_numbers<[1], [0], [0], [1], [0, 0, 1, 1], [], []>} : vector<8x32xf32>, vector<32x128xf32>, vector<8x128xf32> -> vector<8x128xf32>
    %263 = arith.addf %261, %262 : vector<8x128xf32>
    %264 = arith.index_cast %259 : i32 to index
    %c128_68 = arith.constant 128 : index
    %265 = vector.load %arg7[%264, %c128_68] : memref<64x256xf32, #tpu.memory_space<vmem>>, vector<8x128xf32>
    %cst_69 = arith.constant dense<0.000000e+00> : vector<8x128xf32>
    %266 = tpu.matmul %250, %8, %cst_69 {dimension_numbers = #tpu.dot_dimension_numbers<[1], [0], [0], [1], [0, 0, 1, 1], [], []>} : vector<8x32xf32>, vector<32x128xf32>, vector<8x128xf32> -> vector<8x128xf32>
    %267 = arith.addf %265, %266 : vector<8x128xf32>
    %268 = vector.extract_strided_slice %263 {offsets = [0, 0], sizes = [8, 96], strides = [1, 1]} : vector<8x128xf32> to vector<8x96xf32>
    %269 = arith.negf %268 : vector<8x96xf32>
    %270 = math.exp %269 : vector<8x96xf32>
    %cst_70 = arith.constant 1.000000e+00 : f32
    %271 = vector.broadcast %cst_70 : f32 to vector<8x96xf32>
    %272 = arith.addf %271, %270 : vector<8x96xf32>
    %273 = arith.divf %271, %272 : vector<8x96xf32>
    %274 = vector.extract_strided_slice %267 {offsets = [0, 0], sizes = [8, 96], strides = [1, 1]} : vector<8x128xf32> to vector<8x96xf32>
    %275 = arith.negf %274 : vector<8x96xf32>
    %276 = math.exp %275 : vector<8x96xf32>
    %cst_71 = arith.constant 1.000000e+00 : f32
    %277 = vector.broadcast %cst_71 : f32 to vector<8x96xf32>
    %278 = arith.addf %277, %276 : vector<8x96xf32>
    %279 = arith.divf %277, %278 : vector<8x96xf32>
    %280 = vector.extract_strided_slice %273 {offsets = [0, 32], sizes = [8, 32], strides = [1, 1]} : vector<8x96xf32> to vector<8x32xf32>
    %281 = arith.mulf %280, %237 : vector<8x32xf32>
    %282 = vector.extract_strided_slice %273 {offsets = [0, 0], sizes = [8, 32], strides = [1, 1]} : vector<8x96xf32> to vector<8x32xf32>
    %283 = vector.extract_strided_slice %263 {offsets = [0, 96], sizes = [8, 32], strides = [1, 1]} : vector<8x128xf32> to vector<8x32xf32>
    %284 = math.tanh %283 : vector<8x32xf32>
    %285 = arith.mulf %282, %284 : vector<8x32xf32>
    %286 = arith.addf %281, %285 : vector<8x32xf32>
    %287 = vector.extract_strided_slice %279 {offsets = [0, 32], sizes = [8, 32], strides = [1, 1]} : vector<8x96xf32> to vector<8x32xf32>
    %288 = arith.mulf %287, %244 : vector<8x32xf32>
    %289 = vector.extract_strided_slice %279 {offsets = [0, 0], sizes = [8, 32], strides = [1, 1]} : vector<8x96xf32> to vector<8x32xf32>
    %290 = vector.extract_strided_slice %267 {offsets = [0, 96], sizes = [8, 32], strides = [1, 1]} : vector<8x128xf32> to vector<8x32xf32>
    %291 = math.tanh %290 : vector<8x32xf32>
    %292 = arith.mulf %289, %291 : vector<8x32xf32>
    %293 = arith.addf %288, %292 : vector<8x32xf32>
    %294 = vector.extract_strided_slice %273 {offsets = [0, 64], sizes = [8, 32], strides = [1, 1]} : vector<8x96xf32> to vector<8x32xf32>
    %295 = math.tanh %286 : vector<8x32xf32>
    %296 = arith.mulf %294, %295 : vector<8x32xf32>
    %297 = vector.extract_strided_slice %279 {offsets = [0, 64], sizes = [8, 32], strides = [1, 1]} : vector<8x96xf32> to vector<8x32xf32>
    %298 = math.tanh %293 : vector<8x32xf32>
    %299 = arith.mulf %297, %298 : vector<8x32xf32>
    %300 = arith.index_cast %256 : i32 to index
    %c0_72 = arith.constant 0 : index
    %301 = vector.load %arg6[%300, %c0_72] : memref<64x64xf32, #tpu.memory_space<vmem>>, vector<8x32xf32>
    tpu.vector_store %arg6[%300, %c0_72], %296 {strides = array<i32>} : memref<64x64xf32, #tpu.memory_space<vmem>>, vector<8x32xf32>,
    %302 = arith.index_cast %259 : i32 to index
    %c32_73 = arith.constant 32 : index
    %303 = vector.load %arg6[%302, %c32_73] : memref<64x64xf32, #tpu.memory_space<vmem>>, vector<8x32xf32>
    tpu.vector_store %arg6[%302, %c32_73], %299 {strides = array<i32>} : memref<64x64xf32, #tpu.memory_space<vmem>>, vector<8x32xf32>,
    %c6_i32 = arith.constant 6 : i32
    %c8_i32_74 = arith.constant 8 : i32
    %304 = arith.muli %c6_i32, %c8_i32_74 : i32
    %305 = tpu.assume_multiple %304, 8 : i32
    %c7_i32_75 = arith.constant 7 : i32
    %306 = arith.subi %c7_i32_75, %c6_i32 : i32
    %c8_i32_76 = arith.constant 8 : i32
    %307 = arith.muli %306, %c8_i32_76 : i32
    %308 = tpu.assume_multiple %307, 8 : i32
    %309 = arith.index_cast %305 : i32 to index
    %c0_77 = arith.constant 0 : index
    %310 = vector.load %arg7[%309, %c0_77] : memref<64x256xf32, #tpu.memory_space<vmem>>, vector<8x128xf32>
    %cst_78 = arith.constant dense<0.000000e+00> : vector<8x128xf32>
    %311 = tpu.matmul %296, %7, %cst_78 {dimension_numbers = #tpu.dot_dimension_numbers<[1], [0], [0], [1], [0, 0, 1, 1], [], []>} : vector<8x32xf32>, vector<32x128xf32>, vector<8x128xf32> -> vector<8x128xf32>
    %312 = arith.addf %310, %311 : vector<8x128xf32>
    %313 = arith.index_cast %308 : i32 to index
    %c128_79 = arith.constant 128 : index
    %314 = vector.load %arg7[%313, %c128_79] : memref<64x256xf32, #tpu.memory_space<vmem>>, vector<8x128xf32>
    %cst_80 = arith.constant dense<0.000000e+00> : vector<8x128xf32>
    %315 = tpu.matmul %299, %8, %cst_80 {dimension_numbers = #tpu.dot_dimension_numbers<[1], [0], [0], [1], [0, 0, 1, 1], [], []>} : vector<8x32xf32>, vector<32x128xf32>, vector<8x128xf32> -> vector<8x128xf32>
    %316 = arith.addf %314, %315 : vector<8x128xf32>
    %317 = vector.extract_strided_slice %312 {offsets = [0, 0], sizes = [8, 96], strides = [1, 1]} : vector<8x128xf32> to vector<8x96xf32>
    %318 = arith.negf %317 : vector<8x96xf32>
    %319 = math.exp %318 : vector<8x96xf32>
    %cst_81 = arith.constant 1.000000e+00 : f32
    %320 = vector.broadcast %cst_81 : f32 to vector<8x96xf32>
    %321 = arith.addf %320, %319 : vector<8x96xf32>
    %322 = arith.divf %320, %321 : vector<8x96xf32>
    %323 = vector.extract_strided_slice %316 {offsets = [0, 0], sizes = [8, 96], strides = [1, 1]} : vector<8x128xf32> to vector<8x96xf32>
    %324 = arith.negf %323 : vector<8x96xf32>
    %325 = math.exp %324 : vector<8x96xf32>
    %cst_82 = arith.constant 1.000000e+00 : f32
    %326 = vector.broadcast %cst_82 : f32 to vector<8x96xf32>
    %327 = arith.addf %326, %325 : vector<8x96xf32>
    %328 = arith.divf %326, %327 : vector<8x96xf32>
    %329 = vector.extract_strided_slice %322 {offsets = [0, 32], sizes = [8, 32], strides = [1, 1]} : vector<8x96xf32> to vector<8x32xf32>
    %330 = arith.mulf %329, %286 : vector<8x32xf32>
    %331 = vector.extract_strided_slice %322 {offsets = [0, 0], sizes = [8, 32], strides = [1, 1]} : vector<8x96xf32> to vector<8x32xf32>
    %332 = vector.extract_strided_slice %312 {offsets = [0, 96], sizes = [8, 32], strides = [1, 1]} : vector<8x128xf32> to vector<8x32xf32>
    %333 = math.tanh %332 : vector<8x32xf32>
    %334 = arith.mulf %331, %333 : vector<8x32xf32>
    %335 = arith.addf %330, %334 : vector<8x32xf32>
    %336 = vector.extract_strided_slice %328 {offsets = [0, 32], sizes = [8, 32], strides = [1, 1]} : vector<8x96xf32> to vector<8x32xf32>
    %337 = arith.mulf %336, %293 : vector<8x32xf32>
    %338 = vector.extract_strided_slice %328 {offsets = [0, 0], sizes = [8, 32], strides = [1, 1]} : vector<8x96xf32> to vector<8x32xf32>
    %339 = vector.extract_strided_slice %316 {offsets = [0, 96], sizes = [8, 32], strides = [1, 1]} : vector<8x128xf32> to vector<8x32xf32>
    %340 = math.tanh %339 : vector<8x32xf32>
    %341 = arith.mulf %338, %340 : vector<8x32xf32>
    %342 = arith.addf %337, %341 : vector<8x32xf32>
    %343 = vector.extract_strided_slice %322 {offsets = [0, 64], sizes = [8, 32], strides = [1, 1]} : vector<8x96xf32> to vector<8x32xf32>
    %344 = math.tanh %335 : vector<8x32xf32>
    %345 = arith.mulf %343, %344 : vector<8x32xf32>
    %346 = vector.extract_strided_slice %328 {offsets = [0, 64], sizes = [8, 32], strides = [1, 1]} : vector<8x96xf32> to vector<8x32xf32>
    %347 = math.tanh %342 : vector<8x32xf32>
    %348 = arith.mulf %346, %347 : vector<8x32xf32>
    %349 = arith.index_cast %305 : i32 to index
    %c0_83 = arith.constant 0 : index
    %350 = vector.load %arg6[%349, %c0_83] : memref<64x64xf32, #tpu.memory_space<vmem>>, vector<8x32xf32>
    tpu.vector_store %arg6[%349, %c0_83], %345 {strides = array<i32>} : memref<64x64xf32, #tpu.memory_space<vmem>>, vector<8x32xf32>,
    %351 = arith.index_cast %308 : i32 to index
    %c32_84 = arith.constant 32 : index
    %352 = vector.load %arg6[%351, %c32_84] : memref<64x64xf32, #tpu.memory_space<vmem>>, vector<8x32xf32>
    tpu.vector_store %arg6[%351, %c32_84], %348 {strides = array<i32>} : memref<64x64xf32, #tpu.memory_space<vmem>>, vector<8x32xf32>,
    %c7_i32_85 = arith.constant 7 : i32
    %c8_i32_86 = arith.constant 8 : i32
    %353 = arith.muli %c7_i32_85, %c8_i32_86 : i32
    %354 = tpu.assume_multiple %353, 8 : i32
    %c7_i32_87 = arith.constant 7 : i32
    %355 = arith.subi %c7_i32_87, %c7_i32_85 : i32
    %c8_i32_88 = arith.constant 8 : i32
    %356 = arith.muli %355, %c8_i32_88 : i32
    %357 = tpu.assume_multiple %356, 8 : i32
    %358 = arith.index_cast %354 : i32 to index
    %c0_89 = arith.constant 0 : index
    %359 = vector.load %arg7[%358, %c0_89] : memref<64x256xf32, #tpu.memory_space<vmem>>, vector<8x128xf32>
    %cst_90 = arith.constant dense<0.000000e+00> : vector<8x128xf32>
    %360 = tpu.matmul %345, %7, %cst_90 {dimension_numbers = #tpu.dot_dimension_numbers<[1], [0], [0], [1], [0, 0, 1, 1], [], []>} : vector<8x32xf32>, vector<32x128xf32>, vector<8x128xf32> -> vector<8x128xf32>
    %361 = arith.addf %359, %360 : vector<8x128xf32>
    %362 = arith.index_cast %357 : i32 to index
    %c128_91 = arith.constant 128 : index
    %363 = vector.load %arg7[%362, %c128_91] : memref<64x256xf32, #tpu.memory_space<vmem>>, vector<8x128xf32>
    %cst_92 = arith.constant dense<0.000000e+00> : vector<8x128xf32>
    %364 = tpu.matmul %348, %8, %cst_92 {dimension_numbers = #tpu.dot_dimension_numbers<[1], [0], [0], [1], [0, 0, 1, 1], [], []>} : vector<8x32xf32>, vector<32x128xf32>, vector<8x128xf32> -> vector<8x128xf32>
    %365 = arith.addf %363, %364 : vector<8x128xf32>
    %366 = vector.extract_strided_slice %361 {offsets = [0, 0], sizes = [8, 96], strides = [1, 1]} : vector<8x128xf32> to vector<8x96xf32>
    %367 = arith.negf %366 : vector<8x96xf32>
    %368 = math.exp %367 : vector<8x96xf32>
    %cst_93 = arith.constant 1.000000e+00 : f32
    %369 = vector.broadcast %cst_93 : f32 to vector<8x96xf32>
    %370 = arith.addf %369, %368 : vector<8x96xf32>
    %371 = arith.divf %369, %370 : vector<8x96xf32>
    %372 = vector.extract_strided_slice %365 {offsets = [0, 0], sizes = [8, 96], strides = [1, 1]} : vector<8x128xf32> to vector<8x96xf32>
    %373 = arith.negf %372 : vector<8x96xf32>
    %374 = math.exp %373 : vector<8x96xf32>
    %cst_94 = arith.constant 1.000000e+00 : f32
    %375 = vector.broadcast %cst_94 : f32 to vector<8x96xf32>
    %376 = arith.addf %375, %374 : vector<8x96xf32>
    %377 = arith.divf %375, %376 : vector<8x96xf32>
    %378 = vector.extract_strided_slice %371 {offsets = [0, 32], sizes = [8, 32], strides = [1, 1]} : vector<8x96xf32> to vector<8x32xf32>
    %379 = arith.mulf %378, %335 : vector<8x32xf32>
    %380 = vector.extract_strided_slice %371 {offsets = [0, 0], sizes = [8, 32], strides = [1, 1]} : vector<8x96xf32> to vector<8x32xf32>
    %381 = vector.extract_strided_slice %361 {offsets = [0, 96], sizes = [8, 32], strides = [1, 1]} : vector<8x128xf32> to vector<8x32xf32>
    %382 = math.tanh %381 : vector<8x32xf32>
    %383 = arith.mulf %380, %382 : vector<8x32xf32>
    %384 = arith.addf %379, %383 : vector<8x32xf32>
    %385 = vector.extract_strided_slice %377 {offsets = [0, 32], sizes = [8, 32], strides = [1, 1]} : vector<8x96xf32> to vector<8x32xf32>
    %386 = arith.mulf %385, %342 : vector<8x32xf32>
    %387 = vector.extract_strided_slice %377 {offsets = [0, 0], sizes = [8, 32], strides = [1, 1]} : vector<8x96xf32> to vector<8x32xf32>
    %388 = vector.extract_strided_slice %365 {offsets = [0, 96], sizes = [8, 32], strides = [1, 1]} : vector<8x128xf32> to vector<8x32xf32>
    %389 = math.tanh %388 : vector<8x32xf32>
    %390 = arith.mulf %387, %389 : vector<8x32xf32>
    %391 = arith.addf %386, %390 : vector<8x32xf32>
    %392 = vector.extract_strided_slice %371 {offsets = [0, 64], sizes = [8, 32], strides = [1, 1]} : vector<8x96xf32> to vector<8x32xf32>
    %393 = math.tanh %384 : vector<8x32xf32>
    %394 = arith.mulf %392, %393 : vector<8x32xf32>
    %395 = vector.extract_strided_slice %377 {offsets = [0, 64], sizes = [8, 32], strides = [1, 1]} : vector<8x96xf32> to vector<8x32xf32>
    %396 = math.tanh %391 : vector<8x32xf32>
    %397 = arith.mulf %395, %396 : vector<8x32xf32>
    %398 = arith.index_cast %354 : i32 to index
    %c0_95 = arith.constant 0 : index
    %399 = vector.load %arg6[%398, %c0_95] : memref<64x64xf32, #tpu.memory_space<vmem>>, vector<8x32xf32>
    tpu.vector_store %arg6[%398, %c0_95], %394 {strides = array<i32>} : memref<64x64xf32, #tpu.memory_space<vmem>>, vector<8x32xf32>,
    %400 = arith.index_cast %357 : i32 to index
    %c32_96 = arith.constant 32 : index
    %401 = vector.load %arg6[%400, %c32_96] : memref<64x64xf32, #tpu.memory_space<vmem>>, vector<8x32xf32>
    tpu.vector_store %arg6[%400, %c32_96], %397 {strides = array<i32>} : memref<64x64xf32, #tpu.memory_space<vmem>>, vector<8x32xf32>,
    %c8_i32_97 = arith.constant 8 : i32
    return
  }
  func.func @transform_0(%arg0: i32) -> (i32, i32) {
    %c0_i32 = arith.constant 0 : i32
    %c0_i32_0 = arith.constant 0 : i32
    %c0_i32_1 = arith.constant 0 : i32
    return %c0_i32, %c0_i32_0 : i32, i32
  }
  func.func @transform_1(%arg0: i32) -> (i32, i32) {
    %c0_i32 = arith.constant 0 : i32
    %c0_i32_0 = arith.constant 0 : i32
    %c0_i32_1 = arith.constant 0 : i32
    return %c0_i32, %c0_i32_0 : i32, i32
  }
  func.func @transform_2(%arg0: i32) -> (i32, i32) {
    %c0_i32 = arith.constant 0 : i32
    %c0_i32_0 = arith.constant 0 : i32
    %c0_i32_1 = arith.constant 0 : i32
    return %c0_i32, %c0_i32_0 : i32, i32
  }
  func.func @transform_3(%arg0: i32) -> (i32, i32) {
    %c0_i32 = arith.constant 0 : i32
    %c0_i32_0 = arith.constant 0 : i32
    %c0_i32_1 = arith.constant 0 : i32
    return %c0_i32, %c0_i32_0 : i32, i32
  }
  func.func @transform_4(%arg0: i32) -> (i32, i32) {
    %c0_i32 = arith.constant 0 : i32
    %c0_i32_0 = arith.constant 0 : i32
    %c0_i32_1 = arith.constant 0 : i32
    return %c0_i32, %c0_i32_0 : i32, i32
  }
  func.func @transform_5(%arg0: i32) -> (i32, i32) {
    %c0_i32 = arith.constant 0 : i32
    %c0_i32_0 = arith.constant 0 : i32
    %c0_i32_1 = arith.constant 0 : i32
    return %c0_i32, %c0_i32_0 : i32, i32
  }
}

</mosaic_0001>

<bundles_post_ra>
// kernel: bilstm_crf_forward.5
= control target key start
LH: loop header
LB: loop body
LE: loop exit
PB: predicated region body
PF: predicated region fallthrough
CT: control target
= control target key end

     0   :  { %vm3459_vm0 = vcmask 523264   ;;  %vm166_vm1 = vcmask 64512   ;;  %v176_v14 = vlaneseq  ;;  %v2600_v37 = vmov 1966171168   ;;  %s3453_s1 = inlined_call_operand.vmem [shape: f32[64,8], index: 1, kind: input, shape index: {}]   ;;  %s3454_s0 = inlined_call_operand.vmem [shape: f32[64,64], index: 0, kind: input, shape index: {}]   ;;  %s3455_s3 = inlined_call_operand.vmem [shape: f32[1,8], index: 3, kind: input, shape index: {}]   ;;  %s3456_s2 = inlined_call_operand.vmem [shape: f32[8,8], index: 2, kind: input, shape index: {}]   ;;  %s3457_s4 = inlined_call_operand.vmem [shape: f32[1,8], index: 4, kind: input, shape index: {}]   ;;  %s3458_s5 = inlined_call_operand.vmem [shape: s32[64,1], index: 5, kind: output, shape index: {}]  }
   0x1   :  { %v35_v0 = vld [vmem:[%s3453_s1 + $0x38] sm:$0xff]  ;;  %v34_v1 = vld [vmem:[%s3453_s1 + $0x30] sm:$0xff]  ;;  %v33_v2 = vld [vmem:[%s3453_s1 + $0x28] sm:$0xff]  ;;  %v258_v38 = vunpack.c.l.s4 %v2600_v37 }
   0x2   :  { %2546 = vmatprep.subr.mxu0 %v35_v0  ;;  %2574 = vmatprep.subr.mxu1 %v35_v0  ;;  %v20_v3 = vld [vmem:[%s3454_s0] sm:$0xff]  ;;  %v31_v5 = vld [vmem:[%s3453_s1 + $0x18] sm:$0xff]  ;;  %v30_v6 = vld [vmem:[%s3453_s1 + $0x10] sm:$0xff]  ;;  %v2674_v15 = vshrl.u32 %v176_v14, 7 }
   0x3   :  { %2547 = vmatpush3.msra.mxu0 %v35_v0  ;;  %2582 = vmatpush3.msra.mxu1 %v35_v0  ;;  %v32_v4 = vld [vmem:[%s3453_s1 + $0x20] sm:$0xff]  ;;  %v29_v7 = vld [vmem:[%s3453_s1 + $0x8] sm:$0xff]  ;;  %v22_v10 = vld [vmem:[%s3454_s0 + $0x10] sm:$0xff]  ;;  %v259_v39 = vunpack.c.0.s8 %v258_v38 }
   0x4   :  { %2548 = vmatprep.subr.mxu0 %v34_v1  ;;  %2562 = vmatprep.mubr.msk.f32.mxu0 %vm3459_vm0, %v20_v3  ;;  %v28_v8 = vld [vmem:[%s3453_s1] sm:$0xff]  ;;  %v21_v9 = vld [vmem:[%s3454_s0 + $0x8] sm:$0xff]  ;;  %v23_v11 = vld [vmem:[%s3454_s0 + $0x18] sm:$0xff]  ;;  %v200_v17 = vsub.s32 1, %v2674_v15  ;;  %v2681_v18 = vsub.s32 0, %v2674_v15  ;;  %v207_v23 = vsub.s32 2, %v2674_v15 }
   0x5   :  { %2549 = vmatpush3.msra.mxu0 %v34_v1  ;;  %2575 = vmatprep.subr.mxu1 %v34_v1  ;;  %v2521_v16 = vld [vmem:[%s3455_s3] ss:$0 sm:$0xff]  ;;  %v214_v24 = vsub.s32 3, %v2674_v15  ;;  %v221_v27 = vsub.s32 4, %v2674_v15  ;;  %v228_v28 = vsub.s32 5, %v2674_v15  ;;  %v235_v31 = vsub.s32 6, %v2674_v15 }
   0x6   :  { %2550 = vmatprep.subr.mxu0 %v33_v2  ;;  %2583 = vmatpush3.msra.mxu1 %v34_v1  ;;  %v242_v32 = vsub.s32 7, %v2674_v15  ;;  %v2693_v40 = vsub.s32 %v259_v39, %v2674_v15  ;;  %v2702_v48 = vld [vmem:[%s3456_s2] sm:$0xff] }
   0x7   :  { %2551 = vmatpush3.msra.mxu0 %v33_v2  ;;  %2576 = vmatprep.subr.mxu1 %v33_v2 }
   0x8   :  { %2552 = vmatprep.subr.mxu0 %v32_v4  ;;  %2584 = vmatpush3.msra.mxu1 %v33_v2 }
   0x9   :  { %2553 = vmatpush3.msra.mxu0 %v32_v4  ;;  %2577 = vmatprep.subr.mxu1 %v32_v4 }
   0xa   :  { %2554 = vmatprep.subr.mxu0 %v31_v5  ;;  %2585 = vmatpush3.msra.mxu1 %v32_v4 }
   0xb   :  { %2555 = vmatpush3.msra.mxu0 %v31_v5  ;;  %2578 = vmatprep.subr.mxu1 %v31_v5 }
   0xc   :  { %2556 = vmatprep.subr.mxu0 %v30_v6  ;;  %2586 = vmatpush3.msra.mxu1 %v31_v5 }
   0xd   :  { %2557 = vmatpush3.msra.mxu0 %v30_v6  ;;  %2579 = vmatprep.subr.mxu1 %v30_v6 }
   0xe   :  { %2558 = vmatprep.subr.mxu0 %v29_v7  ;;  %2587 = vmatpush3.msra.mxu1 %v30_v6 }
   0xf   :  { %2559 = vmatpush3.msra.mxu0 %v29_v7  ;;  %2580 = vmatprep.subr.mxu1 %v29_v7 }
  0x10   :  { %2560 = vmatprep.subr.mxu0 %v28_v8  ;;  %2588 = vmatpush3.msra.mxu1 %v29_v7 }
  0x11   :  { %2561 = vmatpush3.msra.mxu0 %v28_v8  ;;  %2581 = vmatprep.subr.mxu1 %v28_v8 }
  0x12   :  { %2563 = vmatmul.mubr.msk.f32.vlgmr.msra.gmra.mxu0 %vm3459_vm0, %v21_v9  ;;  %2589 = vmatpush3.msra.mxu1 %v28_v8 }
  0x13   :  { %2565 = vmatprep.mubr.msk.f32.mxu0 %vm3459_vm0, %v22_v10 }
  0x16   :  { %2566 = vmatmul.mubr.msk.f32.gmra.mxu0 %vm3459_vm0, %v23_v11 }
  0xd2   :  { %v2564_v12 = vpop.f32.mrf.mxu0 }
  0xd3   :  { %168 = vst.msk [vmem:[#allocation2 + $0x8] sm:$0xff] %vm166_vm1, %v2564_v12 }
  0xd4   :  { %v127_v13 = vpop.f32.mrf.mxu0 }
  0xd5   :  { %167 = vst.msk [vmem:[#allocation2] sm:$0xff] %vm166_vm1, %v127_v13 }
  0xd6   :  { %v2567_v35 = vpop.f32.mrf.mxu0 }
  0xd7   :  { %170 = vst.msk [vmem:[#allocation2 + $0x18] sm:$0xff] %vm166_vm1, %v2567_v35 }
  0xd8   :  { %v137_v36 = vpop.f32.mrf.mxu0 }
  0xd9   :  { %169 = vst.msk [vmem:[#allocation2 + $0x10] sm:$0xff] %vm166_vm1, %v137_v36 }
  0xda   :  { %v190_v41 = vld [vmem:[#allocation2 + $0x8] sm:$0xff] }
  0xdb   :  { %v263_v42 = vrot.slane %v190_v41, %v2693_v40  ;;  %v256_v44 = vcombine.high %v190_v41, %v190_v41 }
  0xdc   :  { %v181_v19 = vld [vmem:[#allocation2] sm:$0xff] }
  0xdd   :  { %v188_v20 = vadd.f32 %v2521_v16, %v181_v19  ;;  %v271_v43 = vcombine.high %v263_v42, %v263_v42  ;;  %v279_v46 = vrot.slane %v263_v42, %v2693_v40  ;;  %v270_v47 = vrot.slane %v256_v44, %v2693_v40 }
  0xdf   :  { %v201_v21 = vrot.slane %v188_v20, %v200_v17  ;;  %v194_v22 = vrot.slane %v188_v20, %v2681_v18  ;;  %v208_v25 = vrot.slane %v188_v20, %v207_v23  ;;  %v215_v26 = vrot.slane %v188_v20, %v214_v24 }
  0xe0   :  { %v222_v29 = vrot.slane %v188_v20, %v221_v27  ;;  %v229_v30 = vrot.slane %v188_v20, %v228_v28  ;;  %v236_v33 = vrot.slane %v188_v20, %v235_v31  ;;  %v243_v34 = vrot.slane %v188_v20, %v242_v32 }
  0xe1   :  { %203 = vbcast.lane.b32.xlu0 %v201_v21, 256  ;;  %196 = vbcast.lane.b32.xlu1 %v194_v22, 256  ;;  %v293_v45 = vrot.slane %v271_v43, %v2693_v40  ;;  %v301_v51 = vcombine.high %v279_v46, %v279_v46  ;;  %v272_v53 = vcombine.high %v270_v47, %v270_v47 }
  0xe2   :  { %v308_v56 = vrot.slane %v279_v46, %v2681_v18  ;;  %v286_v60 = vrot.slane %v270_v47, %v2693_v40 }
  0xe3   :  { %v303_v52 = vcombine.high %v293_v45, %v293_v45  ;;  %v312_v54 = vrot.slane %v293_v45, %v2681_v18  ;;  %v316_v61 = vrot.slane %v301_v51, %v2681_v18  ;;  %v300_v1 = vrot.slane %v272_v53, %v2693_v40 }
  0xe4   :  { %v302_v10 = vcombine.high %v286_v60, %v286_v60  ;;  %v324_v11 = vrot.slane %v286_v60, %v2681_v18 }
  0xe5   :  { %210 = vbcast.lane.b32.xlu0 %v208_v25, 256  ;;  %217 = vbcast.lane.b32.xlu1 %v215_v26, 256  ;;  %v320_v63 = vrot.slane %v303_v52, %v2681_v18  ;;  %v328_v13 = vrot.slane %v300_v1, %v2681_v18  ;;  %v304_v31 = vcombine.high %v300_v1, %v300_v1 }
  0xe9   :  { %224 = vbcast.lane.b32.xlu0 %v222_v29, 256  ;;  %231 = vbcast.lane.b32.xlu1 %v229_v30, 256  ;;  %v332_v30 = vrot.slane %v302_v10, %v2681_v18 }
  0xed   :  { %238 = vbcast.lane.b32.xlu0 %v236_v33, 256  ;;  %245 = vbcast.lane.b32.xlu1 %v243_v34, 256 }
 0x153   :  { %v204_v49 = vpop.permute.xlu0 %203  ;;  %v197_v50 = vpop.permute.xlu1 %196 }
 0x154   :  { %v248_v55 = vadd.f32 %v204_v49, %v2702_v48  ;;  %v247_v57 = vadd.f32 %v197_v50, %v2702_v48  ;;  %v336_v49 = vrot.slane %v304_v31, %v2681_v18 }
 0x156   :  { %v2708_v58 = vadd.f32 %v312_v54, %v248_v55  ;;  %v2710_v59 = vadd.f32 %v308_v56, %v247_v57 }
 0x157   :  { %v211_v62 = vpop.permute.xlu0 %210  ;;  %v218_v0 = vpop.permute.xlu1 %217 }
 0x158   :  { %v360_v2 = vsel %vm166_vm1, %v2708_v58, -inf  ;;  %v353_v3 = vsel %vm166_vm1, %v2710_v59, -inf  ;;  %v249_v4 = vadd.f32 %v211_v62, %v2702_v48  ;;  %v250_v5 = vadd.f32 %v218_v0, %v2702_v48 }
 0x159   :  { %v361_v6 = vrot.slane %v360_v2, 4  ;;  %v354_v7 = vrot.slane %v353_v3, 4 }
 0x15a   :  { %v2722_v8 = vadd.f32 %v316_v61, %v249_v4  ;;  %v2724_v9 = vadd.f32 %v320_v63, %v250_v5 }
 0x15b   :  { %v225_v12 = vpop.permute.xlu0 %224  ;;  %v232_v16 = vpop.permute.xlu1 %231  ;;  %v362_v17 = vmax.f32 %v360_v2, %v361_v6  ;;  %v355_v19 = vmax.f32 %v353_v3, %v354_v7 }
 0x15c   :  { %v367_v20 = vsel %vm166_vm1, %v2722_v8, -inf  ;;  %v374_v21 = vsel %vm166_vm1, %v2724_v9, -inf  ;;  %v251_v22 = vadd.f32 %v225_v12, %v2702_v48  ;;  %v252_v23 = vadd.f32 %v232_v16, %v2702_v48 }
 0x15d   :  { %v368_v24 = vrot.slane %v367_v20, 4  ;;  %v375_v25 = vrot.slane %v374_v21, 4  ;;  %v363_v26 = vrot.slane %v362_v17, 2  ;;  %v356_v27 = vrot.slane %v355_v19, 2 }
 0x15e   :  { %v2734_v28 = vadd.f32 %v324_v11, %v251_v22  ;;  %v2736_v29 = vadd.f32 %v328_v13, %v252_v23 }
 0x15f   :  { %v239_v32 = vpop.permute.xlu0 %238  ;;  %v246_v33 = vpop.permute.xlu1 %245  ;;  %v364_v34 = vmax.f32 %v362_v17, %v363_v26  ;;  %v369_v35 = vmax.f32 %v367_v20, %v368_v24  ;;  %v357_v36 = vmax.f32 %v355_v19, %v356_v27  ;;  %v376_v37 = vmax.f32 %v374_v21, %v375_v25 }
 0x160   :  { %v381_v38 = vsel %vm166_vm1, %v2734_v28, -inf  ;;  %v388_v39 = vsel %vm166_vm1, %v2736_v29, -inf  ;;  %v253_v41 = vadd.f32 %v239_v32, %v2702_v48  ;;  %v254_v42 = vadd.f32 %v246_v33, %v2702_v48 }
 0x161   :  { %v382_v43 = vrot.slane %v381_v38, 4  ;;  %v389_v44 = vrot.slane %v388_v39, 4  ;;  %v365_v45 = vrot.slane %v364_v34, 1  ;;  %v370_v46 = vrot.slane %v369_v35, 2 }
 0x162   :  { %v2745_v47 = vadd.f32 %v332_v30, %v253_v41  ;;  %v358_v50 = vrot.slane %v357_v36, 1  ;;  %v377_v51 = vrot.slane %v376_v37, 2  ;;  %v2750_v56 = vadd.f32 %v336_v49, %v254_v42 }
 0x163   :  { %v366_v52 = vmax.f32 %v364_v34, %v365_v45  ;;  %v371_v53 = vmax.f32 %v369_v35, %v370_v46  ;;  %v383_v54 = vmax.f32 %v381_v38, %v382_v43  ;;  %v390_v63 = vmax.f32 %v388_v39, %v389_v44 }
 0x164   :  { %v395_v55 = vsel %vm166_vm1, %v2745_v47, -inf  ;;  %v359_v57 = vmax.f32 %v357_v36, %v358_v50  ;;  %v378_v60 = vmax.f32 %v376_v37, %v377_v51  ;;  %v402_v30 = vsel %vm166_vm1, %v2750_v56, -inf }
 0x165   :  { %v396_v61 = vrot.slane %v395_v55, 4  ;;  %527 = vbcast.lane.b32.xlu0 %v366_v52, 256  ;;  %vm410_vm2 = vcmp.eq.f32.partialorder %v2708_v58, %v366_v52  ;;  %v372_v62 = vrot.slane %v371_v53, 1  ;;  %v384_v1 = vrot.slane %v383_v54, 2 }
 0x166   :  { %v418_v0 = vsel %vm410_vm2, %v2674_v15, 8  ;;  %vm409_vm3 = vcmp.eq.f32.partialorder %v2710_v59, %v359_v57  ;;  %v379_v2 = vrot.slane %v378_v60, 1  ;;  %v391_v59 = vrot.slane %v390_v63, 2 }
 0x167   :  { %v435_v3 = vsel %vm166_vm1, %v418_v0, 2147483647  ;;  %v373_v4 = vmax.f32 %v371_v53, %v372_v62  ;;  %v417_v5 = vsel %vm409_vm3, %v2674_v15, 8  ;;  %v397_v6 = vmax.f32 %v395_v55, %v396_v61 }
 0x168   :  { %v436_v7 = vrot.slane %v435_v3, 4  ;;  %v425_v10 = vsel %vm166_vm1, %v417_v5, 2147483647  ;;  %v385_v11 = vmax.f32 %v383_v54, %v384_v1  ;;  %v380_v12 = vmax.f32 %v378_v60, %v379_v2 }
 0x169   :  { %vm411_vm4 = vcmp.eq.f32.partialorder %v2722_v8, %v373_v4  ;;  %530 = vbcast.lane.b32.xlu1 %v373_v4, 256  ;;  %524 = vbcast.lane.b32.xlu0 %v359_v57, 256  ;;  %v426_v58 = vrot.slane %v425_v10, 4  ;;  %v398_v13 = vrot.slane %v397_v6, 2  ;;  %v403_v38 = vrot.slane %v402_v30, 4 }
 0x16a   :  { %vm437_vm5 = vcmp.lt.s32.totalorder %v435_v3, %v436_v7  ;;  %v419_v16 = vsel %vm411_vm4, %v2674_v15, 8  ;;  %v386_v17 = vrot.slane %v385_v11, 1  ;;  %vm412_vm6 = vcmp.eq.f32.partialorder %v2724_v9, %v380_v12 }
 0x16b   :  { %v438_v19 = vsel %vm437_vm5, %v435_v3, %v436_v7  ;;  %v445_v20 = vsel %vm166_vm1, %v419_v16, 2147483647  ;;  %vm427_vm7 = vcmp.lt.s32.totalorder %v425_v10, %v426_v58  ;;  %v420_v21 = vsel %vm412_vm6, %v2674_v15, 8 }
 0x16c   :  { %v439_v22 = vrot.slane %v438_v19, 2  ;;  %v446_v23 = vrot.slane %v445_v20, 4  ;;  %v387_v8 = vmax.f32 %v385_v11, %v386_v17  ;;  %v428_v24 = vsel %vm427_vm7, %v425_v10, %v426_v58 }
 0x16d   :  { %533 = vbcast.lane.b32.xlu1 %v380_v12, 256  ;;  %v455_v25 = vsel %vm166_vm1, %v420_v21, 2147483647  ;;  %v399_v26 = vmax.f32 %v397_v6, %v398_v13  ;;  %v392_v9 = vmax.f32 %v390_v63, %v391_v59  ;;  %v429_v33 = vrot.slane %v428_v24, 2 }
 0x16e   :  { %vm447_vm8 = vcmp.lt.s32.totalorder %v445_v20, %v446_v23  ;;  %vm413_vm9 = vcmp.eq.f32.partialorder %v2734_v28, %v387_v8  ;;  %536 = vbcast.lane.b32.xlu0 %v387_v8, 256  ;;  %v456_v27 = vrot.slane %v455_v25, 4  ;;  %vm440_vm10 = vcmp.lt.s32.totalorder %v438_v19, %v439_v22 }
 0x16f   :  { %v448_v31 = vsel %vm447_vm8, %v445_v20, %v446_v23  ;;  %v421_v32 = vsel %vm413_vm9, %v2674_v15, 8  ;;  %v400_v37 = vrot.slane %v399_v26, 1  ;;  %v393_v28 = vrot.slane %v392_v9, 1 }
 0x170   :  { %v465_v34 = vsel %vm166_vm1, %v421_v32, 2147483647  ;;  %v449_v35 = vrot.slane %v448_v31, 2  ;;  %vm457_vm11 = vcmp.lt.s32.totalorder %v455_v25, %v456_v27  ;;  %v441_v41 = vsel %vm440_vm10, %v438_v19, %v439_v22 }
 0x171   :  { %v466_v36 = vrot.slane %v465_v34, 4  ;;  %v458_v39 = vsel %vm457_vm11, %v455_v25, %v456_v27  ;;  %vm430_vm13 = vcmp.lt.s32.totalorder %v428_v24, %v429_v33  ;;  %v401_v45 = vmax.f32 %v399_v26, %v400_v37 }
 0x172   :  { %v459_v43 = vrot.slane %v458_v39, 2  ;;  %vm450_vm14 = vcmp.lt.s32.totalorder %v448_v31, %v449_v35  ;;  %v394_v46 = vmax.f32 %v392_v9, %v393_v28  ;;  %v404_v49 = vmax.f32 %v402_v30, %v403_v38  ;;  %v24_v38 = vld [vmem:[%s3454_s0 + $0x20] sm:$0xff]  ;;  %v522_v28 = vld [vmem:[#allocation2 + $0x10] sm:$0xff] }
 0x173   :  { %vm467_vm12 = vcmp.lt.s32.totalorder %v465_v34, %v466_v36  ;;  %v431_v50 = vsel %vm430_vm13, %v428_v24, %v429_v33  ;;  %vm415_vm15 = vcmp.eq.f32.partialorder %v2745_v47, %v401_v45  ;;  %542 = vbcast.lane.b32.xlu0 %v401_v45, 256  ;;  %v442_v51 = vrot.slane %v441_v41, 1  ;;  %2568 = vmatprep.mubr.msk.f32.mxu1 %vm3459_vm0, %v24_v38 }
 0x174   :  { %v468_v42 = vsel %vm467_vm12, %v465_v34, %v466_v36  ;;  %v451_v52 = vsel %vm450_vm14, %v448_v31, %v449_v35  ;;  %vm460_vm2 = vcmp.lt.s32.totalorder %v458_v39, %v459_v43  ;;  %v423_v53 = vsel %vm415_vm15, %v2674_v15, 8  ;;  %539 = vbcast.lane.b32.xlu1 %v394_v46, 256 }
 0x175   :  { %v469_v44 = vrot.slane %v468_v42, 2  ;;  %v485_v54 = vsel %vm166_vm1, %v423_v53, 2147483647  ;;  %vm414_vm4 = vcmp.eq.f32.partialorder %v2736_v29, %v394_v46  ;;  %v405_v55 = vrot.slane %v404_v49, 2 }
 0x176   :  { %v432_v57 = vrot.slane %v431_v50, 1  ;;  %v486_v60 = vrot.slane %v485_v54, 4  ;;  %v422_v61 = vsel %vm414_vm4, %v2674_v15, 8  ;;  %v452_v62 = vrot.slane %v451_v52, 1 }
 0x177   :  { %vm470_vm3 = vcmp.lt.s32.totalorder %v468_v42, %v469_v44  ;;  %v461_v63 = vsel %vm460_vm2, %v458_v39, %v459_v43  ;;  %v475_v47 = vsel %vm166_vm1, %v422_v61, 2147483647  ;;  %v406_v0 = vmax.f32 %v404_v49, %v405_v55  ;;  %v25_v39 = vld [vmem:[%s3454_s0 + $0x28] sm:$0xff] }
 0x178   :  { %v471_v1 = vsel %vm470_vm3, %v468_v42, %v469_v44  ;;  %vm487_vm5 = vcmp.lt.s32.totalorder %v485_v54, %v486_v60  ;;  %v476_v2 = vrot.slane %v475_v47, 4  ;;  %vm443_vm6 = vcmp.lt.s32.totalorder %v441_v41, %v442_v51  ;;  %2569 = vmatmul.mubr.msk.f32.vlgmr.msra.gmra.mxu1 %vm3459_vm0, %v25_v39 }
 0x179   :  { %v488_v3 = vsel %vm487_vm5, %v485_v54, %v486_v60  ;;  %v407_v4 = vrot.slane %v406_v0, 1  ;;  %vm433_vm7 = vcmp.lt.s32.totalorder %v431_v50, %v432_v57  ;;  %v462_v5 = vrot.slane %v461_v63, 1 }
 0x17a   :  { %v489_v6 = vrot.slane %v488_v3, 2  ;;  %vm477_vm8 = vcmp.lt.s32.totalorder %v475_v47, %v476_v2  ;;  %vm453_vm9 = vcmp.lt.s32.totalorder %v451_v52, %v452_v62  ;;  %v472_v29 = vrot.slane %v471_v1, 1 }
 0x17b   :  { %v478_v7 = vsel %vm477_vm8, %v475_v47, %v476_v2  ;;  %v408_v10 = vmax.f32 %v406_v0, %v407_v4  ;;  %vm505_vm10 = vcmask 1041409   ;;  %vm507_vm11 = vcmask 1042434  }
 0x17c   :  { %vm490_vm12 = vcmp.lt.s32.totalorder %v488_v3, %v489_v6  ;;  %v479_v11 = vrot.slane %v478_v7, 2  ;;  %v444_v12 = vsel %vm443_vm6, %v441_v41, %v442_v51  ;;  %v434_v58 = vsel %vm433_vm7, %v431_v50, %v432_v57 }
 0x17d   :  { %v491_v13 = vsel %vm490_vm12, %v488_v3, %v489_v6  ;;  %545 = vbcast.lane.b32.xlu1 %v408_v10, 256  ;;  %vm416_vm13 = vcmp.eq.f32.partialorder %v2750_v56, %v408_v10  ;;  %v454_v59 = vsel %vm453_vm9, %v451_v52, %v452_v62  ;;  %vm463_vm14 = vcmp.lt.s32.totalorder %v461_v63, %v462_v5 }
 0x17e   :  { %vm480_vm15 = vcmp.lt.s32.totalorder %v478_v7, %v479_v11  ;;  %v424_v16 = vsel %vm416_vm13, %v2674_v15, 8  ;;  %vm473_vm2 = vcmp.lt.s32.totalorder %v471_v1, %v472_v29  ;;  %v492_v17 = vrot.slane %v491_v13, 1 }
 0x17f   :  { %v481_v19 = vsel %vm480_vm15, %v478_v7, %v479_v11  ;;  %v495_v20 = vsel %vm166_vm1, %v424_v16, 2147483647  ;;  %v506_v21 = vsel %vm505_vm10, %v444_v12, %v434_v58  ;;  %vm509_vm3 = vcmask 1043459  }
 0x180   :  { %v482_v22 = vrot.slane %v481_v19, 1  ;;  %v496_v23 = vrot.slane %v495_v20, 4  ;;  %v508_v8 = vsel %vm507_vm11, %v454_v59, %v506_v21  ;;  %v464_v24 = vsel %vm463_vm14, %v461_v63, %v462_v5 }
 0x181   :  { %v474_v25 = vsel %vm473_vm2, %v471_v1, %v472_v29  ;;  %vm511_vm4 = vcmask 1044484   ;;  %vm493_vm7 = vcmp.lt.s32.totalorder %v491_v13, %v492_v17  ;;  %v510_v26 = vsel %vm509_vm3, %v464_v24, %v508_v8 }
 0x182   :  { %vm483_vm5 = vcmp.lt.s32.totalorder %v481_v19, %v482_v22  ;;  %vm497_vm6 = vcmp.lt.s32.totalorder %v495_v20, %v496_v23  ;;  %v512_v9 = vsel %vm511_vm4, %v474_v25, %v510_v26  ;;  %vm513_vm8 = vcmask 1045509  }
 0x183   :  { %v498_v56 = vsel %vm497_vm6, %v495_v20, %v496_v23  ;;  %v484_v30 = vsel %vm483_vm5, %v481_v19, %v482_v22  ;;  %v494_v31 = vsel %vm493_vm7, %v491_v13, %v492_v17  ;;  %vm3461_vm9 = vcmask 1046534  }
 0x184   :  { %v499_v27 = vrot.slane %v498_v56, 2  ;;  %v514_v33 = vsel %vm513_vm8, %v484_v30, %v512_v9  ;;  %vm3460_vm13 = vcmask 1047559   ;;  %v563_v41 = vrot.slane %v522_v28, %v2693_v40 }
 0x185   :  { %v516_v35 = vsel %vm3461_vm9, %v494_v31, %v514_v33  ;;  %v556_v45 = vcombine.high %v522_v28, %v522_v28 }
 0x186   :  { %vm500_vm12 = vcmp.lt.s32.totalorder %v498_v56, %v499_v27  ;;  %v571_v42 = vcombine.high %v563_v41, %v563_v41  ;;  %v579_v44 = vrot.slane %v563_v41, %v2693_v40 }
 0x187   :  { %v501_v32 = vsel %vm500_vm12, %v498_v56, %v499_v27  ;;  %v570_v52 = vrot.slane %v556_v45, %v2693_v40 }
 0x188   :  { %v502_v34 = vrot.slane %v501_v32, 1  ;;  %v593_v43 = vrot.slane %v571_v42, %v2693_v40  ;;  %v601_v50 = vcombine.high %v579_v44, %v579_v44  ;;  %v608_v55 = vrot.slane %v579_v44, %v2681_v18 }
 0x189   :  { %v586_v0 = vrot.slane %v570_v52, %v2693_v40  ;;  %v572_v6 = vcombine.high %v570_v52, %v570_v52 }
 0x18a   :  { %vm503_vm14 = vcmp.lt.s32.totalorder %v501_v32, %v502_v34  ;;  %v612_v46 = vrot.slane %v593_v43, %v2681_v18  ;;  %v616_v60 = vrot.slane %v601_v50, %v2681_v18  ;;  %v603_v61 = vcombine.high %v593_v43, %v593_v43 }
 0x18b   :  { %v504_v36 = vsel %vm503_vm14, %v501_v32, %v502_v34  ;;  %v624_v12 = vrot.slane %v586_v0, %v2681_v18  ;;  %v602_v24 = vcombine.high %v586_v0, %v586_v0  ;;  %v600_v25 = vrot.slane %v572_v6, %v2693_v40 }
 0x18c   :  { %v518_v37 = vsel %vm3460_vm13, %v504_v36, %v516_v35  ;;  %v620_v5 = vrot.slane %v603_v61, %v2681_v18 }
 0x18d   :  { %520 = vst.msk [vmem:[#allocation3 + $0x8] sm:$0xff] %vm166_vm1, %v518_v37  ;;  %v632_v35 = vrot.slane %v602_v24, %v2681_v18  ;;  %v628_v39 = vrot.slane %v600_v25, %v2681_v18  ;;  %v604_v0 = vcombine.high %v600_v25, %v600_v25 }
 0x1d7   :  { %v528_v49 = vpop.permute.xlu0 %527 }
 0x1d8   :  { %v548_v51 = vadd.f32 %v528_v49, %v2702_v48 }
 0x1da   :  { %v646_v53 = vadd.f32 %v612_v46, %v548_v51 }
 0x1db   :  { %v525_v54 = vpop.permute.xlu0 %524  ;;  %v531_v57 = vpop.permute.xlu1 %530 }
 0x1dc   :  { %v660_v62 = vsel %vm166_vm1, %v646_v53, -inf  ;;  %v547_v63 = vadd.f32 %v525_v54, %v2702_v48  ;;  %v549_v47 = vadd.f32 %v531_v57, %v2702_v48 }
 0x1dd   :  { %v661_v1 = vrot.slane %v660_v62, 4 }
 0x1de   :  { %v2806_v2 = vadd.f32 %v608_v55, %v547_v63  ;;  %v647_v3 = vadd.f32 %v616_v60, %v549_v47 }
 0x1df   :  { %v534_v4 = vpop.permute.xlu1 %533  ;;  %v662_v29 = vmax.f32 %v660_v62, %v661_v1 }
 0x1e0   :  { %v653_v7 = vsel %vm166_vm1, %v2806_v2, -inf  ;;  %v667_v10 = vsel %vm166_vm1, %v647_v3, -inf  ;;  %v537_v11 = vpop.permute.xlu0 %536  ;;  %v550_v58 = vadd.f32 %v534_v4, %v2702_v48 }
 0x1e1   :  { %v654_v13 = vrot.slane %v653_v7, 4  ;;  %v668_v59 = vrot.slane %v667_v10, 4  ;;  %v551_v16 = vadd.f32 %v537_v11, %v2702_v48  ;;  %v663_v17 = vrot.slane %v662_v29, 2 }
 0x1e2   :  { %v2815_v19 = vadd.f32 %v620_v5, %v550_v58 }
 0x1e3   :  { %v2817_v20 = vadd.f32 %v624_v12, %v551_v16  ;;  %v664_v21 = vmax.f32 %v662_v29, %v663_v17  ;;  %v669_v22 = vmax.f32 %v667_v10, %v668_v59  ;;  %v655_v23 = vmax.f32 %v653_v7, %v654_v13 }
 0x1e4   :  { %v674_v8 = vsel %vm166_vm1, %v2815_v19, -inf  ;;  %v636_v13 = vrot.slane %v604_v0, %v2681_v18 }
 0x1e5   :  { %v681_v56 = vsel %vm166_vm1, %v2817_v20, -inf  ;;  %v675_v26 = vrot.slane %v674_v8, 4  ;;  %v665_v27 = vrot.slane %v664_v21, 1  ;;  %v670_v9 = vrot.slane %v669_v22, 2  ;;  %v543_v38 = vpop.permute.xlu0 %542 }
 0x1e6   :  { %v682_v30 = vrot.slane %v681_v56, 4  ;;  %v656_v31 = vrot.slane %v655_v23, 2  ;;  %v553_v42 = vadd.f32 %v543_v38, %v2702_v48  ;;  %v540_v43 = vpop.permute.xlu1 %539 }
 0x1e7   :  { %v666_v32 = vmax.f32 %v664_v21, %v665_v27  ;;  %v671_v33 = vmax.f32 %v669_v22, %v670_v9  ;;  %v676_v34 = vmax.f32 %v674_v8, %v675_v26  ;;  %v552_v49 = vadd.f32 %v540_v43, %v2702_v48 }
 0x1e8   :  { %v657_v36 = vmax.f32 %v655_v23, %v656_v31  ;;  %v683_v37 = vmax.f32 %v681_v56, %v682_v30  ;;  %v2830_v54 = vadd.f32 %v632_v35, %v553_v42 }
 0x1e9   :  { %820 = vbcast.lane.b32.xlu0 %v666_v32, 256  ;;  %vm710_vm15 = vcmp.eq.f32.partialorder %v646_v53, %v666_v32  ;;  %v672_v28 = vrot.slane %v671_v33, 1  ;;  %v677_v41 = vrot.slane %v676_v34, 2  ;;  %v2832_v53 = vadd.f32 %v628_v39, %v552_v49 }
 0x1ea   :  { %v718_v44 = vsel %vm710_vm15, %v2674_v15, 8  ;;  %v658_v45 = vrot.slane %v657_v36, 1  ;;  %v684_v46 = vrot.slane %v683_v37, 2  ;;  %v695_v62 = vsel %vm166_vm1, %v2830_v54, -inf }
 0x1eb   :  { %v735_v50 = vsel %vm166_vm1, %v718_v44, 2147483647  ;;  %v673_v51 = vmax.f32 %v671_v33, %v672_v28  ;;  %v678_v52 = vmax.f32 %v676_v34, %v677_v41  ;;  %v696_v47 = vrot.slane %v695_v62, 4 }
 0x1ec   :  { %v736_v55 = vrot.slane %v735_v50, 4  ;;  %v659_v57 = vmax.f32 %v657_v36, %v658_v45  ;;  %v685_v61 = vmax.f32 %v683_v37, %v684_v46  ;;  %v688_v4 = vsel %vm166_vm1, %v2832_v53, -inf }
 0x1ed   :  { %823 = vbcast.lane.b32.xlu1 %v673_v51, 256  ;;  %vm711_vm2 = vcmp.eq.f32.partialorder %v647_v3, %v673_v51  ;;  %v679_v60 = vrot.slane %v678_v52, 1  ;;  %v689_v12 = vrot.slane %v688_v4, 4 }
 0x1ee   :  { %v719_v63 = vsel %vm711_vm2, %v2674_v15, 8  ;;  %vm709_vm5 = vcmp.eq.f32.partialorder %v2806_v2, %v659_v57  ;;  %817 = vbcast.lane.b32.xlu0 %v659_v57, 256  ;;  %vm2841_vm6 = vcmp.lt.s32.totalorder %v735_v50, %v736_v55  ;;  %v686_v10 = vrot.slane %v685_v61, 1 }
 0x1ef   :  { %v745_v1 = vsel %vm166_vm1, %v719_v63, 2147483647  ;;  %v717_v6 = vsel %vm709_vm5, %v2674_v15, 8  ;;  %v680_v7 = vmax.f32 %v678_v52, %v679_v60  ;;  %v697_v2 = vmax.f32 %v695_v62, %v696_v47  ;;  %v546_v58 = vpop.permute.xlu1 %545 }
 0x1f0   :  { %v746_v3 = vrot.slane %v745_v1, 4  ;;  %v725_v29 = vsel %vm166_vm1, %v717_v6, 2147483647  ;;  %v687_v59 = vmax.f32 %v685_v61, %v686_v10  ;;  %v554_v16 = vadd.f32 %v546_v58, %v2702_v48 }
 0x1f1   :  { %v726_v11 = vrot.slane %v725_v29, 4  ;;  %826 = vbcast.lane.b32.xlu1 %v680_v7, 256  ;;  %vm712_vm12 = vcmp.eq.f32.partialorder %v2815_v19, %v680_v7  ;;  %v738_v17 = vsel %vm2841_vm6, %v735_v50, %v736_v55  ;;  %v698_v8 = vrot.slane %v697_v2, 2 }
 0x1f2   :  { %vm747_vm7 = vcmp.lt.s32.totalorder %v745_v1, %v746_v3  ;;  %v720_v23 = vsel %vm712_vm12, %v2674_v15, 8  ;;  %829 = vbcast.lane.b32.xlu0 %v687_v59, 256  ;;  %vm713_vm15 = vcmp.eq.f32.partialorder %v2817_v20, %v687_v59  ;;  %v2854_v24 = vadd.f32 %v636_v13, %v554_v16 }
 0x1f3   :  { %v748_v21 = vsel %vm747_vm7, %v745_v1, %v746_v3  ;;  %vm727_vm14 = vcmp.lt.s32.totalorder %v725_v29, %v726_v11  ;;  %v739_v56 = vrot.slane %v738_v17, 2  ;;  %v755_v19 = vsel %vm166_vm1, %v720_v23, 2147483647 }
 0x1f4   :  { %v728_v22 = vsel %vm727_vm14, %v725_v29, %v726_v11  ;;  %v721_v26 = vsel %vm713_vm15, %v2674_v15, 8  ;;  %v690_v27 = vmax.f32 %v688_v4, %v689_v12  ;;  %v702_v9 = vsel %vm166_vm1, %v2854_v24, -inf }
 0x1f5   :  { %v729_v25 = vrot.slane %v728_v22, 2  ;;  %v749_v30 = vrot.slane %v748_v21, 2  ;;  %v756_v31 = vrot.slane %v755_v19, 4  ;;  %v703_v32 = vrot.slane %v702_v9, 4 }
 0x1f6   :  { %v765_v33 = vsel %vm166_vm1, %v721_v26, 2147483647  ;;  %v699_v20 = vmax.f32 %v697_v2, %v698_v8  ;;  %vm740_vm6 = vcmp.lt.s32.totalorder %v738_v17, %v739_v56  ;;  %v691_v37 = vrot.slane %v690_v27, 2 }
 0x1f7   :  { %vm730_vm2 = vcmp.lt.s32.totalorder %v728_v22, %v729_v25  ;;  %vm757_vm5 = vcmp.lt.s32.totalorder %v755_v19, %v756_v31  ;;  %v766_v34 = vrot.slane %v765_v33, 4  ;;  %v704_v28 = vmax.f32 %v702_v9, %v703_v32 }
 0x1f8   :  { %v758_v35 = vsel %vm757_vm5, %v755_v19, %v756_v31  ;;  %v700_v36 = vrot.slane %v699_v20, 1  ;;  %v731_v38 = vsel %vm730_vm2, %v728_v22, %v729_v25  ;;  %vm750_vm12 = vcmp.lt.s32.totalorder %v748_v21, %v749_v30 }
 0x1f9   :  { %v759_v39 = vrot.slane %v758_v35, 2  ;;  %vm767_vm7 = vcmp.lt.s32.totalorder %v765_v33, %v766_v34  ;;  %v692_v43 = vmax.f32 %v690_v27, %v691_v37  ;;  %v705_v45 = vrot.slane %v704_v28, 2  ;;  %v815_v37 = vld [vmem:[#allocation2 + $0x18] sm:$0xff] }
 0x1fa   :  { %v768_v41 = vsel %vm767_vm7, %v765_v33, %v766_v34  ;;  %v701_v42 = vmax.f32 %v699_v20, %v700_v36  ;;  %v741_v46 = vsel %vm740_vm6, %v738_v17, %v739_v56  ;;  %v732_v49 = vrot.slane %v731_v38, 1 }
 0x1fb   :  { %vm760_vm14 = vcmp.lt.s32.totalorder %v758_v35, %v759_v39  ;;  %v769_v44 = vrot.slane %v768_v41, 2  ;;  %v693_v50 = vrot.slane %v692_v43, 1  ;;  %v751_v51 = vsel %vm750_vm12, %v748_v21, %v749_v30 }
 0x1fc   :  { %835 = vbcast.lane.b32.xlu0 %v701_v42, 256  ;;  %vm715_vm15 = vcmp.eq.f32.partialorder %v2830_v54, %v701_v42  ;;  %v706_v55 = vmax.f32 %v704_v28, %v705_v45  ;;  %v761_v57 = vsel %vm760_vm14, %v758_v35, %v759_v39  ;;  %v742_v62 = vrot.slane %v741_v46, 1 }
 0x1fd   :  { %v723_v52 = vsel %vm715_vm15, %v2674_v15, 8  ;;  %vm770_vm2 = vcmp.lt.s32.totalorder %v768_v41, %v769_v44  ;;  %v694_v61 = vmax.f32 %v692_v43, %v693_v50  ;;  %v752_v0 = vrot.slane %v751_v51, 1 }
 0x1fe   :  { %v785_v60 = vsel %vm166_vm1, %v723_v52, 2147483647  ;;  %v707_v47 = vrot.slane %v706_v55, 1  ;;  %vm733_vm5 = vcmp.lt.s32.totalorder %v731_v38, %v732_v49  ;;  %v762_v1 = vrot.slane %v761_v57, 1 }
 0x1ff   :  { %v786_v63 = vrot.slane %v785_v60, 4  ;;  %832 = vbcast.lane.b32.xlu1 %v694_v61, 256  ;;  %vm714_vm6 = vcmp.eq.f32.partialorder %v2832_v53, %v694_v61  ;;  %v771_v54 = vsel %vm770_vm2, %v768_v41, %v769_v44  ;;  %vm743_vm12 = vcmp.lt.s32.totalorder %v741_v46, %v742_v62 }
 0x200   :  { %v722_v4 = vsel %vm714_vm6, %v2674_v15, 8  ;;  %v708_v6 = vmax.f32 %v706_v55, %v707_v47  ;;  %vm753_vm14 = vcmp.lt.s32.totalorder %v751_v51, %v752_v0  ;;  %v734_v10 = vsel %vm733_vm5, %v731_v38, %v732_v49 }
 0x201   :  { %vm787_vm7 = vcmp.lt.s32.totalorder %v785_v60, %v786_v63  ;;  %v775_v3 = vsel %vm166_vm1, %v722_v4, 2147483647  ;;  %v772_v2 = vrot.slane %v771_v54, 1  ;;  %vm763_vm0 = vcmp.lt.s32.totalorder %v761_v57, %v762_v1 }
 0x202   :  { %v788_v5 = vsel %vm787_vm7, %v785_v60, %v786_v63  ;;  %v776_v7 = vrot.slane %v775_v3, 4  ;;  %vm716_vm15 = vcmp.eq.f32.partialorder %v2854_v24, %v708_v6  ;;  %v744_v11 = vsel %vm743_vm12, %v741_v46, %v742_v62 }
 0x203   :  { %v789_v29 = vrot.slane %v788_v5, 2  ;;  %838 = vbcast.lane.b32.xlu1 %v708_v6, 256  ;;  %v724_v53 = vsel %vm716_vm15, %v2674_v15, 8  ;;  %v754_v59 = vsel %vm753_vm14, %v751_v51, %v752_v0  ;;  %v805_v16 = vsel %vm505_vm10, %v744_v11, %v734_v10 }
 0x204   :  { %vm777_vm9 = vcmp.lt.s32.totalorder %v775_v3, %v776_v7  ;;  %v795_v13 = vsel %vm166_vm1, %v724_v53, 2147483647  ;;  %v764_v22 = vsel %vm763_vm0, %v761_v57, %v762_v1  ;;  %vm773_vm2 = vcmp.lt.s32.totalorder %v771_v54, %v772_v2 }
 0x205   :  { %vm790_vm13 = vcmp.lt.s32.totalorder %v788_v5, %v789_v29  ;;  %v778_v58 = vsel %vm777_vm9, %v775_v3, %v776_v7  ;;  %v796_v21 = vrot.slane %v795_v13, 4  ;;  %v806_v8 = vsel %vm507_vm11, %v754_v59, %v805_v16 }
 0x206   :  { %v791_v12 = vsel %vm790_vm13, %v788_v5, %v789_v29  ;;  %v779_v17 = vrot.slane %v778_v58, 2  ;;  %v807_v56 = vsel %vm509_vm3, %v764_v22, %v806_v8  ;;  %v774_v19 = vsel %vm773_vm2, %v771_v54, %v772_v2 }
 0x207   :  { %v792_v23 = vrot.slane %v791_v12, 1  ;;  %vm797_vm6 = vcmp.lt.s32.totalorder %v795_v13, %v796_v21  ;;  %v808_v9 = vsel %vm511_vm4, %v774_v19, %v807_v56  ;;  %vm3464_vm12 = vcmask 1046534  }
 0x208   :  { %vm780_vm5 = vcmp.lt.s32.totalorder %v778_v58, %v779_v17  ;;  %v798_v25 = vsel %vm797_vm6, %v795_v13, %v796_v21  ;;  %vm3465_vm14 = vcmask 1047559   ;;  %v856_v38 = vrot.slane %v815_v37, %v2693_v40 }
 0x209   :  { %v781_v24 = vsel %vm780_vm5, %v778_v58, %v779_v17  ;;  %v799_v27 = vrot.slane %v798_v25, 2  ;;  %vm793_vm9 = vcmp.lt.s32.totalorder %v791_v12, %v792_v23  ;;  %v849_v50 = vcombine.high %v815_v37, %v815_v37 }
 0x20a   :  { %v782_v26 = vrot.slane %v781_v24, 1  ;;  %v794_v32 = vsel %vm793_vm9, %v791_v12, %v792_v23  ;;  %v864_v39 = vcombine.high %v856_v38, %v856_v38  ;;  %v872_v41 = vrot.slane %v856_v38, %v2693_v40 }
 0x20b   :  { %vm800_vm7 = vcmp.lt.s32.totalorder %v798_v25, %v799_v27  ;;  %v863_v62 = vrot.slane %v849_v50, %v2693_v40 }
 0x20c   :  { %vm783_vm13 = vcmp.lt.s32.totalorder %v781_v24, %v782_v26  ;;  %v801_v31 = vsel %vm800_vm7, %v798_v25, %v799_v27  ;;  %v886_v28 = vrot.slane %v864_v39, %v2693_v40  ;;  %v894_v49 = vcombine.high %v872_v41, %v872_v41 }
 0x20d   :  { %v784_v30 = vsel %vm783_vm13, %v781_v24, %v782_v26  ;;  %v802_v20 = vrot.slane %v801_v31, 1  ;;  %v901_v47 = vrot.slane %v872_v41, %v2681_v18  ;;  %v879_v6 = vrot.slane %v863_v62, %v2693_v40 }
 0x20e   :  { %v809_v33 = vsel %vm513_vm8, %v784_v30, %v808_v9  ;;  %v905_v45 = vrot.slane %v886_v28, %v2681_v18  ;;  %v909_v57 = vrot.slane %v894_v49, %v2681_v18  ;;  %v896_v54 = vcombine.high %v886_v28, %v886_v28 }
 0x20f   :  { %vm803_vm0 = vcmp.lt.s32.totalorder %v801_v31, %v802_v20  ;;  %v810_v34 = vsel %vm3464_vm12, %v794_v32, %v809_v33  ;;  %v917_v17 = vrot.slane %v879_v6, %v2681_v18  ;;  %v865_v30 = vcombine.high %v863_v62, %v863_v62 }
 0x210   :  { %v804_v35 = vsel %vm803_vm0, %v801_v31, %v802_v20  ;;  %v913_v11 = vrot.slane %v896_v54, %v2681_v18 }
 0x211   :  { %v811_v36 = vsel %vm3465_vm14, %v804_v35, %v810_v34  ;;  %v895_v34 = vcombine.high %v879_v6, %v879_v6 }
 0x212   :  { %813 = vst.msk [vmem:[#allocation3 + $0x10] sm:$0xff] %vm166_vm1, %v811_v36 }
 0x238   :  { %v2570_v42 = vpop.f32.mrf.mxu1 }
 0x239   :  { %172 = vst.msk [vmem:[#allocation2 + $0x28] sm:$0xff] %vm166_vm1, %v2570_v42 }
 0x23a   :  { %v147_v44 = vpop.f32.mrf.mxu1 }
 0x23b   :  { %171 = vst.msk [vmem:[#allocation2 + $0x20] sm:$0xff] %vm166_vm1, %v147_v44 }
 0x25b   :  { %v821_v43 = vpop.permute.xlu0 %820 }
 0x25c   :  { %v841_v46 = vadd.f32 %v821_v43, %v2702_v48  ;;  %v893_v43 = vrot.slane %v865_v30, %v2693_v40 }
 0x25e   :  { %v939_v51 = vadd.f32 %v905_v45, %v841_v46  ;;  %v925_v46 = vrot.slane %v895_v34, %v2681_v18  ;;  %v921_v54 = vrot.slane %v893_v43, %v2681_v18 }
 0x25f   :  { %v824_v52 = vpop.permute.xlu1 %823 }
 0x260   :  { %v953_v55 = vsel %vm166_vm1, %v939_v51, -inf  ;;  %v842_v60 = vadd.f32 %v824_v52, %v2702_v48  ;;  %v818_v61 = vpop.permute.xlu0 %817 }
 0x261   :  { %v954_v63 = vrot.slane %v953_v55, 4  ;;  %v840_v0 = vadd.f32 %v818_v61, %v2702_v48 }
 0x262   :  { %v940_v1 = vadd.f32 %v909_v57, %v842_v60 }
 0x263   :  { %v938_v4 = vadd.f32 %v901_v47, %v840_v0  ;;  %v955_v5 = vmax.f32 %v953_v55, %v954_v63  ;;  %v827_v10 = vpop.permute.xlu1 %826 }
 0x264   :  { %v960_v3 = vsel %vm166_vm1, %v940_v1, -inf  ;;  %v843_v12 = vadd.f32 %v827_v10, %v2702_v48  ;;  %v830_v58 = vpop.permute.xlu0 %829 }
 0x265   :  { %v961_v29 = vrot.slane %v960_v3, 4  ;;  %v946_v7 = vsel %vm166_vm1, %v938_v4, -inf  ;;  %v956_v2 = vrot.slane %v955_v5, 2  ;;  %v844_v21 = vadd.f32 %v830_v58, %v2702_v48 }
 0x266   :  { %v947_v53 = vrot.slane %v946_v7, 4  ;;  %v2896_v16 = vadd.f32 %v913_v11, %v843_v12 }
 0x267   :  { %v957_v13 = vmax.f32 %v955_v5, %v956_v2  ;;  %v962_v59 = vmax.f32 %v960_v3, %v961_v29  ;;  %v2902_v25 = vadd.f32 %v917_v17, %v844_v21  ;;  %v897_v3 = vcombine.high %v893_v43, %v893_v43 }
 0x268   :  { %v948_v22 = vmax.f32 %v946_v7, %v947_v53  ;;  %v967_v24 = vsel %vm166_vm1, %v2896_v16, -inf }
 0x269   :  { %v958_v23 = vrot.slane %v957_v13, 1  ;;  %v963_v8 = vrot.slane %v962_v59, 2  ;;  %v968_v19 = vrot.slane %v967_v24, 4  ;;  %v974_v9 = vsel %vm166_vm1, %v2902_v25, -inf }
 0x26a   :  { %v949_v56 = vrot.slane %v948_v22, 2  ;;  %v975_v32 = vrot.slane %v974_v9, 4  ;;  %v929_v58 = vrot.slane %v897_v3, %v2681_v18 }
 0x26b   :  { %v959_v26 = vmax.f32 %v957_v13, %v958_v23  ;;  %v964_v27 = vmax.f32 %v962_v59, %v963_v8  ;;  %v969_v20 = vmax.f32 %v967_v24, %v968_v19 }
 0x26c   :  { %v950_v31 = vmax.f32 %v948_v22, %v949_v56  ;;  %v976_v38 = vmax.f32 %v974_v9, %v975_v32 }
 0x26d   :  { %vm1003_vm15 = vcmp.eq.f32.partialorder %v939_v51, %v959_v26  ;;  %1113 = vbcast.lane.b32.xlu0 %v959_v26, 256  ;;  %v965_v33 = vrot.slane %v964_v27, 1  ;;  %v970_v39 = vrot.slane %v969_v20, 2 }
 0x26e   :  { %v1011_v35 = vsel %vm1003_vm15, %v2674_v15, 8  ;;  %v951_v36 = vrot.slane %v950_v31, 1  ;;  %v836_v42 = vpop.permute.xlu0 %835  ;;  %v977_v44 = vrot.slane %v976_v38, 2 }
 0x26f   :  { %v966_v37 = vmax.f32 %v964_v27, %v965_v33  ;;  %v1028_v28 = vsel %vm166_vm1, %v1011_v35, 2147483647  ;;  %v971_v45 = vmax.f32 %v969_v20, %v970_v39  ;;  %v846_v49 = vadd.f32 %v836_v42, %v2702_v48 }
 0x270   :  { %v952_v41 = vmax.f32 %v950_v31, %v951_v36  ;;  %v1029_v51 = vrot.slane %v1028_v28, 4  ;;  %v978_v57 = vmax.f32 %v976_v38, %v977_v44 }
 0x271   :  { %vm1004_vm2 = vcmp.eq.f32.partialorder %v940_v1, %v966_v37  ;;  %1116 = vbcast.lane.b32.xlu1 %v966_v37, 256  ;;  %v2914_v60 = vadd.f32 %v925_v46, %v846_v49  ;;  %v833_v63 = vpop.permute.xlu1 %832  ;;  %v972_v1 = vrot.slane %v971_v45, 1 }
 0x272   :  { %vm1002_vm5 = vcmp.eq.f32.partialorder %v938_v4, %v952_v41  ;;  %1110 = vbcast.lane.b32.xlu0 %v952_v41, 256  ;;  %v1012_v50 = vsel %vm1004_vm2, %v2674_v15, 8  ;;  %v979_v0 = vrot.slane %v978_v57, 1  ;;  %v2923_v4 = vld [vmem:[%s3456_s2] sm:$0xff]  ;;  %vm1030_vm6 = vcmp.lt.s32.totalorder %v1028_v28, %v1029_v51 }
 0x273   :  { %v1010_v52 = vsel %vm1002_vm5, %v2674_v15, 8  ;;  %v1038_v55 = vsel %vm166_vm1, %v1012_v50, 2147483647  ;;  %v988_v48 = vsel %vm166_vm1, %v2914_v60, -inf  ;;  %v845_v5 = vadd.f32 %v2923_v4, %v833_v63 }
 0x274   :  { %v1018_v61 = vsel %vm166_vm1, %v1010_v52, 2147483647  ;;  %v1039_v62 = vrot.slane %v1038_v55, 4  ;;  %v989_v6 = vrot.slane %v988_v48, 4  ;;  %v980_v2 = vmax.f32 %v978_v57, %v979_v0 }
 0x275   :  { %v1019_v47 = vrot.slane %v1018_v61, 4  ;;  %v2926_v29 = vadd.f32 %v921_v54, %v845_v5  ;;  %v839_v7 = vpop.permute.xlu1 %838  ;;  %v973_v53 = vmax.f32 %v971_v45, %v972_v1  ;;  %v1031_v59 = vsel %vm1030_vm6, %v1028_v28, %v1029_v51 }
 0x276   :  { %vm1040_vm13 = vcmp.lt.s32.totalorder %v1038_v55, %v1039_v62  ;;  %v990_v11 = vmax.f32 %v988_v48, %v989_v6  ;;  %v847_v13 = vadd.f32 %v2923_v4, %v839_v7  ;;  %1122 = vbcast.lane.b32.xlu0 %v980_v2, 256  ;;  %vm1006_vm7 = vcmp.eq.f32.partialorder %v2902_v25, %v980_v2 }
 0x277   :  { %vm1020_vm9 = vcmp.lt.s32.totalorder %v1018_v61, %v1019_v47  ;;  %v981_v12 = vsel %vm166_vm1, %v2926_v29, -inf  ;;  %v1041_v17 = vsel %vm1040_vm13, %v1038_v55, %v1039_v62  ;;  %1119 = vbcast.lane.b32.xlu1 %v973_v53, 256  ;;  %v1032_v8 = vrot.slane %v1031_v59, 2 }
 0x278   :  { %v1021_v10 = vsel %vm1020_vm9, %v1018_v61, %v1019_v47  ;;  %v982_v21 = vrot.slane %v981_v12, 4  ;;  %v2932_v22 = vadd.f32 %v929_v58, %v847_v13  ;;  %v1014_v24 = vsel %vm1006_vm7, %v2674_v15, 8 }
 0x279   :  { %v1022_v23 = vrot.slane %v1021_v10, 2  ;;  %vm1005_vm0 = vcmp.eq.f32.partialorder %v2896_v16, %v973_v53  ;;  %v991_v56 = vrot.slane %v990_v11, 2  ;;  %v1042_v26 = vrot.slane %v1041_v17, 2 }
 0x27a   :  { %v995_v19 = vsel %vm166_vm1, %v2932_v22, -inf  ;;  %v1058_v27 = vsel %vm166_vm1, %v1014_v24, 2147483647  ;;  %v1013_v9 = vsel %vm1005_vm0, %v2674_v15, 8  ;;  %v983_v33 = vmax.f32 %v981_v12, %v982_v21 }
 0x27b   :  { %v996_v30 = vrot.slane %v995_v19, 4  ;;  %v1059_v31 = vrot.slane %v1058_v27, 4  ;;  %vm1023_vm12 = vcmp.lt.s32.totalorder %v1021_v10, %v1022_v23  ;;  %v1048_v32 = vsel %vm166_vm1, %v1013_v9, 2147483647 }
 0x27c   :  { %v992_v25 = vmax.f32 %v990_v11, %v991_v56  ;;  %vm1033_vm14 = vcmp.lt.s32.totalorder %v1031_v59, %v1032_v8  ;;  %v1049_v20 = vrot.slane %v1048_v32, 4  ;;  %vm1043_vm2 = vcmp.lt.s32.totalorder %v1041_v17, %v1042_v26 }
 0x27d   :  { %vm1060_vm15 = vcmp.lt.s32.totalorder %v1058_v27, %v1059_v31  ;;  %v997_v16 = vmax.f32 %v995_v19, %v996_v30  ;;  %v984_v36 = vrot.slane %v983_v33, 2  ;;  %v1024_v37 = vsel %vm1023_vm12, %v1021_v10, %v1022_v23 }
 0x27e   :  { %v1061_v34 = vsel %vm1060_vm15, %v1058_v27, %v1059_v31  ;;  %v993_v35 = vrot.slane %v992_v25, 1  ;;  %vm1050_vm5 = vcmp.lt.s32.totalorder %v1048_v32, %v1049_v20  ;;  %v1034_v43 = vsel %vm1033_vm14, %v1031_v59, %v1032_v8 }
 0x27f   :  { %v1062_v38 = vrot.slane %v1061_v34, 2  ;;  %v998_v39 = vrot.slane %v997_v16, 2  ;;  %v1051_v28 = vsel %vm1050_vm5, %v1048_v32, %v1049_v20  ;;  %v985_v42 = vmax.f32 %v983_v33, %v984_v36  ;;  %v26_v36 = vld [vmem:[%s3454_s0 + $0x30] sm:$0xff] }
 0x280   :  { %v994_v41 = vmax.f32 %v992_v25, %v993_v35  ;;  %v1052_v44 = vrot.slane %v1051_v28, 2  ;;  %v1025_v46 = vrot.slane %v1024_v37, 1  ;;  %v1044_v49 = vsel %vm1043_vm2, %v1041_v17, %v1042_v26 }
 0x281   :  { %v999_v45 = vmax.f32 %v997_v16, %v998_v39  ;;  %v986_v50 = vrot.slane %v985_v42, 1  ;;  %vm1063_vm9 = vcmp.lt.s32.totalorder %v1061_v34, %v1062_v38  ;;  %v1035_v55 = vrot.slane %v1034_v43, 1 }
 0x282   :  { %1128 = vbcast.lane.b32.xlu0 %v994_v41, 256  ;;  %vm1008_vm6 = vcmp.eq.f32.partialorder %v2914_v60, %v994_v41  ;;  %vm1053_vm13 = vcmp.lt.s32.totalorder %v1051_v28, %v1052_v44  ;;  %v1045_v63 = vrot.slane %v1044_v49, 1  ;;  %vm2945_vm7 = vcmp.lt.s32.totalorder %v1024_v37, %v1025_v46 }
 0x283   :  { %v1016_v51 = vsel %vm1008_vm6, %v2674_v15, 8  ;;  %v1000_v52 = vrot.slane %v999_v45, 1  ;;  %v1054_v57 = vsel %vm1053_vm13, %v1051_v28, %v1052_v44  ;;  %v987_v62 = vmax.f32 %v985_v42, %v986_v50 }
 0x284   :  { %v1078_v61 = vsel %vm166_vm1, %v1016_v51, 2147483647  ;;  %v1064_v48 = vsel %vm1063_vm9, %v1061_v34, %v1062_v38  ;;  %v1055_v60 = vrot.slane %v1054_v57, 1  ;;  %vm1036_vm15 = vcmp.lt.s32.totalorder %v1034_v43, %v1035_v55  ;;  %v1108_v38 = vld [vmem:[#allocation2 + $0x20] sm:$0xff] }
 0x285   :  { %v1079_v47 = vrot.slane %v1078_v61, 4  ;;  %v1001_v0 = vmax.f32 %v999_v45, %v1000_v52  ;;  %vm1007_vm0 = vcmp.eq.f32.partialorder %v2926_v29, %v987_v62  ;;  %1125 = vbcast.lane.b32.xlu1 %v987_v62, 256  ;;  %vm1046_vm2 = vcmp.lt.s32.totalorder %v1044_v49, %v1045_v63 }
 0x286   :  { %v1015_v54 = vsel %vm1007_vm0, %v2674_v15, 8  ;;  %v1027_v29 = vsel %vm2945_vm7, %v1024_v37, %v1025_v46  ;;  %v1065_v53 = vrot.slane %v1064_v48, 1  ;;  %v1037_v12 = vsel %vm1036_vm15, %v1034_v43, %v1035_v55  ;;  %v27_v37 = vld [vmem:[%s3454_s0 + $0x38] sm:$0xff] }
 0x287   :  { %vm1080_vm12 = vcmp.lt.s32.totalorder %v1078_v61, %v1079_v47  ;;  %vm1009_vm14 = vcmp.eq.f32.partialorder %v2932_v22, %v1001_v0  ;;  %v1068_v3 = vsel %vm166_vm1, %v1015_v54, 2147483647  ;;  %vm1056_vm5 = vcmp.lt.s32.totalorder %v1054_v57, %v1055_v60 }
 0x288   :  { %v1081_v5 = vsel %vm1080_vm12, %v1078_v61, %v1079_v47  ;;  %v1017_v6 = vsel %vm1009_vm14, %v2674_v15, 8  ;;  %v1069_v10 = vrot.slane %v1068_v3, 4  ;;  %v1047_v58 = vsel %vm1046_vm2, %v1044_v49, %v1045_v63 }
 0x289   :  { %v1082_v7 = vrot.slane %v1081_v5, 2  ;;  %v1088_v2 = vsel %vm166_vm1, %v1017_v6, 2147483647  ;;  %1131 = vbcast.lane.b32.xlu1 %v1001_v0, 256  ;;  %v1098_v17 = vsel %vm505_vm10, %v1037_v12, %v1027_v29  ;;  %vm1066_vm0 = vcmp.lt.s32.totalorder %v1064_v48, %v1065_v53 }
 0x28a   :  { %v1089_v11 = vrot.slane %v1088_v2, 4  ;;  %vm1070_vm9 = vcmp.lt.s32.totalorder %v1068_v3, %v1069_v10  ;;  %v1057_v8 = vsel %vm1056_vm5, %v1054_v57, %v1055_v60  ;;  %v1099_v56 = vsel %vm507_vm11, %v1047_v58, %v1098_v17 }
 0x28b   :  { %vm1083_vm6 = vcmp.lt.s32.totalorder %v1081_v5, %v1082_v7  ;;  %v1071_v59 = vsel %vm1070_vm9, %v1068_v3, %v1069_v10  ;;  %v1067_v26 = vsel %vm1066_vm0, %v1064_v48, %v1065_v53  ;;  %v1100_v27 = vsel %vm509_vm3, %v1057_v8, %v1099_v56 }
 0x28c   :  { %v1084_v13 = vsel %vm1083_vm6, %v1081_v5, %v1082_v7  ;;  %vm1090_vm13 = vcmp.lt.s32.totalorder %v1088_v2, %v1089_v11  ;;  %v1072_v22 = vrot.slane %v1071_v59, 2  ;;  %v1101_v33 = vsel %vm511_vm4, %v1067_v26, %v1100_v27 }
 0x28d   :  { %v1085_v21 = vrot.slane %v1084_v13, 1  ;;  %v1091_v23 = vsel %vm1090_vm13, %v1088_v2, %v1089_v11  ;;  %vm3468_vm5 = vcmask 1046534   ;;  %vm3469_vm6 = vcmask 1047559  }
 0x28e   :  { %v1092_v24 = vrot.slane %v1091_v23, 2  ;;  %vm1073_vm7 = vcmp.lt.s32.totalorder %v1071_v59, %v1072_v22  ;;  %vm3470_vm9 = vcmask 523264   ;;  %v1149_v39 = vrot.slane %v1108_v38, %v2693_v40 }
 0x28f   :  { %vm1086_vm12 = vcmp.lt.s32.totalorder %v1084_v13, %v1085_v21  ;;  %v1074_v19 = vsel %vm1073_vm7, %v1071_v59, %v1072_v22  ;;  %2571 = vmatprep.mubr.msk.f32.mxu1 %vm3470_vm9, %v26_v36  ;;  %vm3471_vm13 = vmmov %vm3470_vm9  ;;  %v1142_v49 = vcombine.high %v1108_v38, %v1108_v38 }
 0x290   :  { %vm1093_vm14 = vcmp.lt.s32.totalorder %v1091_v23, %v1092_v24  ;;  %v1075_v9 = vrot.slane %v1074_v19, 1  ;;  %v1087_v32 = vsel %vm1086_vm12, %v1084_v13, %v1085_v21  ;;  %2572 = vmatmul.mubr.msk.f32.gmra.mxu1 %vm3471_vm13, %v27_v37  ;;  %v1157_v28 = vcombine.high %v1149_v39, %v1149_v39 }
 0x291   :  { %v1094_v30 = vsel %vm1093_vm14, %v1091_v23, %v1092_v24  ;;  %v1165_v42 = vrot.slane %v1149_v39, %v2693_v40  ;;  %v1156_v0 = vrot.slane %v1142_v49, %v2693_v40 }
 0x292   :  { %v1095_v31 = vrot.slane %v1094_v30, 1  ;;  %vm1076_vm15 = vcmp.lt.s32.totalorder %v1074_v19, %v1075_v9  ;;  %v1179_v41 = vrot.slane %v1157_v28, %v2693_v40 }
 0x293   :  { %v1077_v25 = vsel %vm1076_vm15, %v1074_v19, %v1075_v9  ;;  %v1187_v46 = vcombine.high %v1165_v42, %v1165_v42  ;;  %v1194_v63 = vrot.slane %v1165_v42, %v2681_v18  ;;  %v1172_v6 = vrot.slane %v1156_v0, %v2693_v40 }
 0x294   :  { %vm1096_vm2 = vcmp.lt.s32.totalorder %v1094_v30, %v1095_v31  ;;  %v1102_v20 = vsel %vm513_vm8, %v1077_v25, %v1101_v33  ;;  %v1198_v43 = vrot.slane %v1179_v41, %v2681_v18  ;;  %v1189_v2 = vcombine.high %v1179_v41, %v1179_v41 }
 0x295   :  { %v1097_v16 = vsel %vm1096_vm2, %v1094_v30, %v1095_v31  ;;  %v1103_v34 = vsel %vm3468_vm5, %v1087_v32, %v1102_v20  ;;  %v1202_v57 = vrot.slane %v1187_v46, %v2681_v18  ;;  %v1210_v12 = vrot.slane %v1172_v6, %v2681_v18 }
 0x296   :  { %v1104_v35 = vsel %vm3469_vm6, %v1097_v16, %v1103_v34  ;;  %v1206_v22 = vrot.slane %v1189_v2, %v2681_v18  ;;  %v1158_v16 = vcombine.high %v1156_v0, %v1156_v0 }
 0x297   :  { %1106 = vst.msk [vmem:[#allocation3 + $0x18] sm:$0xff] %vm166_vm1, %v1104_v35  ;;  %v1188_v35 = vcombine.high %v1172_v6, %v1172_v6 }
 0x298   :  { %v1186_v41 = vrot.slane %v1158_v16, %v2693_v40 }
 0x2df   :  { %v1114_v44 = vpop.permute.xlu0 %1113 }
 0x2e0   :  { %v1134_v45 = vadd.f32 %v2923_v4, %v1114_v44 }
 0x2e2   :  { %v1232_v50 = vadd.f32 %v1198_v43, %v1134_v45 }
 0x2e3   :  { %v1117_v51 = vpop.permute.xlu1 %1116 }
 0x2e4   :  { %v1246_v52 = vsel %vm166_vm1, %v1232_v50, -inf  ;;  %v1111_v55 = vpop.permute.xlu0 %1110  ;;  %v1135_v61 = vadd.f32 %v2923_v4, %v1117_v51  ;;  %v1218_v51 = vrot.slane %v1188_v35, %v2681_v18 }
 0x2e5   :  { %v1247_v62 = vrot.slane %v1246_v52, 4  ;;  %v1133_v47 = vadd.f32 %v2923_v4, %v1111_v55 }
 0x2e6   :  { %v1233_v1 = vadd.f32 %v1202_v57, %v1135_v61 }
 0x2e7   :  { %v1231_v48 = vadd.f32 %v1194_v63, %v1133_v47  ;;  %v1248_v60 = vmax.f32 %v1246_v52, %v1247_v62  ;;  %v1214_v47 = vrot.slane %v1186_v41, %v2681_v18 }
 0x2e8   :  { %v1253_v54 = vsel %vm166_vm1, %v1233_v1, -inf  ;;  %v1123_v58 = vpop.permute.xlu0 %1122 }
 0x2e9   :  { %v1239_v5 = vsel %vm166_vm1, %v1231_v48, -inf  ;;  %v1254_v3 = vrot.slane %v1253_v54, 4  ;;  %v1249_v7 = vrot.slane %v1248_v60, 2  ;;  %v1120_v13 = vpop.permute.xlu1 %1119  ;;  %v1137_v21 = vadd.f32 %v2923_v4, %v1123_v58 }
 0x2ea   :  { %v1240_v10 = vrot.slane %v1239_v5, 4  ;;  %v1136_v23 = vadd.f32 %v2923_v4, %v1120_v13 }
 0x2eb   :  { %v1250_v29 = vmax.f32 %v1248_v60, %v1249_v7  ;;  %v1255_v53 = vmax.f32 %v1253_v54, %v1254_v3  ;;  %v2991_v19 = vadd.f32 %v1210_v12, %v1137_v21 }
 0x2ec   :  { %v1241_v11 = vmax.f32 %v1239_v5, %v1240_v10  ;;  %v2993_v26 = vadd.f32 %v1206_v22, %v1136_v23 }
 0x2ed   :  { %v1251_v59 = vrot.slane %v1250_v29, 1  ;;  %v1256_v17 = vrot.slane %v1255_v53, 2  ;;  %v1267_v30 = vsel %vm166_vm1, %v2991_v19, -inf }
 0x2ee   :  { %v1242_v8 = vrot.slane %v1241_v11, 2  ;;  %v1260_v31 = vsel %vm166_vm1, %v2993_v26, -inf  ;;  %v1268_v33 = vrot.slane %v1267_v30, 4 }
 0x2ef   :  { %v1252_v24 = vmax.f32 %v1250_v29, %v1251_v59  ;;  %v1257_v56 = vmax.f32 %v1255_v53, %v1256_v17  ;;  %v1261_v20 = vrot.slane %v1260_v31, 4 }
 0x2f0   :  { %v1243_v27 = vmax.f32 %v1241_v11, %v1242_v8  ;;  %v1269_v38 = vmax.f32 %v1267_v30, %v1268_v33 }
 0x2f1   :  { %1406 = vbcast.lane.b32.xlu0 %v1252_v24, 256  ;;  %vm1296_vm0 = vcmp.eq.f32.partialorder %v1232_v50, %v1252_v24  ;;  %v1258_v9 = vrot.slane %v1257_v56, 1  ;;  %v1262_v39 = vmax.f32 %v1260_v31, %v1261_v20 }
 0x2f2   :  { %v1304_v32 = vsel %vm1296_vm0, %v2674_v15, 8  ;;  %v1244_v25 = vrot.slane %v1243_v27, 1  ;;  %v1270_v43 = vrot.slane %v1269_v38, 2 }
 0x2f3   :  { %v1259_v34 = vmax.f32 %v1257_v56, %v1258_v9  ;;  %v1321_v37 = vsel %vm166_vm1, %v1304_v32, 2147483647  ;;  %v1263_v50 = vrot.slane %v1262_v39, 2 }
 0x2f4   :  { %v1245_v36 = vmax.f32 %v1243_v27, %v1244_v25  ;;  %v1129_v44 = vpop.permute.xlu0 %1128  ;;  %v1322_v45 = vrot.slane %v1321_v37, 4  ;;  %v1271_v57 = vmax.f32 %v1269_v38, %v1270_v43 }
 0x2f5   :  { %1409 = vbcast.lane.b32.xlu1 %v1259_v34, 256  ;;  %vm1297_vm7 = vcmp.eq.f32.partialorder %v1233_v1, %v1259_v34  ;;  %v1139_v52 = vadd.f32 %v2923_v4, %v1129_v44  ;;  %v1264_v61 = vmax.f32 %v1262_v39, %v1263_v50  ;;  %v1190_v1 = vcombine.high %v1186_v41, %v1186_v41 }
 0x2f6   :  { %1403 = vbcast.lane.b32.xlu0 %v1245_v36, 256  ;;  %vm1295_vm12 = vcmp.eq.f32.partialorder %v1231_v48, %v1245_v36  ;;  %v1305_v28 = vsel %vm1297_vm7, %v2674_v15, 8  ;;  %vm1323_vm15 = vcmp.lt.s32.totalorder %v1321_v37, %v1322_v45  ;;  %v1272_v48 = vrot.slane %v1271_v57, 1 }
 0x2f7   :  { %v1303_v42 = vsel %vm1295_vm12, %v2674_v15, 8  ;;  %v1331_v49 = vsel %vm166_vm1, %v1305_v28, 2147483647  ;;  %v3008_v62 = vadd.f32 %v1218_v51, %v1139_v52  ;;  %v1126_v0 = vpop.permute.xlu1 %1125  ;;  %v1265_v3 = vrot.slane %v1264_v61, 1 }
 0x2f8   :  { %v1311_v46 = vsel %vm166_vm1, %v1303_v42, 2147483647  ;;  %v1332_v63 = vrot.slane %v1331_v49, 4  ;;  %v1138_v54 = vadd.f32 %v2923_v4, %v1126_v0  ;;  %v1273_v6 = vmax.f32 %v1271_v57, %v1272_v48 }
 0x2f9   :  { %v1312_v55 = vrot.slane %v1311_v46, 4  ;;  %v1281_v60 = vsel %vm166_vm1, %v3008_v62, -inf  ;;  %v1324_v10 = vsel %vm1323_vm15, %v1321_v37, %v1322_v45  ;;  %v1266_v11 = vmax.f32 %v1264_v61, %v1265_v3 }
 0x2fa   :  { %v3014_v7 = vadd.f32 %v1214_v47, %v1138_v54  ;;  %vm1333_vm2 = vcmp.lt.s32.totalorder %v1331_v49, %v1332_v63  ;;  %v1282_v2 = vrot.slane %v1281_v60, 4  ;;  %1415 = vbcast.lane.b32.xlu0 %v1273_v6, 256  ;;  %vm1299_vm5 = vcmp.eq.f32.partialorder %v2991_v19, %v1273_v6 }
 0x2fb   :  { %vm1313_vm14 = vcmp.lt.s32.totalorder %v1311_v46, %v1312_v55  ;;  %v1132_v29 = vpop.permute.xlu1 %1131  ;;  %v1222_v58 = vrot.slane %v1190_v1, %v2681_v18  ;;  %v1307_v59 = vsel %vm1299_vm5, %v2674_v15, 8  ;;  %v1334_v21 = vsel %vm1333_vm2, %v1331_v49, %v1332_v63  ;;  %1412 = vbcast.lane.b32.xlu1 %v1266_v11, 256 }
 0x2fc   :  { %v1314_v5 = vsel %vm1313_vm14, %v1311_v46, %v1312_v55  ;;  %v1274_v12 = vsel %vm166_vm1, %v3014_v7, -inf  ;;  %v1140_v13 = vadd.f32 %v2923_v4, %v1132_v29  ;;  %v1351_v22 = vsel %vm166_vm1, %v1307_v59, 2147483647 }
 0x2fd   :  { %v1315_v53 = vrot.slane %v1314_v5, 2  ;;  %v1275_v17 = vrot.slane %v1274_v12, 4  ;;  %vm1298_vm6 = vcmp.eq.f32.partialorder %v2993_v26, %v1266_v11  ;;  %v1325_v8 = vrot.slane %v1324_v10, 2 }
 0x2fe   :  { %v1238_v23 = vadd.f32 %v1222_v58, %v1140_v13  ;;  %v1352_v24 = vrot.slane %v1351_v22, 4  ;;  %v1306_v56 = vsel %vm1298_vm6, %v2674_v15, 8  ;;  %v1283_v19 = vmax.f32 %v1281_v60, %v1282_v2 }
 0x2ff   :  { %vm1316_vm9 = vcmp.lt.s32.totalorder %v1314_v5, %v1315_v53  ;;  %v1276_v27 = vmax.f32 %v1274_v12, %v1275_v17  ;;  %v1335_v30 = vrot.slane %v1334_v21, 2  ;;  %v1341_v31 = vsel %vm166_vm1, %v1306_v56, 2147483647 }
 0x300   :  { %v1288_v9 = vsel %vm166_vm1, %v1238_v23, -inf  ;;  %vm1353_vm13 = vcmp.lt.s32.totalorder %v1351_v22, %v1352_v24  ;;  %v1342_v33 = vrot.slane %v1341_v31, 4  ;;  %v1317_v20 = vsel %vm1316_vm9, %v1314_v5, %v1315_v53 }
 0x301   :  { %v1289_v32 = vrot.slane %v1288_v9, 4  ;;  %v1354_v25 = vsel %vm1353_vm13, %v1351_v22, %v1352_v24  ;;  %v1284_v16 = vrot.slane %v1283_v19, 2  ;;  %v1277_v26 = vrot.slane %v1276_v27, 2 }
 0x302   :  { %vm1326_vm0 = vcmp.lt.s32.totalorder %v1324_v10, %v1325_v8  ;;  %v1355_v34 = vrot.slane %v1354_v25, 2  ;;  %vm1343_vm7 = vcmp.lt.s32.totalorder %v1341_v31, %v1342_v33  ;;  %vm1336_vm12 = vcmp.lt.s32.totalorder %v1334_v21, %v1335_v30 }
 0x303   :  { %v1290_v35 = vmax.f32 %v1288_v9, %v1289_v32  ;;  %v1344_v36 = vsel %vm1343_vm7, %v1341_v31, %v1342_v33  ;;  %v1285_v37 = vmax.f32 %v1283_v19, %v1284_v16  ;;  %v1278_v38 = vmax.f32 %v1276_v27, %v1277_v26 }
 0x304   :  { %v1318_v39 = vrot.slane %v1317_v20, 1  ;;  %v1345_v28 = vrot.slane %v1344_v36, 2  ;;  %v1327_v42 = vsel %vm1326_vm0, %v1324_v10, %v1325_v8  ;;  %v1337_v45 = vsel %vm1336_vm12, %v1334_v21, %v1335_v30 }
 0x305   :  { %v1291_v41 = vrot.slane %v1290_v35, 2  ;;  %v1286_v43 = vrot.slane %v1285_v37, 1  ;;  %v1279_v44 = vrot.slane %v1278_v38, 1  ;;  %vm1356_vm14 = vcmp.lt.s32.totalorder %v1354_v25, %v1355_v34 }
 0x306   :  { %vm1346_vm15 = vcmp.lt.s32.totalorder %v1344_v36, %v1345_v28  ;;  %v1328_v52 = vrot.slane %v1327_v42, 1  ;;  %vm3027_vm2 = vcmp.lt.s32.totalorder %v1317_v20, %v1318_v39  ;;  %v1338_v61 = vrot.slane %v1337_v45, 1 }
 0x307   :  { %v1292_v46 = vmax.f32 %v1290_v35, %v1291_v41  ;;  %v1347_v49 = vsel %vm1346_vm15, %v1344_v36, %v1345_v28  ;;  %v1287_v50 = vmax.f32 %v1285_v37, %v1286_v43  ;;  %v1280_v51 = vmax.f32 %v1278_v38, %v1279_v44  ;;  %v1401_v35 = vld [vmem:[#allocation2 + $0x28] sm:$0xff] }
 0x308   :  { %v1357_v63 = vsel %vm1356_vm14, %v1354_v25, %v1355_v34  ;;  %v1348_v47 = vrot.slane %v1347_v49, 1  ;;  %vm1329_vm9 = vcmp.lt.s32.totalorder %v1327_v42, %v1328_v52  ;;  %vm1339_vm0 = vcmp.lt.s32.totalorder %v1337_v45, %v1338_v61 }
 0x309   :  { %v1293_v57 = vrot.slane %v1292_v46, 1  ;;  %1421 = vbcast.lane.b32.xlu0 %v1287_v50, 256  ;;  %vm1301_vm5 = vcmp.eq.f32.partialorder %v3008_v62, %v1287_v50  ;;  %1418 = vbcast.lane.b32.xlu1 %v1280_v51, 256  ;;  %vm1300_vm6 = vcmp.eq.f32.partialorder %v3014_v7, %v1280_v51  ;;  %v1320_v62 = vsel %vm3027_vm2, %v1317_v20, %v1318_v39 }
 0x30a   :  { %v1309_v0 = vsel %vm1301_vm5, %v2674_v15, 8  ;;  %v1308_v1 = vsel %vm1300_vm6, %v2674_v15, 8  ;;  %v1358_v6 = vrot.slane %v1357_v63, 1  ;;  %vm1349_vm7 = vcmp.lt.s32.totalorder %v1347_v49, %v1348_v47 }
 0x30b   :  { %v1294_v48 = vmax.f32 %v1292_v46, %v1293_v57  ;;  %v1371_v60 = vsel %vm166_vm1, %v1309_v0, 2147483647  ;;  %v1361_v54 = vsel %vm166_vm1, %v1308_v1, 2147483647  ;;  %v1330_v2 = vsel %vm1329_vm9, %v1327_v42, %v1328_v52 }
 0x30c   :  { %v1372_v5 = vrot.slane %v1371_v60, 4  ;;  %v1362_v3 = vrot.slane %v1361_v54, 4  ;;  %v1391_v12 = vsel %vm505_vm10, %v1330_v2, %v1320_v62  ;;  %v1340_v58 = vsel %vm1339_vm0, %v1337_v45, %v1338_v61 }
 0x30d   :  { %vm1302_vm13 = vcmp.eq.f32.partialorder %v1238_v23, %v1294_v48  ;;  %1424 = vbcast.lane.b32.xlu1 %v1294_v48, 256  ;;  %vm1359_vm15 = vcmp.lt.s32.totalorder %v1357_v63, %v1358_v6  ;;  %v1350_v17 = vsel %vm1349_vm7, %v1347_v49, %v1348_v47  ;;  %v1392_v22 = vsel %vm507_vm11, %v1340_v58, %v1391_v12 }
 0x30e   :  { %v1310_v7 = vsel %vm1302_vm13, %v2674_v15, 8  ;;  %vm1373_vm12 = vcmp.lt.s32.totalorder %v1371_v60, %v1372_v5  ;;  %vm1363_vm14 = vcmp.lt.s32.totalorder %v1361_v54, %v1362_v3  ;;  %v1360_v56 = vsel %vm1359_vm15, %v1357_v63, %v1358_v6 }
 0x30f   :  { %v1381_v10 = vsel %vm166_vm1, %v1310_v7, 2147483647  ;;  %v1374_v29 = vsel %vm1373_vm12, %v1371_v60, %v1372_v5  ;;  %v1364_v53 = vsel %vm1363_vm14, %v1361_v54, %v1362_v3  ;;  %v1393_v19 = vsel %vm509_vm3, %v1350_v17, %v1392_v22 }
 0x310   :  { %v1382_v11 = vrot.slane %v1381_v10, 4  ;;  %v1375_v13 = vrot.slane %v1374_v29, 2  ;;  %v1365_v59 = vrot.slane %v1364_v53, 2  ;;  %v1394_v32 = vsel %vm511_vm4, %v1360_v56, %v1393_v19 }
 0x311   :  { %vm3474_vm12 = vcmask 1046534   ;;  %vm3475_vm14 = vcmask 1047559   ;;  %v1442_v36 = vrot.slane %v1401_v35, %v2693_v40  ;;  %v1435_v50 = vcombine.high %v1401_v35, %v1401_v35 }
 0x312   :  { %vm1383_vm2 = vcmp.lt.s32.totalorder %v1381_v10, %v1382_v11  ;;  %vm1376_vm5 = vcmp.lt.s32.totalorder %v1374_v29, %v1375_v13  ;;  %vm1366_vm6 = vcmp.lt.s32.totalorder %v1364_v53, %v1365_v59 }
 0x313   :  { %v1384_v21 = vsel %vm1383_vm2, %v1381_v10, %v1382_v11  ;;  %v1377_v23 = vsel %vm1376_vm5, %v1374_v29, %v1375_v13  ;;  %v1367_v8 = vsel %vm1366_vm6, %v1364_v53, %v1365_v59  ;;  %v1450_v37 = vcombine.high %v1442_v36, %v1442_v36 }
 0x314   :  { %v1385_v24 = vrot.slane %v1384_v21, 2  ;;  %v1378_v27 = vrot.slane %v1377_v23, 1  ;;  %v1368_v9 = vrot.slane %v1367_v8, 1  ;;  %v1458_v39 = vrot.slane %v1442_v36, %v2693_v40 }
 0x315   :  { %v1472_v38 = vrot.slane %v1450_v37, %v2693_v40  ;;  %v1449_v48 = vrot.slane %v1435_v50, %v2693_v40 }
 0x316   :  { %vm1386_vm9 = vcmp.lt.s32.totalorder %v1384_v21, %v1385_v24  ;;  %vm1379_vm13 = vcmp.lt.s32.totalorder %v1377_v23, %v1378_v27  ;;  %vm1369_vm0 = vcmp.lt.s32.totalorder %v1367_v8, %v1368_v9  ;;  %v1480_v43 = vcombine.high %v1458_v39, %v1458_v39 }
 0x317   :  { %v1387_v30 = vsel %vm1386_vm9, %v1384_v21, %v1385_v24  ;;  %v1380_v31 = vsel %vm1379_vm13, %v1377_v23, %v1378_v27  ;;  %v1370_v25 = vsel %vm1369_vm0, %v1367_v8, %v1368_v9  ;;  %v1491_v41 = vrot.slane %v1472_v38, %v2681_v18 }
 0x318   :  { %v1388_v33 = vrot.slane %v1387_v30, 1  ;;  %v1395_v20 = vsel %vm513_vm8, %v1370_v25, %v1394_v32  ;;  %v1495_v55 = vrot.slane %v1480_v43, %v2681_v18  ;;  %v1487_v63 = vrot.slane %v1458_v39, %v2681_v18 }
 0x319   :  { %v1396_v16 = vsel %vm3474_vm12, %v1380_v31, %v1395_v20  ;;  %v1465_v7 = vrot.slane %v1449_v48, %v2693_v40  ;;  %v1482_v29 = vcombine.high %v1472_v38, %v1472_v38 }
 0x31a   :  { %vm1389_vm7 = vcmp.lt.s32.totalorder %v1387_v30, %v1388_v33 }
 0x31b   :  { %v1390_v26 = vsel %vm1389_vm7, %v1387_v30, %v1388_v33  ;;  %v1503_v59 = vrot.slane %v1465_v7, %v2681_v18  ;;  %v1499_v23 = vrot.slane %v1482_v29, %v2681_v18  ;;  %v1481_v39 = vcombine.high %v1465_v7, %v1465_v7 }
 0x31c   :  { %v1397_v34 = vsel %vm3475_vm14, %v1390_v26, %v1396_v16  ;;  %v1451_v26 = vcombine.high %v1449_v48, %v1449_v48 }
 0x31d   :  { %1399 = vst.msk [vmem:[#allocation3 + $0x20] sm:$0xff] %vm166_vm1, %v1397_v34 }
 0x350   :  { %v2573_v44 = vpop.f32.mrf.mxu1 }
 0x351   :  { %174 = vst.msk [vmem:[#allocation2 + $0x38] sm:$0xff] %vm166_vm1, %v2573_v44 }
 0x352   :  { %v157_v46 = vpop.f32.mrf.mxu1 }
 0x353   :  { %173 = vst.msk [vmem:[#allocation2 + $0x30] sm:$0xff] %vm166_vm1, %v157_v46 }
 0x363   :  { %v1407_v28 = vpop.permute.xlu0 %1406 }
 0x364   :  { %v1427_v42 = vadd.f32 %v2923_v4, %v1407_v28 }
 0x366   :  { %v1525_v45 = vadd.f32 %v1491_v41, %v1427_v42  ;;  %v1479_v42 = vrot.slane %v1451_v26, %v2693_v40 }
 0x367   :  { %v1410_v49 = vpop.permute.xlu1 %1409 }
 0x368   :  { %v1539_v51 = vsel %vm166_vm1, %v1525_v45, -inf  ;;  %v1404_v52 = vpop.permute.xlu0 %1403  ;;  %v1428_v57 = vadd.f32 %v2923_v4, %v1410_v49  ;;  %v1483_v48 = vcombine.high %v1479_v42, %v1479_v42 }
 0x369   :  { %v1540_v61 = vrot.slane %v1539_v51, 4  ;;  %v1426_v47 = vadd.f32 %v2923_v4, %v1404_v52 }
 0x36a   :  { %v1526_v0 = vadd.f32 %v1495_v55, %v1428_v57  ;;  %v1507_v57 = vrot.slane %v1479_v42, %v2681_v18  ;;  %v1515_v29 = vrot.slane %v1483_v48, %v2681_v18 }
 0x36b   :  { %v1524_v1 = vadd.f32 %v1487_v63, %v1426_v47  ;;  %v1541_v60 = vmax.f32 %v1539_v51, %v1540_v61  ;;  %v1511_v51 = vrot.slane %v1481_v39, %v2681_v18 }
 0x36c   :  { %v1546_v54 = vsel %vm166_vm1, %v1526_v0, -inf  ;;  %v1416_v58 = vpop.permute.xlu0 %1415 }
 0x36d   :  { %v1532_v5 = vsel %vm166_vm1, %v1524_v1, -inf  ;;  %v1547_v3 = vrot.slane %v1546_v54, 4  ;;  %v1542_v62 = vrot.slane %v1541_v60, 2  ;;  %v1430_v17 = vadd.f32 %v2923_v4, %v1416_v58  ;;  %v1413_v8 = vpop.permute.xlu1 %1412 }
 0x36e   :  { %v1533_v6 = vrot.slane %v1532_v5, 4  ;;  %v1429_v19 = vadd.f32 %v2923_v4, %v1413_v8 }
 0x36f   :  { %v1543_v10 = vmax.f32 %v1541_v60, %v1542_v62  ;;  %v1548_v2 = vmax.f32 %v1546_v54, %v1547_v3  ;;  %v3068_v56 = vadd.f32 %v1503_v59, %v1430_v17 }
 0x370   :  { %v1534_v53 = vmax.f32 %v1532_v5, %v1533_v6  ;;  %v3073_v31 = vadd.f32 %v1499_v23, %v1429_v19 }
 0x371   :  { %v1544_v11 = vrot.slane %v1543_v10, 1  ;;  %v1549_v12 = vrot.slane %v1548_v2, 2  ;;  %v1560_v30 = vsel %vm166_vm1, %v3068_v56, -inf }
 0x372   :  { %v1535_v13 = vrot.slane %v1534_v53, 2  ;;  %v1561_v33 = vrot.slane %v1560_v30, 4  ;;  %v1553_v16 = vsel %vm166_vm1, %v3073_v31, -inf }
 0x373   :  { %v1545_v21 = vmax.f32 %v1543_v10, %v1544_v11  ;;  %v1550_v22 = vmax.f32 %v1548_v2, %v1549_v12  ;;  %v1554_v34 = vrot.slane %v1553_v16, 4 }
 0x374   :  { %v1536_v24 = vmax.f32 %v1534_v53, %v1535_v13  ;;  %v1562_v38 = vmax.f32 %v1560_v30, %v1561_v33 }
 0x375   :  { %1699 = vbcast.lane.b32.xlu0 %v1545_v21, 256  ;;  %vm1589_vm15 = vcmp.eq.f32.partialorder %v1525_v45, %v1545_v21  ;;  %v1551_v27 = vrot.slane %v1550_v22, 1  ;;  %v1555_v41 = vmax.f32 %v1553_v16, %v1554_v34 }
 0x376   :  { %v1537_v9 = vrot.slane %v1536_v24, 1  ;;  %v1597_v32 = vsel %vm1589_vm15, %v2674_v15, 8  ;;  %v1563_v45 = vrot.slane %v1562_v38, 2 }
 0x377   :  { %v1552_v25 = vmax.f32 %v1550_v22, %v1551_v27  ;;  %v1614_v35 = vsel %vm166_vm1, %v1597_v32, 2147483647  ;;  %v1556_v49 = vrot.slane %v1555_v41, 2 }
 0x378   :  { %v1538_v20 = vmax.f32 %v1536_v24, %v1537_v9  ;;  %v1615_v43 = vrot.slane %v1614_v35, 4  ;;  %v1564_v50 = vmax.f32 %v1562_v38, %v1563_v45 }
 0x379   :  { %1702 = vbcast.lane.b32.xlu1 %v1552_v25, 256  ;;  %vm1590_vm2 = vcmp.eq.f32.partialorder %v1526_v0, %v1552_v25  ;;  %v1557_v47 = vmax.f32 %v1555_v41, %v1556_v49 }
 0x37a   :  { %1696 = vbcast.lane.b32.xlu0 %v1538_v20, 256  ;;  %vm1588_vm5 = vcmp.eq.f32.partialorder %v1524_v1, %v1538_v20  ;;  %v1598_v36 = vsel %vm1590_vm2, %v2674_v15, 8  ;;  %vm1616_vm6 = vcmp.lt.s32.totalorder %v1614_v35, %v1615_v43  ;;  %v1565_v63 = vrot.slane %v1564_v50, 1 }
 0x37b   :  { %v1596_v37 = vsel %vm1588_vm5, %v2674_v15, 8  ;;  %v1624_v44 = vsel %vm166_vm1, %v1598_v36, 2147483647  ;;  %v1422_v55 = vpop.permute.xlu0 %1421  ;;  %v1419_v61 = vpop.permute.xlu1 %1418  ;;  %v1617_v3 = vsel %vm1616_vm6, %v1614_v35, %v1615_v43  ;;  %v1558_v7 = vrot.slane %v1557_v47, 1 }
 0x37c   :  { %v1604_v28 = vsel %vm166_vm1, %v1596_v37, 2147483647  ;;  %v1625_v52 = vrot.slane %v1624_v44, 4  ;;  %v1432_v0 = vadd.f32 %v2923_v4, %v1422_v55  ;;  %v1431_v1 = vadd.f32 %v2923_v4, %v1419_v61 }
 0x37d   :  { %v1605_v46 = vrot.slane %v1604_v28, 4  ;;  %v1566_v60 = vmax.f32 %v1564_v50, %v1565_v63  ;;  %v1618_v58 = vrot.slane %v1617_v3, 2  ;;  %v1559_v22 = vmax.f32 %v1557_v47, %v1558_v7 }
 0x37e   :  { %v3088_v54 = vadd.f32 %v1511_v51, %v1432_v0  ;;  %v3090_v5 = vadd.f32 %v1507_v57, %v1431_v1  ;;  %vm1626_vm13 = vcmp.lt.s32.totalorder %v1624_v44, %v1625_v52 }
 0x37f   :  { %vm1606_vm9 = vcmp.lt.s32.totalorder %v1604_v28, %v1605_v46  ;;  %v1425_v62 = vpop.permute.xlu1 %1424  ;;  %1708 = vbcast.lane.b32.xlu0 %v1566_v60, 256  ;;  %vm1592_vm0 = vcmp.eq.f32.partialorder %v3068_v56, %v1566_v60  ;;  %v1627_v13 = vsel %vm1626_vm13, %v1624_v44, %v1625_v52  ;;  %1705 = vbcast.lane.b32.xlu1 %v1559_v22, 256 }
 0x380   :  { %v1607_v6 = vsel %vm1606_vm9, %v1604_v28, %v1605_v46  ;;  %v1574_v10 = vsel %vm166_vm1, %v3088_v54, -inf  ;;  %v1567_v2 = vsel %vm166_vm1, %v3090_v5, -inf  ;;  %v1433_v53 = vadd.f32 %v2923_v4, %v1425_v62 }
 0x381   :  { %v1575_v11 = vrot.slane %v1574_v10, 4  ;;  %v1568_v12 = vrot.slane %v1567_v2, 4  ;;  %v1608_v17 = vrot.slane %v1607_v6, 2  ;;  %v1600_v21 = vsel %vm1592_vm0, %v2674_v15, 8 }
 0x382   :  { %v3099_v59 = vadd.f32 %v1515_v29, %v1433_v53  ;;  %v1644_v23 = vsel %vm166_vm1, %v1600_v21, 2147483647  ;;  %v1628_v19 = vrot.slane %v1627_v13, 2  ;;  %vm1591_vm7 = vcmp.eq.f32.partialorder %v3073_v31, %v1559_v22 }
 0x383   :  { %v1576_v8 = vmax.f32 %v1574_v10, %v1575_v11  ;;  %v1569_v24 = vmax.f32 %v1567_v2, %v1568_v12  ;;  %v1645_v27 = vrot.slane %v1644_v23, 4  ;;  %v1599_v9 = vsel %vm1591_vm7, %v2674_v15, 8 }
 0x384   :  { %v1581_v56 = vsel %vm166_vm1, %v3099_v59, -inf  ;;  %vm1619_vm12 = vcmp.lt.s32.totalorder %v1617_v3, %v1618_v58  ;;  %vm1609_vm14 = vcmp.lt.s32.totalorder %v1607_v6, %v1608_v17  ;;  %v1634_v25 = vsel %vm166_vm1, %v1599_v9, 2147483647 }
 0x385   :  { %v1582_v4 = vrot.slane %v1581_v56, 4  ;;  %v1577_v30 = vrot.slane %v1576_v8, 2  ;;  %v1570_v32 = vrot.slane %v1569_v24, 2  ;;  %vm1646_vm15 = vcmp.lt.s32.totalorder %v1644_v23, %v1645_v27 }
 0x386   :  { %v1647_v33 = vsel %vm1646_vm15, %v1644_v23, %v1645_v27  ;;  %v1635_v20 = vrot.slane %v1634_v25, 4  ;;  %vm1629_vm2 = vcmp.lt.s32.totalorder %v1627_v13, %v1628_v19  ;;  %v1610_v35 = vsel %vm1609_vm14, %v1607_v6, %v1608_v17 }
 0x387   :  { %v1578_v16 = vmax.f32 %v1576_v8, %v1577_v30  ;;  %v1571_v26 = vmax.f32 %v1569_v24, %v1570_v32  ;;  %v1583_v34 = vmax.f32 %v1581_v56, %v1582_v4  ;;  %v1620_v37 = vsel %vm1619_vm12, %v1617_v3, %v1618_v58 }
 0x388   :  { %vm1636_vm5 = vcmp.lt.s32.totalorder %v1634_v25, %v1635_v20  ;;  %v1648_v38 = vrot.slane %v1647_v33, 2  ;;  %v1611_v44 = vrot.slane %v1610_v35, 1  ;;  %v1630_v45 = vsel %vm1629_vm2, %v1627_v13, %v1628_v19 }
 0x389   :  { %v1579_v36 = vrot.slane %v1578_v16, 1  ;;  %v1572_v31 = vrot.slane %v1571_v26, 1  ;;  %v1637_v39 = vsel %vm1636_vm5, %v1634_v25, %v1635_v20  ;;  %v1584_v28 = vrot.slane %v1583_v34, 2 }
 0x38a   :  { %v1638_v41 = vrot.slane %v1637_v39, 2  ;;  %v1621_v49 = vrot.slane %v1620_v37, 1  ;;  %vm1649_vm0 = vcmp.lt.s32.totalorder %v1647_v33, %v1648_v38  ;;  %v1631_v55 = vrot.slane %v1630_v45, 1 }
 0x38b   :  { %v1580_v42 = vmax.f32 %v1578_v16, %v1579_v36  ;;  %v1573_v43 = vmax.f32 %v1571_v26, %v1572_v31  ;;  %v1585_v46 = vmax.f32 %v1583_v34, %v1584_v28  ;;  %vm1612_vm7 = vcmp.lt.s32.totalorder %v1610_v35, %v1611_v44  ;;  %v1694_v16 = vld [vmem:[#allocation2 + $0x30] sm:$0xff] }
 0x38c   :  { %vm1639_vm6 = vcmp.lt.s32.totalorder %v1637_v39, %v1638_v41  ;;  %v1650_v1 = vsel %vm1649_vm0, %v1647_v33, %v1648_v38  ;;  %vm1622_vm12 = vcmp.lt.s32.totalorder %v1620_v37, %v1621_v49  ;;  %vm1632_vm2 = vcmp.lt.s32.totalorder %v1630_v45, %v1631_v55  ;;  %v3132_v38 = vld [vmem:[%s3456_s2] sm:$0xff] }
 0x38d   :  { %1714 = vbcast.lane.b32.xlu0 %v1580_v42, 256  ;;  %vm1594_vm9 = vcmp.eq.f32.partialorder %v3088_v54, %v1580_v42  ;;  %1711 = vbcast.lane.b32.xlu1 %v1573_v43, 256  ;;  %vm1593_vm13 = vcmp.eq.f32.partialorder %v3090_v5, %v1573_v43  ;;  %v1640_v50 = vsel %vm1639_vm6, %v1637_v39, %v1638_v41  ;;  %v1586_v0 = vrot.slane %v1585_v46, 1 }
 0x38e   :  { %v1602_v51 = vsel %vm1594_vm9, %v2674_v15, 8  ;;  %v1601_v52 = vsel %vm1593_vm13, %v2674_v15, 8  ;;  %v1641_v48 = vrot.slane %v1640_v50, 1  ;;  %v1613_v54 = vsel %vm1612_vm7, %v1610_v35, %v1611_v44 }
 0x38f   :  { %v1664_v57 = vsel %vm166_vm1, %v1602_v51, 2147483647  ;;  %v1654_v61 = vsel %vm166_vm1, %v1601_v52, 2147483647  ;;  %v1587_v60 = vmax.f32 %v1585_v46, %v1586_v0  ;;  %v1651_v62 = vrot.slane %v1650_v1, 1 }
 0x390   :  { %v1665_v63 = vrot.slane %v1664_v57, 4  ;;  %v1655_v47 = vrot.slane %v1654_v61, 4  ;;  %v1623_v10 = vsel %vm1622_vm12, %v1620_v37, %v1621_v49  ;;  %vm1642_vm6 = vcmp.lt.s32.totalorder %v1640_v50, %v1641_v48 }
 0x391   :  { %1717 = vbcast.lane.b32.xlu1 %v1587_v60, 256  ;;  %vm1595_vm5 = vcmp.eq.f32.partialorder %v3099_v59, %v1587_v60  ;;  %v1633_v29 = vsel %vm1632_vm2, %v1630_v45, %v1631_v55  ;;  %v1684_v11 = vsel %vm505_vm10, %v1623_v10, %v1613_v54  ;;  %vm1652_vm0 = vcmp.lt.s32.totalorder %v1650_v1, %v1651_v62 }
 0x392   :  { %vm1666_vm14 = vcmp.lt.s32.totalorder %v1664_v57, %v1665_v63  ;;  %vm1656_vm15 = vcmp.lt.s32.totalorder %v1654_v61, %v1655_v47  ;;  %v1603_v2 = vsel %vm1595_vm5, %v2674_v15, 8  ;;  %v1643_v17 = vsel %vm1642_vm6, %v1640_v50, %v1641_v48 }
 0x393   :  { %v1667_v5 = vsel %vm1666_vm14, %v1664_v57, %v1665_v63  ;;  %v1657_v3 = vsel %vm1656_vm15, %v1654_v61, %v1655_v47  ;;  %v1674_v53 = vsel %vm166_vm1, %v1603_v2, 2147483647  ;;  %v1685_v59 = vsel %vm507_vm11, %v1633_v29, %v1684_v11 }
 0x394   :  { %v1668_v6 = vrot.slane %v1667_v5, 2  ;;  %v1658_v7 = vrot.slane %v1657_v3, 2  ;;  %v1675_v13 = vrot.slane %v1674_v53, 4  ;;  %v1653_v8 = vsel %vm1652_vm0, %v1650_v1, %v1651_v62 }
 0x395   :  { %v1686_v24 = vsel %vm509_vm3, %v1643_v17, %v1685_v59  ;;  %vm3476_vm5 = vcmask 1046534   ;;  %vm3477_vm6 = vcmask 1047559   ;;  %v1735_v26 = vrot.slane %v1694_v16, %v2693_v40 }
 0x396   :  { %vm1669_vm9 = vcmp.lt.s32.totalorder %v1667_v5, %v1668_v6  ;;  %vm1659_vm13 = vcmp.lt.s32.totalorder %v1657_v3, %v1658_v7  ;;  %vm1676_vm7 = vcmp.lt.s32.totalorder %v1674_v53, %v1675_v13  ;;  %v1687_v27 = vsel %vm511_vm4, %v1653_v8, %v1686_v24 }
 0x397   :  { %v1670_v12 = vsel %vm1669_vm9, %v1667_v5, %v1668_v6  ;;  %v1660_v58 = vsel %vm1659_vm13, %v1657_v3, %v1658_v7  ;;  %v1677_v23 = vsel %vm1676_vm7, %v1674_v53, %v1675_v13  ;;  %v1743_v34 = vcombine.high %v1735_v26, %v1735_v26 }
 0x398   :  { %v1671_v21 = vrot.slane %v1670_v12, 1  ;;  %v1661_v22 = vrot.slane %v1660_v58, 1  ;;  %v1678_v56 = vrot.slane %v1677_v23, 2  ;;  %v1751_v36 = vrot.slane %v1735_v26, %v2693_v40 }
 0x399   :  { %v1765_v35 = vrot.slane %v1743_v34, %v2693_v40  ;;  %v1728_v49 = vcombine.high %v1694_v16, %v1694_v16 }
 0x39a   :  { %vm1662_vm12 = vcmp.lt.s32.totalorder %v1660_v58, %v1661_v22  ;;  %vm1672_vm14 = vcmp.lt.s32.totalorder %v1670_v12, %v1671_v21  ;;  %vm1679_vm15 = vcmp.lt.s32.totalorder %v1677_v23, %v1678_v56  ;;  %v1773_v28 = vcombine.high %v1751_v36, %v1751_v36 }
 0x39b   :  { %v1663_v19 = vsel %vm1662_vm12, %v1660_v58, %v1661_v22  ;;  %v1680_v4 = vsel %vm1679_vm15, %v1677_v23, %v1678_v56  ;;  %v1673_v9 = vsel %vm1672_vm14, %v1670_v12, %v1671_v21  ;;  %v1784_v31 = vrot.slane %v1765_v35, %v2681_v18 }
 0x39c   :  { %v1688_v30 = vsel %vm513_vm8, %v1663_v19, %v1687_v27  ;;  %v1681_v32 = vrot.slane %v1680_v4, 1  ;;  %v1788_v45 = vrot.slane %v1773_v28, %v2681_v18  ;;  %v1780_v51 = vrot.slane %v1751_v36, %v2681_v18 }
 0x39d   :  { %v1689_v25 = vsel %vm3476_vm5, %v1673_v9, %v1688_v30  ;;  %v1742_v47 = vrot.slane %v1728_v49, %v2693_v40  ;;  %v1775_v58 = vcombine.high %v1765_v35, %v1765_v35 }
 0x39e   :  { %vm1682_vm2 = vcmp.lt.s32.totalorder %v1680_v4, %v1681_v32 }
 0x39f   :  { %v1683_v33 = vsel %vm1682_vm2, %v1680_v4, %v1681_v32  ;;  %v1758_v3 = vrot.slane %v1742_v47, %v2693_v40  ;;  %v1792_v56 = vrot.slane %v1775_v58, %v2681_v18  ;;  %v1744_v30 = vcombine.high %v1742_v47, %v1742_v47 }
 0x3a0   :  { %v1690_v20 = vsel %vm3477_vm6, %v1683_v33, %v1689_v25 }
 0x3a1   :  { %1692 = vst.msk [vmem:[#allocation3 + $0x28] sm:$0xff] %vm166_vm1, %v1690_v20  ;;  %v1796_v11 = vrot.slane %v1758_v3, %v2681_v18  ;;  %v1774_v36 = vcombine.high %v1758_v3, %v1758_v3 }
 0x3e7   :  { %v1700_v37 = vpop.permute.xlu0 %1699 }
 0x3e8   :  { %v1720_v39 = vadd.f32 %v3132_v38, %v1700_v37 }
 0x3ea   :  { %v1818_v41 = vadd.f32 %v1784_v31, %v1720_v39  ;;  %v1772_v31 = vrot.slane %v1744_v30, %v2693_v40 }
 0x3eb   :  { %v1703_v42 = vpop.permute.xlu1 %1702 }
 0x3ec   :  { %v1832_v43 = vsel %vm166_vm1, %v1818_v41, -inf  ;;  %v1697_v44 = vpop.permute.xlu0 %1696  ;;  %v1721_v46 = vadd.f32 %v3132_v38, %v1703_v42 }
 0x3ed   :  { %v1833_v50 = vrot.slane %v1832_v43, 4  ;;  %v1719_v52 = vadd.f32 %v3132_v38, %v1697_v44 }
 0x3ee   :  { %v1819_v55 = vadd.f32 %v1788_v45, %v1721_v46 }
 0x3ef   :  { %v1817_v57 = vadd.f32 %v1780_v51, %v1719_v52  ;;  %v1834_v61 = vmax.f32 %v1832_v43, %v1833_v50  ;;  %v1804_v43 = vrot.slane %v1774_v36, %v2681_v18  ;;  %v1800_v51 = vrot.slane %v1772_v31, %v2681_v18 }
 0x3f0   :  { %v1839_v63 = vsel %vm166_vm1, %v1819_v55, -inf }
 0x3f1   :  { %v1825_v0 = vsel %vm166_vm1, %v1817_v57, -inf  ;;  %v1840_v1 = vrot.slane %v1839_v63, 4  ;;  %v1835_v48 = vrot.slane %v1834_v61, 2  ;;  %v1709_v2 = vpop.permute.xlu0 %1708  ;;  %v1706_v19 = vpop.permute.xlu1 %1705 }
 0x3f2   :  { %v1826_v60 = vrot.slane %v1825_v0, 4  ;;  %v1723_v12 = vadd.f32 %v3132_v38, %v1709_v2  ;;  %v1722_v9 = vadd.f32 %v3132_v38, %v1706_v19 }
 0x3f3   :  { %v1836_v54 = vmax.f32 %v1834_v61, %v1835_v48  ;;  %v1841_v5 = vmax.f32 %v1839_v63, %v1840_v1 }
 0x3f4   :  { %v1827_v62 = vmax.f32 %v1825_v0, %v1826_v60  ;;  %v3146_v21 = vadd.f32 %v1796_v11, %v1723_v12  ;;  %v3155_v33 = vadd.f32 %v1792_v56, %v1722_v9 }
 0x3f5   :  { %v1837_v6 = vrot.slane %v1836_v54, 1  ;;  %v1842_v7 = vrot.slane %v1841_v5, 2 }
 0x3f6   :  { %v1828_v10 = vrot.slane %v1827_v62, 2  ;;  %v1853_v24 = vsel %vm166_vm1, %v3146_v21, -inf  ;;  %v1846_v35 = vsel %vm166_vm1, %v3155_v33, -inf }
 0x3f7   :  { %v1838_v29 = vmax.f32 %v1836_v54, %v1837_v6  ;;  %v1843_v53 = vmax.f32 %v1841_v5, %v1842_v7  ;;  %v1854_v4 = vrot.slane %v1853_v24, 4  ;;  %v1847_v37 = vrot.slane %v1846_v35, 4 }
 0x3f8   :  { %v1829_v13 = vmax.f32 %v1827_v62, %v1828_v10 }
 0x3f9   :  { %1992 = vbcast.lane.b32.xlu0 %v1838_v29, 256  ;;  %vm1882_vm9 = vcmp.eq.f32.partialorder %v1818_v41, %v1838_v29  ;;  %v1844_v17 = vrot.slane %v1843_v53, 1  ;;  %v1855_v34 = vmax.f32 %v1853_v24, %v1854_v4  ;;  %v1848_v49 = vmax.f32 %v1846_v35, %v1847_v37 }
 0x3fa   :  { %v1890_v22 = vsel %vm1882_vm9, %v2674_v15, 8  ;;  %v1830_v59 = vrot.slane %v1829_v13, 1 }
 0x3fb   :  { %v1907_v23 = vsel %vm166_vm1, %v1890_v22, 2147483647  ;;  %v1845_v8 = vmax.f32 %v1843_v53, %v1844_v17  ;;  %v1856_v28 = vrot.slane %v1855_v34, 2  ;;  %v1849_v48 = vrot.slane %v1848_v49, 2 }
 0x3fc   :  { %v1831_v27 = vmax.f32 %v1829_v13, %v1830_v59  ;;  %v1908_v32 = vrot.slane %v1907_v23, 4 }
 0x3fd   :  { %1995 = vbcast.lane.b32.xlu1 %v1845_v8, 256  ;;  %vm1883_vm13 = vcmp.eq.f32.partialorder %v1819_v55, %v1845_v8  ;;  %v1857_v42 = vmax.f32 %v1855_v34, %v1856_v28  ;;  %v1776_v55 = vcombine.high %v1772_v31, %v1772_v31  ;;  %v1850_v2 = vmax.f32 %v1848_v49, %v1849_v48 }
 0x3fe   :  { %1989 = vbcast.lane.b32.xlu0 %v1831_v27, 256  ;;  %vm1881_vm0 = vcmp.eq.f32.partialorder %v1817_v57, %v1831_v27  ;;  %v1891_v25 = vsel %vm1883_vm13, %v2674_v15, 8  ;;  %vm1909_vm7 = vcmp.lt.s32.totalorder %v1907_v23, %v1908_v32 }
 0x3ff   :  { %v1889_v20 = vsel %vm1881_vm0, %v2674_v15, 8  ;;  %v1917_v26 = vsel %vm166_vm1, %v1891_v25, 2147483647  ;;  %v1715_v44 = vpop.permute.xlu0 %1714  ;;  %v1712_v45 = vpop.permute.xlu1 %1711  ;;  %v1910_v46 = vsel %vm1909_vm7, %v1907_v23, %v1908_v32  ;;  %v1858_v57 = vrot.slane %v1857_v42, 1 }
 0x400   :  { %v1897_v16 = vsel %vm166_vm1, %v1889_v20, 2147483647  ;;  %v1918_v41 = vrot.slane %v1917_v26, 4  ;;  %v1725_v50 = vadd.f32 %v3132_v38, %v1715_v44  ;;  %v1724_v52 = vadd.f32 %v3132_v38, %v1712_v45 }
 0x401   :  { %v1898_v39 = vrot.slane %v1897_v16, 4  ;;  %v1911_v47 = vrot.slane %v1910_v46, 2  ;;  %v1859_v1 = vmax.f32 %v1857_v42, %v1858_v57  ;;  %v1808_v6 = vrot.slane %v1776_v55, %v2681_v18 }
 0x402   :  { %vm1919_vm14 = vcmp.lt.s32.totalorder %v1917_v26, %v1918_v41  ;;  %v1823_v61 = vadd.f32 %v1804_v43, %v1725_v50  ;;  %v3167_v63 = vadd.f32 %v1800_v51, %v1724_v52  ;;  %v1851_v13 = vrot.slane %v1850_v2, 1 }
 0x403   :  { %vm1899_vm12 = vcmp.lt.s32.totalorder %v1897_v16, %v1898_v39  ;;  %v1920_v5 = vsel %vm1919_vm14, %v1917_v26, %v1918_v41  ;;  %2001 = vbcast.lane.b32.xlu0 %v1859_v1, 256  ;;  %v1718_v7 = vpop.permute.xlu1 %1717  ;;  %vm1912_vm15 = vcmp.lt.s32.totalorder %v1910_v46, %v1911_v47  ;;  %vm1885_vm2 = vcmp.eq.f32.partialorder %v3146_v21, %v1859_v1 }
 0x404   :  { %v1900_v0 = vsel %vm1899_vm12, %v1897_v16, %v1898_v39  ;;  %v1867_v60 = vsel %vm166_vm1, %v1823_v61, -inf  ;;  %v1860_v54 = vsel %vm166_vm1, %v3167_v63, -inf  ;;  %v1726_v29 = vadd.f32 %v3132_v38, %v1718_v7 }
 0x405   :  { %v1868_v3 = vrot.slane %v1867_v60, 4  ;;  %v1861_v62 = vrot.slane %v1860_v54, 4  ;;  %v1901_v10 = vrot.slane %v1900_v0, 2  ;;  %v1921_v53 = vrot.slane %v1920_v5, 2 }
 0x406   :  { %v1893_v11 = vsel %vm1885_vm2, %v2674_v15, 8  ;;  %v3177_v22 = vadd.f32 %v1808_v6, %v1726_v29  ;;  %v3179_v8 = vsel %vm1912_vm15, %v1910_v46, %v1911_v47  ;;  %v1852_v24 = vmax.f32 %v1850_v2, %v1851_v13 }
 0x407   :  { %v1869_v12 = vmax.f32 %v1867_v60, %v1868_v3  ;;  %v1937_v58 = vsel %vm166_vm1, %v1893_v11, 2147483647  ;;  %v1862_v17 = vmax.f32 %v1860_v54, %v1861_v62  ;;  %vm1902_vm5 = vcmp.lt.s32.totalorder %v1900_v0, %v1901_v10 }
 0x408   :  { %v1938_v59 = vrot.slane %v1937_v58, 4  ;;  %v1874_v56 = vsel %vm166_vm1, %v3177_v22, -inf  ;;  %vm1922_vm6 = vcmp.lt.s32.totalorder %v1920_v5, %v1921_v53  ;;  %1998 = vbcast.lane.b32.xlu1 %v1852_v24, 256  ;;  %vm1884_vm13 = vcmp.eq.f32.partialorder %v3155_v33, %v1852_v24 }
 0x409   :  { %v1870_v23 = vrot.slane %v1869_v12, 2  ;;  %v1863_v21 = vrot.slane %v1862_v17, 2  ;;  %v1875_v27 = vrot.slane %v1874_v56, 4  ;;  %v1903_v30 = vsel %vm1902_vm5, %v1900_v0, %v1901_v10 }
 0x40a   :  { %vm1939_vm9 = vcmp.lt.s32.totalorder %v1937_v58, %v1938_v59  ;;  %v1892_v25 = vsel %vm1884_vm13, %v2674_v15, 8  ;;  %v1923_v16 = vsel %vm1922_vm6, %v1920_v5, %v1921_v53  ;;  %v1914_v37 = vrot.slane %v3179_v8, 1 }
 0x40b   :  { %v1871_v19 = vmax.f32 %v1869_v12, %v1870_v23  ;;  %v1940_v4 = vsel %vm1939_vm9, %v1937_v58, %v1938_v59  ;;  %v1864_v9 = vmax.f32 %v1862_v17, %v1863_v21  ;;  %v1927_v26 = vsel %vm166_vm1, %v1892_v25, 2147483647 }
 0x40c   :  { %v1941_v32 = vrot.slane %v1940_v4, 2  ;;  %v1876_v35 = vmax.f32 %v1874_v56, %v1875_v27  ;;  %v1928_v36 = vrot.slane %v1927_v26, 4  ;;  %v1904_v39 = vrot.slane %v1903_v30, 1 }
 0x40d   :  { %v1872_v20 = vrot.slane %v1871_v19, 1  ;;  %v1865_v34 = vrot.slane %v1864_v9, 1  ;;  %v1924_v42 = vrot.slane %v1923_v16, 1  ;;  %vm3197_vm2 = vcmp.lt.s32.totalorder %v3179_v8, %v1914_v37 }
 0x40e   :  { %v1877_v41 = vrot.slane %v1876_v35, 2  ;;  %vm3187_vm0 = vcmp.lt.s32.totalorder %v1940_v4, %v1941_v32  ;;  %vm1929_vm7 = vcmp.lt.s32.totalorder %v1927_v26, %v1928_v36  ;;  %vm1905_vm15 = vcmp.lt.s32.totalorder %v1903_v30, %v1904_v39 }
 0x40f   :  { %v1873_v31 = vmax.f32 %v1871_v19, %v1872_v20  ;;  %v1866_v28 = vmax.f32 %v1864_v9, %v1865_v34  ;;  %v1930_v43 = vsel %vm1929_vm7, %v1927_v26, %v1928_v36  ;;  %vm3203_vm6 = vcmp.lt.s32.totalorder %v1923_v16, %v1924_v42 }
 0x410   :  { %v1878_v45 = vmax.f32 %v1876_v35, %v1877_v41  ;;  %v1931_v46 = vrot.slane %v1930_v43, 2  ;;  %v1906_v48 = vsel %vm1905_vm15, %v1903_v30, %v1904_v39  ;;  %v1916_v10 = vsel %vm3197_vm2, %v3179_v8, %v1914_v37 }
 0x411   :  { %2007 = vbcast.lane.b32.xlu0 %v1873_v31, 256  ;;  %vm1887_vm12 = vcmp.eq.f32.partialorder %v1823_v61, %v1873_v31  ;;  %2004 = vbcast.lane.b32.xlu1 %v1866_v28, 256  ;;  %vm1886_vm14 = vcmp.eq.f32.partialorder %v3167_v63, %v1866_v28  ;;  %v1943_v61 = vsel %vm3187_vm0, %v1940_v4, %v1941_v32 }
 0x412   :  { %v1895_v44 = vsel %vm1887_vm12, %v2674_v15, 8  ;;  %v1894_v50 = vsel %vm1886_vm14, %v2674_v15, 8  ;;  %v1879_v55 = vrot.slane %v1878_v45, 1  ;;  %vm1932_vm5 = vcmp.lt.s32.totalorder %v1930_v43, %v1931_v46 }
 0x413   :  { %v1957_v49 = vsel %vm166_vm1, %v1895_v44, 2147483647  ;;  %v1947_v52 = vsel %vm166_vm1, %v1894_v50, 2147483647  ;;  %v1933_v0 = vsel %vm1932_vm5, %v1930_v43, %v1931_v46  ;;  %v1944_v5 = vrot.slane %v1943_v61, 1 }
 0x414   :  { %v1958_v51 = vrot.slane %v1957_v49, 4  ;;  %v1948_v63 = vrot.slane %v1947_v52, 4  ;;  %v1880_v1 = vmax.f32 %v1878_v45, %v1879_v55  ;;  %v1934_v60 = vrot.slane %v1933_v0, 1 }
 0x415   :  { %v1926_v2 = vsel %vm3203_vm6, %v1923_v16, %v1924_v42  ;;  %v1977_v53 = vsel %vm505_vm10, %v1916_v10, %v1906_v48  ;;  %vm1945_vm15 = vcmp.lt.s32.totalorder %v1943_v61, %v1944_v5  ;;  %v1987_v16 = vld [vmem:[#allocation2 + $0x38] sm:$0xff] }
 0x416   :  { %vm1959_vm9 = vcmp.lt.s32.totalorder %v1957_v49, %v1958_v51  ;;  %vm1949_vm13 = vcmp.lt.s32.totalorder %v1947_v52, %v1948_v63  ;;  %2010 = vbcast.lane.b32.xlu1 %v1880_v1, 256  ;;  %vm1888_vm7 = vcmp.eq.f32.partialorder %v3177_v22, %v1880_v1  ;;  %vm1935_vm0 = vcmp.lt.s32.totalorder %v1933_v0, %v1934_v60 }
 0x417   :  { %v1960_v54 = vsel %vm1959_vm9, %v1957_v49, %v1958_v51  ;;  %v1950_v62 = vsel %vm1949_vm13, %v1947_v52, %v1948_v63  ;;  %v1896_v7 = vsel %vm1888_vm7, %v2674_v15, 8  ;;  %v1936_v58 = vsel %vm1935_vm0, %v1933_v0, %v1934_v60 }
 0x418   :  { %v1961_v3 = vrot.slane %v1960_v54, 2  ;;  %v1951_v6 = vrot.slane %v1950_v62, 2  ;;  %v1967_v29 = vsel %vm166_vm1, %v1896_v7, 2147483647  ;;  %v1978_v59 = vsel %vm507_vm11, %v1926_v2, %v1977_v53 }
 0x419   :  { %v1968_v12 = vrot.slane %v1967_v29, 4  ;;  %v1946_v8 = vsel %vm1945_vm15, %v1943_v61, %v1944_v5  ;;  %v1979_v24 = vsel %vm509_vm3, %v1936_v58, %v1978_v59  ;;  %vm3484_vm7 = vcmask 1046534  }
 0x41a   :  { %vm1962_vm12 = vcmp.lt.s32.totalorder %v1960_v54, %v1961_v3  ;;  %vm1952_vm14 = vcmp.lt.s32.totalorder %v1950_v62, %v1951_v6  ;;  %v1980_v19 = vsel %vm511_vm4, %v1946_v8, %v1979_v24  ;;  %vm3485_vm0 = vcmask 1047559  }
 0x41b   :  { %v1963_v11 = vsel %vm1962_vm12, %v1960_v54, %v1961_v3  ;;  %v1953_v17 = vsel %vm1952_vm14, %v1950_v62, %v1951_v6  ;;  %vm1969_vm5 = vcmp.lt.s32.totalorder %v1967_v29, %v1968_v12  ;;  %v2028_v26 = vrot.slane %v1987_v16, %v2693_v40 }
 0x41c   :  { %v1964_v13 = vrot.slane %v1963_v11, 1  ;;  %v1954_v22 = vrot.slane %v1953_v17, 1  ;;  %v1970_v23 = vsel %vm1969_vm5, %v1967_v29, %v1968_v12  ;;  %v2021_v57 = vcombine.high %v1987_v16, %v1987_v16 }
 0x41d   :  { %v1971_v21 = vrot.slane %v1970_v23, 2  ;;  %v2036_v34 = vcombine.high %v2028_v26, %v2028_v26  ;;  %v2044_v36 = vrot.slane %v2028_v26, %v2693_v40 }
 0x41e   :  { %vm1955_vm2 = vcmp.lt.s32.totalorder %v1953_v17, %v1954_v22  ;;  %vm1965_vm6 = vcmp.lt.s32.totalorder %v1963_v11, %v1964_v13  ;;  %v2035_v54 = vrot.slane %v2021_v57, %v2693_v40 }
 0x41f   :  { %v1956_v56 = vsel %vm1955_vm2, %v1953_v17, %v1954_v22  ;;  %vm1972_vm9 = vcmp.lt.s32.totalorder %v1970_v23, %v1971_v21  ;;  %v1966_v4 = vsel %vm1965_vm6, %v1963_v11, %v1964_v13  ;;  %v2058_v35 = vrot.slane %v2036_v34, %v2693_v40  ;;  %v3254_v34 = vld [vmem:[%s3457_s4] ss:$0 sm:$0xff] }
 0x420   :  { %v1973_v27 = vsel %vm1972_vm9, %v1970_v23, %v1971_v21  ;;  %v1981_v9 = vsel %vm513_vm8, %v1956_v56, %v1980_v19  ;;  %v2066_v28 = vcombine.high %v2044_v36, %v2044_v36  ;;  %v2073_v49 = vrot.slane %v2044_v36, %v2681_v18 }
 0x421   :  { %v1974_v30 = vrot.slane %v1973_v27, 1  ;;  %v1982_v32 = vsel %vm3484_vm7, %v1966_v4, %v1981_v9  ;;  %v2077_v37 = vrot.slane %v2058_v35, %v2681_v18  ;;  %v2051_v2 = vrot.slane %v2035_v54, %v2693_v40 }
 0x422   :  { %v2081_v44 = vrot.slane %v2066_v28, %v2681_v18  ;;  %v2068_v21 = vcombine.high %v2058_v35, %v2058_v35 }
 0x423   :  { %vm1975_vm13 = vcmp.lt.s32.totalorder %v1973_v27, %v1974_v30  ;;  %v2089_v59 = vrot.slane %v2051_v2, %v2681_v18  ;;  %v2067_v36 = vcombine.high %v2051_v2, %v2051_v2 }
 0x424   :  { %v1976_v25 = vsel %vm1975_vm13, %v1973_v27, %v1974_v30  ;;  %v2085_v16 = vrot.slane %v2068_v21, %v2681_v18 }
 0x425   :  { %v1983_v20 = vsel %vm3485_vm0, %v1976_v25, %v1982_v32  ;;  %v2037_v32 = vcombine.high %v2035_v54, %v2035_v54 }
 0x426   :  { %1985 = vst.msk [vmem:[#allocation3 + $0x30] sm:$0xff] %vm166_vm1, %v1983_v20 }
 0x46b   :  { %v1993_v31 = vpop.permute.xlu0 %1992 }
 0x46c   :  { %v2013_v39 = vadd.f32 %v3132_v38, %v1993_v31 }
 0x46e   :  { %v2111_v41 = vadd.f32 %v2077_v37, %v2013_v39 }
 0x46f   :  { %v1996_v42 = vpop.permute.xlu1 %1995 }
 0x470   :  { %v2125_v33 = vsel %vm166_vm1, %v2111_v41, -inf  ;;  %v1990_v43 = vpop.permute.xlu0 %1989  ;;  %v2014_v45 = vadd.f32 %v3132_v38, %v1996_v42  ;;  %v2065_v42 = vrot.slane %v2037_v32, %v2693_v40  ;;  %v2097_v40 = vrot.slane %v2067_v36, %v2681_v18 }
 0x471   :  { %v2126_v46 = vrot.slane %v2125_v33, 4  ;;  %v2012_v50 = vadd.f32 %v3132_v38, %v1990_v43 }
 0x472   :  { %v2112_v51 = vadd.f32 %v2081_v44, %v2014_v45 }
 0x473   :  { %v2127_v52 = vmax.f32 %v2125_v33, %v2126_v46  ;;  %v2110_v55 = vadd.f32 %v2073_v49, %v2012_v50 }
 0x474   :  { %v2132_v61 = vsel %vm166_vm1, %v2112_v51, -inf }
 0x475   :  { %v2128_v63 = vrot.slane %v2127_v52, 2  ;;  %v2118_v47 = vsel %vm166_vm1, %v2110_v55, -inf  ;;  %v2133_v0 = vrot.slane %v2132_v61, 4  ;;  %v2002_v11 = vpop.permute.xlu0 %2001 }
 0x476   :  { %v2119_v1 = vrot.slane %v2118_v47, 4  ;;  %v2016_v13 = vadd.f32 %v3132_v38, %v2002_v11 }
 0x477   :  { %v2129_v48 = vmax.f32 %v2127_v52, %v2128_v63  ;;  %v2134_v60 = vmax.f32 %v2132_v61, %v2133_v0  ;;  %v2093_v0 = vrot.slane %v2065_v42, %v2681_v18 }
 0x478   :  { %v2120_v5 = vmax.f32 %v2118_v47, %v2119_v1  ;;  %v3241_v24 = vadd.f32 %v2089_v59, %v2016_v13  ;;  %v2069_v1 = vcombine.high %v2065_v42, %v2065_v42 }
 0x479   :  { %v2130_v3 = vrot.slane %v2129_v48, 1  ;;  %v2135_v62 = vrot.slane %v2134_v60, 2 }
 0x47a   :  { %v2121_v6 = vrot.slane %v2120_v5, 2  ;;  %v1999_v30 = vpop.permute.xlu1 %1998  ;;  %v2146_v20 = vsel %vm166_vm1, %v3241_v24, -inf  ;;  %v2101_v11 = vrot.slane %v2069_v1, %v2681_v18 }
 0x47b   :  { %v2131_v7 = vmax.f32 %v2129_v48, %v2130_v3  ;;  %v2136_v10 = vmax.f32 %v2134_v60, %v2135_v62  ;;  %v2015_v26 = vadd.f32 %v3132_v38, %v1999_v30  ;;  %v2147_v35 = vrot.slane %v2146_v20, 4 }
 0x47c   :  { %v2122_v29 = vmax.f32 %v2120_v5, %v2121_v6 }
 0x47d   :  { %vm2175_vm12 = vcmp.eq.f32.partialorder %v2111_v41, %v2131_v7  ;;  %v2137_v53 = vrot.slane %v2136_v10, 1  ;;  %v3256_v39 = vadd.f32 %v2085_v16, %v2015_v26  ;;  %v2148_v41 = vmax.f32 %v2146_v20, %v2147_v35 }
 0x47e   :  { %v2183_v12 = vsel %vm2175_vm12, %v2674_v15, 8  ;;  %v2123_v58 = vrot.slane %v2122_v29, 1  ;;  %v3260_v33 = vadd.f32 %v3254_v34, %v2131_v7 }
 0x47f   :  { %v2200_v17 = vsel %vm166_vm1, %v2183_v12, 2147483647  ;;  %v2138_v22 = vmax.f32 %v2136_v10, %v2137_v53  ;;  %v2139_v44 = vsel %vm166_vm1, %v3256_v39, -inf  ;;  %v2149_v50 = vrot.slane %v2148_v41, 2 }
 0x480   :  { %v2201_v23 = vrot.slane %v2200_v17, 4  ;;  %v2124_v8 = vmax.f32 %v2122_v29, %v2123_v58  ;;  %v2302_v48 = vrot.slane %v3260_v33, 7 }
 0x481   :  { %vm2176_vm14 = vcmp.eq.f32.partialorder %v2112_v51, %v2138_v22  ;;  %v3263_v43 = vadd.f32 %v3254_v34, %v2138_v22  ;;  %v2140_v51 = vrot.slane %v2139_v44, 4  ;;  %v2150_v63 = vmax.f32 %v2148_v41, %v2149_v50 }
 0x482   :  { %vm2174_vm15 = vcmp.eq.f32.partialorder %v2110_v55, %v2124_v8  ;;  %v2184_v56 = vsel %vm2176_vm14, %v2674_v15, 8  ;;  %vm2202_vm5 = vcmp.lt.s32.totalorder %v2200_v17, %v2201_v23  ;;  %v3268_v57 = vadd.f32 %v3254_v34, %v2124_v8 }
 0x483   :  { %v2182_v19 = vsel %vm2174_vm15, %v2674_v15, 8  ;;  %v2210_v27 = vsel %vm166_vm1, %v2184_v56, 2147483647  ;;  %v2203_v31 = vsel %vm2202_vm5, %v2200_v17, %v2201_v23  ;;  %v2008_v45 = vpop.permute.xlu0 %2007  ;;  %v2005_v52 = vpop.permute.xlu1 %2004  ;;  %v2141_v47 = vmax.f32 %v2139_v44, %v2140_v51 }
 0x484   :  { %v2190_v4 = vsel %vm166_vm1, %v2182_v19, 2147483647  ;;  %v2211_v9 = vrot.slane %v2210_v27, 4  ;;  %v2204_v46 = vrot.slane %v2203_v31, 2  ;;  %v2018_v61 = vadd.f32 %v3132_v38, %v2008_v45 }
 0x485   :  { %v2191_v25 = vrot.slane %v2190_v4, 4  ;;  %v2304_v60 = vrot.slane %v3263_v43, 6  ;;  %v2017_v5 = vadd.f32 %v3132_v38, %v2005_v52  ;;  %v2151_v3 = vrot.slane %v2150_v63, 1 }
 0x486   :  { %vm2212_vm2 = vcmp.lt.s32.totalorder %v2210_v27, %v2211_v9  ;;  %v3275_v54 = vadd.f32 %v2097_v40, %v2018_v61  ;;  %vm2205_vm9 = vcmp.lt.s32.totalorder %v2203_v31, %v2204_v46  ;;  %v2142_v62 = vrot.slane %v2141_v47, 2 }
 0x487   :  { %vm2192_vm6 = vcmp.lt.s32.totalorder %v2190_v4, %v2191_v25  ;;  %v2213_v37 = vsel %vm2212_vm2, %v2210_v27, %v2211_v9  ;;  %v2303_v6 = vsel %vm505_vm10, %v2302_v48, %v3268_v57  ;;  %v3282_v10 = vadd.f32 %v2093_v0, %v2017_v5 }
 0x488   :  { %v2193_v28 = vsel %vm2192_vm6, %v2190_v4, %v2191_v25  ;;  %v2214_v49 = vrot.slane %v2213_v37, 2  ;;  %v2160_v7 = vsel %vm166_vm1, %v3275_v54, -inf  ;;  %v2152_v2 = vmax.f32 %v2150_v63, %v2151_v3  ;;  %v2011_v12 = vpop.permute.xlu1 %2010 }
 0x489   :  { %v2194_v55 = vrot.slane %v2193_v28, 2  ;;  %v2143_v29 = vmax.f32 %v2141_v47, %v2142_v62  ;;  %v2161_v53 = vrot.slane %v2160_v7, 4  ;;  %v2206_v58 = vsel %vm2205_vm9, %v2203_v31, %v2204_v46 }
 0x48a   :  { %vm2215_vm13 = vcmp.lt.s32.totalorder %v2213_v37, %v2214_v49  ;;  %v2153_v17 = vsel %vm166_vm1, %v3282_v10, -inf  ;;  %v2019_v22 = vadd.f32 %v3132_v38, %v2011_v12  ;;  %vm2178_vm0 = vcmp.eq.f32.partialorder %v3241_v24, %v2152_v2 }
 0x48b   :  { %vm2195_vm7 = vcmp.lt.s32.totalorder %v2193_v28, %v2194_v55  ;;  %v2216_v13 = vsel %vm2215_vm13, %v2213_v37, %v2214_v49  ;;  %v2144_v23 = vrot.slane %v2143_v29, 1  ;;  %v2305_v8 = vsel %vm507_vm11, %v2304_v60, %v2303_v6 }
 0x48c   :  { %v2196_v59 = vsel %vm2195_vm7, %v2193_v28, %v2194_v55  ;;  %v2186_v21 = vsel %vm2178_vm0, %v2674_v15, 8  ;;  %v2162_v56 = vmax.f32 %v2160_v7, %v2161_v53  ;;  %v2154_v19 = vrot.slane %v2153_v17, 4 }
 0x48d   :  { %v3291_v27 = vadd.f32 %v2101_v11, %v2019_v22  ;;  %v2207_v18 = vrot.slane %v2206_v58, 1  ;;  %v2217_v4 = vrot.slane %v2216_v13, 1  ;;  %v2230_v9 = vsel %vm166_vm1, %v2186_v21, 2147483647 }
 0x48e   :  { %v2145_v30 = vmax.f32 %v2143_v29, %v2144_v23  ;;  %v2231_v32 = vrot.slane %v2230_v9, 4  ;;  %v2163_v25 = vrot.slane %v2162_v56, 2  ;;  %v2155_v38 = vmax.f32 %v2153_v17, %v2154_v19 }
 0x48f   :  { %v2167_v24 = vsel %vm166_vm1, %v3291_v27, -inf  ;;  %v2197_v20 = vrot.slane %v2196_v59, 1  ;;  %vm3301_vm15 = vcmp.lt.s32.totalorder %v2206_v58, %v2207_v18  ;;  %vm2218_vm2 = vcmp.lt.s32.totalorder %v2216_v13, %v2217_v4 }
 0x490   :  { %vm2177_vm12 = vcmp.eq.f32.partialorder %v3256_v39, %v2145_v30  ;;  %v3298_v16 = vadd.f32 %v3254_v34, %v2145_v30  ;;  %v2168_v26 = vrot.slane %v2167_v24, 4  ;;  %vm2232_vm14 = vcmp.lt.s32.totalorder %v2230_v9, %v2231_v32 }
 0x491   :  { %v2185_v35 = vsel %vm2177_vm12, %v2674_v15, 8  ;;  %v2164_v36 = vmax.f32 %v2162_v56, %v2163_v25  ;;  %v2156_v31 = vrot.slane %v2155_v38, 2  ;;  %v2233_v28 = vsel %vm2232_vm14, %v2230_v9, %v2231_v32 }
 0x492   :  { %v2220_v41 = vsel %vm166_vm1, %v2185_v35, 2147483647  ;;  %v2169_v42 = vmax.f32 %v2167_v24, %v2168_v26  ;;  %v2234_v44 = vrot.slane %v2233_v28, 2  ;;  %vm2198_vm5 = vcmp.lt.s32.totalorder %v2196_v59, %v2197_v20 }
 0x493   :  { %v2221_v45 = vrot.slane %v2220_v41, 4  ;;  %v2165_v39 = vrot.slane %v2164_v36, 1  ;;  %v2157_v46 = vmax.f32 %v2155_v38, %v2156_v31  ;;  %v3307_v49 = vadd.f32 %v3254_v34, %v2152_v2 }
 0x494   :  { %v2170_v50 = vrot.slane %v2169_v42, 2  ;;  %v2306_v51 = vrot.slane %v3298_v16, 5  ;;  %v2209_v40 = vsel %vm3301_vm15, %v2206_v58, %v2207_v18  ;;  %vm2235_vm9 = vcmp.lt.s32.totalorder %v2233_v28, %v2234_v44 }
 0x495   :  { %vm2222_vm6 = vcmp.lt.s32.totalorder %v2220_v41, %v2221_v45  ;;  %v2166_v52 = vmax.f32 %v2164_v36, %v2165_v39  ;;  %v2158_v55 = vrot.slane %v2157_v46, 1  ;;  %v2199_v47 = vsel %vm2198_vm5, %v2196_v59, %v2197_v20 }
 0x496   :  { %v2223_v61 = vsel %vm2222_vm6, %v2220_v41, %v2221_v45  ;;  %v2171_v63 = vmax.f32 %v2169_v42, %v2170_v50  ;;  %v2219_v0 = vsel %vm2218_vm2, %v2216_v13, %v2217_v4  ;;  %v2308_v48 = vrot.slane %v3307_v49, 4 }
 0x497   :  { %v2224_v1 = vrot.slane %v2223_v61, 2  ;;  %vm2180_vm13 = vcmp.eq.f32.partialorder %v3275_v54, %v2166_v52  ;;  %v2159_v5 = vmax.f32 %v2157_v46, %v2158_v55  ;;  %v2236_v62 = vsel %vm2235_vm9, %v2233_v28, %v2234_v44 }
 0x498   :  { %v2188_v60 = vsel %vm2180_vm13, %v2674_v15, 8  ;;  %v2172_v3 = vrot.slane %v2171_v63, 1  ;;  %v2307_v7 = vsel %vm509_vm3, %v2306_v51, %v2305_v8  ;;  %v3318_v53 = vadd.f32 %v3254_v34, %v2166_v52 }
 0x499   :  { %vm2225_vm7 = vcmp.lt.s32.totalorder %v2223_v61, %v2224_v1  ;;  %v2250_v6 = vsel %vm166_vm1, %v2188_v60, 2147483647  ;;  %vm2179_vm0 = vcmp.eq.f32.partialorder %v3282_v10, %v2159_v5  ;;  %v3323_v12 = vadd.f32 %v3254_v34, %v2159_v5 }
 0x49a   :  { %v2226_v2 = vsel %vm2225_vm7, %v2223_v61, %v2224_v1  ;;  %v2251_v29 = vrot.slane %v2250_v6, 4  ;;  %v2187_v11 = vsel %vm2179_vm0, %v2674_v15, 8  ;;  %v2173_v58 = vmax.f32 %v2171_v63, %v2172_v3 }
 0x49b   :  { %v2227_v54 = vrot.slane %v2226_v2, 1  ;;  %v2270_v13 = vsel %vm505_vm10, %v2209_v40, %v2199_v47  ;;  %v2237_v17 = vrot.slane %v2236_v62, 1  ;;  %v2240_v22 = vsel %vm166_vm1, %v2187_v11, 2147483647 }
 0x49c   :  { %vm2252_vm12 = vcmp.lt.s32.totalorder %v2250_v6, %v2251_v29  ;;  %v2241_v23 = vrot.slane %v2240_v22, 4  ;;  %vm2181_vm14 = vcmp.eq.f32.partialorder %v3291_v27, %v2173_v58  ;;  %v2309_v8 = vsel %vm511_vm4, %v2308_v48, %v2307_v7 }
 0x49d   :  { %v2253_v59 = vsel %vm2252_vm12, %v2250_v6, %v2251_v29  ;;  %v2189_v21 = vsel %vm2181_vm14, %v2674_v15, 8  ;;  %v2293_v56 = vadd.f32 %v3254_v34, %v2173_v58  ;;  %v2312_v19 = vrot.slane %v3318_v53, 2 }
 0x49e   :  { %v2254_v10 = vrot.slane %v2253_v59, 2  ;;  %vm2228_vm15 = vcmp.lt.s32.totalorder %v2226_v2, %v2227_v54  ;;  %vm2242_vm5 = vcmp.lt.s32.totalorder %v2240_v22, %v2241_v23  ;;  %v2260_v18 = vsel %vm166_vm1, %v2189_v21, 2147483647 }
 0x49f   :  { %v2310_v4 = vrot.slane %v3323_v12, 3  ;;  %vm3334_vm2 = vcmp.lt.s32.totalorder %v2236_v62, %v2237_v17  ;;  %v2243_v27 = vsel %vm2242_vm5, %v2240_v22, %v2241_v23  ;;  %v2261_v30 = vrot.slane %v2260_v18, 4 }
 0x4a0   :  { %vm2255_vm6 = vcmp.lt.s32.totalorder %v2253_v59, %v2254_v10  ;;  %v2244_v25 = vrot.slane %v2243_v27, 2  ;;  %v2314_v34 = vrot.slane %v2293_v56, 1  ;;  %v2229_v38 = vsel %vm2228_vm15, %v2226_v2, %v2227_v54 }
 0x4a1   :  { %v2256_v32 = vsel %vm2255_vm6, %v2253_v59, %v2254_v10  ;;  %v2311_v15 = vsel %vm513_vm8, %v2310_v4, %v2309_v8  ;;  %vm2262_vm9 = vcmp.lt.s32.totalorder %v2260_v18, %v2261_v30  ;;  %vm3490_vm13 = vcmask 1046534  }
 0x4a2   :  { %v2257_v24 = vrot.slane %v2256_v32, 1  ;;  %v2313_v20 = vsel %vm3490_vm13, %v2312_v19, %v2311_v15  ;;  %vm2245_vm7 = vcmp.lt.s32.totalorder %v2243_v27, %v2244_v25  ;;  %v2263_v26 = vsel %vm2262_vm9, %v2260_v18, %v2261_v30  ;;  %vm3492_vm6 = vmmov %vm3490_vm13 }
 0x4a3   :  { %vm3491_vm0 = vcmask 1047559   ;;  %v2271_v36 = vsel %vm507_vm11, %v2219_v0, %v2270_v13  ;;  %v2246_v31 = vsel %vm2245_vm7, %v2243_v27, %v2244_v25  ;;  %v2264_v37 = vrot.slane %v2263_v26, 2 }
 0x4a4   :  { %v2315_v35 = vsel %vm3491_vm0, %v2314_v34, %v2313_v20  ;;  %v2239_v41 = vsel %vm3334_vm2, %v2236_v62, %v2237_v17  ;;  %v2272_v42 = vsel %vm509_vm3, %v2229_v38, %v2271_v36  ;;  %vm2258_vm12 = vcmp.lt.s32.totalorder %v2256_v32, %v2257_v24  ;;  %vm3493_vm2 = vmmov %vm3491_vm0 }
 0x4a5   :  { %v2317_v28 = vsel %vm166_vm1, %v2315_v35, -inf  ;;  %v2247_v44 = vrot.slane %v2246_v31, 1  ;;  %vm2265_vm14 = vcmp.lt.s32.totalorder %v2263_v26, %v2264_v37  ;;  %v2259_v39 = vsel %vm2258_vm12, %v2256_v32, %v2257_v24 }
 0x4a6   :  { %2318 = vmax.xlane.f32.xlu0 %v2317_v28  ;;  %v2266_v45 = vsel %vm2265_vm14, %v2263_v26, %v2264_v37  ;;  %v2273_v46 = vsel %vm511_vm4, %v2239_v41, %v2272_v42  ;;  %v3353_v62 = vand.u32 127, %v176_v14 }
 0x4a7   :  { %vm2248_vm15 = vcmp.lt.s32.totalorder %v2246_v31, %v2247_v44  ;;  %v2267_v51 = vrot.slane %v2266_v45, 1 }
 0x4a8   :  { %v2249_v50 = vsel %vm2248_vm15, %v2246_v31, %v2247_v44 }
 0x4a9   :  { %v2274_v52 = vsel %vm513_vm8, %v2249_v50, %v2273_v46  ;;  %vm2268_vm5 = vcmp.lt.s32.totalorder %v2266_v45, %v2267_v51 }
 0x4aa   :  { %v2275_v55 = vsel %vm3492_vm6, %v2259_v39, %v2274_v52  ;;  %v2269_v40 = vsel %vm2268_vm5, %v2266_v45, %v2267_v51 }
 0x4ab   :  { %v2276_v61 = vsel %vm3493_vm2, %v2269_v40, %v2275_v55  ;;  %v2402_v55 = vld [vmem:[#allocation3 + $0x30] sm:$0xff] }
 0x4ac   :  { %2278 = vst.msk [vmem:[#allocation3 + $0x38] sm:$0xff] %vm166_vm1, %v2276_v61 }
 0x4b3   :  { %v2384_v36 = vld [vmem:[#allocation3 + $0x38] sm:$0xff] }
 0x52f   :  { %v2319_v63 = vpop.xlane.xlu0 %2318 }
 0x530   :  { %v2321_v47 = vrot.slane %v2319_v63, 1  ;;  %v2322_v0 = vrot.slane %v2319_v63, 2  ;;  %v2323_v1 = vrot.slane %v2319_v63, 3  ;;  %v2324_v48 = vrot.slane %v2319_v63, 4 }
 0x531   :  { %v2325_v60 = vrot.slane %v2319_v63, 5  ;;  %v2326_v5 = vrot.slane %v2319_v63, 6  ;;  %v2327_v3 = vrot.slane %v2319_v63, 7  ;;  %vm2336_vm0 = vcmp.eq.f32.partialorder %v3268_v57, %v2319_v63 }
 0x532   :  { %vm2337_vm9 = vcmp.eq.f32.partialorder %v3260_v33, %v2321_v47  ;;  %vm2338_vm13 = vcmp.eq.f32.partialorder %v3263_v43, %v2322_v0  ;;  %vm3357_vm7 = vcmp.eq.f32.partialorder %v3298_v16, %v2323_v1  ;;  %vm3363_vm12 = vcmp.eq.f32.partialorder %v3307_v49, %v2324_v48  ;;  %v2420_v33 = vld [vmem:[#allocation3 + $0x28] sm:$0xff] }
 0x533   :  { %vm3368_vm14 = vcmp.eq.f32.partialorder %v3323_v12, %v2325_v60  ;;  %vm3373_vm15 = vcmp.eq.f32.partialorder %v3318_v53, %v2326_v5  ;;  %v2345_v43 = vsel %vm2337_vm9, %v3353_v62, 8  ;;  %v2346_v16 = vsel %vm2338_vm13, %v3353_v62, 8 }
 0x534   :  { %v2347_v57 = vsel %vm3357_vm7, %v3353_v62, 8  ;;  %vm3382_vm5 = vcmp.eq.f32.partialorder %v2293_v56, %v2327_v3  ;;  %v2348_v2 = vsel %vm3363_vm12, %v3353_v62, 8  ;;  %v2352_v29 = vrot.slane %v2345_v43, 7 }
 0x535   :  { %v2344_v53 = vsel %vm2336_vm0, %v3353_v62, 8  ;;  %v2349_v54 = vsel %vm3368_vm14, %v3353_v62, 8  ;;  %v2354_v11 = vrot.slane %v2346_v16, 6  ;;  %v2350_v12 = vsel %vm3373_vm15, %v3353_v62, 8 }
 0x536   :  { %v2353_v58 = vsel %vm505_vm10, %v2352_v29, %v2344_v53  ;;  %v2356_v13 = vrot.slane %v2347_v57, 5  ;;  %v2351_v17 = vsel %vm3382_vm5, %v3353_v62, 8  ;;  %v2358_v59 = vrot.slane %v2348_v2, 4  ;;  %vm3504_vm10 = vmmov %vm3493_vm2 }
 0x537   :  { %v2355_v22 = vsel %vm507_vm11, %v2354_v11, %v2353_v58  ;;  %v2360_v8 = vrot.slane %v2349_v54, 3  ;;  %v2362_v21 = vrot.slane %v2350_v12, 2  ;;  %v2364_v19 = vrot.slane %v2351_v17, 1 }
 0x538   :  { %v2357_v23 = vsel %vm509_vm3, %v2356_v13, %v2355_v22  ;;  %vm2382_vm3 = vcmask 7168   ;;  %v2438_v13 = vld [vmem:[#allocation3 + $0x20] sm:$0xff] }
 0x539   :  { %v2359_v10 = vsel %vm511_vm4, %v2358_v59, %v2357_v23 }
 0x53a   :  { %v2361_v56 = vsel %vm513_vm8, %v2360_v8, %v2359_v10 }
 0x53b   :  { %v2363_v18 = vsel %vm3492_vm6, %v2362_v21, %v2361_v56 }
 0x53c   :  { %v2365_v4 = vsel %vm3504_vm10, %v2364_v19, %v2363_v18 }
 0x53d   :  { %v2366_v9 = vsel %vm166_vm1, %v2365_v4, 2147483647 }
 0x53e   :  { %v2368_v27 = vshra.s32 %v2366_v9, 16  ;;  %v2367_v32 = vand.u32 65535, %v2366_v9 }
 0x540   :  { %v2370_v30 = vcvt.s32.f32 %v2368_v27  ;;  %v2369_v15 = vcvt.s32.f32 %v2367_v32  ;;  %v2456_v27 = vld [vmem:[#allocation3 + $0x18] sm:$0xff] }
 0x542   :  { %2371 = vmin.xlane.f32.xlu1 %v2370_v30 }
 0x5cb   :  { %v2372_v25 = vpop.xlane.xlu1 %2371 }
 0x5cc   :  { %vm2373_vm11 = vcmp.eq.f32.partialorder %v2370_v30, %v2372_v25  ;;  %v2378_v38 = vcvt.f32.s32 %v2372_v25 }
 0x5cd   :  { %v2374_v34 = vsel %vm2373_vm11, %v2369_v15, inf }
 0x5ce   :  { %2375 = vmin.xlane.f32.xlu0 %v2374_v34  ;;  %v2379_v20 = vshll.u32 %v2378_v38, 16 }
 0x657   :  { %v2376_v24 = vpop.xlane.xlu0 %2375 }
 0x658   :  { %v2377_v26 = vcvt.f32.s32 %v2376_v24 }
 0x65a   :  { %v2380_v35 = vadd.s32 %v2379_v20, %v2377_v26 }
 0x65c   :  { %2523 = vst.msk [vmem:[%s3458_s5 + $0x38] sm:$0xff] %vm2382_vm3, %v2380_v35  ;;  %vm2385_vm4 = vcmp.eq.s32.totalorder %v3353_v62, %v2380_v35 }
 0x65d   :  { %v2386_v31 = vsel %vm2385_vm4, %v2384_v36, 0 }
 0x65e   :  { %v2387_v37 = vsel %vm166_vm1, %v2386_v31, 0 }
 0x65f   :  { %v2389_v28 = vshrl.u32 %v2387_v37, 16  ;;  %v2388_v41 = vand.u32 65535, %v2387_v37  ;;  %v2474_v37 = vld [vmem:[#allocation3 + $0x10] sm:$0xff] }
 0x661   :  { %v2391_v42 = vcvt.s32.f32 %v2389_v28  ;;  %v2390_v44 = vcvt.s32.f32 %v2388_v41 }
 0x663   :  { %2394 = vadd.xlane.f32.xlu0 %v2391_v42  ;;  %2392 = vadd.xlane.f32.xlu1 %v2390_v44 }
 0x6ec   :  { %v2395_v45 = vpop.xlane.xlu0 %2394  ;;  %v2393_v39 = vpop.xlane.xlu1 %2392 }
 0x6ed   :  { %v2397_v46 = vcvt.f32.s32 %v2395_v45  ;;  %v2396_v51 = vcvt.f32.s32 %v2393_v39 }
 0x6ef   :  { %v2398_v50 = vshll.u32 %v2397_v46, 16 }
 0x6f1   :  { %v2399_v52 = vadd.s32 %v2398_v50, %v2396_v51 }
 0x6f3   :  { %2524 = vst.msk [vmem:[%s3458_s5 + $0x30] sm:$0xff] %vm2382_vm3, %v2399_v52  ;;  %vm2403_vm8 = vcmp.eq.s32.totalorder %v3353_v62, %v2399_v52 }
 0x6f4   :  { %v2404_v40 = vsel %vm2403_vm8, %v2402_v55, 0 }
 0x6f5   :  { %v2405_v61 = vsel %vm166_vm1, %v2404_v40, 0 }
 0x6f6   :  { %v2407_v63 = vshrl.u32 %v2405_v61, 16  ;;  %v2406_v47 = vand.u32 65535, %v2405_v61  ;;  %v2492_v61 = vld [vmem:[#allocation3 + $0x8] sm:$0xff] }
 0x6f8   :  { %v2409_v0 = vcvt.s32.f32 %v2407_v63  ;;  %v2408_v1 = vcvt.s32.f32 %v2406_v47 }
 0x6fa   :  { %2412 = vadd.xlane.f32.xlu0 %v2409_v0  ;;  %2410 = vadd.xlane.f32.xlu1 %v2408_v1 }
 0x783   :  { %v2413_v48 = vpop.xlane.xlu0 %2412  ;;  %v2411_v60 = vpop.xlane.xlu1 %2410 }
 0x784   :  { %v2415_v5 = vcvt.f32.s32 %v2413_v48  ;;  %v2414_v6 = vcvt.f32.s32 %v2411_v60 }
 0x786   :  { %v2416_v3 = vshll.u32 %v2415_v5, 16 }
 0x788   :  { %v2417_v7 = vadd.s32 %v2416_v3, %v2414_v6 }
 0x78a   :  { %2525 = vst.msk [vmem:[%s3458_s5 + $0x28] sm:$0xff] %vm2382_vm3, %v2417_v7  ;;  %vm2421_vm2 = vcmp.eq.s32.totalorder %v3353_v62, %v2417_v7 }
 0x78b   :  { %v2422_v14 = vsel %vm2421_vm2, %v2420_v33, 0 }
 0x78c   :  { %v2423_v43 = vsel %vm166_vm1, %v2422_v14, 0 }
 0x78d   :  { %v2425_v16 = vshrl.u32 %v2423_v43, 16  ;;  %v2424_v57 = vand.u32 65535, %v2423_v43 }
 0x78f   :  { %v2427_v49 = vcvt.s32.f32 %v2425_v16  ;;  %v2426_v2 = vcvt.s32.f32 %v2424_v57 }
 0x791   :  { %2430 = vadd.xlane.f32.xlu0 %v2427_v49  ;;  %2428 = vadd.xlane.f32.xlu1 %v2426_v2 }
 0x81a   :  { %v2431_v29 = vpop.xlane.xlu0 %2430  ;;  %v2429_v53 = vpop.xlane.xlu1 %2428 }
 0x81b   :  { %v2433_v54 = vcvt.f32.s32 %v2431_v29  ;;  %v2432_v12 = vcvt.f32.s32 %v2429_v53 }
 0x81d   :  { %v2434_v11 = vshll.u32 %v2433_v54, 16 }
 0x81f   :  { %v2435_v58 = vadd.s32 %v2434_v11, %v2432_v12 }
 0x821   :  { %2526 = vst.msk [vmem:[%s3458_s5 + $0x20] sm:$0xff] %vm2382_vm3, %v2435_v58  ;;  %vm2439_vm9 = vcmp.eq.s32.totalorder %v3353_v62, %v2435_v58 }
 0x822   :  { %v2440_v17 = vsel %vm2439_vm9, %v2438_v13, 0 }
 0x823   :  { %v2441_v22 = vsel %vm166_vm1, %v2440_v17, 0 }
 0x824   :  { %v2443_v59 = vshrl.u32 %v2441_v22, 16  ;;  %v2442_v23 = vand.u32 65535, %v2441_v22 }
 0x826   :  { %v2445_v8 = vcvt.s32.f32 %v2443_v59  ;;  %v2444_v10 = vcvt.s32.f32 %v2442_v23 }
 0x828   :  { %2448 = vadd.xlane.f32.xlu0 %v2445_v8  ;;  %2446 = vadd.xlane.f32.xlu1 %v2444_v10 }
 0x8b1   :  { %v2449_v21 = vpop.xlane.xlu0 %2448  ;;  %v2447_v56 = vpop.xlane.xlu1 %2446 }
 0x8b2   :  { %v2451_v19 = vcvt.f32.s32 %v2449_v21  ;;  %v2450_v4 = vcvt.f32.s32 %v2447_v56 }
 0x8b4   :  { %v2452_v18 = vshll.u32 %v2451_v19, 16 }
 0x8b6   :  { %v2453_v9 = vadd.s32 %v2452_v18, %v2450_v4 }
 0x8b8   :  { %2527 = vst.msk [vmem:[%s3458_s5 + $0x18] sm:$0xff] %vm2382_vm3, %v2453_v9  ;;  %vm2457_vm13 = vcmp.eq.s32.totalorder %v3353_v62, %v2453_v9 }
 0x8b9   :  { %v2458_v30 = vsel %vm2457_vm13, %v2456_v27, 0 }
 0x8ba   :  { %v2459_v32 = vsel %vm166_vm1, %v2458_v30, 0 }
 0x8bb   :  { %v2461_v25 = vshrl.u32 %v2459_v32, 16  ;;  %v2460_v15 = vand.u32 65535, %v2459_v32 }
 0x8bd   :  { %v2463_v34 = vcvt.s32.f32 %v2461_v25  ;;  %v2462_v38 = vcvt.s32.f32 %v2460_v15 }
 0x8bf   :  { %2466 = vadd.xlane.f32.xlu0 %v2463_v34  ;;  %2464 = vadd.xlane.f32.xlu1 %v2462_v38 }
 0x948   :  { %v2467_v24 = vpop.xlane.xlu0 %2466  ;;  %v2465_v20 = vpop.xlane.xlu1 %2464 }
 0x949   :  { %v2469_v26 = vcvt.f32.s32 %v2467_v24  ;;  %v2468_v36 = vcvt.f32.s32 %v2465_v20 }
 0x94b   :  { %v2470_v35 = vshll.u32 %v2469_v26, 16 }
 0x94d   :  { %v2471_v31 = vadd.s32 %v2470_v35, %v2468_v36 }
 0x94f   :  { %2528 = vst.msk [vmem:[%s3458_s5 + $0x10] sm:$0xff] %vm2382_vm3, %v2471_v31  ;;  %vm2475_vm7 = vcmp.eq.s32.totalorder %v3353_v62, %v2471_v31 }
 0x950   :  { %v2476_v28 = vsel %vm2475_vm7, %v2474_v37, 0 }
 0x951   :  { %v2477_v41 = vsel %vm166_vm1, %v2476_v28, 0 }
 0x952   :  { %v2479_v42 = vshrl.u32 %v2477_v41, 16  ;;  %v2478_v44 = vand.u32 65535, %v2477_v41 }
 0x954   :  { %v2481_v45 = vcvt.s32.f32 %v2479_v42  ;;  %v2480_v39 = vcvt.s32.f32 %v2478_v44 }
 0x956   :  { %2484 = vadd.xlane.f32.xlu0 %v2481_v45  ;;  %2482 = vadd.xlane.f32.xlu1 %v2480_v39 }
 0x9df   :  { %v2485_v46 = vpop.xlane.xlu0 %2484  ;;  %v2483_v50 = vpop.xlane.xlu1 %2482 }
 0x9e0   :  { %v2487_v51 = vcvt.f32.s32 %v2485_v46  ;;  %v2486_v55 = vcvt.f32.s32 %v2483_v50 }
 0x9e2   :  { %v2488_v52 = vshll.u32 %v2487_v51, 16 }
 0x9e4   :  { %v2489_v40 = vadd.s32 %v2488_v52, %v2486_v55 }
 0x9e6   :  { %2529 = vst.msk [vmem:[%s3458_s5 + $0x8] sm:$0xff] %vm2382_vm3, %v2489_v40  ;;  %vm2493_vm0 = vcmp.eq.s32.totalorder %v3353_v62, %v2489_v40 }
 0x9e7   :  { %v2494_v63 = vsel %vm2493_vm0, %v2492_v61, 0 }
 0x9e8   :  { %v2495_v47 = vsel %vm166_vm1, %v2494_v63, 0 }
 0x9e9   :  { %v2497_v0 = vshrl.u32 %v2495_v47, 16  ;;  %v2496_v1 = vand.u32 65535, %v2495_v47 }
 0x9eb   :  { %v2499_v48 = vcvt.s32.f32 %v2497_v0  ;;  %v2498_v60 = vcvt.s32.f32 %v2496_v1 }
 0x9ed   :  { %2502 = vadd.xlane.f32.xlu0 %v2499_v48  ;;  %2500 = vadd.xlane.f32.xlu1 %v2498_v60 }
 0xa76   :  { %v2503_v5 = vpop.xlane.xlu0 %2502  ;;  %v2501_v3 = vpop.xlane.xlu1 %2500 }
 0xa77   :  { %v2505_v6 = vcvt.f32.s32 %v2503_v5  ;;  %v2504_v33 = vcvt.f32.s32 %v2501_v3 }
 0xa79   :  { %v2506_v7 = vshll.u32 %v2505_v6, 16 }
 0xa7b   :  { %v2507_v14 = vadd.s32 %v2506_v7, %v2504_v33 }
 0xa7d   :  { %2508 = vst.msk [vmem:[%s3458_s5] sm:$0xff] %vm2382_vm3, %v2507_v14 }

// kernel: bilstm_crf_forward.4
= control target key start
LH: loop header
LB: loop body
LE: loop exit
PB: predicated region body
PF: predicated region fallthrough
CT: control target
= control target key end

     0   :  { %v2372_v3 = vmov 0.0   ;;  %vm2373_vm0 = vmmov 0   ;;  %vm56_vm1 = vcmask 523264   ;;  %v46_v33 = vlaneseq  ;;  %s2983_s1 = inlined_call_operand.vmem [shape: f32[64,256], index: 1, kind: input, shape index: {}]   ;;  %s2984_s2 = inlined_call_operand.vmem [shape: f32[32,128], index: 2, kind: input, shape index: {}]   ;;  %s2985_s3 = inlined_call_operand.vmem [shape: f32[32,128], index: 3, kind: input, shape index: {}]   ;;  %s2986_s0 = inlined_call_operand.vmem [shape: f32[64,64], index: 0, kind: input, shape index: {}]   ;;  %s2987_s4 = inlined_call_operand.vmem [shape: f32[1,256], index: 4, kind: input, shape index: {}]   ;;  %s2988_s5 = inlined_call_operand.vmem [shape: f32[64,64], index: 5, kind: output, shape index: {}]  }
   0x1   :  { %v43_v0 = vld [vmem:[%s2983_s1 + $0x78] sm:$0xff]  ;;  %v42_v1 = vld [vmem:[%s2983_s1 + $0x70] sm:$0xff]  ;;  %v41_v2 = vld [vmem:[%s2983_s1 + $0x68] sm:$0xff]  ;;  %2055 = vmatprep.subr.mxu1 %v2372_v3  ;;  %145 = vmatprep.mubr.f32.mxu0 %v2372_v3  ;;  %vm222_vm2 = vcmask 261120   ;;  %vm430_vm3 = vcmask 523520  }
   0x2   :  { %97 = vmatprep.subr.mxu0 %v43_v0  ;;  %v40_v4 = vld [vmem:[%s2983_s1 + $0x60] sm:$0xff]  ;;  %2063 = vmatprep.mubr.msk.f32.mxu1 %vm2373_vm0, %v2372_v3  ;;  %v39_v5 = vld [vmem:[%s2983_s1 + $0x58] sm:$0xff]  ;;  %v38_v6 = vld [vmem:[%s2983_s1 + $0x50] sm:$0xff]  ;;  %v47_v34 = vshrl.u32 %v46_v33, 7 }
   0x3   :  { %98 = vmatpush1.msra.mxu0 %v42_v1  ;;  %v37_v7 = vld [vmem:[%s2983_s1 + $0x48] sm:$0xff]  ;;  %v2435_v8 = vld [vmem:[%s2984_s2 + $0x18] sm:$0xff]  ;;  %v36_v9 = vld [vmem:[%s2983_s1 + $0x40] sm:$0xff] }
   0x4   :  { %99 = vmatprep.subr.mxu0 %v41_v2  ;;  %2056 = vmatpush3.msra.mxu1 %v2435_v8  ;;  %v2444_v10 = vld [vmem:[%s2984_s2 + $0x10] sm:$0xff]  ;;  %v35_v11 = vld [vmem:[%s2983_s1 + $0x38] sm:$0xff]  ;;  %v2453_v12 = vld [vmem:[%s2984_s2 + $0x8] sm:$0xff]  ;;  %v48_v35 = vsub.s32 0, %v47_v34  ;;  %v52_v37 = vsub.s32 1, %v47_v34 }
   0x5   :  { %100 = vmatpush1.msra.mxu0 %v40_v4  ;;  %2057 = vmatprep.subr.mxu1 %v2372_v3  ;;  %v34_v13 = vld [vmem:[%s2983_s1 + $0x30] sm:$0xff]  ;;  %v33_v14 = vld [vmem:[%s2983_s1 + $0x28] sm:$0xff]  ;;  %v2466_v15 = vld [vmem:[%s2984_s2] sm:$0xff] }
   0x6   :  { %101 = vmatprep.subr.mxu0 %v39_v5  ;;  %2058 = vmatpush3.msra.mxu1 %v2444_v10  ;;  %v32_v16 = vld [vmem:[%s2983_s1 + $0x20] sm:$0xff]  ;;  %v31_v17 = vld [vmem:[%s2983_s1 + $0x18] sm:$0xff]  ;;  %v30_v18 = vld [vmem:[%s2983_s1 + $0x10] sm:$0xff] }
   0x7   :  { %102 = vmatpush1.msra.mxu0 %v38_v6  ;;  %2059 = vmatprep.subr.mxu1 %v2372_v3  ;;  %v2483_v19 = vld [vmem:[%s2985_s3 + $0x18] sm:$0xff]  ;;  %v29_v20 = vld [vmem:[%s2983_s1 + $0x8] sm:$0xff]  ;;  %v28_v21 = vld [vmem:[%s2983_s1] sm:$0xff] }
   0x8   :  { %103 = vmatprep.subr.mxu0 %v37_v7  ;;  %2060 = vmatpush3.msra.mxu1 %v2453_v12  ;;  %v2496_v22 = vld [vmem:[%s2985_s3 + $0x10] sm:$0xff]  ;;  %v20_v23 = vld [vmem:[%s2986_s0] sm:$0xff]  ;;  %v2506_v24 = vld [vmem:[%s2985_s3 + $0x8] sm:$0xff] }
   0x9   :  { %104 = vmatpush1.msra.mxu0 %v36_v9  ;;  %2061 = vmatprep.subr.mxu1 %v2372_v3  ;;  %v2514_v25 = vld [vmem:[%s2985_s3] sm:$0xff]  ;;  %v21_v26 = vld [vmem:[%s2986_s0 + $0x8] sm:$0xff]  ;;  %v22_v27 = vld [vmem:[%s2986_s0 + $0x10] sm:$0xff] }
   0xa   :  { %105 = vmatprep.subr.mxu0 %v35_v11  ;;  %2062 = vmatpush3.msra.mxu1 %v2466_v15  ;;  %v23_v28 = vld [vmem:[%s2986_s0 + $0x18] sm:$0xff]  ;;  %v24_v29 = vld [vmem:[%s2986_s0 + $0x20] sm:$0xff]  ;;  %v25_v30 = vld [vmem:[%s2986_s0 + $0x28] sm:$0xff] }
   0xb   :  { %106 = vmatpush1.msra.mxu0 %v34_v13  ;;  %2064 = vmatmul.mubr.f32.vlgmr.msra.gmra.mxu1 %v2372_v3  ;;  %v26_v31 = vld [vmem:[%s2986_s0 + $0x30] sm:$0xff]  ;;  %v27_v32 = vld [vmem:[%s2986_s0 + $0x38] sm:$0xff]  ;;  %v44_v36 = vld [vmem:[%s2987_s4] sm:$0x3]  ;;  %s2374_s0 = smov 32   ;;  %s2375_s4 = smov 64  }
   0xc   :  { %107 = vmatprep.subr.mxu0 %v33_v14  ;;  %2066 = vmatprep.subr.mxu1 %v2372_v3  ;;  %v49_v39 = vrot.slane %v44_v36, %v48_v35  ;;  %v53_v41 = vrot.slane %v44_v36, %v52_v37 }
   0xd   :  { %108 = vmatpush1.msra.mxu0 %v32_v16  ;;  %2067 = vmatpush3.msra.mxu1 %v2483_v19 }
   0xe   :  { %109 = vmatprep.subr.mxu0 %v31_v17  ;;  %2068 = vmatprep.subr.mxu1 %v2372_v3 }
   0xf   :  { %110 = vmatpush1.msra.mxu0 %v30_v18  ;;  %2069 = vmatpush3.msra.mxu1 %v2496_v22 }
  0x10   :  { %111 = vmatprep.subr.mxu0 %v29_v20  ;;  %2070 = vmatprep.subr.mxu1 %v2372_v3 }
  0x11   :  { %112 = vmatpush1.msra.mxu0 %v28_v21  ;;  %2071 = vmatpush3.msra.mxu1 %v2506_v24 }
  0x12   :  { %1923 = vmatmul.mubr.msk.f32.vlgmr.msra.gmra.mxu0 %vm56_vm1, %v20_v23  ;;  %2072 = vmatprep.subr.mxu1 %v2372_v3 }
  0x13   :  { %151 = vmatprep.mubr.f32.mxu0 %v2372_v3  ;;  %2074 = vmatprep.mubr.msk.f32.mxu1 %vm2373_vm0, %v2372_v3 }
  0x14   :  { %2073 = vmatpush3.msra.mxu1 %v2514_v25  ;;  %2110 = vmatprep.subr.mxu0 %v2372_v3 }
  0x15   :  { %2075 = vmatmul.mubr.f32.vlgmr.msra.gmra.mxu1 %v2372_v3  ;;  %2077 = vmatprep.subr.mxu1 %v2372_v3 }
  0x16   :  { %1924 = vmatmul.mubr.msk.f32.gmra.mxu0 %vm56_vm1, %v21_v26  ;;  %2078 = vmatpush3.msra.mxu1 %v2435_v8 }
  0x17   :  { %157 = vmatprep.mubr.f32.mxu0 %v2372_v3  ;;  %2085 = vmatprep.mubr.msk.f32.mxu1 %vm2373_vm0, %v2372_v3 }
  0x18   :  { %2079 = vmatprep.subr.mxu1 %v2372_v3  ;;  %2111 = vmatpush3.msra.mxu0 %v2483_v19 }
  0x19   :  { %2080 = vmatpush3.msra.mxu1 %v2444_v10  ;;  %2112 = vmatprep.subr.mxu0 %v2372_v3 }
  0x1a   :  { %1925 = vmatmul.mubr.msk.f32.gmra.mxu0 %vm56_vm1, %v22_v27  ;;  %2081 = vmatprep.subr.mxu1 %v2372_v3 }
  0x1b   :  { %163 = vmatprep.mubr.f32.mxu0 %v2372_v3  ;;  %2082 = vmatpush3.msra.mxu1 %v2453_v12 }
  0x1c   :  { %2083 = vmatprep.subr.mxu1 %v2372_v3  ;;  %2113 = vmatpush3.msra.mxu0 %v2496_v22 }
  0x1d   :  { %2084 = vmatpush3.msra.mxu1 %v2466_v15  ;;  %2114 = vmatprep.subr.mxu0 %v2372_v3 }
  0x1e   :  { %1926 = vmatmul.mubr.msk.f32.gmra.mxu0 %vm56_vm1, %v23_v28  ;;  %2088 = vmatprep.subr.mxu1 %v2372_v3 }
  0x1f   :  { %169 = vmatprep.mubr.f32.mxu0 %v2372_v3  ;;  %2115 = vmatpush3.msra.mxu0 %v2506_v24 }
  0x20   :  { %2116 = vmatprep.subr.mxu0 %v2372_v3 }
  0x21   :  { %2117 = vmatpush3.msra.mxu0 %v2514_v25 }
  0x22   :  { %1927 = vmatmul.mubr.msk.f32.gmra.mxu0 %vm56_vm1, %v24_v29  ;;  %2132 = vmatprep.subr.mxu0 %v2372_v3 }
  0x23   :  { %175 = vmatprep.mubr.f32.mxu0 %v2372_v3 }
  0x26   :  { %1928 = vmatmul.mubr.msk.f32.gmra.mxu0 %vm56_vm1, %v25_v30 }
  0x27   :  { %181 = vmatprep.mubr.f32.mxu0 %v2372_v3 }
  0x2a   :  { %1929 = vmatmul.mubr.msk.f32.gmra.mxu0 %vm56_vm1, %v26_v31 }
  0x2b   :  { %187 = vmatprep.mubr.f32.mxu0 %v2372_v3 }
  0x2e   :  { %1930 = vmatmul.mubr.msk.f32.gmra.mxu0 %vm56_vm1, %v27_v32 }
  0x2f   :  { %2118 = vmatprep.mubr.msk.f32.mxu0 %vm2373_vm0, %v2372_v3 }
  0xcb   :  { %v292_v38 = vpop.f32.mrf.mxu1 }
  0xcd   :  { %v2065_v40 = vpop.f32.mrf.mxu1 }
  0xd2   :  { %v147_v42 = vpop.f32.mrf.mxu0 }
  0xd3   :  { %v148_v43 = vadd.f32 %v147_v42, %v49_v39 }
  0xd4   :  { %v149_v44 = vpop.f32.mrf.mxu0 }
  0xd5   :  { %v2582_v45 = vadd.f32 %v149_v44, %v53_v41  ;;  %v296_v46 = vadd.f32 %v292_v38, %v148_v43  ;;  %v367_v48 = vpop.f32.mrf.mxu1 }
  0xd6   :  { %v153_v47 = vpop.f32.mrf.mxu0 }
  0xd7   :  { %2236 = vtanh.f32 %v296_v46  ;;  %v2584_v49 = vadd.f32 %v153_v47, %v49_v39  ;;  %v2076_v51 = vpop.f32.mrf.mxu1  ;;  %v1931_v23 = vmul.f32 -1.442695, %v296_v46 }
  0xd8   :  { %v155_v50 = vpop.f32.mrf.mxu0 }
  0xd9   :  { %v2586_v52 = vadd.f32 %v155_v50, %v53_v41 }
  0xda   :  { %v159_v53 = vpop.f32.mrf.mxu0 }
  0xdb   :  { %v2588_v54 = vadd.f32 %v159_v53, %v49_v39 }
  0xdc   :  { %v161_v55 = vpop.f32.mrf.mxu0 }
  0xdd   :  { %v2590_v56 = vadd.f32 %v161_v55, %v53_v41 }
  0xde   :  { %v165_v57 = vpop.f32.mrf.mxu0 }
  0xdf   :  { %v2592_v58 = vadd.f32 %v165_v57, %v49_v39 }
  0xe0   :  { %v167_v59 = vpop.f32.mrf.mxu0 }
  0xe1   :  { %v2594_v60 = vadd.f32 %v167_v59, %v53_v41 }
  0xe2   :  { %v171_v61 = vpop.f32.mrf.mxu0 }
  0xe3   :  { %v2596_v62 = vadd.f32 %v171_v61, %v49_v39 }
  0xe4   :  { %v2237_v63 = vpop.eup %2236  ;;  %v173_v0 = vpop.f32.mrf.mxu0 }
  0xe5   :  { %v2598_v1 = vadd.f32 %v173_v0, %v53_v41  ;;  %387 = vrot.lane.b32.xlu0 %v2237_v63, %s2374_s0 }
  0xe6   :  { %v177_v2 = vpop.f32.mrf.mxu0 }
  0xe7   :  { %v2601_v4 = vadd.f32 %v177_v2, %v49_v39 }
  0xe8   :  { %v179_v5 = vpop.f32.mrf.mxu0 }
  0xe9   :  { %v2603_v6 = vadd.f32 %v179_v5, %v53_v41 }
  0xea   :  { %v183_v7 = vpop.f32.mrf.mxu0 }
  0xeb   :  { %v2605_v9 = vadd.f32 %v183_v7, %v49_v39 }
  0xec   :  { %v185_v11 = vpop.f32.mrf.mxu0 }
  0xed   :  { %v2607_v13 = vadd.f32 %v185_v11, %v53_v41 }
  0xee   :  { %v189_v14 = vpop.f32.mrf.mxu0 }
  0xef   :  { %v2609_v16 = vadd.f32 %v189_v14, %v49_v39 }
  0xf0   :  { %v191_v17 = vpop.f32.mrf.mxu0 }
  0xf1   :  { %v192_v18 = vadd.f32 %v191_v17, %v53_v41 }
  0xf3   :  { %v371_v20 = vadd.f32 %v367_v48, %v192_v18 }
  0xf5   :  { %2238 = vtanh.f32 %v371_v20  ;;  %v1932_v28 = vmul.f32 -1.442695, %v371_v20 }
  0xf6   :  { %2240 = vpow2.f32 %v1931_v23 }
 0x102   :  { %v2239_v21 = vpop.eup %2238 }
 0x103   :  { %399 = vrot.lane.b32.xlu0 %v2239_v21, %s2374_s0  ;;  %v2241_v26 = vpop.eup %2240 }
 0x104   :  { %v375_v27 = vadd.f32 1.0, %v2241_v26 }
 0x106   :  { %2242 = vrcp.f32 %v375_v27 }
 0x107   :  { %2244 = vpow2.f32 %v1932_v28 }
 0x113   :  { %v2243_v29 = vpop.eup %2242 }
 0x114   :  { %v2245_v32 = vpop.eup %2244  ;;  %v384_v37 = vmul.f32 0.0, %v2243_v29 }
 0x115   :  { %v381_v33 = vadd.f32 1.0, %v2245_v32 }
 0x117   :  { %2246 = vrcp.f32 %v381_v33 }
 0x124   :  { %v2247_v34 = vpop.eup %2246 }
 0x125   :  { %v396_v41 = vmul.f32 0.0, %v2247_v34 }
 0x157   :  { %v388_v30 = vpop.permute.xlu0 %387 }
 0x158   :  { %v390_v31 = vmul.f32 %v2243_v29, %v388_v30 }
 0x15a   :  { %392 = vrot.lane.b32.xlu1 %v390_v31, %s2374_s0 }
 0x175   :  { %v400_v35 = vpop.permute.xlu0 %399 }
 0x176   :  { %v402_v36 = vmul.f32 %v2247_v34, %v400_v35 }
 0x178   :  { %404 = vrot.lane.b32.xlu1 %v402_v36, %s2374_s0 }
 0x1cc   :  { %v393_v38 = vpop.permute.xlu1 %392 }
 0x1cd   :  { %v2614_v39 = vadd.f32 %v393_v38, %v384_v37 }
 0x1cf   :  { %2248 = vtanh.f32 %v2614_v39 }
 0x1dc   :  { %v2249_v40 = vpop.eup %2248 }
 0x1dd   :  { %410 = vrot.lane.b32.xlu0 %v2249_v40, %s2374_s0 }
 0x1ea   :  { %v405_v42 = vpop.permute.xlu1 %404 }
 0x1eb   :  { %v2618_v43 = vadd.f32 %v405_v42, %v396_v41 }
 0x1ed   :  { %2250 = vtanh.f32 %v2618_v43 }
 0x1fa   :  { %v2251_v44 = vpop.eup %2250 }
 0x1fb   :  { %416 = vrot.lane.b32.xlu1 %v2251_v44, %s2374_s0 }
 0x24f   :  { %v411_v46 = vpop.permute.xlu0 %410 }
 0x250   :  { %v413_v47 = vmul.f32 %v2243_v29, %v411_v46 }
 0x252   :  { %421 = vrot.lane.b32.xlu0 %v413_v47, %s2375_s4 }
 0x26d   :  { %v417_v48 = vpop.permute.xlu1 %416 }
 0x26e   :  { %v2623_v50 = vmul.f32 %v2247_v34, %v417_v48 }
 0x270   :  { %513 = vrot.lane.b32.xlu1 %v2623_v50, %s2375_s4 }
 0x2c4   :  { %v422_v51 = vpop.permute.xlu0 %421 }
 0x2c5   :  { %424 = vst.msk [vmem:[%s2988_s5] sm:$0xff] %vm222_vm2, %v422_v51  ;;  %2086 = vmatmul.mubr.msk.f32.vlgmr.msra.gmra.mxu1 %vm222_vm2, %v422_v51 }
 0x2c6   :  { %2089 = vmatpush3.msra.mxu1 %v2483_v19  ;;  %2096 = vmatprep.mubr.msk.f32.mxu1 %vm2373_vm0, %v2372_v3 }
 0x2c7   :  { %2090 = vmatprep.subr.mxu1 %v2372_v3 }
 0x2c8   :  { %2091 = vmatpush3.msra.mxu1 %v2496_v22 }
 0x2c9   :  { %2092 = vmatprep.subr.mxu1 %v2372_v3 }
 0x2ca   :  { %2093 = vmatpush3.msra.mxu1 %v2506_v24 }
 0x2cb   :  { %2094 = vmatprep.subr.mxu1 %v2372_v3 }
 0x2cc   :  { %2095 = vmatpush3.msra.mxu1 %v2514_v25 }
 0x2cd   :  { %2099 = vmatprep.subr.mxu1 %v2372_v3 }
 0x2e2   :  { %v514_v53 = vpop.permute.xlu1 %513 }
 0x2e3   :  { %2097 = vmatmul.mubr.msk.f32.vlgmr.msra.gmra.mxu1 %vm222_vm2, %v514_v53 }
 0x2e4   :  { %2100 = vmatpush3.msra.mxu1 %v2435_v8  ;;  %2107 = vmatprep.mubr.msk.f32.mxu1 %vm2373_vm0, %v2372_v3 }
 0x2e5   :  { %2101 = vmatprep.subr.mxu1 %v2372_v3 }
 0x2e6   :  { %2102 = vmatpush3.msra.mxu1 %v2444_v10 }
 0x2e7   :  { %2103 = vmatprep.subr.mxu1 %v2372_v3 }
 0x2e8   :  { %2104 = vmatpush3.msra.mxu1 %v2453_v12 }
 0x2e9   :  { %2105 = vmatprep.subr.mxu1 %v2372_v3 }
 0x2ea   :  { %2106 = vmatpush3.msra.mxu1 %v2466_v15 }
 0x2eb   :  { %2121 = vmatprep.subr.mxu1 %v2372_v3 }
 0x385   :  { %v504_v55 = vpop.f32.mrf.mxu1 }
 0x386   :  { %v508_v57 = vadd.f32 %v504_v55, %v2584_v49 }
 0x387   :  { %v2087_v59 = vpop.f32.mrf.mxu1 }
 0x388   :  { %2252 = vtanh.f32 %v508_v57  ;;  %v1936_v7 = vmul.f32 -1.442695, %v508_v57 }
 0x395   :  { %v2253_v61 = vpop.eup %2252 }
 0x396   :  { %603 = vrot.lane.b32.xlu0 %v2253_v61, %s2374_s0 }
 0x3a3   :  { %v583_v63 = vpop.f32.mrf.mxu1 }
 0x3a4   :  { %v587_v0 = vadd.f32 %v583_v63, %v2607_v13 }
 0x3a5   :  { %v2098_v2 = vpop.f32.mrf.mxu1 }
 0x3a6   :  { %2254 = vtanh.f32 %v587_v0  ;;  %v1937_v17 = vmul.f32 -1.442695, %v587_v0 }
 0x3a7   :  { %2256 = vpow2.f32 %v1936_v7 }
 0x3b3   :  { %v2255_v5 = vpop.eup %2254 }
 0x3b4   :  { %615 = vrot.lane.b32.xlu1 %v2255_v5, %s2374_s0  ;;  %v2257_v11 = vpop.eup %2256 }
 0x3b5   :  { %v591_v14 = vadd.f32 1.0, %v2257_v11 }
 0x3b7   :  { %2258 = vrcp.f32 %v591_v14 }
 0x3b8   :  { %2260 = vpow2.f32 %v1937_v17 }
 0x3c4   :  { %v2259_v49 = vpop.eup %2258 }
 0x3c5   :  { %v2261_v21 = vpop.eup %2260  ;;  %v600_v28 = vmul.f32 %v2259_v49, %v2614_v39 }
 0x3c6   :  { %v597_v23 = vadd.f32 1.0, %v2261_v21 }
 0x3c8   :  { %2262 = vrcp.f32 %v597_v23 }
 0x3d5   :  { %v2263_v13 = vpop.eup %2262 }
 0x3d6   :  { %v612_v32 = vmul.f32 %v2263_v13, %v2618_v43 }
 0x408   :  { %v604_v18 = vpop.permute.xlu0 %603 }
 0x409   :  { %v606_v20 = vmul.f32 %v2259_v49, %v604_v18 }
 0x40b   :  { %608 = vrot.lane.b32.xlu0 %v606_v20, %s2374_s0 }
 0x426   :  { %v616_v26 = vpop.permute.xlu1 %615 }
 0x427   :  { %v618_v27 = vmul.f32 %v2263_v13, %v616_v26 }
 0x429   :  { %620 = vrot.lane.b32.xlu1 %v618_v27, %s2374_s0 }
 0x47d   :  { %v609_v29 = vpop.permute.xlu0 %608 }
 0x47e   :  { %v2660_v30 = vadd.f32 %v609_v29, %v600_v28 }
 0x480   :  { %2264 = vtanh.f32 %v2660_v30 }
 0x48d   :  { %v2265_v31 = vpop.eup %2264 }
 0x48e   :  { %626 = vrot.lane.b32.xlu0 %v2265_v31, %s2374_s0 }
 0x49b   :  { %v621_v33 = vpop.permute.xlu1 %620 }
 0x49c   :  { %v2665_v34 = vadd.f32 %v621_v33, %v612_v32 }
 0x49e   :  { %2266 = vtanh.f32 %v2665_v34 }
 0x4ab   :  { %v2267_v35 = vpop.eup %2266 }
 0x4ac   :  { %632 = vrot.lane.b32.xlu1 %v2267_v35, %s2374_s0 }
 0x500   :  { %v627_v36 = vpop.permute.xlu0 %626 }
 0x501   :  { %v629_v37 = vmul.f32 %v2259_v49, %v627_v36 }
 0x503   :  { %637 = vrot.lane.b32.xlu0 %v629_v37, %s2375_s4 }
 0x51e   :  { %v633_v38 = vpop.permute.xlu1 %632 }
 0x51f   :  { %v2670_v39 = vmul.f32 %v2263_v13, %v633_v38 }
 0x521   :  { %729 = vrot.lane.b32.xlu1 %v2670_v39, %s2375_s4 }
 0x575   :  { %v638_v40 = vpop.permute.xlu0 %637 }
 0x576   :  { %1938 = vst.msk [vmem:[%s2988_s5 + $0x8] sm:$0xff] %vm222_vm2, %v638_v40  ;;  %2108 = vmatmul.mubr.msk.f32.vlgmr.msra.gmra.mxu1 %vm222_vm2, %v638_v40 }
 0x577   :  { %2122 = vmatpush3.msra.mxu1 %v2435_v8  ;;  %2129 = vmatprep.mubr.msk.f32.mxu1 %vm2373_vm0, %v2372_v3 }
 0x578   :  { %2123 = vmatprep.subr.mxu1 %v2372_v3 }
 0x579   :  { %2124 = vmatpush3.msra.mxu1 %v2444_v10 }
 0x57a   :  { %2125 = vmatprep.subr.mxu1 %v2372_v3 }
 0x57b   :  { %2126 = vmatpush3.msra.mxu1 %v2453_v12 }
 0x57c   :  { %2127 = vmatprep.subr.mxu1 %v2372_v3 }
 0x57d   :  { %2128 = vmatpush3.msra.mxu1 %v2466_v15 }
 0x57e   :  { %2143 = vmatprep.subr.mxu1 %v2372_v3 }
 0x593   :  { %v730_v41 = vpop.permute.xlu1 %729 }
 0x594   :  { %2119 = vmatmul.mubr.msk.f32.vlgmr.msra.gmra.mxu0 %vm222_vm2, %v730_v41 }
 0x595   :  { %2133 = vmatpush3.msra.mxu0 %v2483_v19  ;;  %2140 = vmatprep.mubr.msk.f32.mxu0 %vm2373_vm0, %v2372_v3 }
 0x596   :  { %2134 = vmatprep.subr.mxu0 %v2372_v3 }
 0x597   :  { %2135 = vmatpush3.msra.mxu0 %v2496_v22 }
 0x598   :  { %2136 = vmatprep.subr.mxu0 %v2372_v3 }
 0x599   :  { %2137 = vmatpush3.msra.mxu0 %v2506_v24 }
 0x59a   :  { %2138 = vmatprep.subr.mxu0 %v2372_v3 }
 0x59b   :  { %2139 = vmatpush3.msra.mxu0 %v2514_v25 }
 0x59c   :  { %2154 = vmatprep.subr.mxu0 %v2372_v3 }
 0x636   :  { %v720_v42 = vpop.f32.mrf.mxu1 }
 0x637   :  { %v724_v43 = vadd.f32 %v720_v42, %v2588_v54 }
 0x638   :  { %v2109_v44 = vpop.f32.mrf.mxu1 }
 0x639   :  { %2268 = vtanh.f32 %v724_v43  ;;  %v1942_v55 = vmul.f32 -1.442695, %v724_v43 }
 0x646   :  { %v2269_v46 = vpop.eup %2268 }
 0x647   :  { %819 = vrot.lane.b32.xlu0 %v2269_v46, %s2374_s0 }
 0x654   :  { %v799_v47 = vpop.f32.mrf.mxu0 }
 0x655   :  { %v803_v48 = vadd.f32 %v799_v47, %v2603_v6 }
 0x656   :  { %v2120_v51 = vpop.f32.mrf.mxu0 }
 0x657   :  { %2270 = vtanh.f32 %v803_v48  ;;  %v1943_v61 = vmul.f32 -1.442695, %v803_v48 }
 0x658   :  { %2272 = vpow2.f32 %v1942_v55 }
 0x664   :  { %v2271_v53 = vpop.eup %2270 }
 0x665   :  { %831 = vrot.lane.b32.xlu1 %v2271_v53, %s2374_s0  ;;  %v2273_v57 = vpop.eup %2272 }
 0x666   :  { %v807_v59 = vadd.f32 1.0, %v2273_v57 }
 0x668   :  { %2274 = vrcp.f32 %v807_v59 }
 0x669   :  { %2276 = vpow2.f32 %v1943_v61 }
 0x675   :  { %v2275_v54 = vpop.eup %2274 }
 0x676   :  { %v2277_v2 = vpop.eup %2276  ;;  %v816_v14 = vmul.f32 %v2275_v54, %v2660_v30 }
 0x677   :  { %v813_v5 = vadd.f32 1.0, %v2277_v2 }
 0x679   :  { %2278 = vrcp.f32 %v813_v5 }
 0x686   :  { %v2279_v6 = vpop.eup %2278 }
 0x687   :  { %v828_v20 = vmul.f32 %v2279_v6, %v2665_v34 }
 0x6b9   :  { %v820_v63 = vpop.permute.xlu0 %819 }
 0x6ba   :  { %v822_v0 = vmul.f32 %v2275_v54, %v820_v63 }
 0x6bc   :  { %824 = vrot.lane.b32.xlu0 %v822_v0, %s2374_s0 }
 0x6d7   :  { %v832_v7 = vpop.permute.xlu1 %831 }
 0x6d8   :  { %v834_v11 = vmul.f32 %v2279_v6, %v832_v7 }
 0x6da   :  { %836 = vrot.lane.b32.xlu1 %v834_v11, %s2374_s0 }
 0x72e   :  { %v825_v17 = vpop.permute.xlu0 %824 }
 0x72f   :  { %v2707_v49 = vadd.f32 %v825_v17, %v816_v14 }
 0x731   :  { %2280 = vtanh.f32 %v2707_v49 }
 0x73e   :  { %v2281_v18 = vpop.eup %2280 }
 0x73f   :  { %842 = vrot.lane.b32.xlu0 %v2281_v18, %s2374_s0 }
 0x74c   :  { %v837_v21 = vpop.permute.xlu1 %836 }
 0x74d   :  { %v2712_v23 = vadd.f32 %v837_v21, %v828_v20 }
 0x74f   :  { %2282 = vtanh.f32 %v2712_v23 }
 0x75c   :  { %v2283_v13 = vpop.eup %2282 }
 0x75d   :  { %848 = vrot.lane.b32.xlu1 %v2283_v13, %s2374_s0 }
 0x7b1   :  { %v843_v26 = vpop.permute.xlu0 %842 }
 0x7b2   :  { %v845_v27 = vmul.f32 %v2275_v54, %v843_v26 }
 0x7b4   :  { %853 = vrot.lane.b32.xlu0 %v845_v27, %s2375_s4 }
 0x7cf   :  { %v849_v28 = vpop.permute.xlu1 %848 }
 0x7d0   :  { %v2717_v29 = vmul.f32 %v2279_v6, %v849_v28 }
 0x7d2   :  { %945 = vrot.lane.b32.xlu1 %v2717_v29, %s2375_s4 }
 0x826   :  { %v854_v30 = vpop.permute.xlu0 %853 }
 0x827   :  { %1944 = vst.msk [vmem:[%s2988_s5 + $0x10] sm:$0xff] %vm222_vm2, %v854_v30  ;;  %2130 = vmatmul.mubr.msk.f32.vlgmr.msra.gmra.mxu1 %vm222_vm2, %v854_v30 }
 0x828   :  { %2144 = vmatpush3.msra.mxu1 %v2435_v8  ;;  %2151 = vmatprep.mubr.msk.f32.mxu1 %vm2373_vm0, %v2372_v3 }
 0x829   :  { %2145 = vmatprep.subr.mxu1 %v2372_v3 }
 0x82a   :  { %2146 = vmatpush3.msra.mxu1 %v2444_v10 }
 0x82b   :  { %2147 = vmatprep.subr.mxu1 %v2372_v3 }
 0x82c   :  { %2148 = vmatpush3.msra.mxu1 %v2453_v12 }
 0x82d   :  { %2149 = vmatprep.subr.mxu1 %v2372_v3 }
 0x82e   :  { %2150 = vmatpush3.msra.mxu1 %v2466_v15 }
 0x82f   :  { %2165 = vmatprep.subr.mxu1 %v2372_v3 }
 0x844   :  { %v946_v31 = vpop.permute.xlu1 %945 }
 0x845   :  { %2141 = vmatmul.mubr.msk.f32.vlgmr.msra.gmra.mxu0 %vm222_vm2, %v946_v31 }
 0x846   :  { %2155 = vmatpush3.msra.mxu0 %v2483_v19  ;;  %2162 = vmatprep.mubr.msk.f32.mxu0 %vm2373_vm0, %v2372_v3 }
 0x847   :  { %2156 = vmatprep.subr.mxu0 %v2372_v3 }
 0x848   :  { %2157 = vmatpush3.msra.mxu0 %v2496_v22 }
 0x849   :  { %2158 = vmatprep.subr.mxu0 %v2372_v3 }
 0x84a   :  { %2159 = vmatpush3.msra.mxu0 %v2506_v24 }
 0x84b   :  { %2160 = vmatprep.subr.mxu0 %v2372_v3 }
 0x84c   :  { %2161 = vmatpush3.msra.mxu0 %v2514_v25 }
 0x84d   :  { %2176 = vmatprep.subr.mxu0 %v2372_v3 }
 0x8e7   :  { %v936_v32 = vpop.f32.mrf.mxu1 }
 0x8e8   :  { %v940_v33 = vadd.f32 %v936_v32, %v2592_v58 }
 0x8e9   :  { %v2131_v34 = vpop.f32.mrf.mxu1 }
 0x8ea   :  { %2284 = vtanh.f32 %v940_v33  ;;  %v1948_v41 = vmul.f32 -1.442695, %v940_v33 }
 0x8f7   :  { %v2285_v35 = vpop.eup %2284 }
 0x8f8   :  { %1035 = vrot.lane.b32.xlu0 %v2285_v35, %s2374_s0 }
 0x905   :  { %v1015_v36 = vpop.f32.mrf.mxu0 }
 0x906   :  { %v1019_v37 = vadd.f32 %v1015_v36, %v2598_v1 }
 0x907   :  { %v2142_v38 = vpop.f32.mrf.mxu0 }
 0x908   :  { %2286 = vtanh.f32 %v1019_v37  ;;  %v1949_v44 = vmul.f32 -1.442695, %v1019_v37 }
 0x909   :  { %2288 = vpow2.f32 %v1948_v41 }
 0x915   :  { %v2287_v40 = vpop.eup %2286 }
 0x916   :  { %1047 = vrot.lane.b32.xlu1 %v2287_v40, %s2374_s0  ;;  %v2289_v42 = vpop.eup %2288 }
 0x917   :  { %v1023_v43 = vadd.f32 1.0, %v2289_v42 }
 0x919   :  { %2290 = vrcp.f32 %v1023_v43 }
 0x91a   :  { %2292 = vpow2.f32 %v1949_v44 }
 0x926   :  { %v2291_v58 = vpop.eup %2290 }
 0x927   :  { %v2293_v48 = vpop.eup %2292  ;;  %v1032_v57 = vmul.f32 %v2291_v58, %v2707_v49 }
 0x928   :  { %v1029_v51 = vadd.f32 1.0, %v2293_v48 }
 0x92a   :  { %2294 = vrcp.f32 %v1029_v51 }
 0x937   :  { %v2295_v1 = vpop.eup %2294 }
 0x938   :  { %v1044_v63 = vmul.f32 %v2295_v1, %v2712_v23 }
 0x96a   :  { %v1036_v46 = vpop.permute.xlu0 %1035 }
 0x96b   :  { %v1038_v47 = vmul.f32 %v2291_v58, %v1036_v46 }
 0x96d   :  { %1040 = vrot.lane.b32.xlu0 %v1038_v47, %s2374_s0 }
 0x988   :  { %v1048_v53 = vpop.permute.xlu1 %1047 }
 0x989   :  { %v1050_v55 = vmul.f32 %v2295_v1, %v1048_v53 }
 0x98b   :  { %1052 = vrot.lane.b32.xlu1 %v1050_v55, %s2374_s0 }
 0x9df   :  { %v1041_v59 = vpop.permute.xlu0 %1040 }
 0x9e0   :  { %v2754_v61 = vadd.f32 %v1041_v59, %v1032_v57 }
 0x9e2   :  { %2296 = vtanh.f32 %v2754_v61 }
 0x9ef   :  { %v2297_v54 = vpop.eup %2296 }
 0x9f0   :  { %1058 = vrot.lane.b32.xlu0 %v2297_v54, %s2374_s0 }
 0x9fd   :  { %v1053_v0 = vpop.permute.xlu1 %1052 }
 0x9fe   :  { %v2759_v2 = vadd.f32 %v1053_v0, %v1044_v63 }
 0xa00   :  { %2298 = vtanh.f32 %v2759_v2 }
 0xa0d   :  { %v2299_v5 = vpop.eup %2298 }
 0xa0e   :  { %1064 = vrot.lane.b32.xlu1 %v2299_v5, %s2374_s0 }
 0xa62   :  { %v1059_v6 = vpop.permute.xlu0 %1058 }
 0xa63   :  { %v1061_v7 = vmul.f32 %v2291_v58, %v1059_v6 }
 0xa65   :  { %1069 = vrot.lane.b32.xlu0 %v1061_v7, %s2375_s4 }
 0xa80   :  { %v1065_v11 = vpop.permute.xlu1 %1064 }
 0xa81   :  { %v2764_v14 = vmul.f32 %v2295_v1, %v1065_v11 }
 0xa83   :  { %1155 = vrot.lane.b32.xlu1 %v2764_v14, %s2375_s4 }
 0xad7   :  { %v1070_v17 = vpop.permute.xlu0 %1069 }
 0xad8   :  { %1950 = vst.msk [vmem:[%s2988_s5 + $0x18] sm:$0xff] %vm222_vm2, %v1070_v17  ;;  %2152 = vmatmul.mubr.msk.f32.vlgmr.msra.gmra.mxu1 %vm222_vm2, %v1070_v17 }
 0xad9   :  { %2166 = vmatpush3.msra.mxu1 %v2435_v8  ;;  %2173 = vmatprep.mubr.msk.f32.mxu1 %vm2373_vm0, %v2372_v3 }
 0xada   :  { %2167 = vmatprep.subr.mxu1 %v2372_v3 }
 0xadb   :  { %2168 = vmatpush3.msra.mxu1 %v2444_v10 }
 0xadc   :  { %2169 = vmatprep.subr.mxu1 %v2372_v3 }
 0xadd   :  { %2170 = vmatpush3.msra.mxu1 %v2453_v12 }
 0xade   :  { %2171 = vmatprep.subr.mxu1 %v2372_v3 }
 0xadf   :  { %2172 = vmatpush3.msra.mxu1 %v2466_v15 }
 0xae0   :  { %2187 = vmatprep.subr.mxu1 %v2372_v3 }
 0xaf5   :  { %v1156_v49 = vpop.permute.xlu1 %1155 }
 0xaf6   :  { %2163 = vmatmul.mubr.msk.f32.vlgmr.msra.gmra.mxu0 %vm222_vm2, %v1156_v49 }
 0xaf7   :  { %2177 = vmatpush3.msra.mxu0 %v2483_v19  ;;  %2184 = vmatprep.mubr.msk.f32.mxu0 %vm2373_vm0, %v2372_v3 }
 0xaf8   :  { %2178 = vmatprep.subr.mxu0 %v2372_v3 }
 0xaf9   :  { %2179 = vmatpush3.msra.mxu0 %v2496_v22 }
 0xafa   :  { %2180 = vmatprep.subr.mxu0 %v2372_v3 }
 0xafb   :  { %2181 = vmatpush3.msra.mxu0 %v2506_v24 }
 0xafc   :  { %2182 = vmatprep.subr.mxu0 %v2372_v3 }
 0xafd   :  { %2183 = vmatpush3.msra.mxu0 %v2514_v25 }
 0xafe   :  { %2198 = vmatprep.subr.mxu0 %v2372_v3 }
 0xb98   :  { %v1149_v18 = vpop.f32.mrf.mxu1 }
 0xb99   :  { %v1153_v20 = vadd.f32 %v1149_v18, %v2596_v62 }
 0xb9a   :  { %v2153_v21 = vpop.f32.mrf.mxu1 }
 0xb9b   :  { %2300 = vtanh.f32 %v1153_v20  ;;  %v1954_v30 = vmul.f32 -1.442695, %v1153_v20 }
 0xba8   :  { %v2301_v23 = vpop.eup %2300 }
 0xba9   :  { %1245 = vrot.lane.b32.xlu0 %v2301_v23, %s2374_s0 }
 0xbb6   :  { %v1225_v13 = vpop.f32.mrf.mxu0 }
 0xbb7   :  { %v1229_v26 = vadd.f32 %v1225_v13, %v2594_v60 }
 0xbb8   :  { %v2164_v27 = vpop.f32.mrf.mxu0 }
 0xbb9   :  { %2302 = vtanh.f32 %v1229_v26  ;;  %v1955_v33 = vmul.f32 -1.442695, %v1229_v26 }
 0xbba   :  { %2304 = vpow2.f32 %v1954_v30 }
 0xbc6   :  { %v2303_v28 = vpop.eup %2302 }
 0xbc7   :  { %1257 = vrot.lane.b32.xlu1 %v2303_v28, %s2374_s0  ;;  %v2305_v31 = vpop.eup %2304 }
 0xbc8   :  { %v1233_v32 = vadd.f32 1.0, %v2305_v31 }
 0xbca   :  { %2306 = vrcp.f32 %v1233_v32 }
 0xbcb   :  { %2308 = vpow2.f32 %v1955_v33 }
 0xbd7   :  { %v2307_v62 = vpop.eup %2306 }
 0xbd8   :  { %v2309_v36 = vpop.eup %2308  ;;  %v1242_v41 = vmul.f32 %v2307_v62, %v2754_v61 }
 0xbd9   :  { %v1239_v37 = vadd.f32 1.0, %v2309_v36  ;;  %v2367_v36 = vld [vmem:[%s2984_s2] sm:$0xff] }
 0xbdb   :  { %2310 = vrcp.f32 %v1239_v37 }
 0xbe8   :  { %v2311_v60 = vpop.eup %2310 }
 0xbe9   :  { %v1254_v58 = vmul.f32 %v2311_v60, %v2759_v2 }
 0xc1b   :  { %v1246_v34 = vpop.permute.xlu0 %1245 }
 0xc1c   :  { %v1248_v35 = vmul.f32 %v2307_v62, %v1246_v34  ;;  %v2365_v34 = vld [vmem:[%s2984_s2 + $0x10] sm:$0xff] }
 0xc1e   :  { %1250 = vrot.lane.b32.xlu0 %v1248_v35, %s2374_s0  ;;  %v2366_v35 = vld [vmem:[%s2984_s2 + $0x8] sm:$0xff] }
 0xc39   :  { %v1258_v38 = vpop.permute.xlu1 %1257 }
 0xc3a   :  { %v1260_v40 = vmul.f32 %v2311_v60, %v1258_v38  ;;  %v2369_v38 = vld [vmem:[%s2985_s3 + $0x10] sm:$0xff] }
 0xc3c   :  { %1262 = vrot.lane.b32.xlu1 %v1260_v40, %s2374_s0  ;;  %v2370_v40 = vld [vmem:[%s2985_s3 + $0x8] sm:$0xff] }
 0xc90   :  { %v1251_v42 = vpop.permute.xlu0 %1250 }
 0xc91   :  { %v2801_v43 = vadd.f32 %v1251_v42, %v1242_v41  ;;  %v2371_v41 = vld [vmem:[%s2985_s3] sm:$0xff] }
 0xc93   :  { %2312 = vtanh.f32 %v2801_v43 }
 0xca0   :  { %v2313_v44 = vpop.eup %2312 }
 0xca1   :  { %1268 = vrot.lane.b32.xlu0 %v2313_v44, %s2374_s0 }
 0xcae   :  { %v1263_v46 = vpop.permute.xlu1 %1262 }
 0xcaf   :  { %v2806_v47 = vadd.f32 %v1263_v46, %v1254_v58 }
 0xcb1   :  { %2314 = vtanh.f32 %v2806_v47 }
 0xcbe   :  { %v2315_v48 = vpop.eup %2314 }
 0xcbf   :  { %1274 = vrot.lane.b32.xlu1 %v2315_v48, %s2374_s0 }
 0xd13   :  { %v1269_v51 = vpop.permute.xlu0 %1268 }
 0xd14   :  { %v1271_v1 = vmul.f32 %v2307_v62, %v1269_v51  ;;  %v2364_v62 = vld [vmem:[%s2984_s2 + $0x18] sm:$0xff] }
 0xd16   :  { %1279 = vrot.lane.b32.xlu0 %v1271_v1, %s2375_s4 }
 0xd31   :  { %v1275_v53 = vpop.permute.xlu1 %1274 }
 0xd32   :  { %v2811_v55 = vmul.f32 %v2311_v60, %v1275_v53  ;;  %v2368_v60 = vld [vmem:[%s2985_s3 + $0x18] sm:$0xff]  ;;  %s2376_s3 = smov 96  }
 0xd34   :  { %1363 = vrot.lane.b32.xlu1 %v2811_v55, %s2375_s4 }
 0xd88   :  { %v2815_v57 = vpop.permute.xlu0 %1279 }
 0xd89   :  { %2174 = vmatmul.mubr.msk.f32.vlgmr.msra.gmra.mxu1 %vm222_vm2, %v2815_v57 }
 0xd8a   :  { %2188 = vmatpush3.msra.mxu1 %v2435_v8  ;;  %2195 = vmatprep.mubr.msk.f32.mxu1 %vm2373_vm0, %v2372_v3 }
 0xd8b   :  { %2189 = vmatprep.subr.mxu1 %v2372_v3 }
 0xd8c   :  { %2190 = vmatpush3.msra.mxu1 %v2444_v10 }
 0xd8d   :  { %2191 = vmatprep.subr.mxu1 %v2372_v3 }
 0xd8e   :  { %2192 = vmatpush3.msra.mxu1 %v2453_v12 }
 0xd8f   :  { %2193 = vmatprep.subr.mxu1 %v2372_v3 }
 0xd90   :  { %2194 = vmatpush3.msra.mxu1 %v2466_v15 }
 0xd91   :  { %2209 = vmatprep.subr.mxu1 %v2372_v3 }
 0xda6   :  { %v1364_v59 = vpop.permute.xlu1 %1363 }
 0xda7   :  { %2185 = vmatmul.mubr.msk.f32.vlgmr.msra.gmra.mxu0 %vm222_vm2, %v1364_v59 }
 0xda8   :  { %2199 = vmatpush3.msra.mxu0 %v2483_v19  ;;  %2206 = vmatprep.mubr.msk.f32.mxu0 %vm2373_vm0, %v2372_v3 }
 0xda9   :  { %2200 = vmatprep.subr.mxu0 %v2372_v3 }
 0xdaa   :  { %2201 = vmatpush3.msra.mxu0 %v2496_v22 }
 0xdab   :  { %2202 = vmatprep.subr.mxu0 %v2372_v3 }
 0xdac   :  { %2203 = vmatpush3.msra.mxu0 %v2506_v24 }
 0xdad   :  { %2204 = vmatprep.subr.mxu0 %v2372_v3 }
 0xdae   :  { %2205 = vmatpush3.msra.mxu0 %v2514_v25 }
 0xdaf   :  { %2220 = vmatprep.subr.mxu0 %v2372_v3 }
 0xe49   :  { %v1357_v8 = vpop.f32.mrf.mxu1 }
 0xe4a   :  { %v1361_v10 = vadd.f32 %v1357_v8, %v2601_v4 }
 0xe4b   :  { %v2175_v12 = vpop.f32.mrf.mxu1 }
 0xe4c   :  { %2316 = vtanh.f32 %v1361_v10  ;;  %v1960_v54 = vmul.f32 -1.442695, %v1361_v10 }
 0xe59   :  { %v2317_v15 = vpop.eup %2316 }
 0xe5a   :  { %1453 = vrot.lane.b32.xlu0 %v2317_v15, %s2374_s0 }
 0xe67   :  { %v1433_v19 = vpop.f32.mrf.mxu0 }
 0xe68   :  { %v1437_v22 = vadd.f32 %v1433_v19, %v2590_v56 }
 0xe69   :  { %v2186_v61 = vpop.f32.mrf.mxu0 }
 0xe6a   :  { %2318 = vtanh.f32 %v1437_v22  ;;  %v1961_v0 = vmul.f32 -1.442695, %v1437_v22 }
 0xe6b   :  { %2320 = vpow2.f32 %v1960_v54 }
 0xe77   :  { %v2319_v24 = vpop.eup %2318 }
 0xe78   :  { %1465 = vrot.lane.b32.xlu1 %v2319_v24, %s2374_s0  ;;  %v2321_v25 = vpop.eup %2320 }
 0xe79   :  { %v1441_v63 = vadd.f32 1.0, %v2321_v25 }
 0xe7b   :  { %2322 = vrcp.f32 %v1441_v63 }
 0xe7c   :  { %2324 = vpow2.f32 %v1961_v0 }
 0xe88   :  { %v2323_v4 = vpop.eup %2322 }
 0xe89   :  { %v2325_v6 = vpop.eup %2324  ;;  %v1450_v49 = vmul.f32 %v2323_v4, %v2801_v43 }
 0xe8a   :  { %v1447_v7 = vadd.f32 1.0, %v2325_v6 }
 0xe8c   :  { %2326 = vrcp.f32 %v1447_v7 }
 0xe99   :  { %v2327_v56 = vpop.eup %2326 }
 0xe9a   :  { %v1462_v23 = vmul.f32 %v2327_v56, %v2806_v47 }
 0xecc   :  { %v1454_v2 = vpop.permute.xlu0 %1453 }
 0xecd   :  { %v1456_v5 = vmul.f32 %v2323_v4, %v1454_v2 }
 0xecf   :  { %1458 = vrot.lane.b32.xlu0 %v1456_v5, %s2374_s0 }
 0xeea   :  { %v1466_v11 = vpop.permute.xlu1 %1465 }
 0xeeb   :  { %v1468_v17 = vmul.f32 %v2327_v56, %v1466_v11 }
 0xeed   :  { %1470 = vrot.lane.b32.xlu1 %v1468_v17, %s2374_s0 }
 0xf41   :  { %v1459_v18 = vpop.permute.xlu0 %1458 }
 0xf42   :  { %v2847_v20 = vadd.f32 %v1459_v18, %v1450_v49 }
 0xf44   :  { %2328 = vtanh.f32 %v2847_v20 }
 0xf51   :  { %v2329_v21 = vpop.eup %2328 }
 0xf52   :  { %1476 = vrot.lane.b32.xlu0 %v2329_v21, %s2374_s0 }
 0xf5f   :  { %v1471_v13 = vpop.permute.xlu1 %1470 }
 0xf60   :  { %v2852_v26 = vadd.f32 %v1471_v13, %v1462_v23 }
 0xf62   :  { %2330 = vtanh.f32 %v2852_v26 }
 0xf6f   :  { %v2331_v27 = vpop.eup %2330 }
 0xf70   :  { %1482 = vrot.lane.b32.xlu1 %v2331_v27, %s2374_s0 }
 0xfc4   :  { %v1477_v28 = vpop.permute.xlu0 %1476 }
 0xfc5   :  { %v1479_v30 = vmul.f32 %v2323_v4, %v1477_v28 }
 0xfc7   :  { %1487 = vrot.lane.b32.xlu0 %v1479_v30, %s2375_s4 }
 0xfe2   :  { %v1483_v31 = vpop.permute.xlu1 %1482 }
 0xfe3   :  { %v2857_v32 = vmul.f32 %v2327_v56, %v1483_v31 }
 0xfe5   :  { %1571 = vrot.lane.b32.xlu1 %v2857_v32, %s2375_s4 }
0x1039   :  { %v2861_v33 = vpop.permute.xlu0 %1487 }
0x103a   :  { %2196 = vmatmul.mubr.msk.f32.vlgmr.msra.gmra.mxu1 %vm222_vm2, %v2861_v33 }
0x103b   :  { %2210 = vmatpush3.msra.mxu1 %v2364_v62  ;;  %2217 = vmatprep.mubr.msk.f32.mxu1 %vm2373_vm0, %v2372_v3 }
0x103c   :  { %2211 = vmatprep.subr.mxu1 %v2372_v3 }
0x103d   :  { %2212 = vmatpush3.msra.mxu1 %v2365_v34 }
0x103e   :  { %2213 = vmatprep.subr.mxu1 %v2372_v3 }
0x103f   :  { %2214 = vmatpush3.msra.mxu1 %v2366_v35 }
0x1040   :  { %2215 = vmatprep.subr.mxu1 %v2372_v3 }
0x1041   :  { %2216 = vmatpush3.msra.mxu1 %v2367_v36 }
0x1057   :  { %v1572_v37 = vpop.permute.xlu1 %1571 }
0x1058   :  { %2207 = vmatmul.mubr.msk.f32.vlgmr.msra.gmra.mxu0 %vm222_vm2, %v1572_v37 }
0x1059   :  { %2221 = vmatpush3.msra.mxu0 %v2368_v60  ;;  %2228 = vmatprep.mubr.msk.f32.mxu0 %vm2373_vm0, %v2372_v3 }
0x105a   :  { %2222 = vmatprep.subr.mxu0 %v2372_v3 }
0x105b   :  { %2223 = vmatpush3.msra.mxu0 %v2369_v38 }
0x105c   :  { %2224 = vmatprep.subr.mxu0 %v2372_v3 }
0x105d   :  { %2225 = vmatpush3.msra.mxu0 %v2370_v40 }
0x105e   :  { %2226 = vmatprep.subr.mxu0 %v2372_v3 }
0x105f   :  { %2227 = vmatpush3.msra.mxu0 %v2371_v41 }
0x10fa   :  { %v1565_v42 = vpop.f32.mrf.mxu1 }
0x10fb   :  { %v1569_v43 = vadd.f32 %v1565_v42, %v2605_v9 }
0x10fc   :  { %v2197_v44 = vpop.f32.mrf.mxu1 }
0x10fd   :  { %2332 = vtanh.f32 %v1569_v43  ;;  %v1966_v3 = vmul.f32 -1.442695, %v1569_v43 }
0x110a   :  { %v2333_v58 = vpop.eup %2332 }
0x110b   :  { %1661 = vrot.lane.b32.xlu0 %v2333_v58, %s2374_s0 }
0x1118   :  { %v1641_v46 = vpop.f32.mrf.mxu0 }
0x1119   :  { %v1645_v47 = vadd.f32 %v1641_v46, %v2586_v52 }
0x111a   :  { %v2208_v48 = vpop.f32.mrf.mxu0 }
0x111b   :  { %2334 = vtanh.f32 %v1645_v47  ;;  %v1967_v59 = vmul.f32 -1.442695, %v1645_v47 }
0x111c   :  { %2336 = vpow2.f32 %v1966_v3 }
0x1128   :  { %v2335_v51 = vpop.eup %2334 }
0x1129   :  { %1673 = vrot.lane.b32.xlu1 %v2335_v51, %s2374_s0  ;;  %v2337_v1 = vpop.eup %2336 }
0x112a   :  { %v1649_v53 = vadd.f32 1.0, %v2337_v1 }
0x112c   :  { %2338 = vrcp.f32 %v1649_v53 }
0x112d   :  { %2340 = vpow2.f32 %v1967_v59 }
0x1139   :  { %v2339_v9 = vpop.eup %2338 }
0x113a   :  { %v2341_v12 = vpop.eup %2340  ;;  %v1658_v61 = vmul.f32 %v2339_v9, %v2847_v20 }
0x113b   :  { %v1655_v15 = vadd.f32 1.0, %v2341_v12 }
0x113d   :  { %2342 = vrcp.f32 %v1655_v15 }
0x114a   :  { %v2343_v52 = vpop.eup %2342 }
0x114b   :  { %v1670_v63 = vmul.f32 %v2343_v52, %v2852_v26 }
0x117d   :  { %v1662_v8 = vpop.permute.xlu0 %1661 }
0x117e   :  { %v1664_v10 = vmul.f32 %v2339_v9, %v1662_v8 }
0x1180   :  { %1666 = vrot.lane.b32.xlu0 %v1664_v10, %s2374_s0 }
0x119b   :  { %v1674_v19 = vpop.permute.xlu1 %1673 }
0x119c   :  { %v1676_v22 = vmul.f32 %v2343_v52, %v1674_v19 }
0x119e   :  { %1678 = vrot.lane.b32.xlu1 %v1676_v22, %s2374_s0 }
0x11f2   :  { %v1667_v24 = vpop.permute.xlu0 %1666 }
0x11f3   :  { %v1669_v54 = vadd.f32 %v1667_v24, %v1658_v61 }
0x11f5   :  { %2344 = vtanh.f32 %v1669_v54 }
0x1202   :  { %v2345_v25 = vpop.eup %2344 }
0x1203   :  { %1684 = vrot.lane.b32.xlu0 %v2345_v25, %s2374_s0 }
0x1210   :  { %v1679_v0 = vpop.permute.xlu1 %1678 }
0x1211   :  { %v1681_v4 = vadd.f32 %v1679_v0, %v1670_v63 }
0x1213   :  { %2346 = vtanh.f32 %v1681_v4 }
0x1220   :  { %v2347_v2 = vpop.eup %2346 }
0x1221   :  { %1690 = vrot.lane.b32.xlu1 %v2347_v2, %s2374_s0 }
0x1275   :  { %v1685_v5 = vpop.permute.xlu0 %1684 }
0x1276   :  { %v1687_v6 = vmul.f32 %v2339_v9, %v1685_v5 }
0x1278   :  { %1695 = vrot.lane.b32.xlu0 %v1687_v6, %s2375_s4 }
0x1293   :  { %v1691_v7 = vpop.permute.xlu1 %1690 }
0x1294   :  { %v1693_v56 = vmul.f32 %v2343_v52, %v1691_v7 }
0x1296   :  { %1779 = vrot.lane.b32.xlu1 %v1693_v56, %s2375_s4 }
0x12ea   :  { %v2912_v11 = vpop.permute.xlu0 %1695 }
0x12eb   :  { %2218 = vmatmul.mubr.msk.f32.vlgmr.msra.gmra.mxu1 %vm222_vm2, %v2912_v11 }
0x1308   :  { %v1780_v17 = vpop.permute.xlu1 %1779 }
0x1309   :  { %2229 = vmatmul.mubr.msk.f32.vlgmr.msra.gmra.mxu0 %vm222_vm2, %v1780_v17 }
0x13ab   :  { %v1773_v49 = vpop.f32.mrf.mxu1 }
0x13ac   :  { %v1777_v18 = vadd.f32 %v1773_v49, %v2609_v16 }
0x13ad   :  { %v2219_v20 = vpop.f32.mrf.mxu1 }
0x13ae   :  { %2348 = vtanh.f32 %v1777_v18  ;;  %v1972_v28 = vmul.f32 -1.442695, %v1777_v18 }
0x13bb   :  { %v2349_v21 = vpop.eup %2348 }
0x13bc   :  { %1869 = vrot.lane.b32.xlu0 %v2349_v21, %s2374_s0 }
0x13c9   :  { %v1849_v23 = vpop.f32.mrf.mxu0 }
0x13ca   :  { %v1853_v13 = vadd.f32 %v1849_v23, %v2582_v45 }
0x13cb   :  { %v2230_v26 = vpop.f32.mrf.mxu0 }
0x13cc   :  { %2350 = vtanh.f32 %v1853_v13  ;;  %v1973_v62 = vmul.f32 -1.442695, %v1853_v13 }
0x13cd   :  { %2352 = vpow2.f32 %v1972_v28 }
0x13d9   :  { %v2351_v27 = vpop.eup %2350 }
0x13da   :  { %1881 = vrot.lane.b32.xlu1 %v2351_v27, %s2374_s0  ;;  %v2353_v30 = vpop.eup %2352 }
0x13db   :  { %v1857_v31 = vadd.f32 1.0, %v2353_v30 }
0x13dd   :  { %2354 = vrcp.f32 %v1857_v31 }
0x13de   :  { %2356 = vpow2.f32 %v1973_v62 }
0x13ea   :  { %v2355_v16 = vpop.eup %2354 }
0x13eb   :  { %v2357_v36 = vpop.eup %2356  ;;  %v1866_v40 = vmul.f32 %v2355_v16, %v1669_v54 }
0x13ec   :  { %v1863_v37 = vadd.f32 1.0, %v2357_v36 }
0x13ee   :  { %2358 = vrcp.f32 %v1863_v37 }
0x13fb   :  { %v2359_v45 = vpop.eup %2358 }
0x13fc   :  { %v1878_v44 = vmul.f32 %v2359_v45, %v1681_v4 }
0x142e   :  { %v1870_v34 = vpop.permute.xlu0 %1869 }
0x142f   :  { %v1872_v35 = vmul.f32 %v2355_v16, %v1870_v34 }
0x1431   :  { %1874 = vrot.lane.b32.xlu0 %v1872_v35, %s2374_s0 }
0x144c   :  { %v1882_v60 = vpop.permute.xlu1 %1881 }
0x144d   :  { %v1884_v38 = vmul.f32 %v2359_v45, %v1882_v60 }
0x144f   :  { %1886 = vrot.lane.b32.xlu1 %v1884_v38, %s2374_s0 }
0x14a3   :  { %v1875_v41 = vpop.permute.xlu0 %1874 }
0x14a4   :  { %v1877_v42 = vadd.f32 %v1875_v41, %v1866_v40 }
0x14a6   :  { %2360 = vtanh.f32 %v1877_v42 }
0x14b3   :  { %v2361_v43 = vpop.eup %2360 }
0x14b4   :  { %1892 = vrot.lane.b32.xlu0 %v2361_v43, %s2374_s0 }
0x14b8   :  { %426 = vrot.lane.b32.xlu0 %v2623_v50, %s2376_s3 }
0x14bc   :  { %859 = vrot.lane.b32.xlu0 %v2717_v29, %s2376_s3 }
0x14c0   :  { %1284 = vrot.lane.b32.xlu0 %v2811_v55, %s2376_s3 }
0x14c1   :  { %v1887_v58 = vpop.permute.xlu1 %1886 }
0x14c2   :  { %v1889_v46 = vadd.f32 %v1887_v58, %v1878_v44 }
0x14c4   :  { %2362 = vtanh.f32 %v1889_v46  ;;  %1700 = vrot.lane.b32.xlu0 %v1693_v56, %s2376_s3 }
0x14d1   :  { %v2363_v47 = vpop.eup %2362 }
0x14d2   :  { %1898 = vrot.lane.b32.xlu1 %v2363_v47, %s2374_s0 }
0x14d6   :  { %643 = vrot.lane.b32.xlu1 %v2670_v39, %s2376_s3 }
0x14da   :  { %1075 = vrot.lane.b32.xlu1 %v2764_v14, %s2376_s3 }
0x14de   :  { %1492 = vrot.lane.b32.xlu1 %v2857_v32, %s2376_s3 }
0x1526   :  { %v1893_v48 = vpop.permute.xlu0 %1892 }
0x1527   :  { %v1895_v50 = vmul.f32 %v2355_v16, %v1893_v48 }
0x1529   :  { %1903 = vrot.lane.b32.xlu1 %v1895_v50, %s2375_s4 }
0x152a   :  { %v427_v29 = vpop.permute.xlu0 %426 }
0x152b   :  { %1933 = vst.msk [vmem:[%s2988_s5 + $0x38] sm:$0xff] %vm430_vm3, %v427_v29 }
0x152e   :  { %v860_v55 = vpop.permute.xlu0 %859 }
0x152f   :  { %1945 = vst.msk [vmem:[%s2988_s5 + $0x28] sm:$0xff] %vm430_vm3, %v860_v55 }
0x1530   :  { %1962 = vst.msk [vmem:[%s2988_s5 + $0x28] sm:$0xff] %vm222_vm2, %v2861_v33 }
0x1532   :  { %v1285_v39 = vpop.permute.xlu0 %1284 }
0x1533   :  { %1957 = vst.msk [vmem:[%s2988_s5 + $0x18] sm:$0xff] %vm430_vm3, %v1285_v39 }
0x1536   :  { %v1701_v14 = vpop.permute.xlu0 %1700 }
0x1537   :  { %1969 = vst.msk [vmem:[%s2988_s5 + $0x8] sm:$0xff] %vm430_vm3, %v1701_v14 }
0x1544   :  { %v1899_v32 = vpop.permute.xlu1 %1898 }
0x1545   :  { %v1901_v51 = vmul.f32 %v2359_v45, %v1899_v32 }
0x1547   :  { %1908 = vrot.lane.b32.xlu0 %v1901_v51, %s2376_s3 }
0x1548   :  { %v644_v3 = vpop.permute.xlu1 %643 }
0x1549   :  { %1939 = vst.msk [vmem:[%s2988_s5 + $0x30] sm:$0xff] %vm430_vm3, %v644_v3 }
0x154a   :  { %1968 = vst.msk [vmem:[%s2988_s5 + $0x30] sm:$0xff] %vm222_vm2, %v2912_v11 }
0x154c   :  { %v1076_v33 = vpop.permute.xlu1 %1075 }
0x154d   :  { %1951 = vst.msk [vmem:[%s2988_s5 + $0x20] sm:$0xff] %vm430_vm3, %v1076_v33 }
0x154e   :  { %1956 = vst.msk [vmem:[%s2988_s5 + $0x20] sm:$0xff] %vm222_vm2, %v2815_v57 }
0x1550   :  { %v1493_v1 = vpop.permute.xlu1 %1492 }
0x1551   :  { %1963 = vst.msk [vmem:[%s2988_s5 + $0x10] sm:$0xff] %vm430_vm3, %v1493_v1 }
0x159b   :  { %v1904_v53 = vpop.permute.xlu1 %1903 }
0x159c   :  { %1974 = vst.msk [vmem:[%s2988_s5 + $0x38] sm:$0xff] %vm222_vm2, %v1904_v53 }
0x15b9   :  { %v1909_v59 = vpop.permute.xlu0 %1908 }
0x15ba   :  { %1911 = vst.msk [vmem:[%s2988_s5] sm:$0xff] %vm430_vm3, %v1909_v59 }

// kernel: bilstm_crf_forward.3
= control target key start
LH: loop header
LB: loop body
LE: loop exit
PB: predicated region body
PF: predicated region fallthrough
CT: control target
= control target key end

     0   :  { %v2360_v3 = vmov 0.0   ;;  %vm2361_vm0 = vmmov 0   ;;  %vm48_vm1 = vcmask 261120   ;;  %v38_v25 = vlaneseq  ;;  %s2941_s1 = inlined_call_operand.vmem [shape: f32[32,256], index: 1, kind: input, shape index: {}]   ;;  %s2942_s2 = inlined_call_operand.vmem [shape: f32[32,128], index: 2, kind: input, shape index: {}]   ;;  %s2943_s0 = inlined_call_operand.vmem [shape: f32[64,32], index: 0, kind: input, shape index: {}]   ;;  %s2944_s3 = inlined_call_operand.vmem [shape: f32[32,128], index: 3, kind: input, shape index: {}]   ;;  %s2945_s4 = inlined_call_operand.vmem [shape: f32[1,256], index: 4, kind: input, shape index: {}]   ;;  %s2946_s5 = inlined_call_operand.vmem [shape: f32[64,64], index: 5, kind: output, shape index: {}]  }
   0x1   :  { %v35_v0 = vld [vmem:[%s2941_s1 + $0x38] sm:$0xff]  ;;  %v34_v1 = vld [vmem:[%s2941_s1 + $0x30] sm:$0xff]  ;;  %v33_v2 = vld [vmem:[%s2941_s1 + $0x28] sm:$0xff]  ;;  %2046 = vmatprep.subr.mxu1 %v2360_v3  ;;  %137 = vmatprep.mubr.f32.mxu0 %v2360_v3  ;;  %vm421_vm2 = vcmask 523520  }
   0x2   :  { %97 = vmatprep.subr.mxu0 %v35_v0  ;;  %v32_v4 = vld [vmem:[%s2941_s1 + $0x20] sm:$0xff]  ;;  %v2412_v5 = vld [vmem:[%s2942_s2 + $0x18] sm:$0xff]  ;;  %2054 = vmatprep.mubr.msk.f32.mxu1 %vm2361_vm0, %v2360_v3  ;;  %v2423_v7 = vld [vmem:[%s2942_s2 + $0x10] sm:$0xff]  ;;  %v39_v26 = vshrl.u32 %v38_v25, 7 }
   0x3   :  { %98 = vmatpush1.msra.mxu0 %v34_v1  ;;  %2047 = vmatpush3.msra.mxu1 %v2412_v5  ;;  %v31_v6 = vld [vmem:[%s2941_s1 + $0x18] sm:$0xff]  ;;  %v30_v8 = vld [vmem:[%s2941_s1 + $0x10] sm:$0xff]  ;;  %v2432_v9 = vld [vmem:[%s2942_s2 + $0x8] sm:$0xff] }
   0x4   :  { %99 = vmatprep.subr.mxu0 %v33_v2  ;;  %2048 = vmatprep.subr.mxu1 %v2360_v3  ;;  %v29_v10 = vld [vmem:[%s2941_s1 + $0x8] sm:$0xff]  ;;  %v28_v11 = vld [vmem:[%s2941_s1] sm:$0xff]  ;;  %v2456_v14 = vld [vmem:[%s2944_s3 + $0x18] sm:$0xff]  ;;  %v40_v27 = vsub.s32 0, %v39_v26  ;;  %v44_v29 = vsub.s32 1, %v39_v26 }
   0x5   :  { %100 = vmatpush1.msra.mxu0 %v32_v4  ;;  %2049 = vmatpush3.msra.mxu1 %v2423_v7  ;;  %v2445_v12 = vld [vmem:[%s2942_s2] sm:$0xff]  ;;  %v21_v15 = vld [vmem:[%s2943_s0 + $0x8] sm:$0xff]  ;;  %v2468_v16 = vld [vmem:[%s2944_s3 + $0x10] sm:$0xff] }
   0x6   :  { %101 = vmatprep.subr.mxu0 %v31_v6  ;;  %2050 = vmatprep.subr.mxu1 %v2360_v3  ;;  %v20_v13 = vld [vmem:[%s2943_s0] sm:$0xff]  ;;  %v2477_v17 = vld [vmem:[%s2944_s3 + $0x8] sm:$0xff]  ;;  %v22_v18 = vld [vmem:[%s2943_s0 + $0x10] sm:$0xff] }
   0x7   :  { %102 = vmatpush1.msra.mxu0 %v30_v8  ;;  %2051 = vmatpush3.msra.mxu1 %v2432_v9  ;;  %v2490_v19 = vld [vmem:[%s2944_s3] sm:$0xff]  ;;  %v23_v20 = vld [vmem:[%s2943_s0 + $0x18] sm:$0xff]  ;;  %v25_v22 = vld [vmem:[%s2943_s0 + $0x28] sm:$0xff] }
   0x8   :  { %103 = vmatprep.subr.mxu0 %v29_v10  ;;  %2052 = vmatprep.subr.mxu1 %v2360_v3  ;;  %v24_v21 = vld [vmem:[%s2943_s0 + $0x20] sm:$0xff]  ;;  %v26_v23 = vld [vmem:[%s2943_s0 + $0x30] sm:$0xff]  ;;  %v27_v24 = vld [vmem:[%s2943_s0 + $0x38] sm:$0xff]  ;;  %s2362_s0 = smov 32  }
   0x9   :  { %104 = vmatpush1.msra.mxu0 %v28_v11  ;;  %2053 = vmatpush3.msra.mxu1 %v2445_v12  ;;  %v36_v28 = vld [vmem:[%s2945_s4] sm:$0x3]  ;;  %s2363_s4 = smov 64  }
   0xa   :  { %1914 = vmatmul.mubr.msk.f32.vlgmr.msra.gmra.mxu0 %vm48_vm1, %v20_v13  ;;  %2055 = vmatmul.mubr.f32.vlgmr.msra.gmra.mxu1 %v2360_v3  ;;  %v41_v30 = vrot.slane %v36_v28, %v40_v27  ;;  %v45_v31 = vrot.slane %v36_v28, %v44_v29 }
   0xb   :  { %143 = vmatprep.mubr.f32.mxu0 %v2360_v3  ;;  %2057 = vmatprep.subr.mxu1 %v2360_v3 }
   0xc   :  { %2058 = vmatpush3.msra.mxu1 %v2456_v14  ;;  %2065 = vmatprep.mubr.msk.f32.mxu1 %vm2361_vm0, %v2360_v3 }
   0xd   :  { %2059 = vmatprep.subr.mxu1 %v2360_v3  ;;  %2090 = vmatprep.subr.mxu0 %v2360_v3 }
   0xe   :  { %1915 = vmatmul.mubr.msk.f32.gmra.mxu0 %vm48_vm1, %v21_v15  ;;  %2060 = vmatpush3.msra.mxu1 %v2468_v16 }
   0xf   :  { %149 = vmatprep.mubr.f32.mxu0 %v2360_v3  ;;  %2061 = vmatprep.subr.mxu1 %v2360_v3 }
  0x10   :  { %2062 = vmatpush3.msra.mxu1 %v2477_v17  ;;  %2091 = vmatpush3.msra.mxu0 %v2412_v5 }
  0x11   :  { %2063 = vmatprep.subr.mxu1 %v2360_v3  ;;  %2092 = vmatprep.subr.mxu0 %v2360_v3 }
  0x12   :  { %1916 = vmatmul.mubr.msk.f32.gmra.mxu0 %vm48_vm1, %v22_v18  ;;  %2064 = vmatpush3.msra.mxu1 %v2490_v19 }
  0x13   :  { %155 = vmatprep.mubr.f32.mxu0 %v2360_v3  ;;  %2066 = vmatmul.mubr.f32.vlgmr.msra.gmra.mxu1 %v2360_v3 }
  0x14   :  { %2068 = vmatprep.subr.mxu1 %v2360_v3  ;;  %2076 = vmatprep.mubr.msk.f32.mxu1 %vm2361_vm0, %v2360_v3 }
  0x15   :  { %2069 = vmatpush3.msra.mxu1 %v2412_v5  ;;  %2093 = vmatpush3.msra.mxu0 %v2423_v7 }
  0x16   :  { %1917 = vmatmul.mubr.msk.f32.gmra.mxu0 %vm48_vm1, %v23_v20  ;;  %2070 = vmatprep.subr.mxu1 %v2360_v3 }
  0x17   :  { %161 = vmatprep.mubr.f32.mxu0 %v2360_v3  ;;  %2071 = vmatpush3.msra.mxu1 %v2423_v7 }
  0x18   :  { %2072 = vmatprep.subr.mxu1 %v2360_v3  ;;  %2094 = vmatprep.subr.mxu0 %v2360_v3 }
  0x19   :  { %2073 = vmatpush3.msra.mxu1 %v2432_v9  ;;  %2095 = vmatpush3.msra.mxu0 %v2432_v9 }
  0x1a   :  { %1918 = vmatmul.mubr.msk.f32.gmra.mxu0 %vm48_vm1, %v24_v21  ;;  %2074 = vmatprep.subr.mxu1 %v2360_v3 }
  0x1b   :  { %167 = vmatprep.mubr.f32.mxu0 %v2360_v3  ;;  %2075 = vmatpush3.msra.mxu1 %v2445_v12 }
  0x1c   :  { %2079 = vmatprep.subr.mxu1 %v2360_v3  ;;  %2096 = vmatprep.subr.mxu0 %v2360_v3 }
  0x1d   :  { %2097 = vmatpush3.msra.mxu0 %v2445_v12 }
  0x1e   :  { %1919 = vmatmul.mubr.msk.f32.gmra.mxu0 %vm48_vm1, %v25_v22  ;;  %2112 = vmatprep.subr.mxu0 %v2360_v3 }
  0x1f   :  { %173 = vmatprep.mubr.f32.mxu0 %v2360_v3 }
  0x22   :  { %1920 = vmatmul.mubr.msk.f32.gmra.mxu0 %vm48_vm1, %v26_v23 }
  0x23   :  { %179 = vmatprep.mubr.f32.mxu0 %v2360_v3 }
  0x26   :  { %1921 = vmatmul.mubr.msk.f32.gmra.mxu0 %vm48_vm1, %v27_v24 }
  0x27   :  { %2098 = vmatprep.mubr.msk.f32.mxu0 %vm2361_vm0, %v2360_v3 }
  0xca   :  { %v139_v32 = vpop.f32.mrf.mxu0  ;;  %v283_v33 = vpop.f32.mrf.mxu1 }
  0xcb   :  { %v140_v34 = vadd.f32 %v139_v32, %v41_v30 }
  0xcc   :  { %v141_v35 = vpop.f32.mrf.mxu0  ;;  %v2056_v36 = vpop.f32.mrf.mxu1 }
  0xcd   :  { %v2546_v37 = vadd.f32 %v141_v35, %v45_v31  ;;  %v287_v38 = vadd.f32 %v283_v33, %v140_v34 }
  0xce   :  { %v145_v39 = vpop.f32.mrf.mxu0 }
  0xcf   :  { %2227 = vtanh.f32 %v287_v38  ;;  %v2548_v40 = vadd.f32 %v145_v39, %v41_v30  ;;  %v1922_v13 = vmul.f32 -1.442695, %v287_v38 }
  0xd0   :  { %v147_v41 = vpop.f32.mrf.mxu0 }
  0xd1   :  { %v2550_v42 = vadd.f32 %v147_v41, %v45_v31 }
  0xd2   :  { %v151_v43 = vpop.f32.mrf.mxu0 }
  0xd3   :  { %v2552_v44 = vadd.f32 %v151_v43, %v41_v30  ;;  %v358_v45 = vpop.f32.mrf.mxu1 }
  0xd4   :  { %v153_v46 = vpop.f32.mrf.mxu0 }
  0xd5   :  { %v2554_v47 = vadd.f32 %v153_v46, %v45_v31  ;;  %v2067_v48 = vpop.f32.mrf.mxu1 }
  0xd6   :  { %v157_v49 = vpop.f32.mrf.mxu0 }
  0xd7   :  { %v2556_v50 = vadd.f32 %v157_v49, %v41_v30 }
  0xd8   :  { %v159_v51 = vpop.f32.mrf.mxu0 }
  0xd9   :  { %v2558_v52 = vadd.f32 %v159_v51, %v45_v31 }
  0xda   :  { %v163_v53 = vpop.f32.mrf.mxu0 }
  0xdb   :  { %v2560_v54 = vadd.f32 %v163_v53, %v41_v30 }
  0xdc   :  { %v2228_v55 = vpop.eup %2227  ;;  %v165_v56 = vpop.f32.mrf.mxu0 }
  0xdd   :  { %v2562_v57 = vadd.f32 %v165_v56, %v45_v31  ;;  %378 = vrot.lane.b32.xlu0 %v2228_v55, %s2362_s0 }
  0xde   :  { %v169_v58 = vpop.f32.mrf.mxu0 }
  0xdf   :  { %v2565_v59 = vadd.f32 %v169_v58, %v41_v30 }
  0xe0   :  { %v171_v60 = vpop.f32.mrf.mxu0 }
  0xe1   :  { %v2567_v61 = vadd.f32 %v171_v60, %v45_v31 }
  0xe2   :  { %v175_v62 = vpop.f32.mrf.mxu0 }
  0xe3   :  { %v2569_v63 = vadd.f32 %v175_v62, %v41_v30 }
  0xe4   :  { %v177_v0 = vpop.f32.mrf.mxu0 }
  0xe5   :  { %v2571_v1 = vadd.f32 %v177_v0, %v45_v31 }
  0xe6   :  { %v181_v2 = vpop.f32.mrf.mxu0 }
  0xe7   :  { %v2573_v4 = vadd.f32 %v181_v2, %v41_v30 }
  0xe8   :  { %v183_v6 = vpop.f32.mrf.mxu0 }
  0xe9   :  { %v184_v8 = vadd.f32 %v183_v6, %v45_v31 }
  0xeb   :  { %v362_v10 = vadd.f32 %v358_v45, %v184_v8 }
  0xed   :  { %2229 = vtanh.f32 %v362_v10  ;;  %v1923_v20 = vmul.f32 -1.442695, %v362_v10 }
  0xee   :  { %2231 = vpow2.f32 %v1922_v13 }
  0xfa   :  { %v2230_v11 = vpop.eup %2229 }
  0xfb   :  { %390 = vrot.lane.b32.xlu0 %v2230_v11, %s2362_s0  ;;  %v2232_v15 = vpop.eup %2231 }
  0xfc   :  { %v366_v18 = vadd.f32 1.0, %v2232_v15 }
  0xfe   :  { %2233 = vrcp.f32 %v366_v18 }
  0xff   :  { %2235 = vpow2.f32 %v1923_v20 }
 0x10b   :  { %v2234_v21 = vpop.eup %2233 }
 0x10c   :  { %v2236_v24 = vpop.eup %2235  ;;  %v375_v29 = vmul.f32 0.0, %v2234_v21 }
 0x10d   :  { %v372_v25 = vadd.f32 1.0, %v2236_v24 }
 0x10f   :  { %2237 = vrcp.f32 %v372_v25 }
 0x11c   :  { %v2238_v26 = vpop.eup %2237 }
 0x11d   :  { %v387_v33 = vmul.f32 0.0, %v2238_v26 }
 0x14f   :  { %v379_v22 = vpop.permute.xlu0 %378 }
 0x150   :  { %v381_v23 = vmul.f32 %v2234_v21, %v379_v22 }
 0x152   :  { %383 = vrot.lane.b32.xlu1 %v381_v23, %s2362_s0 }
 0x16d   :  { %v391_v27 = vpop.permute.xlu0 %390 }
 0x16e   :  { %v393_v28 = vmul.f32 %v2238_v26, %v391_v27 }
 0x170   :  { %395 = vrot.lane.b32.xlu1 %v393_v28, %s2362_s0 }
 0x1c4   :  { %v384_v30 = vpop.permute.xlu1 %383 }
 0x1c5   :  { %v2578_v31 = vadd.f32 %v384_v30, %v375_v29 }
 0x1c7   :  { %2239 = vtanh.f32 %v2578_v31 }
 0x1d4   :  { %v2240_v32 = vpop.eup %2239 }
 0x1d5   :  { %401 = vrot.lane.b32.xlu0 %v2240_v32, %s2362_s0 }
 0x1e2   :  { %v396_v34 = vpop.permute.xlu1 %395 }
 0x1e3   :  { %v2582_v35 = vadd.f32 %v396_v34, %v387_v33 }
 0x1e5   :  { %2241 = vtanh.f32 %v2582_v35 }
 0x1f2   :  { %v2242_v36 = vpop.eup %2241 }
 0x1f3   :  { %407 = vrot.lane.b32.xlu1 %v2242_v36, %s2362_s0 }
 0x247   :  { %v402_v38 = vpop.permute.xlu0 %401 }
 0x248   :  { %v404_v39 = vmul.f32 %v2234_v21, %v402_v38 }
 0x24a   :  { %412 = vrot.lane.b32.xlu0 %v404_v39, %s2363_s4 }
 0x265   :  { %v408_v41 = vpop.permute.xlu1 %407 }
 0x266   :  { %v2587_v43 = vmul.f32 %v2238_v26, %v408_v41 }
 0x268   :  { %504 = vrot.lane.b32.xlu1 %v2587_v43, %s2363_s4 }
 0x2bc   :  { %v413_v45 = vpop.permute.xlu0 %412 }
 0x2bd   :  { %415 = vst.msk [vmem:[%s2946_s5] sm:$0xff] %vm48_vm1, %v413_v45  ;;  %2077 = vmatmul.mubr.msk.f32.vlgmr.msra.gmra.mxu1 %vm48_vm1, %v413_v45 }
 0x2be   :  { %2080 = vmatpush3.msra.mxu1 %v2456_v14  ;;  %2087 = vmatprep.mubr.msk.f32.mxu1 %vm2361_vm0, %v2360_v3 }
 0x2bf   :  { %2081 = vmatprep.subr.mxu1 %v2360_v3 }
 0x2c0   :  { %2082 = vmatpush3.msra.mxu1 %v2468_v16 }
 0x2c1   :  { %2083 = vmatprep.subr.mxu1 %v2360_v3 }
 0x2c2   :  { %2084 = vmatpush3.msra.mxu1 %v2477_v17 }
 0x2c3   :  { %2085 = vmatprep.subr.mxu1 %v2360_v3 }
 0x2c4   :  { %2086 = vmatpush3.msra.mxu1 %v2490_v19 }
 0x2c5   :  { %2101 = vmatprep.subr.mxu1 %v2360_v3 }
 0x2da   :  { %v505_v46 = vpop.permute.xlu1 %504 }
 0x2db   :  { %2088 = vmatmul.mubr.msk.f32.vlgmr.msra.gmra.mxu1 %vm48_vm1, %v505_v46 }
 0x2dc   :  { %2102 = vmatpush3.msra.mxu1 %v2456_v14  ;;  %2109 = vmatprep.mubr.msk.f32.mxu1 %vm2361_vm0, %v2360_v3 }
 0x2dd   :  { %2103 = vmatprep.subr.mxu1 %v2360_v3 }
 0x2de   :  { %2104 = vmatpush3.msra.mxu1 %v2468_v16 }
 0x2df   :  { %2105 = vmatprep.subr.mxu1 %v2360_v3 }
 0x2e0   :  { %2106 = vmatpush3.msra.mxu1 %v2477_v17 }
 0x2e1   :  { %2107 = vmatprep.subr.mxu1 %v2360_v3 }
 0x2e2   :  { %2108 = vmatpush3.msra.mxu1 %v2490_v19 }
 0x2e3   :  { %2123 = vmatprep.subr.mxu1 %v2360_v3 }
 0x37d   :  { %v495_v48 = vpop.f32.mrf.mxu1 }
 0x37e   :  { %v499_v49 = vadd.f32 %v495_v48, %v2548_v40 }
 0x37f   :  { %v2078_v51 = vpop.f32.mrf.mxu1 }
 0x380   :  { %2243 = vtanh.f32 %v499_v49  ;;  %v1927_v62 = vmul.f32 -1.442695, %v499_v49 }
 0x38d   :  { %v2244_v53 = vpop.eup %2243 }
 0x38e   :  { %594 = vrot.lane.b32.xlu0 %v2244_v53, %s2362_s0 }
 0x39b   :  { %v574_v55 = vpop.f32.mrf.mxu1 }
 0x39c   :  { %v578_v56 = vadd.f32 %v574_v55, %v2571_v1 }
 0x39d   :  { %v2089_v58 = vpop.f32.mrf.mxu1 }
 0x39e   :  { %2245 = vtanh.f32 %v578_v56  ;;  %v1928_v6 = vmul.f32 -1.442695, %v578_v56 }
 0x39f   :  { %2247 = vpow2.f32 %v1927_v62 }
 0x3ab   :  { %v2246_v60 = vpop.eup %2245 }
 0x3ac   :  { %606 = vrot.lane.b32.xlu1 %v2246_v60, %s2362_s0  ;;  %v2248_v0 = vpop.eup %2247 }
 0x3ad   :  { %v582_v2 = vadd.f32 1.0, %v2248_v0 }
 0x3af   :  { %2249 = vrcp.f32 %v582_v2 }
 0x3b0   :  { %2251 = vpow2.f32 %v1928_v6 }
 0x3bc   :  { %v2250_v40 = vpop.eup %2249 }
 0x3bd   :  { %v2252_v11 = vpop.eup %2251  ;;  %v591_v20 = vmul.f32 %v2250_v40, %v2578_v31 }
 0x3be   :  { %v588_v13 = vadd.f32 1.0, %v2252_v11 }
 0x3c0   :  { %2253 = vrcp.f32 %v588_v13 }
 0x3cd   :  { %v2254_v1 = vpop.eup %2253 }
 0x3ce   :  { %v603_v24 = vmul.f32 %v2254_v1, %v2582_v35 }
 0x400   :  { %v595_v8 = vpop.permute.xlu0 %594 }
 0x401   :  { %v597_v10 = vmul.f32 %v2250_v40, %v595_v8 }
 0x403   :  { %599 = vrot.lane.b32.xlu0 %v597_v10, %s2362_s0 }
 0x41e   :  { %v607_v15 = vpop.permute.xlu1 %606 }
 0x41f   :  { %v609_v18 = vmul.f32 %v2254_v1, %v607_v15 }
 0x421   :  { %611 = vrot.lane.b32.xlu1 %v609_v18, %s2362_s0 }
 0x475   :  { %v600_v21 = vpop.permute.xlu0 %599 }
 0x476   :  { %v2624_v22 = vadd.f32 %v600_v21, %v591_v20 }
 0x478   :  { %2255 = vtanh.f32 %v2624_v22 }
 0x485   :  { %v2256_v23 = vpop.eup %2255 }
 0x486   :  { %617 = vrot.lane.b32.xlu0 %v2256_v23, %s2362_s0 }
 0x493   :  { %v612_v25 = vpop.permute.xlu1 %611 }
 0x494   :  { %v2629_v26 = vadd.f32 %v612_v25, %v603_v24 }
 0x496   :  { %2257 = vtanh.f32 %v2629_v26 }
 0x4a3   :  { %v2258_v27 = vpop.eup %2257 }
 0x4a4   :  { %623 = vrot.lane.b32.xlu1 %v2258_v27, %s2362_s0 }
 0x4f8   :  { %v618_v28 = vpop.permute.xlu0 %617 }
 0x4f9   :  { %v620_v29 = vmul.f32 %v2250_v40, %v618_v28 }
 0x4fb   :  { %628 = vrot.lane.b32.xlu0 %v620_v29, %s2363_s4 }
 0x516   :  { %v624_v30 = vpop.permute.xlu1 %623 }
 0x517   :  { %v2634_v31 = vmul.f32 %v2254_v1, %v624_v30 }
 0x519   :  { %720 = vrot.lane.b32.xlu1 %v2634_v31, %s2363_s4 }
 0x56d   :  { %v629_v32 = vpop.permute.xlu0 %628 }
 0x56e   :  { %1929 = vst.msk [vmem:[%s2946_s5 + $0x8] sm:$0xff] %vm48_vm1, %v629_v32  ;;  %2099 = vmatmul.mubr.msk.f32.vlgmr.msra.gmra.mxu0 %vm48_vm1, %v629_v32 }
 0x56f   :  { %2113 = vmatpush3.msra.mxu0 %v2412_v5  ;;  %2120 = vmatprep.mubr.msk.f32.mxu0 %vm2361_vm0, %v2360_v3 }
 0x570   :  { %2114 = vmatprep.subr.mxu0 %v2360_v3 }
 0x571   :  { %2115 = vmatpush3.msra.mxu0 %v2423_v7 }
 0x572   :  { %2116 = vmatprep.subr.mxu0 %v2360_v3 }
 0x573   :  { %2117 = vmatpush3.msra.mxu0 %v2432_v9 }
 0x574   :  { %2118 = vmatprep.subr.mxu0 %v2360_v3 }
 0x575   :  { %2119 = vmatpush3.msra.mxu0 %v2445_v12 }
 0x576   :  { %2134 = vmatprep.subr.mxu0 %v2360_v3 }
 0x58b   :  { %v721_v33 = vpop.permute.xlu1 %720 }
 0x58c   :  { %2110 = vmatmul.mubr.msk.f32.vlgmr.msra.gmra.mxu1 %vm48_vm1, %v721_v33 }
 0x58d   :  { %2124 = vmatpush3.msra.mxu1 %v2456_v14  ;;  %2131 = vmatprep.mubr.msk.f32.mxu1 %vm2361_vm0, %v2360_v3 }
 0x58e   :  { %2125 = vmatprep.subr.mxu1 %v2360_v3 }
 0x58f   :  { %2126 = vmatpush3.msra.mxu1 %v2468_v16 }
 0x590   :  { %2127 = vmatprep.subr.mxu1 %v2360_v3 }
 0x591   :  { %2128 = vmatpush3.msra.mxu1 %v2477_v17 }
 0x592   :  { %2129 = vmatprep.subr.mxu1 %v2360_v3 }
 0x593   :  { %2130 = vmatpush3.msra.mxu1 %v2490_v19 }
 0x594   :  { %2145 = vmatprep.subr.mxu1 %v2360_v3 }
 0x62e   :  { %v711_v34 = vpop.f32.mrf.mxu0 }
 0x62f   :  { %v715_v35 = vadd.f32 %v711_v34, %v2552_v44 }
 0x630   :  { %v2100_v36 = vpop.f32.mrf.mxu0 }
 0x631   :  { %2259 = vtanh.f32 %v715_v35  ;;  %v1933_v48 = vmul.f32 -1.442695, %v715_v35 }
 0x63e   :  { %v2260_v38 = vpop.eup %2259 }
 0x63f   :  { %810 = vrot.lane.b32.xlu0 %v2260_v38, %s2362_s0 }
 0x64c   :  { %v790_v39 = vpop.f32.mrf.mxu1 }
 0x64d   :  { %v794_v41 = vadd.f32 %v790_v39, %v2567_v61 }
 0x64e   :  { %v2111_v45 = vpop.f32.mrf.mxu1 }
 0x64f   :  { %2261 = vtanh.f32 %v794_v41  ;;  %v1934_v53 = vmul.f32 -1.442695, %v794_v41 }
 0x650   :  { %2263 = vpow2.f32 %v1933_v48 }
 0x65c   :  { %v2262_v46 = vpop.eup %2261 }
 0x65d   :  { %822 = vrot.lane.b32.xlu1 %v2262_v46, %s2362_s0  ;;  %v2264_v49 = vpop.eup %2263 }
 0x65e   :  { %v798_v51 = vadd.f32 1.0, %v2264_v49 }
 0x660   :  { %2265 = vrcp.f32 %v798_v51 }
 0x661   :  { %2267 = vpow2.f32 %v1934_v53 }
 0x66d   :  { %v2266_v44 = vpop.eup %2265 }
 0x66e   :  { %v2268_v58 = vpop.eup %2267  ;;  %v807_v2 = vmul.f32 %v2266_v44, %v2624_v22 }
 0x66f   :  { %v804_v60 = vadd.f32 1.0, %v2268_v58 }
 0x671   :  { %2269 = vrcp.f32 %v804_v60 }
 0x67e   :  { %v2270_v61 = vpop.eup %2269 }
 0x67f   :  { %v819_v10 = vmul.f32 %v2270_v61, %v2629_v26 }
 0x6b1   :  { %v811_v55 = vpop.permute.xlu0 %810 }
 0x6b2   :  { %v813_v56 = vmul.f32 %v2266_v44, %v811_v55 }
 0x6b4   :  { %815 = vrot.lane.b32.xlu0 %v813_v56, %s2362_s0 }
 0x6cf   :  { %v823_v62 = vpop.permute.xlu1 %822 }
 0x6d0   :  { %v825_v0 = vmul.f32 %v2270_v61, %v823_v62 }
 0x6d2   :  { %827 = vrot.lane.b32.xlu1 %v825_v0, %s2362_s0 }
 0x726   :  { %v816_v6 = vpop.permute.xlu0 %815 }
 0x727   :  { %v2671_v40 = vadd.f32 %v816_v6, %v807_v2 }
 0x729   :  { %2271 = vtanh.f32 %v2671_v40 }
 0x736   :  { %v2272_v8 = vpop.eup %2271 }
 0x737   :  { %833 = vrot.lane.b32.xlu0 %v2272_v8, %s2362_s0 }
 0x744   :  { %v828_v11 = vpop.permute.xlu1 %827 }
 0x745   :  { %v2676_v13 = vadd.f32 %v828_v11, %v819_v10 }
 0x747   :  { %2273 = vtanh.f32 %v2676_v13 }
 0x754   :  { %v2274_v1 = vpop.eup %2273 }
 0x755   :  { %839 = vrot.lane.b32.xlu1 %v2274_v1, %s2362_s0 }
 0x7a9   :  { %v834_v15 = vpop.permute.xlu0 %833 }
 0x7aa   :  { %v836_v18 = vmul.f32 %v2266_v44, %v834_v15 }
 0x7ac   :  { %844 = vrot.lane.b32.xlu0 %v836_v18, %s2363_s4 }
 0x7c7   :  { %v840_v20 = vpop.permute.xlu1 %839 }
 0x7c8   :  { %v2681_v21 = vmul.f32 %v2270_v61, %v840_v20 }
 0x7ca   :  { %936 = vrot.lane.b32.xlu1 %v2681_v21, %s2363_s4 }
 0x81e   :  { %v845_v22 = vpop.permute.xlu0 %844 }
 0x81f   :  { %1935 = vst.msk [vmem:[%s2946_s5 + $0x10] sm:$0xff] %vm48_vm1, %v845_v22  ;;  %2121 = vmatmul.mubr.msk.f32.vlgmr.msra.gmra.mxu0 %vm48_vm1, %v845_v22 }
 0x820   :  { %2135 = vmatpush3.msra.mxu0 %v2412_v5  ;;  %2142 = vmatprep.mubr.msk.f32.mxu0 %vm2361_vm0, %v2360_v3 }
 0x821   :  { %2136 = vmatprep.subr.mxu0 %v2360_v3 }
 0x822   :  { %2137 = vmatpush3.msra.mxu0 %v2423_v7 }
 0x823   :  { %2138 = vmatprep.subr.mxu0 %v2360_v3 }
 0x824   :  { %2139 = vmatpush3.msra.mxu0 %v2432_v9 }
 0x825   :  { %2140 = vmatprep.subr.mxu0 %v2360_v3 }
 0x826   :  { %2141 = vmatpush3.msra.mxu0 %v2445_v12 }
 0x827   :  { %2156 = vmatprep.subr.mxu0 %v2360_v3 }
 0x83c   :  { %v937_v23 = vpop.permute.xlu1 %936 }
 0x83d   :  { %2132 = vmatmul.mubr.msk.f32.vlgmr.msra.gmra.mxu1 %vm48_vm1, %v937_v23 }
 0x83e   :  { %2146 = vmatpush3.msra.mxu1 %v2456_v14  ;;  %2153 = vmatprep.mubr.msk.f32.mxu1 %vm2361_vm0, %v2360_v3 }
 0x83f   :  { %2147 = vmatprep.subr.mxu1 %v2360_v3 }
 0x840   :  { %2148 = vmatpush3.msra.mxu1 %v2468_v16 }
 0x841   :  { %2149 = vmatprep.subr.mxu1 %v2360_v3 }
 0x842   :  { %2150 = vmatpush3.msra.mxu1 %v2477_v17 }
 0x843   :  { %2151 = vmatprep.subr.mxu1 %v2360_v3 }
 0x844   :  { %2152 = vmatpush3.msra.mxu1 %v2490_v19 }
 0x845   :  { %2167 = vmatprep.subr.mxu1 %v2360_v3 }
 0x8df   :  { %v927_v24 = vpop.f32.mrf.mxu0 }
 0x8e0   :  { %v931_v25 = vadd.f32 %v927_v24, %v2556_v50 }
 0x8e1   :  { %v2122_v26 = vpop.f32.mrf.mxu0 }
 0x8e2   :  { %2275 = vtanh.f32 %v931_v25  ;;  %v1939_v33 = vmul.f32 -1.442695, %v931_v25 }
 0x8ef   :  { %v2276_v27 = vpop.eup %2275 }
 0x8f0   :  { %1026 = vrot.lane.b32.xlu0 %v2276_v27, %s2362_s0 }
 0x8fd   :  { %v1006_v28 = vpop.f32.mrf.mxu1 }
 0x8fe   :  { %v1010_v29 = vadd.f32 %v1006_v28, %v2562_v57 }
 0x8ff   :  { %v2133_v30 = vpop.f32.mrf.mxu1 }
 0x900   :  { %2277 = vtanh.f32 %v1010_v29  ;;  %v1940_v36 = vmul.f32 -1.442695, %v1010_v29 }
 0x901   :  { %2279 = vpow2.f32 %v1939_v33 }
 0x90d   :  { %v2278_v32 = vpop.eup %2277 }
 0x90e   :  { %1038 = vrot.lane.b32.xlu1 %v2278_v32, %s2362_s0  ;;  %v2280_v34 = vpop.eup %2279 }
 0x90f   :  { %v1014_v35 = vadd.f32 1.0, %v2280_v34 }
 0x911   :  { %2281 = vrcp.f32 %v1014_v35 }
 0x912   :  { %2283 = vpow2.f32 %v1940_v36 }
 0x91e   :  { %v2282_v50 = vpop.eup %2281 }
 0x91f   :  { %v2284_v41 = vpop.eup %2283  ;;  %v1023_v49 = vmul.f32 %v2282_v50, %v2671_v40 }
 0x920   :  { %v1020_v45 = vadd.f32 1.0, %v2284_v41 }
 0x922   :  { %2285 = vrcp.f32 %v1020_v45 }
 0x92f   :  { %v2286_v57 = vpop.eup %2285 }
 0x930   :  { %v1035_v55 = vmul.f32 %v2286_v57, %v2676_v13 }
 0x962   :  { %v1027_v38 = vpop.permute.xlu0 %1026 }
 0x963   :  { %v1029_v39 = vmul.f32 %v2282_v50, %v1027_v38 }
 0x965   :  { %1031 = vrot.lane.b32.xlu0 %v1029_v39, %s2362_s0 }
 0x980   :  { %v1039_v46 = vpop.permute.xlu1 %1038 }
 0x981   :  { %v1041_v48 = vmul.f32 %v2286_v57, %v1039_v46 }
 0x983   :  { %1043 = vrot.lane.b32.xlu1 %v1041_v48, %s2362_s0 }
 0x9d7   :  { %v1032_v51 = vpop.permute.xlu0 %1031 }
 0x9d8   :  { %v2718_v53 = vadd.f32 %v1032_v51, %v1023_v49 }
 0x9da   :  { %2287 = vtanh.f32 %v2718_v53 }
 0x9e7   :  { %v2288_v44 = vpop.eup %2287 }
 0x9e8   :  { %1049 = vrot.lane.b32.xlu0 %v2288_v44, %s2362_s0 }
 0x9f5   :  { %v1044_v56 = vpop.permute.xlu1 %1043 }
 0x9f6   :  { %v2723_v58 = vadd.f32 %v1044_v56, %v1035_v55 }
 0x9f8   :  { %2289 = vtanh.f32 %v2723_v58 }
 0xa05   :  { %v2290_v60 = vpop.eup %2289 }
 0xa06   :  { %1055 = vrot.lane.b32.xlu1 %v2290_v60, %s2362_s0 }
 0xa5a   :  { %v1050_v61 = vpop.permute.xlu0 %1049 }
 0xa5b   :  { %v1052_v62 = vmul.f32 %v2282_v50, %v1050_v61 }
 0xa5d   :  { %1060 = vrot.lane.b32.xlu0 %v1052_v62, %s2363_s4 }
 0xa78   :  { %v1056_v0 = vpop.permute.xlu1 %1055 }
 0xa79   :  { %v2728_v2 = vmul.f32 %v2286_v57, %v1056_v0 }
 0xa7b   :  { %1146 = vrot.lane.b32.xlu1 %v2728_v2, %s2363_s4 }
 0xacf   :  { %v1061_v6 = vpop.permute.xlu0 %1060 }
 0xad0   :  { %1941 = vst.msk [vmem:[%s2946_s5 + $0x18] sm:$0xff] %vm48_vm1, %v1061_v6  ;;  %2143 = vmatmul.mubr.msk.f32.vlgmr.msra.gmra.mxu0 %vm48_vm1, %v1061_v6 }
 0xad1   :  { %2157 = vmatpush3.msra.mxu0 %v2412_v5  ;;  %2164 = vmatprep.mubr.msk.f32.mxu0 %vm2361_vm0, %v2360_v3 }
 0xad2   :  { %2158 = vmatprep.subr.mxu0 %v2360_v3 }
 0xad3   :  { %2159 = vmatpush3.msra.mxu0 %v2423_v7 }
 0xad4   :  { %2160 = vmatprep.subr.mxu0 %v2360_v3 }
 0xad5   :  { %2161 = vmatpush3.msra.mxu0 %v2432_v9 }
 0xad6   :  { %2162 = vmatprep.subr.mxu0 %v2360_v3 }
 0xad7   :  { %2163 = vmatpush3.msra.mxu0 %v2445_v12 }
 0xad8   :  { %2178 = vmatprep.subr.mxu0 %v2360_v3 }
 0xaed   :  { %v1147_v40 = vpop.permute.xlu1 %1146 }
 0xaee   :  { %2154 = vmatmul.mubr.msk.f32.vlgmr.msra.gmra.mxu1 %vm48_vm1, %v1147_v40 }
 0xaef   :  { %2168 = vmatpush3.msra.mxu1 %v2456_v14  ;;  %2175 = vmatprep.mubr.msk.f32.mxu1 %vm2361_vm0, %v2360_v3 }
 0xaf0   :  { %2169 = vmatprep.subr.mxu1 %v2360_v3 }
 0xaf1   :  { %2170 = vmatpush3.msra.mxu1 %v2468_v16 }
 0xaf2   :  { %2171 = vmatprep.subr.mxu1 %v2360_v3 }
 0xaf3   :  { %2172 = vmatpush3.msra.mxu1 %v2477_v17 }
 0xaf4   :  { %2173 = vmatprep.subr.mxu1 %v2360_v3 }
 0xaf5   :  { %2174 = vmatpush3.msra.mxu1 %v2490_v19 }
 0xaf6   :  { %2189 = vmatprep.subr.mxu1 %v2360_v3 }
 0xb90   :  { %v1140_v8 = vpop.f32.mrf.mxu0 }
 0xb91   :  { %v1144_v10 = vadd.f32 %v1140_v8, %v2560_v54 }
 0xb92   :  { %v2144_v11 = vpop.f32.mrf.mxu0 }
 0xb93   :  { %2291 = vtanh.f32 %v1144_v10  ;;  %v1945_v22 = vmul.f32 -1.442695, %v1144_v10 }
 0xba0   :  { %v2292_v13 = vpop.eup %2291 }
 0xba1   :  { %1236 = vrot.lane.b32.xlu0 %v2292_v13, %s2362_s0 }
 0xbae   :  { %v1216_v1 = vpop.f32.mrf.mxu1 }
 0xbaf   :  { %v1220_v15 = vadd.f32 %v1216_v1, %v2558_v52 }
 0xbb0   :  { %v2155_v18 = vpop.f32.mrf.mxu1 }
 0xbb1   :  { %2293 = vtanh.f32 %v1220_v15  ;;  %v1946_v25 = vmul.f32 -1.442695, %v1220_v15 }
 0xbb2   :  { %2295 = vpow2.f32 %v1945_v22 }
 0xbbe   :  { %v2294_v20 = vpop.eup %2293 }
 0xbbf   :  { %1248 = vrot.lane.b32.xlu1 %v2294_v20, %s2362_s0  ;;  %v2296_v23 = vpop.eup %2295 }
 0xbc0   :  { %v1224_v24 = vadd.f32 1.0, %v2296_v23 }
 0xbc2   :  { %2297 = vrcp.f32 %v1224_v24 }
 0xbc3   :  { %2299 = vpow2.f32 %v1946_v25 }
 0xbcf   :  { %v2298_v54 = vpop.eup %2297 }
 0xbd0   :  { %v2300_v28 = vpop.eup %2299  ;;  %v1233_v33 = vmul.f32 %v2298_v54, %v2718_v53 }
 0xbd1   :  { %v1230_v29 = vadd.f32 1.0, %v2300_v28  ;;  %v2355_v28 = vld [vmem:[%s2942_s2 + $0x18] sm:$0xff] }
 0xbd3   :  { %2301 = vrcp.f32 %v1230_v29  ;;  %v2356_v29 = vld [vmem:[%s2942_s2 + $0x10] sm:$0xff] }
 0xbe0   :  { %v2302_v52 = vpop.eup %2301 }
 0xbe1   :  { %v1245_v50 = vmul.f32 %v2302_v52, %v2723_v58 }
 0xc13   :  { %v1237_v26 = vpop.permute.xlu0 %1236 }
 0xc14   :  { %v1239_v27 = vmul.f32 %v2298_v54, %v1237_v26 }
 0xc16   :  { %1241 = vrot.lane.b32.xlu0 %v1239_v27, %s2362_s0 }
 0xc31   :  { %v1249_v30 = vpop.permute.xlu1 %1248 }
 0xc32   :  { %v1251_v32 = vmul.f32 %v2302_v52, %v1249_v30  ;;  %v2358_v30 = vld [vmem:[%s2942_s2] sm:$0xff] }
 0xc34   :  { %1253 = vrot.lane.b32.xlu1 %v1251_v32, %s2362_s0 }
 0xc88   :  { %v1242_v34 = vpop.permute.xlu0 %1241 }
 0xc89   :  { %v2765_v35 = vadd.f32 %v1242_v34, %v1233_v33  ;;  %v2359_v33 = vld [vmem:[%s2944_s3 + $0x18] sm:$0xff] }
 0xc8b   :  { %2303 = vtanh.f32 %v2765_v35 }
 0xc98   :  { %v2304_v36 = vpop.eup %2303 }
 0xc99   :  { %1259 = vrot.lane.b32.xlu0 %v2304_v36, %s2362_s0 }
 0xca6   :  { %v1254_v38 = vpop.permute.xlu1 %1253 }
 0xca7   :  { %v2770_v39 = vadd.f32 %v1254_v38, %v1245_v50 }
 0xca9   :  { %2305 = vtanh.f32 %v2770_v39 }
 0xcb6   :  { %v2306_v41 = vpop.eup %2305 }
 0xcb7   :  { %1265 = vrot.lane.b32.xlu1 %v2306_v41, %s2362_s0 }
 0xd0b   :  { %v1260_v45 = vpop.permute.xlu0 %1259 }
 0xd0c   :  { %v1262_v57 = vmul.f32 %v2298_v54, %v1260_v45 }
 0xd0e   :  { %1270 = vrot.lane.b32.xlu0 %v1262_v57, %s2363_s4 }
 0xd29   :  { %v1266_v46 = vpop.permute.xlu1 %1265 }
 0xd2a   :  { %v2775_v48 = vmul.f32 %v2302_v52, %v1266_v46  ;;  %v2357_v52 = vld [vmem:[%s2942_s2 + $0x8] sm:$0xff]  ;;  %s2364_s2 = smov 96  }
 0xd2c   :  { %1354 = vrot.lane.b32.xlu1 %v2775_v48, %s2363_s4 }
 0xd80   :  { %v2779_v49 = vpop.permute.xlu0 %1270 }
 0xd81   :  { %2165 = vmatmul.mubr.msk.f32.vlgmr.msra.gmra.mxu0 %vm48_vm1, %v2779_v49 }
 0xd82   :  { %2179 = vmatpush3.msra.mxu0 %v2412_v5  ;;  %2186 = vmatprep.mubr.msk.f32.mxu0 %vm2361_vm0, %v2360_v3 }
 0xd83   :  { %2180 = vmatprep.subr.mxu0 %v2360_v3 }
 0xd84   :  { %2181 = vmatpush3.msra.mxu0 %v2423_v7 }
 0xd85   :  { %2182 = vmatprep.subr.mxu0 %v2360_v3 }
 0xd86   :  { %2183 = vmatpush3.msra.mxu0 %v2432_v9 }
 0xd87   :  { %2184 = vmatprep.subr.mxu0 %v2360_v3 }
 0xd88   :  { %2185 = vmatpush3.msra.mxu0 %v2445_v12 }
 0xd89   :  { %2200 = vmatprep.subr.mxu0 %v2360_v3 }
 0xd9e   :  { %v1355_v51 = vpop.permute.xlu1 %1354 }
 0xd9f   :  { %2176 = vmatmul.mubr.msk.f32.vlgmr.msra.gmra.mxu1 %vm48_vm1, %v1355_v51 }
 0xda0   :  { %2190 = vmatpush3.msra.mxu1 %v2456_v14  ;;  %2197 = vmatprep.mubr.msk.f32.mxu1 %vm2361_vm0, %v2360_v3 }
 0xda1   :  { %2191 = vmatprep.subr.mxu1 %v2360_v3 }
 0xda2   :  { %2192 = vmatpush3.msra.mxu1 %v2468_v16 }
 0xda3   :  { %2193 = vmatprep.subr.mxu1 %v2360_v3 }
 0xda4   :  { %2194 = vmatpush3.msra.mxu1 %v2477_v17 }
 0xda5   :  { %2195 = vmatprep.subr.mxu1 %v2360_v3 }
 0xda6   :  { %2196 = vmatpush3.msra.mxu1 %v2490_v19 }
 0xda7   :  { %2211 = vmatprep.subr.mxu1 %v2360_v3 }
 0xe41   :  { %v1348_v5 = vpop.f32.mrf.mxu0 }
 0xe42   :  { %v1352_v7 = vadd.f32 %v1348_v5, %v2565_v59 }
 0xe43   :  { %v2166_v9 = vpop.f32.mrf.mxu0 }
 0xe44   :  { %2307 = vtanh.f32 %v1352_v7  ;;  %v1951_v56 = vmul.f32 -1.442695, %v1352_v7 }
 0xe51   :  { %v2308_v12 = vpop.eup %2307 }
 0xe52   :  { %1444 = vrot.lane.b32.xlu0 %v2308_v12, %s2362_s0 }
 0xe5f   :  { %v1424_v14 = vpop.f32.mrf.mxu1 }
 0xe60   :  { %v1428_v53 = vadd.f32 %v1424_v14, %v2554_v47 }
 0xe61   :  { %v2177_v44 = vpop.f32.mrf.mxu1 }
 0xe62   :  { %2309 = vtanh.f32 %v1428_v53  ;;  %v1952_v61 = vmul.f32 -1.442695, %v1428_v53 }
 0xe63   :  { %2311 = vpow2.f32 %v1951_v56 }
 0xe6f   :  { %v2310_v55 = vpop.eup %2309 }
 0xe70   :  { %1456 = vrot.lane.b32.xlu1 %v2310_v55, %s2362_s0  ;;  %v2312_v58 = vpop.eup %2311 }
 0xe71   :  { %v1432_v60 = vadd.f32 1.0, %v2312_v58 }
 0xe73   :  { %2313 = vrcp.f32 %v1432_v60 }
 0xe74   :  { %2315 = vpow2.f32 %v1952_v61 }
 0xe80   :  { %v2314_v59 = vpop.eup %2313 }
 0xe81   :  { %v2316_v6 = vpop.eup %2315  ;;  %v1441_v11 = vmul.f32 %v2314_v59, %v2765_v35 }
 0xe82   :  { %v1438_v40 = vadd.f32 1.0, %v2316_v6 }
 0xe84   :  { %2317 = vrcp.f32 %v1438_v40 }
 0xe91   :  { %v2318_v47 = vpop.eup %2317 }
 0xe92   :  { %v1453_v18 = vmul.f32 %v2318_v47, %v2770_v39 }
 0xec4   :  { %v1445_v62 = vpop.permute.xlu0 %1444 }
 0xec5   :  { %v1447_v0 = vmul.f32 %v2314_v59, %v1445_v62 }
 0xec7   :  { %1449 = vrot.lane.b32.xlu0 %v1447_v0, %s2362_s0 }
 0xee2   :  { %v1457_v8 = vpop.permute.xlu1 %1456 }
 0xee3   :  { %v1459_v10 = vmul.f32 %v2318_v47, %v1457_v8 }
 0xee5   :  { %1461 = vrot.lane.b32.xlu1 %v1459_v10, %s2362_s0 }
 0xf39   :  { %v1450_v13 = vpop.permute.xlu0 %1449 }
 0xf3a   :  { %v2811_v1 = vadd.f32 %v1450_v13, %v1441_v11 }
 0xf3c   :  { %2319 = vtanh.f32 %v2811_v1 }
 0xf49   :  { %v2320_v15 = vpop.eup %2319 }
 0xf4a   :  { %1467 = vrot.lane.b32.xlu0 %v2320_v15, %s2362_s0 }
 0xf57   :  { %v1462_v20 = vpop.permute.xlu1 %1461 }
 0xf58   :  { %v2816_v22 = vadd.f32 %v1462_v20, %v1453_v18 }
 0xf5a   :  { %2321 = vtanh.f32 %v2816_v22 }
 0xf67   :  { %v2322_v23 = vpop.eup %2321 }
 0xf68   :  { %1473 = vrot.lane.b32.xlu1 %v2322_v23, %s2362_s0 }
 0xfbc   :  { %v1468_v24 = vpop.permute.xlu0 %1467 }
 0xfbd   :  { %v1470_v25 = vmul.f32 %v2314_v59, %v1468_v24 }
 0xfbf   :  { %1478 = vrot.lane.b32.xlu0 %v1470_v25, %s2363_s4 }
 0xfda   :  { %v1474_v54 = vpop.permute.xlu1 %1473 }
 0xfdb   :  { %v2821_v26 = vmul.f32 %v2318_v47, %v1474_v54 }
 0xfdd   :  { %1562 = vrot.lane.b32.xlu1 %v2821_v26, %s2363_s4 }
0x1031   :  { %v2825_v27 = vpop.permute.xlu0 %1478 }
0x1032   :  { %2187 = vmatmul.mubr.msk.f32.vlgmr.msra.gmra.mxu0 %vm48_vm1, %v2825_v27 }
0x1033   :  { %2201 = vmatpush3.msra.mxu0 %v2355_v28  ;;  %2208 = vmatprep.mubr.msk.f32.mxu0 %vm2361_vm0, %v2360_v3 }
0x1034   :  { %2202 = vmatprep.subr.mxu0 %v2360_v3 }
0x1035   :  { %2203 = vmatpush3.msra.mxu0 %v2356_v29 }
0x1036   :  { %2204 = vmatprep.subr.mxu0 %v2360_v3 }
0x1037   :  { %2205 = vmatpush3.msra.mxu0 %v2357_v52 }
0x1038   :  { %2206 = vmatprep.subr.mxu0 %v2360_v3 }
0x1039   :  { %2207 = vmatpush3.msra.mxu0 %v2358_v30 }
0x104f   :  { %v1563_v32 = vpop.permute.xlu1 %1562 }
0x1050   :  { %2198 = vmatmul.mubr.msk.f32.vlgmr.msra.gmra.mxu1 %vm48_vm1, %v1563_v32 }
0x1051   :  { %2212 = vmatpush3.msra.mxu1 %v2359_v33  ;;  %2219 = vmatprep.mubr.msk.f32.mxu1 %vm2361_vm0, %v2360_v3 }
0x1052   :  { %2213 = vmatprep.subr.mxu1 %v2360_v3 }
0x1053   :  { %2214 = vmatpush3.msra.mxu1 %v2468_v16 }
0x1054   :  { %2215 = vmatprep.subr.mxu1 %v2360_v3 }
0x1055   :  { %2216 = vmatpush3.msra.mxu1 %v2477_v17 }
0x1056   :  { %2217 = vmatprep.subr.mxu1 %v2360_v3 }
0x1057   :  { %2218 = vmatpush3.msra.mxu1 %v2490_v19 }
0x10f2   :  { %v1556_v34 = vpop.f32.mrf.mxu0 }
0x10f3   :  { %v1560_v35 = vadd.f32 %v1556_v34, %v2569_v63 }
0x10f4   :  { %v2188_v36 = vpop.f32.mrf.mxu0 }
0x10f5   :  { %2323 = vtanh.f32 %v1560_v35  ;;  %v1957_v17 = vmul.f32 -1.442695, %v1560_v35 }
0x1102   :  { %v2324_v50 = vpop.eup %2323 }
0x1103   :  { %1652 = vrot.lane.b32.xlu0 %v2324_v50, %s2362_s0 }
0x1110   :  { %v1632_v38 = vpop.f32.mrf.mxu1 }
0x1111   :  { %v1636_v39 = vadd.f32 %v1632_v38, %v2550_v42 }
0x1112   :  { %v2199_v16 = vpop.f32.mrf.mxu1 }
0x1113   :  { %2325 = vtanh.f32 %v1636_v39  ;;  %v1958_v45 = vmul.f32 -1.442695, %v1636_v39 }
0x1114   :  { %2327 = vpow2.f32 %v1957_v17 }
0x1120   :  { %v2326_v41 = vpop.eup %2325 }
0x1121   :  { %1664 = vrot.lane.b32.xlu1 %v2326_v41, %s2362_s0  ;;  %v2328_v3 = vpop.eup %2327 }
0x1122   :  { %v1640_v19 = vadd.f32 1.0, %v2328_v3 }
0x1124   :  { %2329 = vrcp.f32 %v1640_v19 }
0x1125   :  { %2331 = vpow2.f32 %v1958_v45 }
0x1131   :  { %v2330_v63 = vpop.eup %2329 }
0x1132   :  { %v2332_v51 = vpop.eup %2331  ;;  %v1649_v12 = vmul.f32 %v2330_v63, %v2811_v1 }
0x1133   :  { %v1646_v5 = vadd.f32 1.0, %v2332_v51 }
0x1135   :  { %2333 = vrcp.f32 %v1646_v5 }
0x1142   :  { %v2334_v42 = vpop.eup %2333 }
0x1143   :  { %v1661_v55 = vmul.f32 %v2334_v42, %v2816_v22 }
0x1175   :  { %v1653_v57 = vpop.permute.xlu0 %1652 }
0x1176   :  { %v1655_v46 = vmul.f32 %v2330_v63, %v1653_v57 }
0x1178   :  { %1657 = vrot.lane.b32.xlu0 %v1655_v46, %s2362_s0 }
0x1193   :  { %v1665_v7 = vpop.permute.xlu1 %1664 }
0x1194   :  { %v1667_v9 = vmul.f32 %v2334_v42, %v1665_v7 }
0x1196   :  { %1669 = vrot.lane.b32.xlu1 %v1667_v9, %s2362_s0 }
0x11ea   :  { %v1658_v14 = vpop.permute.xlu0 %1657 }
0x11eb   :  { %v1660_v53 = vadd.f32 %v1658_v14, %v1649_v12 }
0x11ed   :  { %2335 = vtanh.f32 %v1660_v53 }
0x11fa   :  { %v2336_v44 = vpop.eup %2335 }
0x11fb   :  { %1675 = vrot.lane.b32.xlu0 %v2336_v44, %s2362_s0 }
0x1208   :  { %v1670_v56 = vpop.permute.xlu1 %1669 }
0x1209   :  { %v1672_v58 = vadd.f32 %v1670_v56, %v1661_v55 }
0x120b   :  { %2337 = vtanh.f32 %v1672_v58 }
0x1218   :  { %v2338_v60 = vpop.eup %2337 }
0x1219   :  { %1681 = vrot.lane.b32.xlu1 %v2338_v60, %s2362_s0 }
0x126d   :  { %v1676_v61 = vpop.permute.xlu0 %1675 }
0x126e   :  { %v1678_v59 = vmul.f32 %v2330_v63, %v1676_v61 }
0x1270   :  { %1686 = vrot.lane.b32.xlu0 %v1678_v59, %s2363_s4 }
0x128b   :  { %v1682_v62 = vpop.permute.xlu1 %1681 }
0x128c   :  { %v1684_v0 = vmul.f32 %v2334_v42, %v1682_v62 }
0x128e   :  { %1770 = vrot.lane.b32.xlu1 %v1684_v0, %s2363_s4 }
0x12e2   :  { %v2870_v6 = vpop.permute.xlu0 %1686 }
0x12e3   :  { %2209 = vmatmul.mubr.msk.f32.vlgmr.msra.gmra.mxu0 %vm48_vm1, %v2870_v6 }
0x1300   :  { %v1771_v40 = vpop.permute.xlu1 %1770 }
0x1301   :  { %2220 = vmatmul.mubr.msk.f32.vlgmr.msra.gmra.mxu1 %vm48_vm1, %v1771_v40 }
0x13a3   :  { %v1764_v47 = vpop.f32.mrf.mxu0 }
0x13a4   :  { %v1768_v8 = vadd.f32 %v1764_v47, %v2573_v4 }
0x13a5   :  { %v2210_v10 = vpop.f32.mrf.mxu0 }
0x13a6   :  { %2339 = vtanh.f32 %v1768_v8  ;;  %v1963_v20 = vmul.f32 -1.442695, %v1768_v8 }
0x13b3   :  { %v2340_v11 = vpop.eup %2339 }
0x13b4   :  { %1860 = vrot.lane.b32.xlu0 %v2340_v11, %s2362_s0 }
0x13c1   :  { %v1840_v13 = vpop.f32.mrf.mxu1 }
0x13c2   :  { %v1844_v1 = vadd.f32 %v1840_v13, %v2546_v37 }
0x13c3   :  { %v2221_v15 = vpop.f32.mrf.mxu1 }
0x13c4   :  { %2341 = vtanh.f32 %v1844_v1  ;;  %v1964_v24 = vmul.f32 -1.442695, %v1844_v1 }
0x13c5   :  { %2343 = vpow2.f32 %v1963_v20 }
0x13d1   :  { %v2342_v18 = vpop.eup %2341 }
0x13d2   :  { %1872 = vrot.lane.b32.xlu1 %v2342_v18, %s2362_s0  ;;  %v2344_v22 = vpop.eup %2343 }
0x13d3   :  { %v1848_v23 = vadd.f32 1.0, %v2344_v22 }
0x13d5   :  { %2345 = vrcp.f32 %v1848_v23 }
0x13d6   :  { %2347 = vpow2.f32 %v1964_v24 }
0x13e2   :  { %v2346_v4 = vpop.eup %2345 }
0x13e3   :  { %v2348_v28 = vpop.eup %2347  ;;  %v1857_v32 = vmul.f32 %v2346_v4, %v1660_v53 }
0x13e4   :  { %v1854_v29 = vadd.f32 1.0, %v2348_v28 }
0x13e6   :  { %2349 = vrcp.f32 %v1854_v29 }
0x13f3   :  { %v2350_v37 = vpop.eup %2349 }
0x13f4   :  { %v1869_v36 = vmul.f32 %v2350_v37, %v1672_v58 }
0x1426   :  { %v1861_v25 = vpop.permute.xlu0 %1860 }
0x1427   :  { %v1863_v54 = vmul.f32 %v2346_v4, %v1861_v25 }
0x1429   :  { %1865 = vrot.lane.b32.xlu0 %v1863_v54, %s2362_s0 }
0x1444   :  { %v1873_v52 = vpop.permute.xlu1 %1872 }
0x1445   :  { %v1875_v30 = vmul.f32 %v2350_v37, %v1873_v52 }
0x1447   :  { %1877 = vrot.lane.b32.xlu1 %v1875_v30, %s2362_s0 }
0x149b   :  { %v1866_v33 = vpop.permute.xlu0 %1865 }
0x149c   :  { %v1868_v34 = vadd.f32 %v1866_v33, %v1857_v32 }
0x149e   :  { %2351 = vtanh.f32 %v1868_v34 }
0x14ab   :  { %v2352_v35 = vpop.eup %2351 }
0x14ac   :  { %1883 = vrot.lane.b32.xlu0 %v2352_v35, %s2362_s0 }
0x14b0   :  { %417 = vrot.lane.b32.xlu0 %v2587_v43, %s2364_s2 }
0x14b4   :  { %850 = vrot.lane.b32.xlu0 %v2681_v21, %s2364_s2 }
0x14b8   :  { %1275 = vrot.lane.b32.xlu0 %v2775_v48, %s2364_s2 }
0x14b9   :  { %v1878_v50 = vpop.permute.xlu1 %1877 }
0x14ba   :  { %v1880_v38 = vadd.f32 %v1878_v50, %v1869_v36 }
0x14bc   :  { %2353 = vtanh.f32 %v1880_v38  ;;  %1691 = vrot.lane.b32.xlu0 %v1684_v0, %s2364_s2 }
0x14c9   :  { %v2354_v39 = vpop.eup %2353 }
0x14ca   :  { %1889 = vrot.lane.b32.xlu1 %v2354_v39, %s2362_s0 }
0x14ce   :  { %634 = vrot.lane.b32.xlu1 %v2634_v31, %s2364_s2 }
0x14d2   :  { %1066 = vrot.lane.b32.xlu1 %v2728_v2, %s2364_s2 }
0x14d6   :  { %1483 = vrot.lane.b32.xlu1 %v2821_v26, %s2364_s2 }
0x151e   :  { %v1884_v16 = vpop.permute.xlu0 %1883 }
0x151f   :  { %v1886_v43 = vmul.f32 %v2346_v4, %v1884_v16 }
0x1521   :  { %1894 = vrot.lane.b32.xlu1 %v1886_v43, %s2363_s4 }
0x1522   :  { %v418_v21 = vpop.permute.xlu0 %417 }
0x1523   :  { %1924 = vst.msk [vmem:[%s2946_s5 + $0x38] sm:$0xff] %vm421_vm2, %v418_v21 }
0x1526   :  { %v851_v48 = vpop.permute.xlu0 %850 }
0x1527   :  { %1936 = vst.msk [vmem:[%s2946_s5 + $0x28] sm:$0xff] %vm421_vm2, %v851_v48 }
0x1528   :  { %1953 = vst.msk [vmem:[%s2946_s5 + $0x28] sm:$0xff] %vm48_vm1, %v2825_v27 }
0x152a   :  { %v1276_v31 = vpop.permute.xlu0 %1275 }
0x152b   :  { %1948 = vst.msk [vmem:[%s2946_s5 + $0x18] sm:$0xff] %vm421_vm2, %v1276_v31 }
0x152e   :  { %v1692_v2 = vpop.permute.xlu0 %1691 }
0x152f   :  { %1960 = vst.msk [vmem:[%s2946_s5 + $0x8] sm:$0xff] %vm421_vm2, %v1692_v2 }
0x153c   :  { %v1890_v26 = vpop.permute.xlu1 %1889 }
0x153d   :  { %v1892_v41 = vmul.f32 %v2350_v37, %v1890_v26 }
0x153f   :  { %1899 = vrot.lane.b32.xlu0 %v1892_v41, %s2364_s2 }
0x1540   :  { %v635_v17 = vpop.permute.xlu1 %634 }
0x1541   :  { %1930 = vst.msk [vmem:[%s2946_s5 + $0x30] sm:$0xff] %vm421_vm2, %v635_v17 }
0x1542   :  { %1959 = vst.msk [vmem:[%s2946_s5 + $0x30] sm:$0xff] %vm48_vm1, %v2870_v6 }
0x1544   :  { %v1067_v27 = vpop.permute.xlu1 %1066 }
0x1545   :  { %1942 = vst.msk [vmem:[%s2946_s5 + $0x20] sm:$0xff] %vm421_vm2, %v1067_v27 }
0x1546   :  { %1947 = vst.msk [vmem:[%s2946_s5 + $0x20] sm:$0xff] %vm48_vm1, %v2779_v49 }
0x1548   :  { %v1484_v3 = vpop.permute.xlu1 %1483 }
0x1549   :  { %1954 = vst.msk [vmem:[%s2946_s5 + $0x10] sm:$0xff] %vm421_vm2, %v1484_v3 }
0x1593   :  { %v1895_v19 = vpop.permute.xlu1 %1894 }
0x1594   :  { %1965 = vst.msk [vmem:[%s2946_s5 + $0x38] sm:$0xff] %vm48_vm1, %v1895_v19 }
0x15b1   :  { %v1900_v45 = vpop.permute.xlu0 %1899 }
0x15b2   :  { %1902 = vst.msk [vmem:[%s2946_s5] sm:$0xff] %vm421_vm2, %v1900_v45 }

</bundles_post_ra>
